<compile_context>
chip_gen: v7x
topology: tpu7x:2x2x1
jax: 0.10.0
libtpu: 0.0.40
codegen_flags: <defaults>
</compile_context>

<pallas_src>
import jax
import jax.numpy as jnp
from jax import lax
from jax.experimental import pallas as pl
from jax.experimental.pallas import tpu as pltpu

EPS = 1e-5     # InstanceNorm3d default eps
LANE = 128     # TPU lane width


def _round_up(x, m):
    return (x + m - 1) // m * m


def _instance_norm(y, inv_s):
    # InstanceNorm3d(affine=False): per-channel stats over the spatial axis,
    # one-pass sum / sum-of-squares (var = E[y^2] - mean^2).
    mean = jnp.sum(y, axis=0, keepdims=True) * inv_s
    mean_sq = jnp.sum(y * y, axis=0, keepdims=True) * inv_s
    var = mean_sq - mean * mean
    return (y - mean) * lax.rsqrt(var + EPS)


def _shift(a, s, axis):
    """Shift value `a` by static s in {-1,0,1} along `axis`, zero fill at the border."""
    if s == 0:
        return a
    zshape = list(a.shape)
    zshape[axis] = 1
    z = jnp.zeros(zshape, a.dtype)
    idx = [slice(None)] * a.ndim
    if s < 0:                       # out[i] = a[i-1]
        idx[axis] = slice(0, a.shape[axis] - 1)
        return jnp.concatenate([z, a[tuple(idx)]], axis=axis)
    idx[axis] = slice(1, a.shape[axis])
    return jnp.concatenate([a[tuple(idx)], z], axis=axis)      # out[i] = a[i+1]


# ------------------------------- fused kernel ------------------------------- #
def _make_fused_kernel(D, H, W, Cin, Kc1, cop):
    S = D * H * W
    HW = H * W
    inv_s = 1.0 / S
    K2 = 9 * cop

    def kernel(xs_ref, w1_ref, w2_ref, ws_ref, bs_ref, o_ref, acc_ref, hs_ref):
        # ---------------- conv1: 3 dots over kd, K = 9*Cin (lane-folded kh,kw) -----
        acc_ref[...] = jnp.zeros_like(acc_ref)
        for kd in range(3):                                   # leading-dim slices only
            slab = xs_ref[0, kd:kd + D].reshape(S, Kc1)       # bf16, no per-tap cast
            acc_ref[...] += jnp.dot(slab, w1_ref[kd],
                                    preferred_element_type=jnp.float32)
        # conv1 bias omitted: InstanceNorm3d(affine=False) cancels it exactly.
        y1 = jnp.maximum(_instance_norm(acc_ref[...], inv_s), 0.0)     # (S, cop) f32

        # -------- build D-halo'd, (kh,kw)-stacked h in VMEM (bf16, never hits HBM) --
        hs_ref[...] = jnp.zeros_like(hs_ref)                  # zero kd-halo rows
        y4 = y1.reshape(D, H, W, cop)                         # shifts done in f32
        for kh in range(3):
            for kw in range(3):
                blk = _shift(_shift(y4, kh - 1, 1), kw - 1, 2)
                j = kh * 3 + kw                               # lane block (128-aligned)
                hs_ref[1:1 + D, :, j * cop:(j + 1) * cop] = (
                    blk.reshape(D, HW, cop).astype(hs_ref.dtype))

        # ---------------- conv2: 3 dots over kd, K = 9*cop --------------------------
        acc_ref[...] = jnp.zeros_like(acc_ref)
        for kd in range(3):
            slab = hs_ref[kd:kd + D].reshape(S, K2)
            acc_ref[...] += jnp.dot(slab, w2_ref[kd],
                                    preferred_element_type=jnp.float32)
        y2 = _instance_norm(acc_ref[...], inv_s)              # conv2 bias cancels too

        # -------- fused 1x1x1 shortcut: centre-tap lanes of xs, zero-masked weights -
        xc = xs_ref[0, 1:1 + D].reshape(S, Kc1)
        res = jnp.dot(xc, ws_ref[...], preferred_element_type=jnp.float32) + bs_ref[...]

        # ---------------- residual add + final ReLU, lane-dense store ---------------
        o_ref[0] = jnp.maximum(y2 + res, 0.0).astype(o_ref.dtype)

    return kernel


# ------------------------------ forward pass -------------------------------- #
def res_conv_block_forward(x_ncdhw, params):
    """Pallas implementation of Res_conv_block.forward.  Input/output are NCDHW."""
    w1, b1, w2, b2, ws, bs = params
    del b1, b2                       # cancelled exactly by InstanceNorm3d(affine=False)
    N, Cin, D, H, W = x_ncdhw.shape
    Cout = w1.shape[0]
    S = D * H * W
    HW = H * W
    Kc1 = _round_up(9 * Cin, LANE)   # conv1 contraction (kh,kw,Cin packed, then padded)
    cop = _round_up(Cout, LANE)      # lane-padded out-channels

    # channels-last bf16 activations, halo pad, (kh,kw)-window stack on the lane dim.
    x = jnp.transpose(x_ncdhw, (0, 2, 3, 4, 1)).astype(jnp.bfloat16)
    xp = jnp.pad(x, ((0, 0), (1, 1), (1, 1), (1, 1), (0, 0)))
    wins = [xp[:, :, kh:kh + H, kw:kw + W, :] for kh in range(3) for kw in range(3)]
    xs = jnp.concatenate(wins, axis=-1)                       # (N, D+2, H, W, 9*Cin)
    xs = xs.reshape(N, D + 2, HW, 9 * Cin)
    xs = jnp.pad(xs, ((0, 0), (0, 0), (0, 0), (0, Kc1 - 9 * Cin)))

    # weights: (O, I, kd, kh, kw) -> (3, K, cop) bf16, K laid out to match xs / hs.
    w1_t = jnp.transpose(w1, (2, 3, 4, 1, 0)).reshape(3, 9 * Cin, Cout)
    w1_t = jnp.pad(w1_t, ((0, 0), (0, Kc1 - 9 * Cin),
                          (0, cop - Cout))).astype(jnp.bfloat16)
    w2_t = jnp.transpose(w2, (2, 3, 4, 1, 0))                 # (3, 3, 3, Cout, Cout)
    w2_t = jnp.pad(w2_t, ((0, 0), (0, 0), (0, 0),
                          (0, cop - Cout), (0, cop - Cout)))
    w2_t = w2_t.reshape(3, 9 * cop, cop).astype(jnp.bfloat16)
    # 1x1x1 shortcut weight embedded at the centre-tap rows (kh=1, kw=1 lane block).
    ws_full = jnp.zeros((Kc1, cop), jnp.float32)
    ws_full = ws_full.at[4 * Cin:5 * Cin, :Cout].set(ws.reshape(Cout, Cin).T)
    ws_full = ws_full.astype(jnp.bfloat16)
    bs_t = jnp.pad(bs, (0, cop - Cout)).reshape(1, cop).astype(jnp.float32)

    kernel = _make_fused_kernel(D, H, W, Cin, Kc1, cop)
    out = pl.pallas_call(
        kernel,
        out_shape=jax.ShapeDtypeStruct((N, S, cop), jnp.float32),
        grid_spec=pltpu.PrefetchScalarGridSpec(
            num_scalar_prefetch=0,
            grid=(N,),
            in_specs=[
                pl.BlockSpec((1, D + 2, HW, Kc1), lambda n: (n, 0, 0, 0)),
                pl.BlockSpec((3, Kc1, cop), lambda n: (0, 0, 0)),
                pl.BlockSpec((3, 9 * cop, cop), lambda n: (0, 0, 0)),
                pl.BlockSpec((Kc1, cop), lambda n: (0, 0)),
                pl.BlockSpec((1, cop), lambda n: (0, 0)),
            ],
            out_specs=pl.BlockSpec((1, S, cop), lambda n: (n, 0, 0)),
            scratch_shapes=[
                pltpu.VMEM((S, cop), jnp.float32),                  # shared accumulator
                pltpu.VMEM((D + 2, HW, 9 * cop), jnp.bfloat16),     # halo'd stacked h
            ],
        ),
        compiler_params=pltpu.CompilerParams(
            dimension_semantics=("parallel",),
            vmem_limit_bytes=48 * 1024 * 1024),     # v7x has only 64 MiB physical VMEM
    )(xs, w1_t, w2_t, ws_full, bs_t)

    out = out[:, :, :Cout].reshape(N, D, H, W, Cout)   # drop channel padding
    return jnp.transpose(out, (0, 4, 1, 2, 3))         # back to NCDHW


# ------------------------- pure-JAX reference -------------------------------- #
def ref_forward(x, params):
    """Reference (mirrors the kernel's bf16-activation / f32-accumulation policy)."""
    w1, b1, w2, b2, ws, bs = params
    dn = ("NCDHW", "OIDHW", "NCDHW")

    def conv(x, w, b, pad):
        y = lax.conv_general_dilated(x, w, window_strides=(1, 1, 1), padding=pad,
                                     dimension_numbers=dn,
                                     precision=lax.Precision.HIGHEST)
        return y + b.reshape(1, -1, 1, 1, 1)

    def instnorm(y):
        # same one-pass variance formulation as the kernel (mathematically identical
        # to InstanceNorm3d; keeps the bf16-quantised h comparison tight).
        m = jnp.mean(y, axis=(2, 3, 4), keepdims=True)
        v = jnp.mean(y * y, axis=(2, 3, 4), keepdims=True) - m * m
        return (y - m) * lax.rsqrt(v + EPS)

    res = conv(x, ws, bs, "VALID")
    h = jax.nn.relu(instnorm(conv(x, w1, b1, [(1, 1)] * 3)))
    h = h.astype(jnp.bfloat16).astype(jnp.float32)   # kernel keeps h in bf16
    h = instnorm(conv(h, w2, b2, [(1, 1)] * 3))
    return jax.nn.relu(h + res)


# ---------------------------------- main ------------------------------------- #
if __name__ == "__main__":
    N, Cin, Cout, D, H, W = 2, 4, 8, 8, 8, 8

    key = jax.random.PRNGKey(0)
    kx, k1, k2, k3, k4, k5, k6 = jax.random.split(key, 7)

    def bf16_round(a):
        # make inputs exactly bf16-representable so kernel (bf16 MXU inputs) and the
        # f32 reference consume identical operands -> tight comparison.
        return a.astype(jnp.bfloat16).astype(jnp.float32)

    x = bf16_round(jax.random.normal(kx, (N, Cin, D, H, W), dtype=jnp.float32))

    w1 = bf16_round(jax.random.uniform(k1, (Cout, Cin, 3, 3, 3), jnp.float32, -0.1, 0.1))
    b1 = jax.random.uniform(k2, (Cout,), jnp.float32, -0.1, 0.1)
    w2 = bf16_round(jax.random.uniform(k3, (Cout, Cout, 3, 3, 3), jnp.float32, -0.1, 0.1))
    b2 = jax.random.uniform(k4, (Cout,), jnp.float32, -0.1, 0.1)
    ws = bf16_round(jax.random.uniform(k5, (Cout, Cin, 1, 1, 1), jnp.float32, -0.1, 0.1))
    bs = jax.random.uniform(k6, (Cout,), jnp.float32, -0.1, 0.1)
    params = (w1, b1, w2, b2, ws, bs)

    out = jax.block_until_ready(jax.jit(res_conv_block_forward)(x, params))
    ref = jax.block_until_ready(ref_forward(x, params))

    assert out.shape == (N, Cout, D, H, W), out.shape
    assert bool(jnp.all(jnp.isfinite(out)))
    max_err = float(jnp.max(jnp.abs(out - ref)))
    # atol slightly above rtol: a differing f32 accumulation order can flip one bf16
    # ulp of h, which propagates ~4e-4 through conv2+IN2 in the worst case.
    assert bool(jnp.allclose(out, ref, atol=3e-3, rtol=2e-3)), max_err

    print("KERNEL_OK")
</pallas_src>

<mosaic_0001>
module attributes {stable_mosaic.version = 11 : i64} {
  func.func @kernel(%arg0: i32, %arg1: memref<1x10x64x128xbf16, #tpu.memory_space<vmem>>, %arg2: memref<3x128x128xbf16, #tpu.memory_space<vmem>>, %arg3: memref<3x1152x128xbf16, #tpu.memory_space<vmem>>, %arg4: memref<128x128xbf16, #tpu.memory_space<vmem>>, %arg5: memref<1x128xf32, #tpu.memory_space<vmem>>, %arg6: memref<1x512x128xf32, #tpu.memory_space<vmem>>, %arg7: memref<512x128xf32, #tpu.memory_space<vmem>>, %arg8: memref<10x64x1152xbf16, #tpu.memory_space<vmem>>) attributes {dimension_semantics = [#tpu.dimension_semantics<parallel>], iteration_bounds = array<i64: 2>, scalar_prefetch = 0 : i64, scratch_operands = 2 : i64, tpu.core_type = #tpu.core_type<tc>, window_params = [{transform_indices = @transform_0, window_bounds = array<i64: 1, 10, 64, 128>}, {pipeline_mode = #tpu.pipeline_mode<synchronous>, transform_indices = @transform_1, window_bounds = array<i64: 3, 128, 128>}, {pipeline_mode = #tpu.pipeline_mode<synchronous>, transform_indices = @transform_2, window_bounds = array<i64: 3, 1152, 128>}, {pipeline_mode = #tpu.pipeline_mode<synchronous>, transform_indices = @transform_3, window_bounds = array<i64: 128, 128>}, {pipeline_mode = #tpu.pipeline_mode<synchronous>, transform_indices = @transform_4, window_bounds = array<i64: 1, 128>}, {transform_indices = @transform_5, window_bounds = array<i64: 1, 512, 128>}]} {
    %cst = arith.constant 0.000000e+00 : f32
    %0 = vector.broadcast %cst : f32 to vector<512x128xf32>
    %c0 = arith.constant 0 : index
    %c0_0 = arith.constant 0 : index
    %1 = vector.load %arg7[%c0, %c0_0] : memref<512x128xf32, #tpu.memory_space<vmem>>, vector<512x128xf32>
    tpu.vector_store %arg7[%c0, %c0_0], %0 {strides = array<i32>} : memref<512x128xf32, #tpu.memory_space<vmem>>, vector<512x128xf32>,
    %c0_1 = arith.constant 0 : index
    %c0_2 = arith.constant 0 : index
    %c0_3 = arith.constant 0 : index
    %c0_4 = arith.constant 0 : index
    %2 = vector.load %arg1[%c0_1, %c0_2, %c0_3, %c0_4] : memref<1x10x64x128xbf16, #tpu.memory_space<vmem>>, vector<1x8x64x128xbf16>
    %3 = vector.shape_cast %2 : vector<1x8x64x128xbf16> to vector<8x64x128xbf16>
    %4 = vector.shape_cast %3 : vector<8x64x128xbf16> to vector<512x128xbf16>
    %c0_5 = arith.constant 0 : index
    %c0_6 = arith.constant 0 : index
    %5 = vector.load %arg7[%c0_5, %c0_6] : memref<512x128xf32, #tpu.memory_space<vmem>>, vector<512x128xf32>
    %c0_7 = arith.constant 0 : index
    %c0_8 = arith.constant 0 : index
    %c0_9 = arith.constant 0 : index
    %6 = vector.load %arg2[%c0_7, %c0_8, %c0_9] : memref<3x128x128xbf16, #tpu.memory_space<vmem>>, vector<1x128x128xbf16>
    %7 = vector.shape_cast %6 : vector<1x128x128xbf16> to vector<128x128xbf16>
    %cst_10 = arith.constant dense<0.000000e+00> : vector<512x128xf32>
    %8 = tpu.matmul %4, %7, %cst_10 {dimension_numbers = #tpu.dot_dimension_numbers<[1], [0], [0], [1], [0, 0, 1, 1], [], []>} : vector<512x128xbf16>, vector<128x128xbf16>, vector<512x128xf32> -> vector<512x128xf32>
    %9 = arith.addf %5, %8 : vector<512x128xf32>
    %c0_11 = arith.constant 0 : index
    %c0_12 = arith.constant 0 : index
    %10 = vector.load %arg7[%c0_11, %c0_12] : memref<512x128xf32, #tpu.memory_space<vmem>>, vector<512x128xf32>
    tpu.vector_store %arg7[%c0_11, %c0_12], %9 {strides = array<i32>} : memref<512x128xf32, #tpu.memory_space<vmem>>, vector<512x128xf32>,
    %c0_13 = arith.constant 0 : index
    %c1 = arith.constant 1 : index
    %c0_14 = arith.constant 0 : index
    %c0_15 = arith.constant 0 : index
    %11 = vector.load %arg1[%c0_13, %c1, %c0_14, %c0_15] : memref<1x10x64x128xbf16, #tpu.memory_space<vmem>>, vector<1x8x64x128xbf16>
    %12 = vector.shape_cast %11 : vector<1x8x64x128xbf16> to vector<8x64x128xbf16>
    %13 = vector.shape_cast %12 : vector<8x64x128xbf16> to vector<512x128xbf16>
    %c0_16 = arith.constant 0 : index
    %c0_17 = arith.constant 0 : index
    %14 = vector.load %arg7[%c0_16, %c0_17] : memref<512x128xf32, #tpu.memory_space<vmem>>, vector<512x128xf32>
    %c1_18 = arith.constant 1 : index
    %c0_19 = arith.constant 0 : index
    %c0_20 = arith.constant 0 : index
    %15 = vector.load %arg2[%c1_18, %c0_19, %c0_20] : memref<3x128x128xbf16, #tpu.memory_space<vmem>>, vector<1x128x128xbf16>
    %16 = vector.shape_cast %15 : vector<1x128x128xbf16> to vector<128x128xbf16>
    %cst_21 = arith.constant dense<0.000000e+00> : vector<512x128xf32>
    %17 = tpu.matmul %13, %16, %cst_21 {dimension_numbers = #tpu.dot_dimension_numbers<[1], [0], [0], [1], [0, 0, 1, 1], [], []>} : vector<512x128xbf16>, vector<128x128xbf16>, vector<512x128xf32> -> vector<512x128xf32>
    %18 = arith.addf %14, %17 : vector<512x128xf32>
    %c0_22 = arith.constant 0 : index
    %c0_23 = arith.constant 0 : index
    %19 = vector.load %arg7[%c0_22, %c0_23] : memref<512x128xf32, #tpu.memory_space<vmem>>, vector<512x128xf32>
    tpu.vector_store %arg7[%c0_22, %c0_23], %18 {strides = array<i32>} : memref<512x128xf32, #tpu.memory_space<vmem>>, vector<512x128xf32>,
    %c0_24 = arith.constant 0 : index
    %c2 = arith.constant 2 : index
    %c0_25 = arith.constant 0 : index
    %c0_26 = arith.constant 0 : index
    %20 = vector.load %arg1[%c0_24, %c2, %c0_25, %c0_26] : memref<1x10x64x128xbf16, #tpu.memory_space<vmem>>, vector<1x8x64x128xbf16>
    %21 = vector.shape_cast %20 : vector<1x8x64x128xbf16> to vector<8x64x128xbf16>
    %22 = vector.shape_cast %21 : vector<8x64x128xbf16> to vector<512x128xbf16>
    %c0_27 = arith.constant 0 : index
    %c0_28 = arith.constant 0 : index
    %23 = vector.load %arg7[%c0_27, %c0_28] : memref<512x128xf32, #tpu.memory_space<vmem>>, vector<512x128xf32>
    %c2_29 = arith.constant 2 : index
    %c0_30 = arith.constant 0 : index
    %c0_31 = arith.constant 0 : index
    %24 = vector.load %arg2[%c2_29, %c0_30, %c0_31] : memref<3x128x128xbf16, #tpu.memory_space<vmem>>, vector<1x128x128xbf16>
    %25 = vector.shape_cast %24 : vector<1x128x128xbf16> to vector<128x128xbf16>
    %cst_32 = arith.constant dense<0.000000e+00> : vector<512x128xf32>
    %26 = tpu.matmul %22, %25, %cst_32 {dimension_numbers = #tpu.dot_dimension_numbers<[1], [0], [0], [1], [0, 0, 1, 1], [], []>} : vector<512x128xbf16>, vector<128x128xbf16>, vector<512x128xf32> -> vector<512x128xf32>
    %27 = arith.addf %23, %26 : vector<512x128xf32>
    %c0_33 = arith.constant 0 : index
    %c0_34 = arith.constant 0 : index
    %28 = vector.load %arg7[%c0_33, %c0_34] : memref<512x128xf32, #tpu.memory_space<vmem>>, vector<512x128xf32>
    tpu.vector_store %arg7[%c0_33, %c0_34], %27 {strides = array<i32>} : memref<512x128xf32, #tpu.memory_space<vmem>>, vector<512x128xf32>,
    %c0_35 = arith.constant 0 : index
    %c0_36 = arith.constant 0 : index
    %29 = vector.load %arg7[%c0_35, %c0_36] : memref<512x128xf32, #tpu.memory_space<vmem>>, vector<512x128xf32>
    %cst_37 = arith.constant dense<0.000000e+00> : vector<128xf32>
    %30 = vector.multi_reduction <add>, %29, %cst_37 [0] : vector<512x128xf32> to vector<128xf32>
    %31 = vector.shape_cast %30 : vector<128xf32> to vector<1x128xf32>
    %cst_38 = arith.constant 0.001953125 : f32
    %32 = vector.broadcast %cst_38 : f32 to vector<1x128xf32>
    %33 = arith.mulf %31, %32 : vector<1x128xf32>
    %34 = arith.mulf %29, %29 : vector<512x128xf32>
    %cst_39 = arith.constant dense<0.000000e+00> : vector<128xf32>
    %35 = vector.multi_reduction <add>, %34, %cst_39 [0] : vector<512x128xf32> to vector<128xf32>
    %36 = vector.shape_cast %35 : vector<128xf32> to vector<1x128xf32>
    %cst_40 = arith.constant 0.001953125 : f32
    %37 = vector.broadcast %cst_40 : f32 to vector<1x128xf32>
    %38 = arith.mulf %36, %37 : vector<1x128xf32>
    %39 = arith.mulf %33, %33 : vector<1x128xf32>
    %40 = arith.subf %38, %39 : vector<1x128xf32>
    %41 = vector.broadcast %33 : vector<1x128xf32> to vector<512x128xf32>
    %42 = arith.subf %29, %41 : vector<512x128xf32>
    %cst_41 = arith.constant 9.99999974E-6 : f32
    %43 = vector.broadcast %cst_41 : f32 to vector<1x128xf32>
    %44 = arith.addf %40, %43 : vector<1x128xf32>
    %45 = math.rsqrt %44 : vector<1x128xf32>
    %46 = vector.broadcast %45 : vector<1x128xf32> to vector<512x128xf32>
    %47 = arith.mulf %42, %46 : vector<512x128xf32>
    %cst_42 = arith.constant 0.000000e+00 : f32
    %48 = vector.broadcast %cst_42 : f32 to vector<512x128xf32>
    %49 = arith.maximumf %47, %48 : vector<512x128xf32>
    %cst_43 = arith.constant 0.000000e+00 : bf16
    %50 = vector.broadcast %cst_43 : bf16 to vector<10x64x1152xbf16>
    %c0_44 = arith.constant 0 : index
    %c0_45 = arith.constant 0 : index
    %c0_46 = arith.constant 0 : index
    %51 = vector.load %arg8[%c0_44, %c0_45, %c0_46] : memref<10x64x1152xbf16, #tpu.memory_space<vmem>>, vector<10x64x1152xbf16>
    tpu.vector_store %arg8[%c0_44, %c0_45, %c0_46], %50 {strides = array<i32>} : memref<10x64x1152xbf16, #tpu.memory_space<vmem>>, vector<10x64x1152xbf16>,
    %52 = vector.shape_cast %49 : vector<512x128xf32> to vector<8x8x8x128xf32>
    %cst_47 = arith.constant 0.000000e+00 : f32
    %53 = vector.broadcast %cst_47 : f32 to vector<8x1x8x128xf32>
    %54 = vector.extract_strided_slice %52 {offsets = [0, 0, 0, 0], sizes = [8, 7, 8, 128], strides = [1, 1, 1, 1]} : vector<8x8x8x128xf32> to vector<8x7x8x128xf32>
    %55 = tpu.concatenate %53, %54 in 1 : vector<8x1x8x128xf32>, vector<8x7x8x128xf32> -> vector<8x8x8x128xf32>
    %cst_48 = arith.constant 0.000000e+00 : f32
    %56 = vector.broadcast %cst_48 : f32 to vector<8x8x1x128xf32>
    %57 = vector.extract_strided_slice %55 {offsets = [0, 0, 0, 0], sizes = [8, 8, 7, 128], strides = [1, 1, 1, 1]} : vector<8x8x8x128xf32> to vector<8x8x7x128xf32>
    %58 = tpu.concatenate %56, %57 in 2 : vector<8x8x1x128xf32>, vector<8x8x7x128xf32> -> vector<8x8x8x128xf32>
    %59 = vector.shape_cast %58 : vector<8x8x8x128xf32> to vector<8x64x128xf32>
    %60 = arith.truncf %59 : vector<8x64x128xf32> to vector<8x64x128xbf16>
    %c1_49 = arith.constant 1 : index
    %c0_50 = arith.constant 0 : index
    %c0_51 = arith.constant 0 : index
    %61 = vector.load %arg8[%c1_49, %c0_50, %c0_51] : memref<10x64x1152xbf16, #tpu.memory_space<vmem>>, vector<8x64x128xbf16>
    tpu.vector_store %arg8[%c1_49, %c0_50, %c0_51], %60 {strides = array<i32>} : memref<10x64x1152xbf16, #tpu.memory_space<vmem>>, vector<8x64x128xbf16>,
    %cst_52 = arith.constant 0.000000e+00 : f32
    %62 = vector.broadcast %cst_52 : f32 to vector<8x1x8x128xf32>
    %63 = vector.extract_strided_slice %52 {offsets = [0, 0, 0, 0], sizes = [8, 7, 8, 128], strides = [1, 1, 1, 1]} : vector<8x8x8x128xf32> to vector<8x7x8x128xf32>
    %64 = tpu.concatenate %62, %63 in 1 : vector<8x1x8x128xf32>, vector<8x7x8x128xf32> -> vector<8x8x8x128xf32>
    %65 = vector.shape_cast %64 : vector<8x8x8x128xf32> to vector<8x64x128xf32>
    %66 = arith.truncf %65 : vector<8x64x128xf32> to vector<8x64x128xbf16>
    %c1_53 = arith.constant 1 : index
    %c0_54 = arith.constant 0 : index
    %c128 = arith.constant 128 : index
    %67 = vector.load %arg8[%c1_53, %c0_54, %c128] : memref<10x64x1152xbf16, #tpu.memory_space<vmem>>, vector<8x64x128xbf16>
    tpu.vector_store %arg8[%c1_53, %c0_54, %c128], %66 {strides = array<i32>} : memref<10x64x1152xbf16, #tpu.memory_space<vmem>>, vector<8x64x128xbf16>,
    %cst_55 = arith.constant 0.000000e+00 : f32
    %68 = vector.broadcast %cst_55 : f32 to vector<8x1x8x128xf32>
    %69 = vector.extract_strided_slice %52 {offsets = [0, 0, 0, 0], sizes = [8, 7, 8, 128], strides = [1, 1, 1, 1]} : vector<8x8x8x128xf32> to vector<8x7x8x128xf32>
    %70 = tpu.concatenate %68, %69 in 1 : vector<8x1x8x128xf32>, vector<8x7x8x128xf32> -> vector<8x8x8x128xf32>
    %cst_56 = arith.constant 0.000000e+00 : f32
    %71 = vector.broadcast %cst_56 : f32 to vector<8x8x1x128xf32>
    %72 = vector.extract_strided_slice %70 {offsets = [0, 0, 1, 0], sizes = [8, 8, 7, 128], strides = [1, 1, 1, 1]} : vector<8x8x8x128xf32> to vector<8x8x7x128xf32>
    %73 = tpu.concatenate %72, %71 in 2 : vector<8x8x7x128xf32>, vector<8x8x1x128xf32> -> vector<8x8x8x128xf32>
    %74 = vector.shape_cast %73 : vector<8x8x8x128xf32> to vector<8x64x128xf32>
    %75 = arith.truncf %74 : vector<8x64x128xf32> to vector<8x64x128xbf16>
    %c1_57 = arith.constant 1 : index
    %c0_58 = arith.constant 0 : index
    %c256 = arith.constant 256 : index
    %76 = vector.load %arg8[%c1_57, %c0_58, %c256] : memref<10x64x1152xbf16, #tpu.memory_space<vmem>>, vector<8x64x128xbf16>
    tpu.vector_store %arg8[%c1_57, %c0_58, %c256], %75 {strides = array<i32>} : memref<10x64x1152xbf16, #tpu.memory_space<vmem>>, vector<8x64x128xbf16>,
    %cst_59 = arith.constant 0.000000e+00 : f32
    %77 = vector.broadcast %cst_59 : f32 to vector<8x8x1x128xf32>
    %78 = vector.extract_strided_slice %52 {offsets = [0, 0, 0, 0], sizes = [8, 8, 7, 128], strides = [1, 1, 1, 1]} : vector<8x8x8x128xf32> to vector<8x8x7x128xf32>
    %79 = tpu.concatenate %77, %78 in 2 : vector<8x8x1x128xf32>, vector<8x8x7x128xf32> -> vector<8x8x8x128xf32>
    %80 = vector.shape_cast %79 : vector<8x8x8x128xf32> to vector<8x64x128xf32>
    %81 = arith.truncf %80 : vector<8x64x128xf32> to vector<8x64x128xbf16>
    %c1_60 = arith.constant 1 : index
    %c0_61 = arith.constant 0 : index
    %c384 = arith.constant 384 : index
    %82 = vector.load %arg8[%c1_60, %c0_61, %c384] : memref<10x64x1152xbf16, #tpu.memory_space<vmem>>, vector<8x64x128xbf16>
    tpu.vector_store %arg8[%c1_60, %c0_61, %c384], %81 {strides = array<i32>} : memref<10x64x1152xbf16, #tpu.memory_space<vmem>>, vector<8x64x128xbf16>,
    %83 = vector.shape_cast %52 : vector<8x8x8x128xf32> to vector<8x64x128xf32>
    %84 = arith.truncf %83 : vector<8x64x128xf32> to vector<8x64x128xbf16>
    %c1_62 = arith.constant 1 : index
    %c0_63 = arith.constant 0 : index
    %c512 = arith.constant 512 : index
    %85 = vector.load %arg8[%c1_62, %c0_63, %c512] : memref<10x64x1152xbf16, #tpu.memory_space<vmem>>, vector<8x64x128xbf16>
    tpu.vector_store %arg8[%c1_62, %c0_63, %c512], %84 {strides = array<i32>} : memref<10x64x1152xbf16, #tpu.memory_space<vmem>>, vector<8x64x128xbf16>,
    %cst_64 = arith.constant 0.000000e+00 : f32
    %86 = vector.broadcast %cst_64 : f32 to vector<8x8x1x128xf32>
    %87 = vector.extract_strided_slice %52 {offsets = [0, 0, 1, 0], sizes = [8, 8, 7, 128], strides = [1, 1, 1, 1]} : vector<8x8x8x128xf32> to vector<8x8x7x128xf32>
    %88 = tpu.concatenate %87, %86 in 2 : vector<8x8x7x128xf32>, vector<8x8x1x128xf32> -> vector<8x8x8x128xf32>
    %89 = vector.shape_cast %88 : vector<8x8x8x128xf32> to vector<8x64x128xf32>
    %90 = arith.truncf %89 : vector<8x64x128xf32> to vector<8x64x128xbf16>
    %c1_65 = arith.constant 1 : index
    %c0_66 = arith.constant 0 : index
    %c640 = arith.constant 640 : index
    %91 = vector.load %arg8[%c1_65, %c0_66, %c640] : memref<10x64x1152xbf16, #tpu.memory_space<vmem>>, vector<8x64x128xbf16>
    tpu.vector_store %arg8[%c1_65, %c0_66, %c640], %90 {strides = array<i32>} : memref<10x64x1152xbf16, #tpu.memory_space<vmem>>, vector<8x64x128xbf16>,
    %cst_67 = arith.constant 0.000000e+00 : f32
    %92 = vector.broadcast %cst_67 : f32 to vector<8x1x8x128xf32>
    %93 = vector.extract_strided_slice %52 {offsets = [0, 1, 0, 0], sizes = [8, 7, 8, 128], strides = [1, 1, 1, 1]} : vector<8x8x8x128xf32> to vector<8x7x8x128xf32>
    %94 = tpu.concatenate %93, %92 in 1 : vector<8x7x8x128xf32>, vector<8x1x8x128xf32> -> vector<8x8x8x128xf32>
    %cst_68 = arith.constant 0.000000e+00 : f32
    %95 = vector.broadcast %cst_68 : f32 to vector<8x8x1x128xf32>
    %96 = vector.extract_strided_slice %94 {offsets = [0, 0, 0, 0], sizes = [8, 8, 7, 128], strides = [1, 1, 1, 1]} : vector<8x8x8x128xf32> to vector<8x8x7x128xf32>
    %97 = tpu.concatenate %95, %96 in 2 : vector<8x8x1x128xf32>, vector<8x8x7x128xf32> -> vector<8x8x8x128xf32>
    %98 = vector.shape_cast %97 : vector<8x8x8x128xf32> to vector<8x64x128xf32>
    %99 = arith.truncf %98 : vector<8x64x128xf32> to vector<8x64x128xbf16>
    %c1_69 = arith.constant 1 : index
    %c0_70 = arith.constant 0 : index
    %c768 = arith.constant 768 : index
    %100 = vector.load %arg8[%c1_69, %c0_70, %c768] : memref<10x64x1152xbf16, #tpu.memory_space<vmem>>, vector<8x64x128xbf16>
    tpu.vector_store %arg8[%c1_69, %c0_70, %c768], %99 {strides = array<i32>} : memref<10x64x1152xbf16, #tpu.memory_space<vmem>>, vector<8x64x128xbf16>,
    %cst_71 = arith.constant 0.000000e+00 : f32
    %101 = vector.broadcast %cst_71 : f32 to vector<8x1x8x128xf32>
    %102 = vector.extract_strided_slice %52 {offsets = [0, 1, 0, 0], sizes = [8, 7, 8, 128], strides = [1, 1, 1, 1]} : vector<8x8x8x128xf32> to vector<8x7x8x128xf32>
    %103 = tpu.concatenate %102, %101 in 1 : vector<8x7x8x128xf32>, vector<8x1x8x128xf32> -> vector<8x8x8x128xf32>
    %104 = vector.shape_cast %103 : vector<8x8x8x128xf32> to vector<8x64x128xf32>
    %105 = arith.truncf %104 : vector<8x64x128xf32> to vector<8x64x128xbf16>
    %c1_72 = arith.constant 1 : index
    %c0_73 = arith.constant 0 : index
    %c896 = arith.constant 896 : index
    %106 = vector.load %arg8[%c1_72, %c0_73, %c896] : memref<10x64x1152xbf16, #tpu.memory_space<vmem>>, vector<8x64x128xbf16>
    tpu.vector_store %arg8[%c1_72, %c0_73, %c896], %105 {strides = array<i32>} : memref<10x64x1152xbf16, #tpu.memory_space<vmem>>, vector<8x64x128xbf16>,
    %cst_74 = arith.constant 0.000000e+00 : f32
    %107 = vector.broadcast %cst_74 : f32 to vector<8x1x8x128xf32>
    %108 = vector.extract_strided_slice %52 {offsets = [0, 1, 0, 0], sizes = [8, 7, 8, 128], strides = [1, 1, 1, 1]} : vector<8x8x8x128xf32> to vector<8x7x8x128xf32>
    %109 = tpu.concatenate %108, %107 in 1 : vector<8x7x8x128xf32>, vector<8x1x8x128xf32> -> vector<8x8x8x128xf32>
    %cst_75 = arith.constant 0.000000e+00 : f32
    %110 = vector.broadcast %cst_75 : f32 to vector<8x8x1x128xf32>
    %111 = vector.extract_strided_slice %109 {offsets = [0, 0, 1, 0], sizes = [8, 8, 7, 128], strides = [1, 1, 1, 1]} : vector<8x8x8x128xf32> to vector<8x8x7x128xf32>
    %112 = tpu.concatenate %111, %110 in 2 : vector<8x8x7x128xf32>, vector<8x8x1x128xf32> -> vector<8x8x8x128xf32>
    %113 = vector.shape_cast %112 : vector<8x8x8x128xf32> to vector<8x64x128xf32>
    %114 = arith.truncf %113 : vector<8x64x128xf32> to vector<8x64x128xbf16>
    %c1_76 = arith.constant 1 : index
    %c0_77 = arith.constant 0 : index
    %c1024 = arith.constant 1024 : index
    %115 = vector.load %arg8[%c1_76, %c0_77, %c1024] : memref<10x64x1152xbf16, #tpu.memory_space<vmem>>, vector<8x64x128xbf16>
    tpu.vector_store %arg8[%c1_76, %c0_77, %c1024], %114 {strides = array<i32>} : memref<10x64x1152xbf16, #tpu.memory_space<vmem>>, vector<8x64x128xbf16>,
    %cst_78 = arith.constant 0.000000e+00 : f32
    %116 = vector.broadcast %cst_78 : f32 to vector<512x128xf32>
    %c0_79 = arith.constant 0 : index
    %c0_80 = arith.constant 0 : index
    %117 = vector.load %arg7[%c0_79, %c0_80] : memref<512x128xf32, #tpu.memory_space<vmem>>, vector<512x128xf32>
    tpu.vector_store %arg7[%c0_79, %c0_80], %116 {strides = array<i32>} : memref<512x128xf32, #tpu.memory_space<vmem>>, vector<512x128xf32>,
    %c0_81 = arith.constant 0 : index
    %c0_82 = arith.constant 0 : index
    %c0_83 = arith.constant 0 : index
    %118 = vector.load %arg8[%c0_81, %c0_82, %c0_83] : memref<10x64x1152xbf16, #tpu.memory_space<vmem>>, vector<8x64x1152xbf16>
    %119 = vector.shape_cast %118 : vector<8x64x1152xbf16> to vector<512x1152xbf16>
    %c0_84 = arith.constant 0 : index
    %c0_85 = arith.constant 0 : index
    %120 = vector.load %arg7[%c0_84, %c0_85] : memref<512x128xf32, #tpu.memory_space<vmem>>, vector<512x128xf32>
    %c0_86 = arith.constant 0 : index
    %c0_87 = arith.constant 0 : index
    %c0_88 = arith.constant 0 : index
    %121 = vector.load %arg3[%c0_86, %c0_87, %c0_88] : memref<3x1152x128xbf16, #tpu.memory_space<vmem>>, vector<1x1152x128xbf16>
    %122 = vector.shape_cast %121 : vector<1x1152x128xbf16> to vector<1152x128xbf16>
    %cst_89 = arith.constant dense<0.000000e+00> : vector<512x128xf32>
    %123 = tpu.matmul %119, %122, %cst_89 {dimension_numbers = #tpu.dot_dimension_numbers<[1], [0], [0], [1], [0, 0, 1, 1], [], []>} : vector<512x1152xbf16>, vector<1152x128xbf16>, vector<512x128xf32> -> vector<512x128xf32>
    %124 = arith.addf %120, %123 : vector<512x128xf32>
    %c0_90 = arith.constant 0 : index
    %c0_91 = arith.constant 0 : index
    %125 = vector.load %arg7[%c0_90, %c0_91] : memref<512x128xf32, #tpu.memory_space<vmem>>, vector<512x128xf32>
    tpu.vector_store %arg7[%c0_90, %c0_91], %124 {strides = array<i32>} : memref<512x128xf32, #tpu.memory_space<vmem>>, vector<512x128xf32>,
    %c1_92 = arith.constant 1 : index
    %c0_93 = arith.constant 0 : index
    %c0_94 = arith.constant 0 : index
    %126 = vector.load %arg8[%c1_92, %c0_93, %c0_94] : memref<10x64x1152xbf16, #tpu.memory_space<vmem>>, vector<8x64x1152xbf16>
    %127 = vector.shape_cast %126 : vector<8x64x1152xbf16> to vector<512x1152xbf16>
    %c0_95 = arith.constant 0 : index
    %c0_96 = arith.constant 0 : index
    %128 = vector.load %arg7[%c0_95, %c0_96] : memref<512x128xf32, #tpu.memory_space<vmem>>, vector<512x128xf32>
    %c1_97 = arith.constant 1 : index
    %c0_98 = arith.constant 0 : index
    %c0_99 = arith.constant 0 : index
    %129 = vector.load %arg3[%c1_97, %c0_98, %c0_99] : memref<3x1152x128xbf16, #tpu.memory_space<vmem>>, vector<1x1152x128xbf16>
    %130 = vector.shape_cast %129 : vector<1x1152x128xbf16> to vector<1152x128xbf16>
    %cst_100 = arith.constant dense<0.000000e+00> : vector<512x128xf32>
    %131 = tpu.matmul %127, %130, %cst_100 {dimension_numbers = #tpu.dot_dimension_numbers<[1], [0], [0], [1], [0, 0, 1, 1], [], []>} : vector<512x1152xbf16>, vector<1152x128xbf16>, vector<512x128xf32> -> vector<512x128xf32>
    %132 = arith.addf %128, %131 : vector<512x128xf32>
    %c0_101 = arith.constant 0 : index
    %c0_102 = arith.constant 0 : index
    %133 = vector.load %arg7[%c0_101, %c0_102] : memref<512x128xf32, #tpu.memory_space<vmem>>, vector<512x128xf32>
    tpu.vector_store %arg7[%c0_101, %c0_102], %132 {strides = array<i32>} : memref<512x128xf32, #tpu.memory_space<vmem>>, vector<512x128xf32>,
    %c2_103 = arith.constant 2 : index
    %c0_104 = arith.constant 0 : index
    %c0_105 = arith.constant 0 : index
    %134 = vector.load %arg8[%c2_103, %c0_104, %c0_105] : memref<10x64x1152xbf16, #tpu.memory_space<vmem>>, vector<8x64x1152xbf16>
    %135 = vector.shape_cast %134 : vector<8x64x1152xbf16> to vector<512x1152xbf16>
    %c0_106 = arith.constant 0 : index
    %c0_107 = arith.constant 0 : index
    %136 = vector.load %arg7[%c0_106, %c0_107] : memref<512x128xf32, #tpu.memory_space<vmem>>, vector<512x128xf32>
    %c2_108 = arith.constant 2 : index
    %c0_109 = arith.constant 0 : index
    %c0_110 = arith.constant 0 : index
    %137 = vector.load %arg3[%c2_108, %c0_109, %c0_110] : memref<3x1152x128xbf16, #tpu.memory_space<vmem>>, vector<1x1152x128xbf16>
    %138 = vector.shape_cast %137 : vector<1x1152x128xbf16> to vector<1152x128xbf16>
    %cst_111 = arith.constant dense<0.000000e+00> : vector<512x128xf32>
    %139 = tpu.matmul %135, %138, %cst_111 {dimension_numbers = #tpu.dot_dimension_numbers<[1], [0], [0], [1], [0, 0, 1, 1], [], []>} : vector<512x1152xbf16>, vector<1152x128xbf16>, vector<512x128xf32> -> vector<512x128xf32>
    %140 = arith.addf %136, %139 : vector<512x128xf32>
    %c0_112 = arith.constant 0 : index
    %c0_113 = arith.constant 0 : index
    %141 = vector.load %arg7[%c0_112, %c0_113] : memref<512x128xf32, #tpu.memory_space<vmem>>, vector<512x128xf32>
    tpu.vector_store %arg7[%c0_112, %c0_113], %140 {strides = array<i32>} : memref<512x128xf32, #tpu.memory_space<vmem>>, vector<512x128xf32>,
    %c0_114 = arith.constant 0 : index
    %c0_115 = arith.constant 0 : index
    %142 = vector.load %arg7[%c0_114, %c0_115] : memref<512x128xf32, #tpu.memory_space<vmem>>, vector<512x128xf32>
    %cst_116 = arith.constant dense<0.000000e+00> : vector<128xf32>
    %143 = vector.multi_reduction <add>, %142, %cst_116 [0] : vector<512x128xf32> to vector<128xf32>
    %144 = vector.shape_cast %143 : vector<128xf32> to vector<1x128xf32>
    %cst_117 = arith.constant 0.001953125 : f32
    %145 = vector.broadcast %cst_117 : f32 to vector<1x128xf32>
    %146 = arith.mulf %144, %145 : vector<1x128xf32>
    %147 = arith.mulf %142, %142 : vector<512x128xf32>
    %cst_118 = arith.constant dense<0.000000e+00> : vector<128xf32>
    %148 = vector.multi_reduction <add>, %147, %cst_118 [0] : vector<512x128xf32> to vector<128xf32>
    %149 = vector.shape_cast %148 : vector<128xf32> to vector<1x128xf32>
    %cst_119 = arith.constant 0.001953125 : f32
    %150 = vector.broadcast %cst_119 : f32 to vector<1x128xf32>
    %151 = arith.mulf %149, %150 : vector<1x128xf32>
    %152 = arith.mulf %146, %146 : vector<1x128xf32>
    %153 = arith.subf %151, %152 : vector<1x128xf32>
    %154 = vector.broadcast %146 : vector<1x128xf32> to vector<512x128xf32>
    %155 = arith.subf %142, %154 : vector<512x128xf32>
    %cst_120 = arith.constant 9.99999974E-6 : f32
    %156 = vector.broadcast %cst_120 : f32 to vector<1x128xf32>
    %157 = arith.addf %153, %156 : vector<1x128xf32>
    %158 = math.rsqrt %157 : vector<1x128xf32>
    %159 = vector.broadcast %158 : vector<1x128xf32> to vector<512x128xf32>
    %160 = arith.mulf %155, %159 : vector<512x128xf32>
    %c0_121 = arith.constant 0 : index
    %c1_122 = arith.constant 1 : index
    %c0_123 = arith.constant 0 : index
    %c0_124 = arith.constant 0 : index
    %161 = vector.load %arg1[%c0_121, %c1_122, %c0_123, %c0_124] : memref<1x10x64x128xbf16, #tpu.memory_space<vmem>>, vector<1x8x64x128xbf16>
    %162 = vector.shape_cast %161 : vector<1x8x64x128xbf16> to vector<8x64x128xbf16>
    %163 = vector.shape_cast %162 : vector<8x64x128xbf16> to vector<512x128xbf16>
    %c0_125 = arith.constant 0 : index
    %c0_126 = arith.constant 0 : index
    %164 = vector.load %arg4[%c0_125, %c0_126] : memref<128x128xbf16, #tpu.memory_space<vmem>>, vector<128x128xbf16>
    %cst_127 = arith.constant dense<0.000000e+00> : vector<512x128xf32>
    %165 = tpu.matmul %163, %164, %cst_127 {dimension_numbers = #tpu.dot_dimension_numbers<[1], [0], [0], [1], [0, 0, 1, 1], [], []>} : vector<512x128xbf16>, vector<128x128xbf16>, vector<512x128xf32> -> vector<512x128xf32>
    %c0_128 = arith.constant 0 : index
    %c0_129 = arith.constant 0 : index
    %166 = vector.load %arg5[%c0_128, %c0_129] : memref<1x128xf32, #tpu.memory_space<vmem>>, vector<1x128xf32>
    %167 = vector.broadcast %166 : vector<1x128xf32> to vector<512x128xf32>
    %168 = arith.addf %165, %167 : vector<512x128xf32>
    %169 = arith.addf %160, %168 : vector<512x128xf32>
    %cst_130 = arith.constant 0.000000e+00 : f32
    %170 = vector.broadcast %cst_130 : f32 to vector<512x128xf32>
    %171 = arith.maximumf %169, %170 : vector<512x128xf32>
    %c0_131 = arith.constant 0 : index
    %c0_132 = arith.constant 0 : index
    %c0_133 = arith.constant 0 : index
    %172 = vector.load %arg6[%c0_131, %c0_132, %c0_133] : memref<1x512x128xf32, #tpu.memory_space<vmem>>, vector<1x512x128xf32>
    %173 = vector.shape_cast %172 : vector<1x512x128xf32> to vector<512x128xf32>
    %174 = vector.shape_cast %171 : vector<512x128xf32> to vector<1x512x128xf32>
    tpu.vector_store %arg6[%c0_131, %c0_132, %c0_133], %174 {strides = array<i32>} : memref<1x512x128xf32, #tpu.memory_space<vmem>>, vector<1x512x128xf32>,
    return
  }
  func.func @transform_0(%arg0: i32) -> (i32, i32, i32, i32) {
    %c0_i32 = arith.constant 0 : i32
    %c0_i32_0 = arith.constant 0 : i32
    %c0_i32_1 = arith.constant 0 : i32
    %c0_i32_2 = arith.constant 0 : i32
    return %arg0, %c0_i32, %c0_i32_0, %c0_i32_1 : i32, i32, i32, i32
  }
  func.func @transform_1(%arg0: i32) -> (i32, i32, i32) {
    %c0_i32 = arith.constant 0 : i32
    %c0_i32_0 = arith.constant 0 : i32
    %c0_i32_1 = arith.constant 0 : i32
    %c0_i32_2 = arith.constant 0 : i32
    return %c0_i32, %c0_i32_0, %c0_i32_1 : i32, i32, i32
  }
  func.func @transform_2(%arg0: i32) -> (i32, i32, i32) {
    %c0_i32 = arith.constant 0 : i32
    %c0_i32_0 = arith.constant 0 : i32
    %c0_i32_1 = arith.constant 0 : i32
    %c0_i32_2 = arith.constant 0 : i32
    return %c0_i32, %c0_i32_0, %c0_i32_1 : i32, i32, i32
  }
  func.func @transform_3(%arg0: i32) -> (i32, i32) {
    %c0_i32 = arith.constant 0 : i32
    %c0_i32_0 = arith.constant 0 : i32
    %c0_i32_1 = arith.constant 0 : i32
    return %c0_i32, %c0_i32_0 : i32, i32
  }
  func.func @transform_4(%arg0: i32) -> (i32, i32) {
    %c0_i32 = arith.constant 0 : i32
    %c0_i32_0 = arith.constant 0 : i32
    %c0_i32_1 = arith.constant 0 : i32
    return %c0_i32, %c0_i32_0 : i32, i32
  }
  func.func @transform_5(%arg0: i32) -> (i32, i32, i32) {
    %c0_i32 = arith.constant 0 : i32
    %c0_i32_0 = arith.constant 0 : i32
    %c0_i32_1 = arith.constant 0 : i32
    return %arg0, %c0_i32, %c0_i32_0 : i32, i32, i32
  }
}

</mosaic_0001>

<bundles_post_ra>
// kernel: res_conv_block_forward.1
= control target key start
LH: loop header
LB: loop body
LE: loop exit
PB: predicated region body
PF: predicated region fallthrough
CT: control target
= control target key end

     0   :  { %s18875_s18 = smov 0   ;;  %s26520_s0 = inlined_call_operand.vmem [shape: bf16[2,10,64,128], index: 0, kind: input, shape index: {}]   ;;  %s26521_s1 = inlined_call_operand.vmem [shape: bf16[3,128,128], index: 1, kind: input, shape index: {}]   ;;  %s26522_s2 = inlined_call_operand.vmem [shape: bf16[3,1152,128], index: 2, kind: input, shape index: {}]   ;;  %s26523_s3 = inlined_call_operand.vmem [shape: bf16[128,128], index: 3, kind: input, shape index: {}]   ;;  %s26524_s4 = inlined_call_operand.vmem [shape: f32[1,128], index: 4, kind: input, shape index: {}]   ;;  %s26525_s5 = inlined_call_operand.vmem [shape: f32[2,512,128], index: 5, kind: output, shape index: {}]  }
   0x1 LB: > { %s13316_s19 = sadd.s32 4294967295, %s18841_s18   ;;  %p13320_p0 = scmp.ge.s32.totalorder %s18841_s18, 1  ;;  %s18841_s18 = sphi %s18875_s18, %s15_s18  }
   0x2   : > { %p187_p1 = scmp.lt.s32.totalorder %s18841_s18, 3 }
   0x4   : > { %p188_p2 = pnand %p13320_p0, %p187_p1 }
   0x6   : > { %191 = sbr.rel (%p188_p2) target bundleno = 2978 (0xba2), region = 40 }
   0xd   : > { %v18439_v0 = vld [vmem:[%s26521_s1] sm:$0xff]   ;;  %p215_p3 = scmp.lt.s32.totalorder %s13316_s19, 1  ;;  %v18440_v1 = vld [vmem:[%s26521_s1 + $0x8] sm:$0xff]   ;;  %v18441_v2 = vld [vmem:[%s26521_s1 + $0x10] sm:$0xff]   ;;  %vm3692_vm0 = vcmask 1040384   ;;  %vm3993_vm3 = vcmask 1046528  }
   0xe   : > { %16608 = vmatprep.subr.bf16.mxu0 %v18439_v0  ;;  %v18442_v3 = vld [vmem:[%s26521_s1 + $0x18] sm:$0xff]   ;;  %v18443_v5 = vld [vmem:[%s26521_s1 + $0x20] sm:$0xff]   ;;  %v18444_v6 = vld [vmem:[%s26521_s1 + $0x28] sm:$0xff]  }
   0xf   : > { %s29319_s19 = smov (!%p215_p3, %s13316_s19), 1  ;;  %16609 = vmatpush3.bf16.msra.mxu0 %v18439_v0  ;;  %v18445_v7 = vld [vmem:[%s26521_s1 + $0x30] sm:$0xff]   ;;  %v18446_v8 = vld [vmem:[%s26521_s1 + $0x38] sm:$0xff]   ;;  %v18449_v9 = vld [vmem:[%s26521_s1 + $0x40] sm:$0xff]  }
  0x10   : > { %16610 = vmatprep.subr.bf16.mxu0 %v18440_v1  ;;  %s18428_s26 = smul.u32 320, %s29319_s19  ;;  %v18454_v12 = vld [vmem:[%s26521_s1 + $0x48] sm:$0xff]   ;;  %v18459_v13 = vld [vmem:[%s26521_s1 + $0x50] sm:$0xff]   ;;  %v18464_v16 = vld [vmem:[%s26521_s1 + $0x58] sm:$0xff]   ;;  %s14215_s24 = sshll.u32 %s29319_s19, 9 }
  0x11   : > { %v18469_v17 = vld [vmem:[%s26521_s1 + $0x60] sm:$0xff]   ;;  %v18474_v20 = vld [vmem:[%s26521_s1 + $0x68] sm:$0xff]   ;;  %v18479_v21 = vld [vmem:[%s26521_s1 + $0x70] sm:$0xff]  }
  0x12   : > { %s18898_s29 = scalar_lea.vmem %s26520_s0, %s18428_s26  ;;  %v18484_v24 = vld [vmem:[%s26521_s1 + $0x78] sm:$0xff]   ;;  %v18489_v25 = vld [vmem:[%s26521_s1 + $0x80] sm:$0xff]   ;;  %v18494_v52 = vld [vmem:[%s26521_s1 + $0x88] sm:$0xff]   ;;  %s26298_s26 = scalar_lea.vmem %s26525_s5, %s14215_s24 }
  0x13   : > { %16611 = vmatpush3.bf16.msra.mxu0 %v18440_v1  ;;  %v18447_v4 = vld [vmem:[%s18898_s29] sm:$0xff]   ;;  %v18448_v10 = vld [vmem:[%s18898_s29 + $0x8] sm:$0xff]   ;;  %v18450_v11 = vld [vmem:[%s18898_s29 + $0x10] sm:$0xff]  }
  0x14   : > { %16612 = vmatprep.subr.bf16.mxu0 %v18441_v2  ;;  %16624 = vmatprep.mubr.bf16.mxu0 %v18447_v4  ;;  %v18451_v14 = vld [vmem:[%s18898_s29 + $0x18] sm:$0xff]   ;;  %v18452_v15 = vld [vmem:[%s18898_s29 + $0x20] sm:$0xff]   ;;  %v18453_v18 = vld [vmem:[%s18898_s29 + $0x28] sm:$0xff]  }
  0x15   : > { %v18455_v19 = vld [vmem:[%s18898_s29 + $0x30] sm:$0xff]   ;;  %v18456_v22 = vld [vmem:[%s18898_s29 + $0x38] sm:$0xff]   ;;  %v18457_v23 = vld [vmem:[%s18898_s29 + $0x40] sm:$0xff]  }
  0x16   : > { %v18458_v26 = vld [vmem:[%s18898_s29 + $0x48] sm:$0xff]   ;;  %v18460_v27 = vld [vmem:[%s18898_s29 + $0x50] sm:$0xff]   ;;  %v18461_v28 = vld [vmem:[%s18898_s29 + $0x58] sm:$0xff]  }
  0x17   : > { %16613 = vmatpush3.bf16.msra.mxu0 %v18441_v2  ;;  %v18462_v29 = vld [vmem:[%s18898_s29 + $0x60] sm:$0xff]   ;;  %v18463_v30 = vld [vmem:[%s18898_s29 + $0x68] sm:$0xff]   ;;  %v18465_v31 = vld [vmem:[%s18898_s29 + $0x70] sm:$0xff]  }
  0x18   : > { %16614 = vmatprep.subr.bf16.mxu0 %v18442_v3  ;;  %v18466_v32 = vld [vmem:[%s18898_s29 + $0x78] sm:$0xff]   ;;  %v18467_v33 = vld [vmem:[%s18898_s29 + $0x80] sm:$0xff]   ;;  %v18468_v34 = vld [vmem:[%s18898_s29 + $0x88] sm:$0xff]  }
  0x19   : > { %v18470_v35 = vld [vmem:[%s18898_s29 + $0x90] sm:$0xff]   ;;  %v18471_v36 = vld [vmem:[%s18898_s29 + $0x98] sm:$0xff]   ;;  %v18472_v37 = vld [vmem:[%s18898_s29 + $0xa0] sm:$0xff]  }
  0x1a   : > { %v18473_v38 = vld [vmem:[%s18898_s29 + $0xa8] sm:$0xff]   ;;  %v18475_v39 = vld [vmem:[%s18898_s29 + $0xb0] sm:$0xff]   ;;  %v18476_v40 = vld [vmem:[%s18898_s29 + $0xb8] sm:$0xff]  }
  0x1b   : > { %16615 = vmatpush3.bf16.msra.mxu0 %v18442_v3  ;;  %v18477_v41 = vld [vmem:[%s18898_s29 + $0xc0] sm:$0xff]   ;;  %v18478_v42 = vld [vmem:[%s18898_s29 + $0xc8] sm:$0xff]   ;;  %v18480_v43 = vld [vmem:[%s18898_s29 + $0xd0] sm:$0xff]  }
  0x1c   : > { %16616 = vmatprep.subr.bf16.mxu0 %v18443_v5  ;;  %v18481_v44 = vld [vmem:[%s18898_s29 + $0xd8] sm:$0xff]   ;;  %v18482_v45 = vld [vmem:[%s18898_s29 + $0xe0] sm:$0xff]   ;;  %v18483_v46 = vld [vmem:[%s18898_s29 + $0xe8] sm:$0xff]  }
  0x1d   : > { %v18485_v47 = vld [vmem:[%s18898_s29 + $0xf0] sm:$0xff]   ;;  %v18486_v48 = vld [vmem:[%s18898_s29 + $0xf8] sm:$0xff]   ;;  %v18487_v49 = vld [vmem:[%s18898_s29 + $0x20] sm:$0xff]  }
  0x1e   : > { %v18488_v50 = vld [vmem:[%s18898_s29 + $0x28] sm:$0xff]   ;;  %v18490_v51 = vld [vmem:[%s18898_s29 + $0x30] sm:$0xff]   ;;  %v18491_v54 = vld [vmem:[%s18898_s29 + $0x38] sm:$0xff]  }
  0x1f   : > { %16617 = vmatpush3.bf16.msra.mxu0 %v18443_v5  ;;  %v18499_v53 = vld [vmem:[%s26521_s1 + $0x90] sm:$0xff]   ;;  %v18492_v55 = vld [vmem:[%s18898_s29 + $0x40] sm:$0xff]   ;;  %v18504_v56 = vld [vmem:[%s26521_s1 + $0x98] sm:$0xff]  }
  0x20   : > { %16618 = vmatprep.subr.bf16.mxu0 %v18444_v6  ;;  %v18509_v57 = vld [vmem:[%s26521_s1 + $0xa0] sm:$0xff]   ;;  %v18493_v58 = vld [vmem:[%s18898_s29 + $0x48] sm:$0xff]   ;;  %v18495_v59 = vld [vmem:[%s18898_s29 + $0x50] sm:$0xff]  }
  0x21   : > { %v18514_v60 = vld [vmem:[%s26521_s1 + $0xa8] sm:$0xff]   ;;  %v18519_v61 = vld [vmem:[%s26521_s1 + $0xb0] sm:$0xff]   ;;  %v18496_v62 = vld [vmem:[%s18898_s29 + $0x58] sm:$0xff]  }
  0x22   : > { %v18497_v63 = vld [vmem:[%s18898_s29 + $0x60] sm:$0xff]   ;;  %v18524_v0 = vld [vmem:[%s26521_s1 + $0xb8] sm:$0xff]   ;;  %v18498_v1 = vld [vmem:[%s18898_s29 + $0x68] sm:$0xff]  }
  0x23   : > { %16619 = vmatpush3.bf16.msra.mxu0 %v18444_v6  ;;  %v18500_v2 = vld [vmem:[%s18898_s29 + $0x70] sm:$0xff]   ;;  %v18501_v3 = vld [vmem:[%s18898_s29 + $0x78] sm:$0xff]   ;;  %v18502_v4 = vld [vmem:[%s18898_s29 + $0x80] sm:$0xff]  }
  0x24   : > { %16620 = vmatprep.subr.bf16.mxu0 %v18445_v7  ;;  %v18503_v5 = vld [vmem:[%s18898_s29 + $0x88] sm:$0xff]   ;;  %v18505_v6 = vld [vmem:[%s18898_s29 + $0x90] sm:$0xff]   ;;  %vm14216_vm1 = vmneg %vm3692_vm0 }
  0x25   : > { %vm19825_vm2 = vmpackc.low %vm14216_vm1, %vm14216_vm1 }
  0x26   : > { %vm21370_vm4 = vmpackc.low %vm3993_vm3, %vm3993_vm3 }
  0x27   : > { %16621 = vmatpush3.bf16.msra.mxu0 %v18445_v7  ;;  %v18506_v7 = vld [vmem:[%s18898_s29 + $0x98] sm:$0xff]  }
  0x28   : > { %16622 = vmatprep.subr.bf16.mxu0 %v18446_v8 }
  0x2b   : > { %16623 = vmatpush3.bf16.msra.mxu0 %v18446_v8  ;;  %v18507_v8 = vld [vmem:[%s18898_s29 + $0xa0] sm:$0xff]  }
  0x2c   : > { %16688 = vmatprep.subr.bf16.mxu0 %v18449_v9 }
  0x2e   : > { %16625 = vmatmul.mubr.bf16.vlgmr.msra.gmra.mrb[0].mxu0 %v18448_v10  ;;  %v18510_v10 = vld [vmem:[%s18898_s29 + $0xb0] sm:$0xff]  }
  0x2f   : > { %16689 = vmatpush3.bf16.msra.mxu0 %v18449_v9  ;;  %16628 = vmatprep.mubr.bf16.mxu0 %v18450_v11  ;;  %v18508_v9 = vld [vmem:[%s18898_s29 + $0xa8] sm:$0xff]   ;;  %v18511_v11 = vld [vmem:[%s18898_s29 + $0xb8] sm:$0xff]  }
  0x30   : > { %16690 = vmatprep.subr.bf16.mxu0 %v18454_v12 }
  0x33   : > { %16691 = vmatpush3.bf16.msra.mxu0 %v18454_v12  ;;  %v18512_v12 = vld [vmem:[%s18898_s29 + $0xc0] sm:$0xff]  }
  0x34   : > { %16692 = vmatprep.subr.bf16.mxu0 %v18459_v13 }
  0x36   : > { %16629 = vmatmul.mubr.bf16.gmra.mrb[4].mxu0 %v18451_v14  ;;  %v18515_v14 = vld [vmem:[%s18898_s29 + $0xd0] sm:$0xff]  }
  0x37   : > { %16632 = vmatprep.mubr.bf16.mxu0 %v18452_v15  ;;  %16693 = vmatpush3.bf16.msra.mxu0 %v18459_v13  ;;  %v18513_v13 = vld [vmem:[%s18898_s29 + $0xc8] sm:$0xff]   ;;  %v18516_v15 = vld [vmem:[%s18898_s29 + $0xd8] sm:$0xff]  }
  0x38   : > { %16694 = vmatprep.subr.bf16.mxu0 %v18464_v16 }
  0x3b   : > { %16695 = vmatpush3.bf16.msra.mxu0 %v18464_v16  ;;  %v18517_v16 = vld [vmem:[%s18898_s29 + $0xe0] sm:$0xff]  }
  0x3c   : > { %16696 = vmatprep.subr.bf16.mxu0 %v18469_v17 }
  0x3e   : > { %16633 = vmatmul.mubr.bf16.gmra.mrb[8].mxu0 %v18453_v18  ;;  %v18520_v18 = vld [vmem:[%s18898_s29 + $0xf0] sm:$0xff]  }
  0x3f   : > { %16636 = vmatprep.mubr.bf16.mxu0 %v18455_v19  ;;  %16697 = vmatpush3.bf16.msra.mxu0 %v18469_v17  ;;  %v18518_v17 = vld [vmem:[%s18898_s29 + $0xe8] sm:$0xff]   ;;  %v18521_v19 = vld [vmem:[%s18898_s29 + $0xf8] sm:$0xff]  }
  0x40   : > { %16698 = vmatprep.subr.bf16.mxu0 %v18474_v20 }
  0x43   : > { %16699 = vmatpush3.bf16.msra.mxu0 %v18474_v20  ;;  %v18522_v20 = vld [vmem:[%s18898_s29 + $0x100] sm:$0xff]  }
  0x44   : > { %16700 = vmatprep.subr.bf16.mxu0 %v18479_v21 }
  0x46   : > { %16637 = vmatmul.mubr.bf16.gmra.mrb[12].mxu0 %v18456_v22  ;;  %v18525_v22 = vld [vmem:[%s18898_s29 + $0x110] sm:$0xff]  }
  0x47   : > { %16640 = vmatprep.mubr.bf16.mxu0 %v18457_v23  ;;  %16701 = vmatpush3.bf16.msra.mxu0 %v18479_v21  ;;  %v18523_v21 = vld [vmem:[%s18898_s29 + $0x108] sm:$0xff]   ;;  %v18526_v23 = vld [vmem:[%s18898_s29 + $0x118] sm:$0xff]  }
  0x48   : > { %16702 = vmatprep.subr.bf16.mxu0 %v18484_v24 }
  0x4b   : > { %16703 = vmatpush3.bf16.msra.mxu0 %v18484_v24  ;;  %v18527_v24 = vld [vmem:[%s18898_s29 + $0x40] sm:$0xff]  }
  0x4c   : > { %16768 = vmatprep.subr.bf16.mxu0 %v18489_v25 }
  0x4e   : > { %16641 = vmatmul.mubr.bf16.gmra.mrb[16].mxu0 %v18458_v26  ;;  %v18529_v26 = vld [vmem:[%s18898_s29 + $0x50] sm:$0xff]  }
  0x4f   : > { %16644 = vmatprep.mubr.bf16.mxu0 %v18460_v27  ;;  %v18530_v27 = vld [vmem:[%s18898_s29 + $0x58] sm:$0xff]  }
  0x56   : > { %16645 = vmatmul.mubr.bf16.gmra.mrb[20].mxu0 %v18461_v28  ;;  %v18531_v28 = vld [vmem:[%s18898_s29 + $0x60] sm:$0xff]  }
  0x57   : > { %16648 = vmatprep.mubr.bf16.mxu0 %v18462_v29  ;;  %v18532_v29 = vld [vmem:[%s18898_s29 + $0x68] sm:$0xff]  }
  0x5e   : > { %16649 = vmatmul.mubr.bf16.gmra.mrb[24].mxu0 %v18463_v30  ;;  %v18533_v30 = vld [vmem:[%s18898_s29 + $0x70] sm:$0xff]  }
  0x5f   : > { %16652 = vmatprep.mubr.bf16.mxu0 %v18465_v31  ;;  %v18534_v31 = vld [vmem:[%s18898_s29 + $0x78] sm:$0xff]  }
  0x66   : > { %16653 = vmatmul.mubr.bf16.gmra.mrb[28].mxu0 %v18466_v32  ;;  %v18535_v32 = vld [vmem:[%s18898_s29 + $0x80] sm:$0xff]  }
  0x67   : > { %16656 = vmatprep.mubr.bf16.mxu0 %v18467_v33  ;;  %v18536_v33 = vld [vmem:[%s18898_s29 + $0x88] sm:$0xff]  }
  0x6e   : > { %16657 = vmatmul.mubr.bf16.gmra.mrb[32].mxu0 %v18468_v34  ;;  %v18537_v34 = vld [vmem:[%s18898_s29 + $0x90] sm:$0xff]  }
  0x6f   : > { %16660 = vmatprep.mubr.bf16.mxu0 %v18470_v35  ;;  %v18538_v35 = vld [vmem:[%s18898_s29 + $0x98] sm:$0xff]  }
  0x76   : > { %16661 = vmatmul.mubr.bf16.gmra.mrb[36].mxu0 %v18471_v36  ;;  %v18539_v36 = vld [vmem:[%s18898_s29 + $0xa0] sm:$0xff]  }
  0x77   : > { %16664 = vmatprep.mubr.bf16.mxu0 %v18472_v37  ;;  %v18540_v37 = vld [vmem:[%s18898_s29 + $0xa8] sm:$0xff]  }
  0x7e   : > { %16665 = vmatmul.mubr.bf16.gmra.mrb[40].mxu0 %v18473_v38  ;;  %v18541_v38 = vld [vmem:[%s18898_s29 + $0xb0] sm:$0xff]  }
  0x7f   : > { %16668 = vmatprep.mubr.bf16.mxu0 %v18475_v39  ;;  %v18542_v39 = vld [vmem:[%s18898_s29 + $0xb8] sm:$0xff]  }
  0x86   : > { %16669 = vmatmul.mubr.bf16.gmra.mrb[44].mxu0 %v18476_v40  ;;  %v18543_v40 = vld [vmem:[%s18898_s29 + $0xc0] sm:$0xff]  }
  0x87   : > { %16672 = vmatprep.mubr.bf16.mxu0 %v18477_v41  ;;  %v18544_v41 = vld [vmem:[%s18898_s29 + $0xc8] sm:$0xff]  }
  0x8e   : > { %16673 = vmatmul.mubr.bf16.gmra.mrb[48].mxu0 %v18478_v42  ;;  %v18545_v42 = vld [vmem:[%s18898_s29 + $0xd0] sm:$0xff]  }
  0x8f   : > { %16676 = vmatprep.mubr.bf16.mxu0 %v18480_v43  ;;  %v18546_v43 = vld [vmem:[%s18898_s29 + $0xd8] sm:$0xff]  }
  0x96   : > { %16677 = vmatmul.mubr.bf16.gmra.mrb[52].mxu0 %v18481_v44  ;;  %v18547_v44 = vld [vmem:[%s18898_s29 + $0xe0] sm:$0xff]  }
  0x97   : > { %16680 = vmatprep.mubr.bf16.mxu0 %v18482_v45  ;;  %v18548_v45 = vld [vmem:[%s18898_s29 + $0xe8] sm:$0xff]  }
  0x9e   : > { %16681 = vmatmul.mubr.bf16.gmra.mrb[56].mxu0 %v18483_v46  ;;  %v18549_v46 = vld [vmem:[%s18898_s29 + $0xf0] sm:$0xff]  }
  0x9f   : > { %16684 = vmatprep.mubr.bf16.mxu0 %v18485_v47  ;;  %v18550_v47 = vld [vmem:[%s18898_s29 + $0xf8] sm:$0xff]  }
  0xa6   : > { %16685 = vmatmul.mubr.bf16.gmra.mrb[60].mxu0 %v18486_v48  ;;  %v18551_v48 = vld [vmem:[%s18898_s29 + $0x100] sm:$0xff]  }
  0xa7   : > { %16704 = vmatprep.mubr.bf16.mxu0 %v18487_v49  ;;  %v18552_v49 = vld [vmem:[%s18898_s29 + $0x108] sm:$0xff]  }
  0xae   : > { %16705 = vmatmul.mubr.bf16.vlgmr.msra.gmra.mrb[0].mxu0 %v18488_v50  ;;  %v18553_v50 = vld [vmem:[%s18898_s29 + $0x110] sm:$0xff]  }
  0xaf   : > { %16769 = vmatpush3.bf16.msra.mxu0 %v18489_v25  ;;  %16708 = vmatprep.mubr.bf16.mxu0 %v18490_v51  ;;  %v18528_v25 = vld [vmem:[%s18898_s29 + $0x48] sm:$0xff]   ;;  %v18554_v51 = vld [vmem:[%s18898_s29 + $0x118] sm:$0xff]  }
  0xb0   : > { %16770 = vmatprep.subr.bf16.mxu0 %v18494_v52 }
  0xb3   : > { %16771 = vmatpush3.bf16.msra.mxu0 %v18494_v52  ;;  %v18555_v52 = vld [vmem:[%s18898_s29 + $0x120] sm:$0xff]  }
  0xb4   : > { %16772 = vmatprep.subr.bf16.mxu0 %v18499_v53 }
  0xb6   : > { %16709 = vmatmul.mubr.bf16.gmra.mrb[4].mxu0 %v18491_v54  ;;  %v18557_v54 = vld [vmem:[%s18898_s29 + $0x130] sm:$0xff]  }
  0xb7   : > { %16712 = vmatprep.mubr.bf16.mxu0 %v18492_v55  ;;  %16773 = vmatpush3.bf16.msra.mxu0 %v18499_v53  ;;  %v18556_v53 = vld [vmem:[%s18898_s29 + $0x128] sm:$0xff]   ;;  %v18558_v55 = vld [vmem:[%s18898_s29 + $0x138] sm:$0xff]  }
  0xb8   : > { %16774 = vmatprep.subr.bf16.mxu0 %v18504_v56 }
  0xbb   : > { %16775 = vmatpush3.bf16.msra.mxu0 %v18504_v56  ;;  %v18559_v56 = vld [vmem:[%s26522_s2] sm:$0xff]  }
  0xbc   : > { %16776 = vmatprep.subr.bf16.mxu0 %v18509_v57 }
  0xbe   : > { %16713 = vmatmul.mubr.bf16.gmra.mrb[8].mxu0 %v18493_v58  ;;  %v26526_v58 = vmov 0  }
  0xbf   : > { %16716 = vmatprep.mubr.bf16.mxu0 %v18495_v59  ;;  %16777 = vmatpush3.bf16.msra.mxu0 %v18509_v57  ;;  %v18560_v57 = vld [vmem:[%s26522_s2 + $0x180] sm:$0xff]   ;;  %v18561_v59 = vld [vmem:[%s26522_s2 + $0x8] sm:$0xff]  }
  0xc0   : > { %16778 = vmatprep.subr.bf16.mxu0 %v18514_v60  ;;  %5475 = vmatprep.subr.bf16.mxu1 %v26526_v58 }
  0xc1   : > { %5476 = vmatpush1.bf16.msra.mxu1 %v18559_v56  ;;  %5507 = vmatprep.mubr.bf16.mxu1 %v26526_v58 }
  0xc2   : > { %5477 = vmatprep.subr.bf16.mxu1 %v26526_v58 }
  0xc3   : > { %16779 = vmatpush3.bf16.msra.mxu0 %v18514_v60  ;;  %v18562_v60 = vld [vmem:[%s26522_s2 + $0x188] sm:$0xff]  }
  0xc4   : > { %16780 = vmatprep.subr.bf16.mxu0 %v18519_v61 }
  0xc5   : > { %5478 = vmatpush1.bf16.msra.mxu1 %v18561_v59 }
  0xc6   : > { %16717 = vmatmul.mubr.bf16.gmra.mrb[12].mxu0 %v18496_v62  ;;  %5479 = vmatprep.subr.bf16.mxu1 %v26526_v58  ;;  %v18564_v62 = vld [vmem:[%s26522_s2 + $0x190] sm:$0xff]  }
  0xc7   : > { %16720 = vmatprep.mubr.bf16.mxu0 %v18497_v63  ;;  %16781 = vmatpush3.bf16.msra.mxu0 %v18519_v61  ;;  %v18563_v61 = vld [vmem:[%s26522_s2 + $0x10] sm:$0xff]   ;;  %v18565_v63 = vld [vmem:[%s26522_s2 + $0x18] sm:$0xff]  }
  0xc8   : > { %16782 = vmatprep.subr.bf16.mxu0 %v18524_v0 }
  0xc9   : > { %5480 = vmatpush1.bf16.msra.mxu1 %v18563_v61  ;;  %v18590_v61 = vld [vmem:[%s26522_s2 + $0x1f8] sm:$0xff]  }
  0xca   : > { %5481 = vmatprep.subr.bf16.mxu1 %v26526_v58 }
  0xcb   : > { %16783 = vmatpush3.bf16.msra.mxu0 %v18524_v0  ;;  %v18566_v0 = vld [vmem:[%s26522_s2 + $0x198] sm:$0xff]  }
  0xcc   : > { %6342 = vmatprep.subr.bf16.mxu0 %v26526_v58 }
  0xcd   : > { %5482 = vmatpush1.bf16.msra.mxu1 %v18565_v63 }
  0xce   : > { %16721 = vmatmul.mubr.bf16.gmra.mrb[16].mxu0 %v18498_v1  ;;  %5483 = vmatprep.subr.bf16.mxu1 %v26526_v58  ;;  %v18567_v1 = vld [vmem:[%s26522_s2 + $0x20] sm:$0xff]  }
  0xcf   : > { %16724 = vmatprep.mubr.bf16.mxu0 %v18500_v2  ;;  %v18568_v2 = vld [vmem:[%s26522_s2 + $0x1a0] sm:$0xff]  }
  0xd1   : > { %5484 = vmatpush1.bf16.msra.mxu1 %v18567_v1 }
  0xd2   : > { %5485 = vmatprep.subr.bf16.mxu1 %v26526_v58 }
  0xd6   : > { %16725 = vmatmul.mubr.bf16.gmra.mrb[20].mxu0 %v18501_v3  ;;  %v18569_v3 = vld [vmem:[%s26522_s2 + $0x28] sm:$0xff]  }
  0xd7   : > { %16728 = vmatprep.mubr.bf16.mxu0 %v18502_v4  ;;  %v18570_v4 = vld [vmem:[%s26522_s2 + $0x1a8] sm:$0xff]   ;;  %5486 = vmatpush1.bf16.msra.mxu1 %v18569_v3 }
  0xd8   : > { %5487 = vmatprep.subr.bf16.mxu1 %v26526_v58 }
  0xde   : > { %16729 = vmatmul.mubr.bf16.gmra.mrb[24].mxu0 %v18503_v5  ;;  %v18571_v5 = vld [vmem:[%s26522_s2 + $0x30] sm:$0xff]  }
  0xdf   : > { %16732 = vmatprep.mubr.bf16.mxu0 %v18505_v6  ;;  %v18572_v6 = vld [vmem:[%s26522_s2 + $0x1b0] sm:$0xff]   ;;  %5488 = vmatpush1.bf16.msra.mxu1 %v18571_v5 }
  0xe0   : > { %5489 = vmatprep.subr.bf16.mxu1 %v26526_v58 }
  0xe6   : > { %16733 = vmatmul.mubr.bf16.gmra.mrb[28].mxu0 %v18506_v7  ;;  %v18573_v7 = vld [vmem:[%s26522_s2 + $0x38] sm:$0xff]  }
  0xe7   : > { %16736 = vmatprep.mubr.bf16.mxu0 %v18507_v8  ;;  %v18574_v8 = vld [vmem:[%s26522_s2 + $0x1b8] sm:$0xff]   ;;  %5490 = vmatpush1.bf16.msra.mxu1 %v18573_v7 }
  0xe8   : > { %5491 = vmatprep.subr.bf16.mxu1 %v26526_v58 }
  0xee   : > { %16737 = vmatmul.mubr.bf16.gmra.mrb[32].mxu0 %v18508_v9  ;;  %v18575_v9 = vld [vmem:[%s26522_s2 + $0x40] sm:$0xff]  }
  0xef   : > { %16740 = vmatprep.mubr.bf16.mxu0 %v18510_v10  ;;  %v18576_v10 = vld [vmem:[%s26522_s2 + $0x1c0] sm:$0xff]   ;;  %5492 = vmatpush1.bf16.msra.mxu1 %v18575_v9 }
  0xf0   : > { %5493 = vmatprep.subr.bf16.mxu1 %v26526_v58 }
  0xf6   : > { %16741 = vmatmul.mubr.bf16.gmra.mrb[36].mxu0 %v18511_v11  ;;  %v18577_v11 = vld [vmem:[%s26522_s2 + $0x48] sm:$0xff]  }
  0xf7   : > { %16744 = vmatprep.mubr.bf16.mxu0 %v18512_v12  ;;  %v18578_v12 = vld [vmem:[%s26522_s2 + $0x1c8] sm:$0xff]   ;;  %5494 = vmatpush1.bf16.msra.mxu1 %v18577_v11 }
  0xf8   : > { %5495 = vmatprep.subr.bf16.mxu1 %v26526_v58 }
  0xfe   : > { %16745 = vmatmul.mubr.bf16.gmra.mrb[40].mxu0 %v18513_v13  ;;  %v18579_v13 = vld [vmem:[%s26522_s2 + $0x50] sm:$0xff]  }
  0xff   : > { %16748 = vmatprep.mubr.bf16.mxu0 %v18515_v14  ;;  %v18580_v14 = vld [vmem:[%s26522_s2 + $0x1d0] sm:$0xff]   ;;  %5496 = vmatpush1.bf16.msra.mxu1 %v18579_v13 }
 0x100   : > { %5497 = vmatprep.subr.bf16.mxu1 %v26526_v58 }
 0x106   : > { %16749 = vmatmul.mubr.bf16.gmra.mrb[44].mxu0 %v18516_v15  ;;  %v18581_v15 = vld [vmem:[%s26522_s2 + $0x58] sm:$0xff]  }
 0x107   : > { %16752 = vmatprep.mubr.bf16.mxu0 %v18517_v16  ;;  %v18582_v16 = vld [vmem:[%s26522_s2 + $0x1d8] sm:$0xff]   ;;  %5498 = vmatpush1.bf16.msra.mxu1 %v18581_v15 }
 0x108   : > { %5499 = vmatprep.subr.bf16.mxu1 %v26526_v58 }
 0x10e   : > { %16753 = vmatmul.mubr.bf16.gmra.mrb[48].mxu0 %v18518_v17  ;;  %v18583_v17 = vld [vmem:[%s26522_s2 + $0x60] sm:$0xff]  }
 0x10f   : > { %16756 = vmatprep.mubr.bf16.mxu0 %v18520_v18  ;;  %v18584_v18 = vld [vmem:[%s26522_s2 + $0x1e0] sm:$0xff]   ;;  %5500 = vmatpush1.bf16.msra.mxu1 %v18583_v17 }
 0x110   : > { %5501 = vmatprep.subr.bf16.mxu1 %v26526_v58 }
 0x116   : > { %16757 = vmatmul.mubr.bf16.gmra.mrb[52].mxu0 %v18521_v19 }
 0x117   : > { %16760 = vmatprep.mubr.bf16.mxu0 %v18522_v20 }
 0x11e   : > { %16761 = vmatmul.mubr.bf16.gmra.mrb[56].mxu0 %v18523_v21 }
 0x11f   : > { %16764 = vmatprep.mubr.bf16.mxu0 %v18525_v22 }
 0x126   : > { %16765 = vmatmul.mubr.bf16.gmra.mrb[60].mxu0 %v18526_v23 }
 0x127   : > { %16784 = vmatprep.mubr.bf16.mxu0 %v18527_v24 }
 0x12e   : > { %16785 = vmatmul.mubr.bf16.vlgmr.msra.gmra.mrb[0].mxu0 %v18528_v25 }
 0x12f   : > { %16788 = vmatprep.mubr.bf16.mxu0 %v18529_v26  ;;  %6343 = vmatpush1.bf16.msra.mxu0 %v18560_v57 }
 0x130   : > { %6344 = vmatprep.subr.bf16.mxu0 %v26526_v58 }
 0x133   : > { %6345 = vmatpush1.bf16.msra.mxu0 %v18562_v60  ;;  %v18589_v60 = vld [vmem:[%s26522_s2 + $0x78] sm:$0xff]  }
 0x134   : > { %6346 = vmatprep.subr.bf16.mxu0 %v26526_v58 }
 0x136   : > { %16789 = vmatmul.mubr.bf16.gmra.mrb[4].mxu0 %v18530_v27 }
 0x137   : > { %16792 = vmatprep.mubr.bf16.mxu0 %v18531_v28  ;;  %6347 = vmatpush1.bf16.msra.mxu0 %v18564_v62 }
 0x138   : > { %6348 = vmatprep.subr.bf16.mxu0 %v26526_v58 }
 0x13b   : > { %6349 = vmatpush1.bf16.msra.mxu0 %v18566_v0 }
 0x13c   : > { %6350 = vmatprep.subr.bf16.mxu0 %v26526_v58 }
 0x13e   : > { %16793 = vmatmul.mubr.bf16.gmra.mrb[8].mxu0 %v18532_v29 }
 0x13f   : > { %16796 = vmatprep.mubr.bf16.mxu0 %v18533_v30  ;;  %6351 = vmatpush1.bf16.msra.mxu0 %v18568_v2 }
 0x140   : > { %6352 = vmatprep.subr.bf16.mxu0 %v26526_v58 }
 0x143   : > { %6353 = vmatpush1.bf16.msra.mxu0 %v18570_v4 }
 0x144   : > { %6354 = vmatprep.subr.bf16.mxu0 %v26526_v58 }
 0x146   : > { %16797 = vmatmul.mubr.bf16.gmra.mrb[12].mxu0 %v18534_v31 }
 0x147   : > { %16800 = vmatprep.mubr.bf16.mxu0 %v18535_v32  ;;  %6355 = vmatpush1.bf16.msra.mxu0 %v18572_v6 }
 0x148   : > { %6356 = vmatprep.subr.bf16.mxu0 %v26526_v58 }
 0x14b   : > { %6357 = vmatpush1.bf16.msra.mxu0 %v18574_v8 }
 0x14c   : > { %6358 = vmatprep.subr.bf16.mxu0 %v26526_v58 }
 0x14e   : > { %16801 = vmatmul.mubr.bf16.gmra.mrb[16].mxu0 %v18536_v33 }
 0x14f   : > { %16804 = vmatprep.mubr.bf16.mxu0 %v18537_v34  ;;  %6359 = vmatpush1.bf16.msra.mxu0 %v18576_v10 }
 0x150   : > { %6360 = vmatprep.subr.bf16.mxu0 %v26526_v58 }
 0x153   : > { %6361 = vmatpush1.bf16.msra.mxu0 %v18578_v12 }
 0x154   : > { %6362 = vmatprep.subr.bf16.mxu0 %v26526_v58 }
 0x156   : > { %16805 = vmatmul.mubr.bf16.gmra.mrb[20].mxu0 %v18538_v35 }
 0x157   : > { %16808 = vmatprep.mubr.bf16.mxu0 %v18539_v36  ;;  %6363 = vmatpush1.bf16.msra.mxu0 %v18580_v14 }
 0x158   : > { %6364 = vmatprep.subr.bf16.mxu0 %v26526_v58 }
 0x15b   : > { %6365 = vmatpush1.bf16.msra.mxu0 %v18582_v16 }
 0x15c   : > { %6366 = vmatprep.subr.bf16.mxu0 %v26526_v58 }
 0x15e   : > { %16809 = vmatmul.mubr.bf16.gmra.mrb[24].mxu0 %v18540_v37 }
 0x15f   : > { %16812 = vmatprep.mubr.bf16.mxu0 %v18541_v38  ;;  %6367 = vmatpush1.bf16.msra.mxu0 %v18584_v18 }
 0x160   : > { %6368 = vmatprep.subr.bf16.mxu0 %v26526_v58 }
 0x166   : > { %16813 = vmatmul.mubr.bf16.gmra.mrb[28].mxu0 %v18542_v39  ;;  %v18585_v39 = vld [vmem:[%s26522_s2 + $0x68] sm:$0xff]  }
 0x167   : > { %16816 = vmatprep.mubr.bf16.mxu0 %v18543_v40  ;;  %v18586_v40 = vld [vmem:[%s26522_s2 + $0x1e8] sm:$0xff]   ;;  %5502 = vmatpush1.bf16.msra.mxu1 %v18585_v39 }
 0x168   : > { %6369 = vmatpush1.bf16.msra.mxu0 %v18586_v40  ;;  %5503 = vmatprep.subr.bf16.mxu1 %v26526_v58 }
 0x169   : > { %6370 = vmatprep.subr.bf16.mxu0 %v26526_v58 }
 0x16e   : > { %16817 = vmatmul.mubr.bf16.gmra.mrb[32].mxu0 %v18544_v41 }
 0x16f   : > { %16820 = vmatprep.mubr.bf16.mxu0 %v18545_v42 }
 0x176   : > { %16821 = vmatmul.mubr.bf16.gmra.mrb[36].mxu0 %v18546_v43 }
 0x177   : > { %16824 = vmatprep.mubr.bf16.mxu0 %v18547_v44 }
 0x17e   : > { %16825 = vmatmul.mubr.bf16.gmra.mrb[40].mxu0 %v18548_v45 }
 0x17f   : > { %16828 = vmatprep.mubr.bf16.mxu0 %v18549_v46 }
 0x186   : > { %16829 = vmatmul.mubr.bf16.gmra.mrb[44].mxu0 %v18550_v47  ;;  %v18587_v47 = vld [vmem:[%s26522_s2 + $0x70] sm:$0xff]  }
 0x187   : > { %16832 = vmatprep.mubr.bf16.mxu0 %v18551_v48  ;;  %v18588_v48 = vld [vmem:[%s26522_s2 + $0x1f0] sm:$0xff]   ;;  %5504 = vmatpush1.bf16.msra.mxu1 %v18587_v47 }
 0x188   : > { %6371 = vmatpush1.bf16.msra.mxu0 %v18588_v48  ;;  %5505 = vmatprep.subr.bf16.mxu1 %v26526_v58 }
 0x189   : > { %6372 = vmatprep.subr.bf16.mxu0 %v26526_v58 }
 0x18b   : > { %5506 = vmatpush1.bf16.msra.mxu1 %v18589_v60 }
 0x18c   : > { %6373 = vmatpush1.bf16.msra.mxu0 %v18590_v61  ;;  %5764 = vmatprep.subr.bf16.mxu1 %v26526_v58 }
 0x18e   : > { %16833 = vmatmul.mubr.bf16.gmra.mrb[48].mxu0 %v18552_v49  ;;  %5508 = vmatmul.mubr.bf16.vlgmr.msra.gmra.mrb[0].mxu1 %v26526_v58 }
 0x18f   : > { %16836 = vmatprep.mubr.bf16.mxu0 %v18553_v50  ;;  %5515 = vmatprep.mubr.bf16.mxu1 %v26526_v58 }
 0x196   : > { %16837 = vmatmul.mubr.bf16.gmra.mrb[52].mxu0 %v18554_v51  ;;  %5516 = vmatmul.mubr.bf16.gmra.mrb[4].mxu1 %v26526_v58 }
 0x197   : > { %16840 = vmatprep.mubr.bf16.mxu0 %v18555_v52  ;;  %5523 = vmatprep.mubr.bf16.mxu1 %v26526_v58 }
 0x19e   : > { %16841 = vmatmul.mubr.bf16.gmra.mrb[56].mxu0 %v18556_v53  ;;  %5524 = vmatmul.mubr.bf16.gmra.mrb[8].mxu1 %v26526_v58 }
 0x19f   : > { %16844 = vmatprep.mubr.bf16.mxu0 %v18557_v54  ;;  %5531 = vmatprep.mubr.bf16.mxu1 %v26526_v58 }
 0x1a6   : > { %16845 = vmatmul.mubr.bf16.gmra.mrb[60].mxu0 %v18558_v55  ;;  %5532 = vmatmul.mubr.bf16.gmra.mrb[12].mxu1 %v26526_v58 }
 0x1a7   : > { %6374 = vmatprep.mubr.bf16.mxu0 %v26526_v58 }
 0x1ae   : > { %6375 = vmatmul.mubr.bf16.vlgmr.msra.gmra.mrb[64].mxu0 %v26526_v58 }
 0x1af   : > { %6382 = vmatprep.mubr.bf16.mxu0 %v26526_v58 }
 0x1b6   : > { %6383 = vmatmul.mubr.bf16.gmra.mrb[68].mxu0 %v26526_v58 }
 0x1b7   : > { %6390 = vmatprep.mubr.bf16.mxu0 %v26526_v58 }
 0x1be   : > { %6391 = vmatmul.mubr.bf16.gmra.mrb[72].mxu0 %v26526_v58 }
 0x1bf   : > { %6398 = vmatprep.mubr.bf16.mxu0 %v26526_v58 }
 0x1c6   : > { %6399 = vmatmul.mubr.bf16.gmra.mrb[76].mxu0 %v26526_v58 }
 0x201   : > { %v19167_v19 = vpop.f32.mrb[0].mxu0 }
 0x202   : > { %v19169_v20 = vpop.f32.mrb[1].mxu0  ;;  %v2833_v26 = vmul.f32 %v19167_v19, %v19167_v19 }
 0x203   : > { %v19171_v21 = vpop.f32.mrb[2].mxu0  ;;  %v2831_v23 = vmul.f32 %v19169_v20, %v19169_v20 }
 0x204   : > { %v19173_v22 = vpop.f32.mrb[3].mxu0  ;;  %v2834_v29 = vmul.f32 %v19171_v21, %v19171_v21 }
 0x205   : > { %v2761_v24 = vadd.f32 %v19173_v22, %v19169_v20  ;;  %v2832_v25 = vmul.f32 %v19173_v22, %v19173_v22 }
 0x207   : > { %v2762_v27 = vadd.f32 %v19167_v19, %v2761_v24  ;;  %v2895_v28 = vadd.f32 %v2832_v25, %v2831_v23 }
 0x209   : > { %v2896_v30 = vadd.f32 %v2895_v28, %v2833_v26  ;;  %v19186_v31 = vpop.f32.mrb[4].mxu0  ;;  %v2763_v32 = vadd.f32 %v19171_v21, %v2762_v27 }
 0x20a   : > { %27150 = vst [vmem:[#allocation4_spill] sm:$0xff] %v19186_v31  ;;  %v19189_v33 = vpop.f32.mrb[5].mxu0  ;;  %v2837_v44 = vmul.f32 %v19186_v31, %v19186_v31 }
 0x20b   : > { %27151 = vst [vmem:[#allocation5_spill] sm:$0xff] %v19189_v33  ;;  %v2764_v34 = vadd.f32 %v2763_v32, %v19189_v33  ;;  %v2835_v35 = vmul.f32 %v19189_v33, %v19189_v33  ;;  %v2897_v36 = vadd.f32 %v2896_v30, %v2834_v29  ;;  %v19194_v37 = vpop.f32.mrb[6].mxu0 }
 0x20c   : > { %27152 = vst [vmem:[#allocation6_spill] sm:$0xff] %v19194_v37  ;;  %v19196_v38 = vpop.f32.mrb[7].mxu0  ;;  %v2838_v49 = vmul.f32 %v19194_v37, %v19194_v37 }
 0x20d   : > { %27153 = vst [vmem:[#allocation7_spill] sm:$0xff] %v19196_v38  ;;  %v2898_v41 = vadd.f32 %v2897_v36, %v2835_v35  ;;  %v2765_v42 = vadd.f32 %v2764_v34, %v19196_v38  ;;  %v2836_v43 = vmul.f32 %v19196_v38, %v19196_v38 }
 0x20f   : > { %v2766_v45 = vadd.f32 %v19186_v31, %v2765_v42  ;;  %v2899_v46 = vadd.f32 %v2898_v41, %v2836_v43 }
 0x211   : > { %v2900_v50 = vadd.f32 %v2899_v46, %v2837_v44  ;;  %v19220_v51 = vpop.f32.mrb[8].mxu0  ;;  %v2767_v52 = vadd.f32 %v19194_v37, %v2766_v45 }
 0x212   : > { %v19223_v53 = vpop.f32.mrb[9].mxu0  ;;  %v2841_v1 = vmul.f32 %v19220_v51, %v19220_v51 }
 0x213   : > { %27154 = vst [vmem:[#allocation8_spill] sm:$0xff] %v19223_v53  ;;  %v2768_v54 = vadd.f32 %v2767_v52, %v19223_v53  ;;  %v2839_v55 = vmul.f32 %v19223_v53, %v19223_v53  ;;  %v2901_v56 = vadd.f32 %v2900_v50, %v2838_v49  ;;  %v19228_v57 = vpop.f32.mrb[10].mxu0 }
 0x214   : > { %v19232_v59 = vpop.f32.mrb[11].mxu0  ;;  %v2842_v4 = vmul.f32 %v19228_v57, %v19228_v57 }
 0x215   : > { %v2902_v62 = vadd.f32 %v2901_v56, %v2839_v55  ;;  %v2769_v63 = vadd.f32 %v2768_v54, %v19232_v59  ;;  %v2840_v0 = vmul.f32 %v19232_v59, %v19232_v59 }
 0x217   : > { %v2770_v2 = vadd.f32 %v19220_v51, %v2769_v63  ;;  %v2903_v3 = vadd.f32 %v2902_v62, %v2840_v0 }
 0x219   : > { %v2904_v5 = vadd.f32 %v2903_v3, %v2841_v1  ;;  %v19249_v6 = vpop.f32.mrb[12].mxu0  ;;  %v2771_v7 = vadd.f32 %v19228_v57, %v2770_v2 }
 0x21a   : > { %v19254_v8 = vpop.f32.mrb[13].mxu0  ;;  %v2845_v17 = vmul.f32 %v19249_v6, %v19249_v6 }
 0x21b   : > { %v2772_v9 = vadd.f32 %v2771_v7, %v19254_v8  ;;  %v2843_v10 = vmul.f32 %v19254_v8, %v19254_v8  ;;  %v2905_v11 = vadd.f32 %v2904_v5, %v2842_v4  ;;  %v19261_v12 = vpop.f32.mrb[14].mxu0 }
 0x21c   : > { %27155 = vst [vmem:[#allocation9_spill] sm:$0xff] %v19261_v12  ;;  %v19263_v13 = vpop.f32.mrb[15].mxu0  ;;  %v2846_v24 = vmul.f32 %v19261_v12, %v19261_v12 }
 0x21d   : > { %v2906_v14 = vadd.f32 %v2905_v11, %v2843_v10  ;;  %v2773_v15 = vadd.f32 %v2772_v9, %v19263_v13  ;;  %v2844_v16 = vmul.f32 %v19263_v13, %v19263_v13 }
 0x21f   : > { %v2774_v18 = vadd.f32 %v19249_v6, %v2773_v15  ;;  %v2907_v23 = vadd.f32 %v2906_v14, %v2844_v16  ;;  %v18591_v14 = vld [vmem:[%s26522_s2 + $0x80] sm:$0xff]  }
 0x220   : > { %5765 = vmatpush1.bf16.msra.mxu1 %v18591_v14 }
 0x221   : > { %v2908_v25 = vadd.f32 %v2907_v23, %v2845_v17  ;;  %v19273_v26 = vpop.f32.mrb[16].mxu0  ;;  %v2775_v27 = vadd.f32 %v19261_v12, %v2774_v18  ;;  %v18592_v23 = vld [vmem:[%s26522_s2 + $0x88] sm:$0xff]   ;;  %5766 = vmatprep.subr.bf16.mxu1 %v26526_v58 }
 0x222   : > { %v19278_v28 = vpop.f32.mrb[17].mxu0  ;;  %v2849_v41 = vmul.f32 %v19273_v26, %v19273_v26 }
 0x223   : > { %27156 = vst [vmem:[#allocation10_spill] sm:$0xff] %v19278_v28  ;;  %v2776_v29 = vadd.f32 %v2775_v27, %v19278_v28  ;;  %v2847_v30 = vmul.f32 %v19278_v28, %v19278_v28  ;;  %v2909_v32 = vadd.f32 %v2908_v25, %v2846_v24  ;;  %v19285_v34 = vpop.f32.mrb[18].mxu0 }
 0x224   : > { %v19287_v35 = vpop.f32.mrb[19].mxu0  ;;  %v2850_v44 = vmul.f32 %v19285_v34, %v19285_v34  ;;  %5767 = vmatpush1.bf16.msra.mxu1 %v18592_v23 }
 0x225   : > { %v2910_v36 = vadd.f32 %v2909_v32, %v2847_v30  ;;  %v2777_v39 = vadd.f32 %v2776_v29, %v19287_v35  ;;  %v2848_v40 = vmul.f32 %v19287_v35, %v19287_v35  ;;  %5768 = vmatprep.subr.bf16.mxu1 %v26526_v58 }
 0x227   : > { %v2778_v42 = vadd.f32 %v19273_v26, %v2777_v39  ;;  %v2911_v43 = vadd.f32 %v2910_v36, %v2848_v40 }
 0x229   : > { %v2912_v45 = vadd.f32 %v2911_v43, %v2849_v41  ;;  %v19297_v46 = vpop.f32.mrb[20].mxu0  ;;  %v2779_v47 = vadd.f32 %v19285_v34, %v2778_v42 }
 0x22a   : > { %v19302_v48 = vpop.f32.mrb[21].mxu0  ;;  %v2853_v62 = vmul.f32 %v19297_v46, %v19297_v46 }
 0x22b   : > { %v2780_v49 = vadd.f32 %v2779_v47, %v19302_v48  ;;  %v2851_v50 = vmul.f32 %v19302_v48, %v19302_v48  ;;  %v2913_v52 = vadd.f32 %v2912_v45, %v2850_v44  ;;  %v19309_v54 = vpop.f32.mrb[22].mxu0 }
 0x22c   : > { %27157 = vst [vmem:[#allocation11_spill] sm:$0xff] %v19309_v54  ;;  %v19311_v55 = vpop.f32.mrb[23].mxu0  ;;  %v2854_v1 = vmul.f32 %v19309_v54, %v19309_v54 }
 0x22d   : > { %v2914_v56 = vadd.f32 %v2913_v52, %v2851_v50  ;;  %v2781_v60 = vadd.f32 %v2780_v49, %v19311_v55  ;;  %v2852_v61 = vmul.f32 %v19311_v55, %v19311_v55  ;;  %v18593_v50 = vld [vmem:[%s26522_s2 + $0x90] sm:$0xff]  }
 0x22e   : > { %5769 = vmatpush1.bf16.msra.mxu1 %v18593_v50 }
 0x22f   : > { %v2782_v63 = vadd.f32 %v19297_v46, %v2781_v60  ;;  %v2915_v0 = vadd.f32 %v2914_v56, %v2852_v61  ;;  %5770 = vmatprep.subr.bf16.mxu1 %v26526_v58 }
 0x231   : > { %v2916_v2 = vadd.f32 %v2915_v0, %v2853_v62  ;;  %v19321_v3 = vpop.f32.mrb[24].mxu0  ;;  %v2783_v4 = vadd.f32 %v19309_v54, %v2782_v63 }
 0x232   : > { %v19326_v5 = vpop.f32.mrb[25].mxu0  ;;  %v2857_v24 = vmul.f32 %v19321_v3, %v19321_v3 }
 0x233   : > { %27158 = vst [vmem:[#allocation12_spill] sm:$0xff] %v19326_v5  ;;  %v2784_v7 = vadd.f32 %v2783_v4, %v19326_v5  ;;  %v2855_v9 = vmul.f32 %v19326_v5, %v19326_v5  ;;  %v2917_v10 = vadd.f32 %v2916_v2, %v2854_v1  ;;  %v19331_v11 = vpop.f32.mrb[26].mxu0 }
 0x234   : > { %v19336_v15 = vpop.f32.mrb[27].mxu0  ;;  %v2858_v29 = vmul.f32 %v19331_v11, %v19331_v11 }
 0x235   : > { %v2918_v16 = vadd.f32 %v2917_v10, %v2855_v9  ;;  %v2785_v17 = vadd.f32 %v2784_v7, %v19336_v15  ;;  %v2856_v18 = vmul.f32 %v19336_v15, %v19336_v15 }
 0x237   : > { %v2786_v25 = vadd.f32 %v19321_v3, %v2785_v17  ;;  %v2919_v27 = vadd.f32 %v2918_v16, %v2856_v18 }
 0x239   : > { %v2920_v30 = vadd.f32 %v2919_v27, %v2857_v24  ;;  %v19350_v32 = vpop.f32.mrb[28].mxu0  ;;  %v2787_v36 = vadd.f32 %v19331_v11, %v2786_v25 }
 0x23a   : > { %v19353_v39 = vpop.f32.mrb[29].mxu0  ;;  %v2861_v52 = vmul.f32 %v19350_v32, %v19350_v32 }
 0x23b   : > { %v2788_v40 = vadd.f32 %v2787_v36, %v19353_v39  ;;  %v2859_v41 = vmul.f32 %v19353_v39, %v19353_v39  ;;  %v2921_v42 = vadd.f32 %v2920_v30, %v2858_v29  ;;  %v19359_v43 = vpop.f32.mrb[30].mxu0 }
 0x23c   : > { %27159 = vst [vmem:[#allocation13_spill] sm:$0xff] %v19359_v43  ;;  %v19361_v44 = vpop.f32.mrb[31].mxu0  ;;  %v2862_v61 = vmul.f32 %v19359_v43, %v19359_v43 }
 0x23d   : > { %v2922_v45 = vadd.f32 %v2921_v42, %v2859_v41  ;;  %v2789_v47 = vadd.f32 %v2788_v40, %v19361_v44  ;;  %v2860_v49 = vmul.f32 %v19361_v44, %v19361_v44 }
 0x23f   : > { %v2790_v56 = vadd.f32 %v19350_v32, %v2789_v47  ;;  %v2923_v60 = vadd.f32 %v2922_v45, %v2860_v49 }
 0x241   : > { %v2924_v62 = vadd.f32 %v2923_v60, %v2861_v52  ;;  %v19375_v63 = vpop.f32.mrb[32].mxu0  ;;  %v2791_v0 = vadd.f32 %v19359_v43, %v2790_v56  ;;  %v18594_v56 = vld [vmem:[%s26522_s2 + $0x98] sm:$0xff]  }
 0x242   : > { %v19378_v1 = vpop.f32.mrb[33].mxu0  ;;  %v2865_v18 = vmul.f32 %v19375_v63, %v19375_v63  ;;  %5771 = vmatpush1.bf16.msra.mxu1 %v18594_v56 }
 0x243   : > { %27160 = vst [vmem:[#allocation14_spill] sm:$0xff] %v19378_v1  ;;  %v2792_v2 = vadd.f32 %v2791_v0, %v19378_v1  ;;  %v2863_v4 = vmul.f32 %v19378_v1, %v19378_v1  ;;  %v2925_v7 = vadd.f32 %v2924_v62, %v2862_v61  ;;  %v19383_v9 = vpop.f32.mrb[34].mxu0  ;;  %5772 = vmatprep.subr.bf16.mxu1 %v26526_v58 }
 0x244   : > { %v19385_v10 = vpop.f32.mrb[35].mxu0  ;;  %v2866_v25 = vmul.f32 %v19383_v9, %v19383_v9 }
 0x245   : > { %v2926_v14 = vadd.f32 %v2925_v7, %v2863_v4  ;;  %v2793_v16 = vadd.f32 %v2792_v2, %v19385_v10  ;;  %v2864_v17 = vmul.f32 %v19385_v10, %v19385_v10 }
 0x247   : > { %v2794_v23 = vadd.f32 %v19375_v63, %v2793_v16  ;;  %v2927_v24 = vadd.f32 %v2926_v14, %v2864_v17 }
 0x249   : > { %v2928_v27 = vadd.f32 %v2927_v24, %v2865_v18  ;;  %v19395_v29 = vpop.f32.mrb[36].mxu0  ;;  %v2795_v30 = vadd.f32 %v19383_v9, %v2794_v23 }
 0x24a   : > { %v19398_v36 = vpop.f32.mrb[37].mxu0  ;;  %v2869_v60 = vmul.f32 %v19395_v29, %v19395_v29 }
 0x24b   : > { %v2796_v40 = vadd.f32 %v2795_v30, %v19398_v36  ;;  %v2867_v41 = vmul.f32 %v19398_v36, %v19398_v36  ;;  %v2929_v42 = vadd.f32 %v2928_v27, %v2866_v25  ;;  %v19403_v45 = vpop.f32.mrb[38].mxu0 }
 0x24c   : > { %27161 = vst [vmem:[#allocation15_spill] sm:$0xff] %v19403_v45  ;;  %v19405_v47 = vpop.f32.mrb[39].mxu0  ;;  %v2870_v0 = vmul.f32 %v19403_v45, %v19403_v45 }
 0x24d   : > { %v2930_v49 = vadd.f32 %v2929_v42, %v2867_v41  ;;  %v2797_v50 = vadd.f32 %v2796_v40, %v19405_v47  ;;  %v2868_v52 = vmul.f32 %v19405_v47, %v19405_v47 }
 0x24f   : > { %v2798_v61 = vadd.f32 %v19395_v29, %v2797_v50  ;;  %v2931_v62 = vadd.f32 %v2930_v49, %v2868_v52 }
 0x251   : > { %v2932_v2 = vadd.f32 %v2931_v62, %v2869_v60  ;;  %v19419_v4 = vpop.f32.mrb[40].mxu0  ;;  %v2799_v7 = vadd.f32 %v19403_v45, %v2798_v61 }
 0x252   : > { %v19422_v14 = vpop.f32.mrb[41].mxu0  ;;  %v2873_v40 = vmul.f32 %v19419_v4, %v19419_v4 }
 0x253   : > { %27162 = vst [vmem:[#allocation16_spill] sm:$0xff] %v19422_v14  ;;  %v2800_v16 = vadd.f32 %v2799_v7, %v19422_v14  ;;  %v2871_v17 = vmul.f32 %v19422_v14, %v19422_v14  ;;  %v2933_v18 = vadd.f32 %v2932_v2, %v2870_v0  ;;  %v19427_v23 = vpop.f32.mrb[42].mxu0 }
 0x254   : > { %v19429_v24 = vpop.f32.mrb[43].mxu0  ;;  %v2874_v49 = vmul.f32 %v19427_v23, %v19427_v23 }
 0x255   : > { %v2934_v25 = vadd.f32 %v2933_v18, %v2871_v17  ;;  %v2801_v27 = vadd.f32 %v2800_v16, %v19429_v24  ;;  %v2872_v30 = vmul.f32 %v19429_v24, %v19429_v24 }
 0x257   : > { %v2802_v41 = vadd.f32 %v19419_v4, %v2801_v27  ;;  %v2935_v42 = vadd.f32 %v2934_v25, %v2872_v30  ;;  %v18595_v25 = vld [vmem:[%s26522_s2 + $0xa0] sm:$0xff]  }
 0x258   : > { %5773 = vmatpush1.bf16.msra.mxu1 %v18595_v25 }
 0x259   : > { %v2936_v50 = vadd.f32 %v2935_v42, %v2873_v40  ;;  %v19439_v52 = vpop.f32.mrb[44].mxu0  ;;  %v2803_v56 = vadd.f32 %v19427_v23, %v2802_v41  ;;  %5774 = vmatprep.subr.bf16.mxu1 %v26526_v58 }
 0x25a   : > { %v19442_v60 = vpop.f32.mrb[45].mxu0  ;;  %v2877_v27 = vmul.f32 %v19439_v52, %v19439_v52 }
 0x25b   : > { %v2804_v61 = vadd.f32 %v2803_v56, %v19442_v60  ;;  %v2875_v62 = vmul.f32 %v19442_v60, %v19442_v60  ;;  %v2937_v0 = vadd.f32 %v2936_v50, %v2874_v49  ;;  %v19447_v2 = vpop.f32.mrb[46].mxu0 }
 0x25c   : > { %27163 = vst [vmem:[#allocation17_spill] sm:$0xff] %v19447_v2  ;;  %v19449_v7 = vpop.f32.mrb[47].mxu0  ;;  %v2878_v41 = vmul.f32 %v19447_v2, %v19447_v2 }
 0x25d   : > { %v2938_v16 = vadd.f32 %v2937_v0, %v2875_v62  ;;  %v2805_v17 = vadd.f32 %v2804_v61, %v19449_v7  ;;  %v2876_v18 = vmul.f32 %v19449_v7, %v19449_v7 }
 0x25f   : > { %v2806_v30 = vadd.f32 %v19439_v52, %v2805_v17  ;;  %v2939_v40 = vadd.f32 %v2938_v16, %v2876_v18 }
 0x261   : > { %v2940_v42 = vadd.f32 %v2939_v40, %v2877_v27  ;;  %v19463_v49 = vpop.f32.mrb[48].mxu0  ;;  %v2807_v50 = vadd.f32 %v19447_v2, %v2806_v30 }
 0x262   : > { %v19466_v56 = vpop.f32.mrb[49].mxu0  ;;  %v2881_v30 = vmul.f32 %v19463_v49, %v19463_v49 }
 0x263   : > { %27164 = vst [vmem:[#allocation18_spill] sm:$0xff] %v19466_v56  ;;  %v2808_v61 = vadd.f32 %v2807_v50, %v19466_v56  ;;  %v2879_v62 = vmul.f32 %v19466_v56, %v19466_v56  ;;  %v2941_v0 = vadd.f32 %v2940_v42, %v2878_v41  ;;  %v19471_v16 = vpop.f32.mrb[50].mxu0 }
 0x264   : > { %v19473_v17 = vpop.f32.mrb[51].mxu0  ;;  %v2882_v58 = vmul.f32 %v19471_v16, %v19471_v16 }
 0x265   : > { %v2942_v18 = vadd.f32 %v2941_v0, %v2879_v62  ;;  %v2809_v25 = vadd.f32 %v2808_v61, %v19473_v17  ;;  %v2880_v27 = vmul.f32 %v19473_v17, %v19473_v17 }
 0x267   : > { %v2810_v40 = vadd.f32 %v19463_v49, %v2809_v25  ;;  %v2943_v50 = vadd.f32 %v2942_v18, %v2880_v27 }
 0x269   : > { %v2944_v41 = vadd.f32 %v2943_v50, %v2881_v30  ;;  %v19483_v42 = vpop.f32.mrb[52].mxu0  ;;  %v2811_v56 = vadd.f32 %v19471_v16, %v2810_v40  ;;  %v18596_v40 = vld [vmem:[%s26522_s2 + $0xa8] sm:$0xff]  }
 0x26a   : > { %v19486_v62 = vpop.f32.mrb[53].mxu0  ;;  %5775 = vmatpush1.bf16.msra.mxu1 %v18596_v40 }
 0x26b   : > { %v2812_v61 = vadd.f32 %v2811_v56, %v19486_v62  ;;  %v2883_v0 = vmul.f32 %v19486_v62, %v19486_v62  ;;  %v2945_v14 = vadd.f32 %v2944_v41, %v2882_v58  ;;  %v19491_v45 = vpop.f32.mrb[54].mxu0  ;;  %v2885_v56 = vmul.f32 %v19483_v42, %v19483_v42 }
 0x26c   : > { %27165 = vst [vmem:[#allocation19_spill] sm:$0xff] %v19491_v45  ;;  %v19493_v25 = vpop.f32.mrb[55].mxu0  ;;  %v27166_v41 = vmov 0  }
 0x26d   : > { %v2946_v18 = vadd.f32 %v2945_v14, %v2883_v0  ;;  %v2813_v27 = vadd.f32 %v2812_v61, %v19493_v25  ;;  %v2884_v30 = vmul.f32 %v19493_v25, %v19493_v25  ;;  %5776 = vmatprep.subr.bf16.mxu1 %v27166_v41  ;;  %v2886_v14 = vmul.f32 %v19491_v45, %v19491_v45 }
 0x26f   : > { %v2814_v50 = vadd.f32 %v19483_v42, %v2813_v27  ;;  %v2947_v58 = vadd.f32 %v2946_v18, %v2884_v30 }
 0x271   : > { %v2948_v61 = vadd.f32 %v2947_v58, %v2885_v56  ;;  %v19507_v0 = vpop.f32.mrb[56].mxu0  ;;  %v2815_v1 = vadd.f32 %v19491_v45, %v2814_v50 }
 0x272   : > { %27167 = vst [vmem:[#allocation20_spill] sm:$0xff] %v19507_v0  ;;  %v19510_v43 = vpop.f32.mrb[57].mxu0  ;;  %v2889_v50 = vmul.f32 %v19507_v0, %v19507_v0 }
 0x273   : > { %27168 = vst [vmem:[#allocation21_spill] sm:$0xff] %v19510_v43  ;;  %v2816_v5 = vadd.f32 %v2815_v1, %v19510_v43  ;;  %v2887_v54 = vmul.f32 %v19510_v43, %v19510_v43  ;;  %v2949_v27 = vadd.f32 %v2948_v61, %v2886_v14  ;;  %v19515_v18 = vpop.f32.mrb[58].mxu0 }
 0x274   : > { %27169 = vst [vmem:[#allocation22_spill] sm:$0xff] %v19515_v18  ;;  %v19517_v30 = vpop.f32.mrb[59].mxu0  ;;  %v2890_v43 = vmul.f32 %v19515_v18, %v19515_v18 }
 0x275   : > { %27170 = vst [vmem:[#allocation23_spill] sm:$0xff] %v19517_v30  ;;  %v2950_v40 = vadd.f32 %v2949_v27, %v2887_v54  ;;  %v2817_v28 = vadd.f32 %v2816_v5, %v19517_v30  ;;  %v2888_v56 = vmul.f32 %v19517_v30, %v19517_v30 }
 0x277   : > { %v2818_v58 = vadd.f32 %v19507_v0, %v2817_v28  ;;  %v2951_v1 = vadd.f32 %v2950_v40, %v2888_v56 }
 0x279   : > { %v2952_v14 = vadd.f32 %v2951_v1, %v2889_v50  ;;  %v19527_v61 = vpop.f32.mrb[60].mxu0  ;;  %v2819_v12 = vadd.f32 %v19515_v18, %v2818_v58  ;;  %v18597_v58 = vld [vmem:[%s26522_s2 + $0xb0] sm:$0xff]  }
 0x27a   : > { %27171 = vst [vmem:[#allocation24_spill] sm:$0xff] %v19527_v61  ;;  %v19530_v54 = vpop.f32.mrb[61].mxu0  ;;  %5777 = vmatpush1.bf16.msra.mxu1 %v18597_v58 }
 0x27b   : > { %27172 = vst [vmem:[#allocation25_spill] sm:$0xff] %v19530_v54  ;;  %v2820_v5 = vadd.f32 %v2819_v12, %v19530_v54  ;;  %v2891_v27 = vmul.f32 %v19530_v54, %v19530_v54  ;;  %v2953_v30 = vadd.f32 %v2952_v14, %v2890_v43  ;;  %v19535_v53 = vpop.f32.mrb[62].mxu0  ;;  %v2893_v12 = vmul.f32 %v19527_v61, %v19527_v61 }
 0x27c   : > { %27173 = vst [vmem:[#allocation26_spill] sm:$0xff] %v19535_v53  ;;  %v19537_v28 = vpop.f32.mrb[63].mxu0  ;;  %5778 = vmatprep.subr.bf16.mxu1 %v27166_v41 }
 0x27d   : > { %27174 = vst [vmem:[#allocation27_spill] sm:$0xff] %v19537_v28  ;;  %v2954_v40 = vadd.f32 %v2953_v30, %v2891_v27  ;;  %v2821_v56 = vadd.f32 %v2820_v5, %v19537_v28  ;;  %v2892_v50 = vmul.f32 %v19537_v28, %v19537_v28  ;;  %v2894_v30 = vmul.f32 %v19535_v53, %v19535_v53 }
 0x27f   : > { %v2822_v1 = vadd.f32 %v19527_v61, %v2821_v56  ;;  %v2955_v43 = vadd.f32 %v2954_v40, %v2892_v50  ;;  %v18598_v40 = vld [vmem:[%s26522_s2 + $0xb8] sm:$0xff]  }
 0x280   : > { %5779 = vmatpush1.bf16.msra.mxu1 %v18598_v40  ;;  %v27183_v40 = vld [vmem:[#allocation11_spill] sm:$0xff] }
 0x281   : > { %v2823_v14 = vadd.f32 %v19535_v53, %v2822_v1  ;;  %v2956_v5 = vadd.f32 %v2955_v43, %v2893_v12  ;;  %5780 = vmatprep.subr.bf16.mxu1 %v27166_v41  ;;  %v27186_v53 = vld [vmem:[#allocation14_spill] sm:$0xff] }
 0x283   : > { %v2824_v27 = vrot.slane %v2823_v14, 4  ;;  %v2957_v28 = vadd.f32 %v2956_v5, %v2894_v30 }
 0x285   : > { %v2825_v54 = vadd.f32 %v2824_v27, %v2823_v14  ;;  %v2958_v18 = vrot.slane %v2957_v28, 4 }
 0x287   : > { %v2826_v0 = vrot.slane %v2825_v54, 2  ;;  %v2959_v37 = vadd.f32 %v2958_v18, %v2957_v28 }
 0x289   : > { %v2827_v31 = vadd.f32 %v2826_v0, %v2825_v54  ;;  %v2960_v38 = vrot.slane %v2959_v37, 2 }
 0x28b   : > { %v2828_v33 = vrot.slane %v2827_v31, 1  ;;  %v2961_v56 = vadd.f32 %v2960_v38, %v2959_v37  ;;  %v18599_v37 = vld [vmem:[%s26522_s2 + $0xc0] sm:$0xff]  }
 0x28c   : > { %5781 = vmatpush1.bf16.msra.mxu1 %v18599_v37  ;;  %v27176_v37 = vld [vmem:[#allocation5_spill] sm:$0xff] }
 0x28d   : > { %v2829_v50 = vadd.f32 %v2828_v33, %v2827_v31  ;;  %v2962_v58 = vrot.slane %v2961_v56, 1  ;;  %5782 = vmatprep.subr.bf16.mxu1 %v27166_v41  ;;  %v26567_v31 = vmov 0.0  }
 0x28e   : > { %v19565_v33 = vrot.slane %v26567_v31, 7  ;;  %v27178_v31 = vld [vmem:[#allocation4_spill] sm:$0xff] }
 0x28f   : > { %v19556_v12 = vmul.f32 0.001953125, %v2829_v50  ;;  %v2963_v1 = vadd.f32 %v2962_v58, %v2961_v56  ;;  %v27182_v50 = vld [vmem:[#allocation10_spill] sm:$0xff] }
 0x290   : > { %27175 = vst [vmem:[#allocation28_spill] sm:$0xff] %v19565_v33 }
 0x291   : > { %v2964_v43 = vmul.f32 0.001953125, %v2963_v1  ;;  %v2965_v18 = vmul.f32 %v19556_v12, %v19556_v12  ;;  %v2967_v1 = vsub.f32 %v19169_v20, %v19556_v12  ;;  %v2971_v58 = vsub.f32 %v27176_v37, %v19556_v12  ;;  %v27179_v20 = vld [vmem:[#allocation6_spill] sm:$0xff] }
 0x292   : > { %v27193_v2 = vsub.f32 %v19232_v59, %v19556_v12  ;;  %v27197_v54 = vsub.f32 %v19220_v51, %v19556_v12  ;;  %v27198_v59 = vsub.f32 %v19228_v57, %v19556_v12  ;;  %v27199_v5 = vsub.f32 %v19254_v8, %v19556_v12 }
 0x293   : > { %v2966_v0 = vsub.f32 %v2964_v43, %v2965_v18  ;;  %v2968_v43 = vsub.f32 %v19173_v22, %v19556_v12  ;;  %v2969_v18 = vsub.f32 %v19167_v19, %v19556_v12  ;;  %v27180_v22 = vld [vmem:[#allocation8_spill] sm:$0xff]  ;;  %v18600_v19 = vld [vmem:[%s26522_s2 + $0xc8] sm:$0xff]   ;;  %v27200_v28 = vsub.f32 %v19263_v13, %v19556_v12 }
 0x294   : > { %5783 = vmatpush1.bf16.msra.mxu1 %v18600_v19  ;;  %v27221_v37 = vsub.f32 %v19350_v32, %v19556_v12 }
 0x295   : > { %v3031_v38 = vadd.f32 1e-05, %v2966_v0  ;;  %v2970_v0 = vsub.f32 %v19171_v21, %v19556_v12  ;;  %5784 = vmatprep.subr.bf16.mxu1 %v27166_v41 }
 0x297   : > { %18815 = vrsqrt.f32 %v3031_v38  ;;  %v27177_v38 = vld [vmem:[#allocation7_spill] sm:$0xff] }
 0x2a1   : > { %v19664_v21 = vpop.eup %18815 }
 0x2a2   : > { %v19695_v45 = vmul.f32 %v19664_v21, %v27193_v2  ;;  %v19707_v61 = vmul.f32 %v19664_v21, %v27197_v54  ;;  %v19713_v2 = vmul.f32 %v19664_v21, %v27198_v59  ;;  %v19719_v30 = vmul.f32 %v19664_v21, %v27199_v5 }
 0x2a3   : > { %v19725_v51 = vmul.f32 %v19664_v21, %v27200_v28  ;;  %v27201_v54 = vsub.f32 %v19249_v6, %v19556_v12  ;;  %v27202_v59 = vsub.f32 %v19287_v35, %v19556_v12  ;;  %v27203_v5 = vsub.f32 %v19273_v26, %v19556_v12 }
 0x2a4   : > { %v27204_v28 = vsub.f32 %v19285_v34, %v19556_v12  ;;  %v3034_v19 = vmul.f32 %v19664_v21, %v2968_v43  ;;  %v3035_v35 = vmul.f32 %v19664_v21, %v2969_v18  ;;  %v27205_v26 = vsub.f32 %v19302_v48, %v19556_v12 }
 0x2a5   : > { %v19731_v57 = vmul.f32 %v19664_v21, %v27201_v54  ;;  %v19737_v8 = vmul.f32 %v19664_v21, %v27202_v59  ;;  %v19743_v13 = vmul.f32 %v19664_v21, %v27203_v5  ;;  %v3033_v54 = vmul.f32 %v19664_v21, %v2967_v1 }
 0x2a6   : > { %v19749_v6 = vmul.f32 %v19664_v21, %v27204_v28  ;;  %v3036_v59 = vmul.f32 %v19664_v21, %v2970_v0  ;;  %v19759_v5 = vmul.f32 %v19664_v21, %v27205_v26  ;;  %v27206_v34 = vsub.f32 %v19311_v55, %v19556_v12 }
 0x2a7   : > { %v27207_v1 = vsub.f32 %v19297_v46, %v19556_v12  ;;  %v3037_v18 = vmul.f32 %v19664_v21, %v2971_v58  ;;  %v27208_v48 = vsub.f32 %v19336_v15, %v19556_v12  ;;  %v19780_v26 = vmax.f32 %v3033_v54, 0.0 }
 0x2a8   : > { %v19765_v28 = vmul.f32 %v19664_v21, %v27206_v34  ;;  %v19782_v55 = vmax.f32 %v3034_v19, 0.0  ;;  %v19784_v34 = vmax.f32 %v3035_v35, 0.0  ;;  %v27212_v46 = vsub.f32 %v19321_v3, %v19556_v12 }
 0x2a9   : > { %v19771_v43 = vmul.f32 %v19664_v21, %v27207_v1  ;;  %v19778_v0 = vmul.f32 %v19664_v21, %v27208_v48  ;;  %27209 = vst [vmem:[#allocation5_spill] sm:$0xff] %v19780_v26  ;;  %v27213_v15 = vsub.f32 %v19331_v11, %v19556_v12  ;;  %v19799_v54 = vmax.f32 %v3036_v59, 0.0 }
 0x2aa   : > { %27210 = vst [vmem:[#allocation7_spill] sm:$0xff] %v19782_v55  ;;  %27211 = vst [vmem:[#allocation4_spill] sm:$0xff] %v19784_v34  ;;  %v19791_v1 = vmul.f32 %v19664_v21, %v27212_v46  ;;  %v19801_v19 = vmax.f32 %v3037_v18, 0.0  ;;  %v27216_v35 = vmov 0.0   ;;  %v19809_v3 = vpack.c.bf16 %v19784_v34, %v19782_v55 }
 0x2ab   : > { %v19797_v58 = vmul.f32 %v19664_v21, %v27213_v15  ;;  %27214 = vst [vmem:[#allocation6_spill] sm:$0xff] %v19799_v54  ;;  %v19805_v48 = vpack.c.bf16 %v19780_v26, %v27216_v35  ;;  %v26574_v46 = vrot.slane %v19780_v26, 7  ;;  %v27219_v11 = vsub.f32 %v19353_v39, %v19556_v12 }
 0x2ac   : > { %27215 = vst [vmem:[#allocation8_spill] sm:$0xff] %v19801_v19  ;;  %27218 = vst [vmem:[#allocation11_spill] sm:$0xff] %v19809_v3  ;;  %v27220_v18 = vsub.f32 %v19361_v44, %v19556_v12  ;;  %v3063_v27 = vmul.f32 %v19664_v21, %v27221_v37  ;;  %v27224_v39 = vsub.f32 %v19385_v10, %v19556_v12  ;;  %6406 = vmatprep.mubr.bf16.mxu0 %v19809_v3 }
 0x2ad   : > { %27217 = vst [vmem:[#allocation10_spill] sm:$0xff] %v19805_v48  ;;  %v3061_v59 = vmul.f32 %v19664_v21, %v27219_v11  ;;  %v27225_v44 = vsub.f32 %v19375_v63, %v19556_v12  ;;  %5539 = vmatprep.mubr.bf16.mxu1 %v19805_v48  ;;  %v19843_v32 = vpack.c.bf16 %v26574_v46, %v19565_v33  ;;  %v27230_v48 = vrot.slane %v19782_v55, 7 }
 0x2ae   : > { %v3062_v15 = vmul.f32 %v19664_v21, %v27220_v18  ;;  %v3066_v11 = vmul.f32 %v19664_v21, %v27224_v39  ;;  %v27227_v37 = vsub.f32 %v19383_v9, %v19556_v12  ;;  %v27228_v39 = vsub.f32 %v19398_v36, %v19556_v12 }
 0x2af   : > { %v3067_v18 = vmul.f32 %v19664_v21, %v27225_v44  ;;  %27226 = vst [vmem:[#allocation14_spill] sm:$0xff] %v19843_v32  ;;  %v27229_v44 = vsub.f32 %v19405_v47, %v19556_v12  ;;  %v27231_v46 = vrot.slane %v19784_v34, 7  ;;  %v27233_v9 = vsub.f32 %v19395_v29, %v19556_v12  ;;  %14220 = vmatmul.mubr.msk.bf16.gmra.mrb[16].mxu1 %vm19825_vm2, %v19843_v32 }
 0x2b0   : > { %v3068_v10 = vmul.f32 %v19664_v21, %v27227_v37  ;;  %v3069_v63 = vmul.f32 %v19664_v21, %v27228_v39  ;;  %v19872_v36 = vpack.c.bf16 %v19801_v19, %v19799_v54  ;;  %v27235_v47 = vsub.f32 %v27177_v38, %v19556_v12  ;;  %5547 = vmatprep.mubr.bf16.mxu1 %v19809_v3 }
 0x2b1   : > { %v3070_v14 = vmul.f32 %v19664_v21, %v27229_v44  ;;  %v19861_v26 = vpack.c.bf16 %v27231_v46, %v27230_v48  ;;  %v3071_v37 = vmul.f32 %v19664_v21, %v27233_v9  ;;  %v27236_v48 = vsub.f32 %v27178_v31, %v19556_v12 }
 0x2b2   : > { %27234 = vst [vmem:[#allocation30_spill] sm:$0xff] %v19872_v36  ;;  %v3038_v39 = vmul.f32 %v19664_v21, %v27235_v47  ;;  %v27237_v46 = vsub.f32 %v19429_v24, %v19556_v12  ;;  %v27238_v9 = vsub.f32 %v19419_v4, %v19556_v12  ;;  %v27239_v38 = vsub.f32 %v19427_v23, %v19556_v12  ;;  %v18601_v24 = vld [vmem:[%s26522_s2 + $0xd0] sm:$0xff]  }
 0x2b3   : > { %27232 = vst [vmem:[#allocation29_spill] sm:$0xff] %v19861_v26  ;;  %v3039_v29 = vmul.f32 %v19664_v21, %v27236_v48  ;;  %14668 = vmatmul.mubr.msk.bf16.gmra.mrb[80].mxu0 %vm19825_vm2, %v19861_v26  ;;  %v19902_v31 = vrot.slane %v27216_v35, 1  ;;  %v27241_v4 = vsub.f32 %v19442_v60, %v19556_v12  ;;  %v27242_v48 = vsub.f32 %v19449_v7, %v19556_v12 }
 0x2b4   : > { %v3074_v44 = vmul.f32 %v19664_v21, %v27237_v46  ;;  %v3075_v32 = vmul.f32 %v19664_v21, %v27238_v9  ;;  %v3076_v47 = vmul.f32 %v19664_v21, %v27239_v38  ;;  %v27243_v9 = vsub.f32 %v19439_v52, %v19556_v12  ;;  %6414 = vmatprep.mubr.bf16.mxu0 %v19872_v36 }
 0x2b5   : > { %27240 = vst [vmem:[#allocation31_spill] sm:$0xff] %v19902_v31  ;;  %v3077_v23 = vmul.f32 %v19664_v21, %v27241_v4  ;;  %v3078_v46 = vmul.f32 %v19664_v21, %v27242_v48  ;;  %v27244_v3 = vsub.f32 %v19473_v17, %v19556_v12  ;;  %v27245_v60 = vsub.f32 %v19463_v49, %v19556_v12 }
 0x2b6   : > { %v3079_v38 = vmul.f32 %v19664_v21, %v27243_v9  ;;  %v27246_v7 = vsub.f32 %v19471_v16, %v19556_v12  ;;  %v26584_v52 = vrot.slane %v19799_v54, 7  ;;  %v26583_v9 = vrot.slane %v19801_v19, 7  ;;  %5785 = vmatpush1.bf16.msra.mxu1 %v18601_v24 }
 0x2b7   : > { %v3082_v31 = vmul.f32 %v19664_v21, %v27244_v3  ;;  %v3083_v4 = vmul.f32 %v19664_v21, %v27245_v60  ;;  %v27247_v17 = vsub.f32 %v19486_v62, %v19556_v12  ;;  %v27248_v49 = vsub.f32 %v19493_v25, %v19556_v12  ;;  %5786 = vmatprep.subr.bf16.mxu1 %v27166_v41 }
 0x2b8   : > { %v3084_v48 = vmul.f32 %v19664_v21, %v27246_v7  ;;  %v19939_v34 = vmax.f32 %v3038_v39, 0.0  ;;  %v19941_v16 = vmax.f32 %v3039_v29, 0.0  ;;  %v27251_v7 = vsub.f32 %v19483_v42, %v19556_v12  ;;  %14225 = vmatmul.mubr.msk.bf16.gmra.mrb[20].mxu1 %vm19825_vm2, %v19861_v26 }
 0x2b9   : > { %v3085_v3 = vmul.f32 %v19664_v21, %v27247_v17  ;;  %v3086_v60 = vmul.f32 %v19664_v21, %v27248_v49  ;;  %v19949_v62 = vmax.f32 %v19695_v45, 0.0  ;;  %v19952_v17 = vmax.f32 %v19707_v61, 0.0  ;;  %5555 = vmatprep.mubr.bf16.mxu1 %v19872_v36 }
 0x2ba   : > { %27249 = vst [vmem:[#allocation32_spill] sm:$0xff] %v19939_v34  ;;  %27250 = vst [vmem:[#allocation33_spill] sm:$0xff] %v19941_v16  ;;  %v3087_v24 = vmul.f32 %v19664_v21, %v27251_v7  ;;  %v19955_v25 = vmax.f32 %v19713_v2, 0.0  ;;  %v19958_v39 = vmax.f32 %v19719_v30, 0.0  ;;  %v19961_v29 = vmax.f32 %v19725_v51, 0.0 }
 0x2bb   : > { %27252 = vst [vmem:[#allocation34_spill] sm:$0xff] %v19949_v62  ;;  %27253 = vst [vmem:[#allocation35_spill] sm:$0xff] %v19952_v17  ;;  %v19964_v49 = vmax.f32 %v19731_v57, 0.0  ;;  %v27258_v42 = vsub.f32 %v27179_v20, %v19556_v12  ;;  %v19971_v61 = vmax.f32 %v19737_v8, 0.0  ;;  %v19974_v2 = vmax.f32 %v19743_v13, 0.0 }
 0x2bc   : > { %27254 = vst [vmem:[#allocation36_spill] sm:$0xff] %v19955_v25  ;;  %27255 = vst [vmem:[#allocation37_spill] sm:$0xff] %v19958_v39  ;;  %v19977_v30 = vmax.f32 %v19749_v6, 0.0  ;;  %v19983_v51 = vpack.c.bf16 %v26583_v9, %v26584_v52  ;;  %v19986_v57 = vmax.f32 %v19759_v5, 0.0  ;;  %v19989_v20 = vmax.f32 %v19765_v28, 0.0 }
 0x2bd   : > { %27256 = vst [vmem:[#allocation38_spill] sm:$0xff] %v19961_v29  ;;  %27257 = vst [vmem:[#allocation39_spill] sm:$0xff] %v19964_v49  ;;  %v3040_v45 = vmul.f32 %v19664_v21, %v27258_v42  ;;  %v19992_v8 = vmax.f32 %v19771_v43, 0.0  ;;  %v19999_v13 = vpack.c.bf16 %v19941_v16, %v19939_v34  ;;  %v20002_v6 = vmax.f32 %v19778_v0, 0.0 }
 0x2be   : > { %27259 = vst [vmem:[#allocation40_spill] sm:$0xff] %v19971_v61  ;;  %27260 = vst [vmem:[#allocation41_spill] sm:$0xff] %v19974_v2  ;;  %v20005_v5 = vmax.f32 %v19791_v1, 0.0  ;;  %v20008_v28 = vmax.f32 %v19797_v58, 0.0  ;;  %v20010_v7 = vmax.f32 %v3061_v59, 0.0  ;;  %14673 = vmatmul.mubr.msk.bf16.gmra.mrb[84].mxu0 %vm19825_vm2, %v19983_v51  ;;  %v20016_v43 = vmax.f32 %v3062_v15, 0.0 }
 0x2bf   : > { %27261 = vst [vmem:[#allocation42_spill] sm:$0xff] %v19977_v30  ;;  %27262 = vst [vmem:[#allocation43_spill] sm:$0xff] %v19983_v51  ;;  %v20018_v42 = vmax.f32 %v3063_v27, 0.0  ;;  %v20020_v0 = vmax.f32 %v3066_v11, 0.0  ;;  %6422 = vmatprep.mubr.bf16.mxu0 %v19999_v13  ;;  %v20023_v1 = vmax.f32 %v3040_v45, 0.0  ;;  %v20025_v58 = vmax.f32 %v3067_v18, 0.0 }
 0x2c0   : > { %27263 = vst [vmem:[#allocation44_spill] sm:$0xff] %v19986_v57  ;;  %27264 = vst [vmem:[#allocation45_spill] sm:$0xff] %v19989_v20  ;;  %v20027_v59 = vmax.f32 %v3068_v10, 0.0  ;;  %v20031_v26 = vmax.f32 %v3069_v63, 0.0  ;;  %v20033_v15 = vmax.f32 %v3070_v14, 0.0  ;;  %v20035_v27 = vmax.f32 %v3071_v37, 0.0  ;;  %14230 = vmatmul.mubr.msk.bf16.gmra.mrb[24].mxu1 %vm19825_vm2, %v19983_v51 }
 0x2c1   : > { %27265 = vst [vmem:[#allocation46_spill] sm:$0xff] %v19992_v8  ;;  %27266 = vst [vmem:[#allocation47_spill] sm:$0xff] %v19999_v13  ;;  %v27280_v11 = vsub.f32 %v27180_v22, %v19556_v12  ;;  %v20041_v36 = vmax.f32 %v3074_v44, 0.0  ;;  %v20043_v18 = vmax.f32 %v3075_v32, 0.0  ;;  %v20045_v10 = vmax.f32 %v3076_v47, 0.0  ;;  %5563 = vmatprep.mubr.bf16.mxu1 %v19999_v13 }
 0x2c2   : > { %27267 = vst [vmem:[#allocation48_spill] sm:$0xff] %v20002_v6  ;;  %27268 = vst [vmem:[#allocation49_spill] sm:$0xff] %v20005_v5  ;;  %v20047_v9 = vmax.f32 %v3077_v23, 0.0  ;;  %v20049_v52 = vmax.f32 %v3078_v46, 0.0  ;;  %v20051_v63 = vmax.f32 %v3079_v38, 0.0  ;;  %v20053_v14 = vmax.f32 %v3082_v31, 0.0 }
 0x2c3   : > { %27269 = vst [vmem:[#allocation50_spill] sm:$0xff] %v20008_v28  ;;  %27270 = vst [vmem:[#allocation51_spill] sm:$0xff] %v20010_v7  ;;  %v3041_v45 = vmul.f32 %v19664_v21, %v27280_v11  ;;  %v26596_v37 = vrot.slane %v20023_v1, 7  ;;  %v20056_v19 = vmax.f32 %v3083_v4, 0.0  ;;  %v27281_v22 = vrot.slane %v19939_v34, 7  ;;  %v27286_v4 = vld [vmem:[#allocation9_spill] sm:$0xff] }
 0x2c4   : > { %27271 = vst [vmem:[#allocation52_spill] sm:$0xff] %v20016_v43  ;;  %27272 = vst [vmem:[#allocation53_spill] sm:$0xff] %v20018_v42  ;;  %v27282_v44 = vrot.slane %v19941_v16, 7  ;;  %v20066_v46 = vmax.f32 %v3084_v48, 0.0  ;;  %v20073_v31 = vpack.c.bf16 %v27216_v35, %v20023_v1  ;;  %v27287_v11 = vsub.f32 %v27286_v4, %v19556_v12  ;;  %v18602_v4 = vld [vmem:[%s26522_s2 + $0x200] sm:$0xff]  }
 0x2c5   : > { %27273 = vst [vmem:[#allocation54_spill] sm:$0xff] %v20020_v0  ;;  %27274 = vst [vmem:[#allocation55_spill] sm:$0xff] %v20023_v1  ;;  %v20075_v38 = vmax.f32 %v3041_v45, 0.0  ;;  %v20083_v23 = vmax.f32 %v3086_v60, 0.0  ;;  %v20097_v60 = vmax.f32 %v3087_v24, 0.0  ;;  %v20107_v45 = vpack.c.bf16 %v19952_v17, %v19949_v62  ;;  %v18604_v24 = vld [vmem:[%s26522_s2 + $0x208] sm:$0xff]   ;;  %16848 = vmatprep.subr.bf16.mxu0 %v18602_v4 }
 0x2c6   : > { %27275 = vst [vmem:[#allocation56_spill] sm:$0xff] %v20025_v58  ;;  %27276 = vst [vmem:[#allocation57_spill] sm:$0xff] %v20027_v59  ;;  %v20062_v32 = vpack.c.bf16 %v27282_v44, %v27281_v22  ;;  %v3048_v22 = vmul.f32 %v19664_v21, %v27287_v11  ;;  %v20081_v44 = vmax.f32 %v3085_v3, 0.0  ;;  %v18603_v3 = vld [vmem:[%s26522_s2 + $0xd8] sm:$0xff]   ;;  %v20103_v11 = vpack.c.bf16 %v19565_v33, %v26596_v37 }
 0x2c7   : > { %27277 = vst [vmem:[#allocation58_spill] sm:$0xff] %v20031_v26  ;;  %27278 = vst [vmem:[#allocation59_spill] sm:$0xff] %v20033_v15  ;;  %v27290_v48 = vsub.f32 %v27182_v50, %v19556_v12  ;;  %v27292_v13 = vrot.slane %v19952_v17, 7  ;;  %v20124_v37 = vpack.c.bf16 %v19958_v39, %v19955_v25  ;;  %v20128_v1 = vpack.c.bf16 %v19964_v49, %v19961_v29  ;;  %v27374_v26 = vld [vmem:[#allocation37_spill] sm:$0xff] }
 0x2c8   : > { %27279 = vst [vmem:[#allocation60_spill] sm:$0xff] %v20035_v27  ;;  %27283 = vst [vmem:[#allocation61_spill] sm:$0xff] %v20062_v32  ;;  %14678 = vmatmul.mubr.msk.bf16.gmra.mrb[88].mxu0 %vm19825_vm2, %v20062_v32  ;;  %5787 = vmatpush1.bf16.msra.mxu1 %v18603_v3  ;;  %v27299_v16 = vrot.slane %v19958_v39, 7  ;;  %v20148_v3 = vpack.c.bf16 %v19974_v2, %v19971_v61  ;;  %v20152_v17 = vpack.c.bf16 %v20043_v18, %v20041_v36 }
 0x2c9   : > { %27284 = vst [vmem:[#allocation62_spill] sm:$0xff] %v20073_v31  ;;  %27285 = vst [vmem:[#allocation63_spill] sm:$0xff] %v20075_v38  ;;  %6430 = vmatprep.mubr.bf16.mxu0 %v20073_v31  ;;  %v3049_v47 = vmul.f32 %v19664_v21, %v27290_v48  ;;  %v27291_v31 = vrot.slane %v19949_v62, 7  ;;  %v20133_v48 = vpack.c.bf16 %v20075_v38, %v27216_v35  ;;  %16849 = vmatpush3.bf16.msra.mxu0 %v18602_v4 }
 0x2ca   : > { %27288 = vst [vmem:[#allocation9_spill] sm:$0xff] %v20103_v11  ;;  %27289 = vst [vmem:[#allocation64_spill] sm:$0xff] %v20107_v45  ;;  %5788 = vmatprep.subr.bf16.mxu1 %v27166_v41  ;;  %v27298_v62 = vrot.slane %v19955_v25, 7  ;;  %16850 = vmatprep.subr.bf16.mxu0 %v18604_v24  ;;  %v27379_v27 = vrot.slane %v19939_v34, 7  ;;  %v26678_v15 = vrot.slane %v20047_v9, 1 }
 0x2cb   : > { %v20120_v51 = vpack.c.bf16 %v27292_v13, %v27291_v31  ;;  %27294 = vst [vmem:[#allocation66_spill] sm:$0xff] %v20124_v37  ;;  %27295 = vst [vmem:[#allocation67_spill] sm:$0xff] %v20128_v1  ;;  %v20137_v31 = vmax.f32 %v3048_v22, 0.0  ;;  %v20155_v4 = vmax.f32 %v3049_v47, 0.0  ;;  %14235 = vmatmul.mubr.msk.bf16.gmra.mrb[28].mxu1 %vm19825_vm2, %v20062_v32  ;;  %v27306_v47 = vrot.slane %v20075_v38, 7 }
 0x2cc   : > { %27296 = vst [vmem:[#allocation68_spill] sm:$0xff] %v20133_v48  ;;  %v20144_v50 = vpack.c.bf16 %v27299_v16, %v27298_v62  ;;  %27301 = vst [vmem:[#allocation71_spill] sm:$0xff] %v20148_v3  ;;  %v20162_v62 = vpack.c.bf16 %v20047_v9, %v20045_v10  ;;  %v27308_v13 = vrot.slane %v19961_v29, 7  ;;  %v27309_v16 = vrot.slane %v19964_v49, 7  ;;  %5571 = vmatprep.mubr.bf16.mxu1 %v20133_v48 }
 0x2cd   : > { %27293 = vst [vmem:[#allocation65_spill] sm:$0xff] %v20120_v51  ;;  %27297 = vst [vmem:[#allocation69_spill] sm:$0xff] %v20137_v31  ;;  %v20176_v25 = vpack.c.bf16 %v27306_v47, %v19565_v33  ;;  %v20187_v22 = vpack.c.bf16 %v19986_v57, %v19977_v30  ;;  %16851 = vmatpush3.bf16.msra.mxu0 %v18604_v24  ;;  %v18605_v47 = vld [vmem:[%s26522_s2 + $0x210] sm:$0xff]   ;;  %v27315_v32 = vrot.slane %v20045_v10, 7  ;;  %v27316_v24 = vrot.slane %v20047_v9, 7 }
 0x2ce   : > { %27300 = vst [vmem:[#allocation70_spill] sm:$0xff] %v20144_v50  ;;  %27302 = vst [vmem:[#allocation72_spill] sm:$0xff] %v20152_v17  ;;  %v20168_v17 = vpack.c.bf16 %v20051_v63, %v20049_v52  ;;  %v20182_v3 = vpack.c.bf16 %v27309_v16, %v27308_v13  ;;  %v27312_v13 = vrot.slane %v20041_v36, 7  ;;  %v27313_v16 = vrot.slane %v20043_v18, 7  ;;  %16852 = vmatprep.subr.bf16.mxu0 %v18605_v47 }
 0x2cf   : > { %27303 = vst [vmem:[#allocation73_spill] sm:$0xff] %v20155_v4  ;;  %27304 = vst [vmem:[#allocation74_spill] sm:$0xff] %v20162_v62  ;;  %v20227_v62 = vpack.c.bf16 %v20155_v4, %v27216_v35 }
 0x2d0   : > { %27305 = vst [vmem:[#allocation75_spill] sm:$0xff] %v20168_v17  ;;  %27307 = vst [vmem:[#allocation76_spill] sm:$0xff] %v20176_v25  ;;  %14683 = vmatmul.mubr.msk.bf16.gmra.mrb[92].mxu0 %vm19825_vm2, %v20103_v11  ;;  %v20200_v39 = vpack.c.bf16 %v27313_v16, %v27312_v13  ;;  %v20206_v17 = vpack.c.bf16 %v27316_v24, %v27315_v32  ;;  %v26624_v11 = vrot.slane %v20049_v52, 7  ;;  %v18606_v32 = vld [vmem:[%s26522_s2 + $0x218] sm:$0xff]  }
 0x2d1   : > { %27310 = vst [vmem:[#allocation77_spill] sm:$0xff] %v20182_v3  ;;  %27311 = vst [vmem:[#allocation78_spill] sm:$0xff] %v20187_v22  ;;  %6438 = vmatprep.mubr.bf16.mxu0 %v20107_v45  ;;  %v27318_v13 = vsub.f32 %v27183_v40, %v19556_v12  ;;  %v20223_v24 = vpack.c.bf16 %v27216_v35, %v20137_v31  ;;  %v27321_v22 = vrot.slane %v19971_v61, 7  ;;  %v27322_v3 = vrot.slane %v19974_v2, 7 }
 0x2d2   : > { %27314 = vst [vmem:[#allocation79_spill] sm:$0xff] %v20200_v39  ;;  %27317 = vst [vmem:[#allocation80_spill] sm:$0xff] %v20206_v17  ;;  %v27324_v40 = vrot.slane %v20051_v63, 7  ;;  %v27326_v17 = vrot.slane %v20137_v31, 7  ;;  %v20248_v35 = vpack.c.bf16 %v19992_v8, %v19989_v20  ;;  %16853 = vmatpush3.bf16.msra.mxu0 %v18605_v47 }
 0x2d3   : > { %v3056_v16 = vmul.f32 %v19664_v21, %v27318_v13  ;;  %27319 = vst [vmem:[#allocation81_spill] sm:$0xff] %v20223_v24  ;;  %27320 = vst [vmem:[#allocation82_spill] sm:$0xff] %v20227_v62  ;;  %v20233_v48 = vpack.c.bf16 %v27322_v3, %v27321_v22  ;;  %v20253_v3 = vpack.c.bf16 %v20056_v19, %v20053_v14  ;;  %16854 = vmatprep.subr.bf16.mxu0 %v18606_v32 }
 0x2d4   : > { %v20239_v13 = vpack.c.bf16 %v27324_v40, %v26624_v11  ;;  %v20244_v39 = vpack.c.bf16 %v19565_v33, %v27326_v17  ;;  %27328 = vst [vmem:[#allocation86_spill] sm:$0xff] %v20248_v35  ;;  %v27330_v40 = vld [vmem:[#allocation12_spill] sm:$0xff]  ;;  %v27332_v62 = vrot.slane %v20155_v4, 7  ;;  %v27334_v35 = vrot.slane %v19977_v30, 7  ;;  %14240 = vmatmul.mubr.msk.bf16.gmra.mrb[32].mxu1 %vm19825_vm2, %v20176_v25 }
 0x2d5   : > { %27323 = vst [vmem:[#allocation83_spill] sm:$0xff] %v20233_v48  ;;  %27329 = vst [vmem:[#allocation87_spill] sm:$0xff] %v20253_v3  ;;  %v27331_v11 = vsub.f32 %v27330_v40, %v19556_v12  ;;  %v27335_v3 = vrot.slane %v19986_v57, 7  ;;  %v27338_v40 = vld [vmem:[#allocation13_spill] sm:$0xff]  ;;  %v27340_v4 = vsub.f32 %v27186_v53, %v19556_v12  ;;  %5579 = vmatprep.mubr.bf16.mxu1 %v20107_v45 }
 0x2d6   : > { %27325 = vst [vmem:[#allocation84_spill] sm:$0xff] %v20239_v13  ;;  %27327 = vst [vmem:[#allocation85_spill] sm:$0xff] %v20244_v39  ;;  %v20265_v47 = vpack.c.bf16 %v27332_v62, %v19565_v33  ;;  %v20273_v39 = vmax.f32 %v3056_v16, 0.0  ;;  %v27339_v17 = vsub.f32 %v27338_v40, %v19556_v12  ;;  %v27341_v33 = vrot.slane %v20053_v14, 7  ;;  %16855 = vmatpush3.bf16.msra.mxu0 %v18606_v32 }
 0x2d7   : > { %v3057_v13 = vmul.f32 %v19664_v21, %v27331_v11  ;;  %v20271_v22 = vpack.c.bf16 %v27335_v3, %v27334_v35  ;;  %v3065_v62 = vmul.f32 %v19664_v21, %v27340_v4  ;;  %v20292_v16 = vpack.c.bf16 %v20081_v44, %v20066_v46  ;;  %v27345_v3 = vld [vmem:[#allocation15_spill] sm:$0xff]  ;;  %v27347_v4 = vld [vmem:[#allocation16_spill] sm:$0xff] }
 0x2d8   : > { %27333 = vst [vmem:[#allocation12_spill] sm:$0xff] %v20265_v47  ;;  %27337 = vst [vmem:[#allocation89_spill] sm:$0xff] %v20273_v39  ;;  %v3064_v48 = vmul.f32 %v19664_v21, %v27339_v17  ;;  %v27342_v47 = vrot.slane %v20056_v19, 7  ;;  %v27346_v17 = vsub.f32 %v27345_v3, %v19556_v12  ;;  %v27348_v40 = vsub.f32 %v27347_v4, %v19556_v12 }
 0x2d9   : > { %27336 = vst [vmem:[#allocation88_spill] sm:$0xff] %v20271_v22  ;;  %27344 = vst [vmem:[#allocation90_spill] sm:$0xff] %v20292_v16  ;;  %14688 = vmatmul.mubr.msk.bf16.gmra.mrb[96].mxu0 %vm19825_vm2, %v20120_v51  ;;  %v27349_v3 = vrot.slane %v19989_v20, 7  ;;  %v20317_v4 = vmax.f32 %v3057_v13, 0.0  ;;  %v18609_v13 = vld [vmem:[%s26522_s2 + $0x228] sm:$0xff]   ;;  %v27355_v16 = vrot.slane %v20066_v46, 7 }
 0x2da   : > { %v20288_v35 = vpack.c.bf16 %v27342_v47, %v27341_v33  ;;  %v3072_v53 = vmul.f32 %v19664_v21, %v27346_v17  ;;  %v3073_v11 = vmul.f32 %v19664_v21, %v27348_v40  ;;  %v27350_v17 = vrot.slane %v19992_v8, 7  ;;  %v18607_v40 = vld [vmem:[%s26522_s2 + $0x220] sm:$0xff]   ;;  %6446 = vmatprep.mubr.bf16.mxu0 %v20124_v37 }
 0x2db   : > { %v18608_v47 = vld [vmem:[%s26522_s2 + $0xe0] sm:$0xff]   ;;  %v20328_v33 = vpack.c.bf16 %v20097_v60, %v20083_v23  ;;  %v20349_v28 = vmax.f32 %v3065_v62, 0.0  ;;  %16856 = vmatprep.subr.bf16.mxu0 %v18607_v40  ;;  %v27367_v62 = vrot.slane %v19782_v55, 7 }
 0x2dc   : > { %27343 = vst [vmem:[#allocation13_spill] sm:$0xff] %v20288_v35  ;;  %v20315_v25 = vpack.c.bf16 %v27350_v17, %v27349_v3  ;;  %v27353_v17 = vld [vmem:[#allocation18_spill] sm:$0xff]  ;;  %v27356_v35 = vrot.slane %v20081_v44, 7  ;;  %v20347_v3 = vmax.f32 %v3064_v48, 0.0  ;;  %5789 = vmatpush1.bf16.msra.mxu1 %v18608_v47  ;;  %v20354_v6 = vmax.f32 %v3072_v53, 0.0  ;;  %16857 = vmatpush3.bf16.msra.mxu0 %v18607_v40  ;;  %v27363_v40 = vld [vmem:[#allocation4_spill] sm:$0xff] }
 0x2dd   : > { %27352 = vst [vmem:[#allocation16_spill] sm:$0xff] %v20328_v33  ;;  %v27354_v32 = vsub.f32 %v27353_v17, %v19556_v12  ;;  %v26651_v33 = vrot.slane %v20083_v23, 7  ;;  %27359 = vst [vmem:[#allocation92_spill] sm:$0xff] %v20349_v28  ;;  %v26650_v17 = vrot.slane %v20097_v60, 7  ;;  %5790 = vmatprep.subr.bf16.mxu1 %v27166_v41  ;;  %16858 = vmatprep.subr.bf16.mxu0 %v18609_v13  ;;  %v18610_v48 = vld [vmem:[%s26522_s2 + $0x230] sm:$0xff]  }
 0x2de   : > { %27351 = vst [vmem:[#allocation15_spill] sm:$0xff] %v20315_v25  ;;  %v20343_v25 = vpack.c.bf16 %v27356_v35, %v27355_v16  ;;  %27358 = vst [vmem:[#allocation91_spill] sm:$0xff] %v20347_v3  ;;  %v20356_v35 = vmax.f32 %v3073_v11, 0.0  ;;  %14245 = vmatmul.mubr.msk.bf16.gmra.mrb[36].mxu1 %vm19825_vm2, %v20120_v51  ;;  %v27365_v16 = vld [vmem:[#allocation5_spill] sm:$0xff]  ;;  %v27373_v11 = vld [vmem:[#allocation36_spill] sm:$0xff]  ;;  %v26679_v51 = vrot.slane %v20045_v10, 1 }
 0x2df   : > { %v3081_v45 = vmul.f32 %v19664_v21, %v27354_v32  ;;  %27360 = vst [vmem:[#allocation93_spill] sm:$0xff] %v20354_v6  ;;  %v20366_v47 = vpack.c.bf16 %v26650_v17, %v26651_v33  ;;  %5587 = vmatprep.mubr.bf16.mxu1 %v20124_v37  ;;  %v18611_v17 = vld [vmem:[%s26522_s2 + $0x238] sm:$0xff]   ;;  %v27364_v33 = vld [vmem:[#allocation8_spill] sm:$0xff]  ;;  %v27366_v53 = vrot.slane %v27365_v16, 7  ;;  %v27369_v37 = vld [vmem:[#allocation33_spill] sm:$0xff]  ;;  %v26672_v32 = vrot.slane %v20354_v6, 1 }
 0x2e0   : > { %27357 = vst [vmem:[#allocation18_spill] sm:$0xff] %v20343_v25  ;;  %27361 = vst [vmem:[#allocation94_spill] sm:$0xff] %v20356_v35  ;;  %16859 = vmatpush3.bf16.msra.mxu0 %v18609_v13  ;;  %v27371_v35 = vld [vmem:[#allocation34_spill] sm:$0xff]  ;;  %v27378_v59 = vrot.slane %v27364_v33, 7  ;;  %v27381_v13 = vld [vmem:[#allocation31_spill] sm:$0xff] }
 0x2e1   : > { %27362 = vst [vmem:[#allocation95_spill] sm:$0xff] %v20366_v47  ;;  %v20371_v5 = vmax.f32 %v3081_v45, 0.0  ;;  %14693 = vmatmul.mubr.msk.bf16.gmra.mrb[100].mxu0 %vm19825_vm2, %v20144_v50  ;;  %v20401_v22 = vpack.c.bf16 %v27367_v62, %v27366_v53  ;;  %v27370_v47 = vld [vmem:[#allocation55_spill] sm:$0xff]  ;;  %16860 = vmatprep.subr.bf16.mxu0 %v18610_v48  ;;  %v27375_v62 = vrot.slane %v27363_v40, 7  ;;  %v27376_v53 = vrot.slane %v19799_v54, 7 }
 0x2e2   : > { %6454 = vmatprep.mubr.bf16.mxu0 %v20128_v1  ;;  %v27372_v45 = vld [vmem:[#allocation35_spill] sm:$0xff]  ;;  %v20426_v40 = vpack.c.bf16 %v27379_v27, %v27378_v59  ;;  %v20434_v25 = vpack.c.bf16 %v27381_v13, %v26672_v32  ;;  %v27384_v27 = vrot.slane %v27369_v37, 7  ;;  %v27391_v32 = vrot.slane %v27371_v35, 7 }
 0x2e3   : > { %27368 = vst [vmem:[#allocation96_spill] sm:$0xff] %v20401_v22  ;;  %v20415_v22 = vpack.c.bf16 %v27376_v53, %v27375_v62  ;;  %v26674_v62 = vrot.slane %v20041_v36, 1 }
 0x2e4   : > { %16861 = vmatpush3.bf16.msra.mxu0 %v18610_v48  ;;  %27380 = vst [vmem:[#allocation98_spill] sm:$0xff] %v20426_v40  ;;  %v26673_v48 = vrot.slane %v20043_v18, 1  ;;  %27382 = vst [vmem:[#allocation31_spill] sm:$0xff] %v20434_v25  ;;  %v27385_v40 = vrot.slane %v27370_v47, 7  ;;  %v27417_v25 = vrot.slane %v20097_v60, 1 }
 0x2e5   : > { %27377 = vst [vmem:[#allocation97_spill] sm:$0xff] %v20415_v22  ;;  %16862 = vmatprep.subr.bf16.mxu0 %v18611_v17 }
 0x2e6   : > { %v20442_v59 = vpack.c.bf16 %v26673_v48, %v26674_v62  ;;  %v20448_v53 = vpack.c.bf16 %v27385_v40, %v27384_v27  ;;  %14250 = vmatmul.mubr.msk.bf16.gmra.mrb[40].mxu1 %vm19825_vm2, %v20144_v50  ;;  %v20459_v48 = vpack.c.bf16 %v26678_v15, %v26679_v51  ;;  %v27388_v62 = vld [vmem:[#allocation17_spill] sm:$0xff]  ;;  %v27390_v27 = vrot.slane %v20075_v38, 7 }
 0x2e7   : > { %5595 = vmatprep.mubr.bf16.mxu1 %v20128_v1  ;;  %v27395_v15 = vrot.slane %v20051_v63, 1 }
 0x2e8   : > { %27383 = vst [vmem:[#allocation99_spill] sm:$0xff] %v20442_v59  ;;  %27386 = vst [vmem:[#allocation100_spill] sm:$0xff] %v20448_v53  ;;  %16863 = vmatpush3.bf16.msra.mxu0 %v18611_v17  ;;  %v27389_v59 = vsub.f32 %v27388_v62, %v19556_v12  ;;  %v20469_v22 = vpack.c.bf16 %v27391_v32, %v27390_v27  ;;  %v27393_v17 = vld [vmem:[#allocation77_spill] sm:$0xff]  ;;  %v26688_v32 = vrot.slane %v20056_v19, 1  ;;  %v27398_v53 = vrot.slane %v27372_v45, 7 }
 0x2e9   : > { %27387 = vst [vmem:[#allocation101_spill] sm:$0xff] %v20459_v48  ;;  %14698 = vmatmul.mubr.msk.bf16.gmra.mrb[104].mxu0 %vm19825_vm2, %v27393_v17  ;;  %v18612_v62 = vld [vmem:[%s26522_s2 + $0xe8] sm:$0xff]   ;;  %7977 = vmatprep.subr.bf16.mxu0 %v27166_v41  ;;  %v27399_v48 = vrot.slane %v27373_v11, 7  ;;  %v27401_v27 = vrot.slane %v20053_v14, 1 }
 0x2ea   : > { %v3080_v40 = vmul.f32 %v19664_v21, %v27389_v59  ;;  %27392 = vst [vmem:[#allocation17_spill] sm:$0xff] %v20469_v22  ;;  %v27394_v59 = vrot.slane %v20049_v52, 1  ;;  %6462 = vmatprep.mubr.bf16.mxu0 %v20223_v24  ;;  %5791 = vmatpush1.bf16.msra.mxu1 %v18612_v62  ;;  %v27427_v62 = vrot.slane %v19977_v30, 7 }
 0x2eb   : > { %v20504_v50 = vpack.c.bf16 %v26688_v32, %v27401_v27  ;;  %5792 = vmatprep.subr.bf16.mxu1 %v27166_v41  ;;  %v27408_v27 = vrot.slane %v20081_v44, 1 }
 0x2ec   : > { %v20483_v51 = vpack.c.bf16 %v27395_v15, %v27394_v59  ;;  %v20490_v1 = vmax.f32 %v3080_v40, 0.0  ;;  %v20497_v15 = vpack.c.bf16 %v27399_v48, %v27398_v53  ;;  %v27403_v40 = vrot.slane %v20075_v38, 1 }
 0x2ed   : > { %27402 = vst [vmem:[#allocation105_spill] sm:$0xff] %v20504_v50  ;;  %v27407_v59 = vrot.slane %v20066_v46, 1  ;;  %v27416_v50 = vrot.slane %v20083_v23, 1 }
 0x2ee   : > { %27396 = vst [vmem:[#allocation102_spill] sm:$0xff] %v20483_v51  ;;  %27397 = vst [vmem:[#allocation103_spill] sm:$0xff] %v20490_v1  ;;  %v20509_v24 = vpack.c.bf16 %v27403_v40, %v27381_v13  ;;  %v27405_v51 = vld [vmem:[#allocation19_spill] sm:$0xff]  ;;  %v27410_v40 = vrot.slane %v27374_v26, 7  ;;  %14255 = vmatmul.mubr.msk.bf16.gmra.mrb[44].mxu1 %vm19825_vm2, %v27393_v17  ;;  %v27450_v17 = vrot.slane %v20349_v28, 7 }
 0x2ef   : > { %27400 = vst [vmem:[#allocation104_spill] sm:$0xff] %v20497_v15  ;;  %v27406_v48 = vsub.f32 %v27405_v51, %v19556_v12  ;;  %v20522_v32 = vpack.c.bf16 %v27408_v27, %v27407_v59  ;;  %v27411_v15 = vrot.slane %v19961_v29, 7  ;;  %v27413_v51 = vrot.slane %v19964_v49, 7 }
 0x2f0   : > { %27404 = vst [vmem:[#allocation106_spill] sm:$0xff] %v20509_v24  ;;  %v20541_v59 = vpack.c.bf16 %v27417_v25, %v27416_v50  ;;  %v27429_v25 = vrot.slane %v19986_v57, 7  ;;  %v27430_v50 = vrot.slane %v19989_v20, 7  ;;  %v27467_v57 = vld [vmem:[#allocation60_spill] sm:$0xff] }
 0x2f1   : > { %v3088_v53 = vmul.f32 %v19664_v21, %v27406_v48  ;;  %27409 = vst [vmem:[#allocation19_spill] sm:$0xff] %v20522_v32  ;;  %v20528_v22 = vpack.c.bf16 %v27411_v15, %v27410_v40  ;;  %v27414_v48 = vrot.slane %v20137_v31, 7  ;;  %v27420_v32 = vld [vmem:[#allocation73_spill] sm:$0xff]  ;;  %v27422_v15 = vrot.slane %v19971_v61, 7 }
 0x2f2   : > { %27418 = vst [vmem:[#allocation109_spill] sm:$0xff] %v20541_v59  ;;  %v27421_v29 = vrot.slane %v27420_v32, 7  ;;  %v27444_v59 = vrot.slane %v20010_v7, 7  ;;  %v27473_v31 = vrot.slane %v20041_v36, 7 }
 0x2f3   : > { %27412 = vst [vmem:[#allocation107_spill] sm:$0xff] %v20528_v22  ;;  %v20534_v24 = vpack.c.bf16 %v27414_v48, %v27413_v51  ;;  %v20543_v27 = vmax.f32 %v3088_v53, 0.0  ;;  %v27424_v22 = vrot.slane %v20490_v1, 1  ;;  %v27426_v48 = vrot.slane %v19974_v2, 7 }
 0x2f4   : > { %v20549_v40 = vpack.c.bf16 %v27422_v15, %v27421_v29  ;;  %v20566_v53 = vpack.c.bf16 %v27430_v50, %v27429_v25  ;;  %v27432_v29 = vrot.slane %v19992_v8, 7  ;;  %v27433_v15 = vrot.slane %v20273_v39, 7  ;;  %v27439_v25 = vld [vmem:[#allocation49_spill] sm:$0xff] }
 0x2f5   : > { %27415 = vst [vmem:[#allocation108_spill] sm:$0xff] %v20534_v24  ;;  %27419 = vst [vmem:[#allocation110_spill] sm:$0xff] %v20543_v27  ;;  %v20554_v51 = vpack.c.bf16 %v27381_v13, %v27424_v22  ;;  %v20560_v24 = vpack.c.bf16 %v27427_v62, %v27426_v48  ;;  %v27435_v62 = vrot.slane %v20317_v4, 7  ;;  %v27436_v48 = vld [vmem:[#allocation48_spill] sm:$0xff]  ;;  %v27440_v50 = vrot.slane %v27439_v25, 7 }
 0x2f6   : > { %27423 = vst [vmem:[#allocation111_spill] sm:$0xff] %v20549_v40  ;;  %27431 = vst [vmem:[#allocation114_spill] sm:$0xff] %v20566_v53  ;;  %v20572_v40 = vpack.c.bf16 %v27433_v15, %v27432_v29  ;;  %v27441_v29 = vld [vmem:[#allocation50_spill] sm:$0xff]  ;;  %v27445_v22 = vrot.slane %v20016_v43, 7  ;;  %v27447_v53 = vrot.slane %v20018_v42, 7  ;;  %v27468_v2 = vrot.slane %v27467_v57, 7 }
 0x2f7   : > { %27425 = vst [vmem:[#allocation112_spill] sm:$0xff] %v20554_v51  ;;  %27428 = vst [vmem:[#allocation113_spill] sm:$0xff] %v20560_v24  ;;  %v27437_v24 = vrot.slane %v27436_v48, 7  ;;  %v27442_v15 = vrot.slane %v27441_v29, 7 }
 0x2f8   : > { %27434 = vst [vmem:[#allocation115_spill] sm:$0xff] %v20572_v40  ;;  %v20596_v51 = vpack.c.bf16 %v27445_v22, %v27444_v59  ;;  %v27464_v59 = vld [vmem:[#allocation59_spill] sm:$0xff] }
 0x2f9   : > { %v20581_v30 = vpack.c.bf16 %v27437_v24, %v27435_v62  ;;  %v20590_v40 = vpack.c.bf16 %v27442_v15, %v27440_v50  ;;  %v27448_v24 = vrot.slane %v20347_v3, 7  ;;  %v27453_v50 = vld [vmem:[#allocation85_spill] sm:$0xff]  ;;  %v27454_v15 = vld [vmem:[#allocation82_spill] sm:$0xff]  ;;  %v27465_v8 = vrot.slane %v27464_v59, 7 }
 0x2fa   : > { %27446 = vst [vmem:[#allocation118_spill] sm:$0xff] %v20596_v51  ;;  %14703 = vmatmul.mubr.msk.bf16.gmra.mrb[108].mxu0 %vm19825_vm2, %v27453_v50  ;;  %5603 = vmatprep.mubr.bf16.mxu1 %v27454_v15  ;;  %v27455_v51 = vrot.slane %v20543_v27, 1  ;;  %v27462_v15 = vld [vmem:[#allocation58_spill] sm:$0xff] }
 0x2fb   : > { %27438 = vst [vmem:[#allocation116_spill] sm:$0xff] %v20581_v30  ;;  %27443 = vst [vmem:[#allocation117_spill] sm:$0xff] %v20590_v40  ;;  %v20602_v62 = vpack.c.bf16 %v27448_v24, %v27447_v53  ;;  %v27451_v30 = vrot.slane %v20020_v0, 7  ;;  %v27463_v40 = vrot.slane %v27462_v15, 7  ;;  %v27471_v24 = vld [vmem:[#allocation94_spill] sm:$0xff] }
 0x2fc   : > { %v20619_v53 = vpack.c.bf16 %v27381_v13, %v27455_v51  ;;  %v27469_v51 = vrot.slane %v20354_v6, 7  ;;  %v27472_v61 = vrot.slane %v27471_v24, 7 }
 0x2fd   : > { %27449 = vst [vmem:[#allocation119_spill] sm:$0xff] %v20602_v62  ;;  %v20608_v20 = vpack.c.bf16 %v27451_v30, %v27450_v17  ;;  %v27457_v62 = vld [vmem:[#allocation71_spill] sm:$0xff]  ;;  %v27458_v30 = vrot.slane %v20025_v58, 7  ;;  %v27459_v17 = vld [vmem:[#allocation57_spill] sm:$0xff]  ;;  %v20633_v22 = vpack.c.bf16 %v27465_v8, %v27463_v40  ;;  %v27477_v40 = vrot.slane %v20043_v18, 7 }
 0x2fe   : > { %27456 = vst [vmem:[#allocation121_spill] sm:$0xff] %v20619_v53  ;;  %6470 = vmatprep.mubr.bf16.mxu0 %v27457_v62  ;;  %v20639_v53 = vpack.c.bf16 %v27469_v51, %v27468_v2  ;;  %v20645_v49 = vpack.c.bf16 %v27473_v31, %v27472_v61  ;;  %v27480_v2 = vrot.slane %v20047_v9, 7  ;;  %v27481_v51 = vrot.slane %v20049_v52, 7 }
 0x2ff   : > { %27452 = vst [vmem:[#allocation120_spill] sm:$0xff] %v20608_v20  ;;  %v27460_v20 = vrot.slane %v27459_v17, 7  ;;  %27466 = vst [vmem:[#allocation123_spill] sm:$0xff] %v20633_v22  ;;  %v27478_v22 = vrot.slane %v20045_v10, 7  ;;  %v27483_v31 = vrot.slane %v20371_v5, 7  ;;  %v27491_v61 = vrot.slane %v20081_v44, 7 }
 0x300   : > { %27470 = vst [vmem:[#allocation124_spill] sm:$0xff] %v20639_v53  ;;  %27474 = vst [vmem:[#allocation94_spill] sm:$0xff] %v20645_v49  ;;  %v20663_v53 = vpack.c.bf16 %v27481_v51, %v27480_v2  ;;  %v27489_v2 = vrot.slane %v27471_v24, 1  ;;  %v27495_v8 = vrot.slane %v19782_v55, 1 }
 0x301   : > { %v20627_v50 = vpack.c.bf16 %v27460_v20, %v27458_v30  ;;  %v27475_v20 = vrot.slane %v20349_v28, 1 }
 0x302   : > { %27482 = vst [vmem:[#allocation127_spill] sm:$0xff] %v20663_v53  ;;  %v20682_v51 = vpack.c.bf16 %v27489_v2, %v27381_v13  ;;  %v27492_v53 = vrot.slane %v20083_v23, 7  ;;  %v27498_v2 = vrot.slane %v20490_v1, 7 }
 0x303   : > { %27461 = vst [vmem:[#allocation122_spill] sm:$0xff] %v20627_v50  ;;  %v20650_v30 = vpack.c.bf16 %v27475_v20, %v27381_v13  ;;  %v20657_v50 = vpack.c.bf16 %v27478_v22, %v27477_v40  ;;  %v27484_v20 = vrot.slane %v20053_v14, 7  ;;  %v27487_v22 = vrot.slane %v20066_v46, 7 }
 0x304   : > { %27490 = vst [vmem:[#allocation130_spill] sm:$0xff] %v20682_v51  ;;  %v27504_v51 = vrot.slane %v19799_v54, 1 }
 0x305   : > { %27476 = vst [vmem:[#allocation125_spill] sm:$0xff] %v20650_v30  ;;  %27479 = vst [vmem:[#allocation126_spill] sm:$0xff] %v20657_v50  ;;  %v20670_v49 = vpack.c.bf16 %v27484_v20, %v27483_v31  ;;  %v27486_v30 = vrot.slane %v20056_v19, 7  ;;  %v20688_v50 = vpack.c.bf16 %v27492_v53, %v27491_v61  ;;  %v27494_v20 = vrot.slane %v27365_v16, 1  ;;  %v27502_v31 = vld [vmem:[#allocation4_spill] sm:$0xff] }
 0x306   : > { %v27500_v53 = vrot.slane %v20371_v5, 1 }
 0x307   : > { %27485 = vst [vmem:[#allocation128_spill] sm:$0xff] %v20670_v49  ;;  %v20677_v40 = vpack.c.bf16 %v27487_v22, %v27486_v30  ;;  %27493 = vst [vmem:[#allocation131_spill] sm:$0xff] %v20688_v50  ;;  %v20695_v49 = vpack.c.bf16 %v27495_v8, %v27494_v20  ;;  %v27497_v22 = vrot.slane %v20051_v63, 7  ;;  %v27503_v50 = vrot.slane %v27502_v31, 1 }
 0x308   : > { %v20707_v61 = vpack.c.bf16 %v27500_v53, %v27381_v13  ;;  %v27506_v20 = vrot.slane %v20097_v60, 7  ;;  %v27507_v30 = vrot.slane %v20543_v27, 7 }
 0x309   : > { %27488 = vst [vmem:[#allocation129_spill] sm:$0xff] %v20677_v40  ;;  %27496 = vst [vmem:[#allocation132_spill] sm:$0xff] %v20695_v49  ;;  %v20702_v40 = vpack.c.bf16 %v27498_v2, %v27497_v22  ;;  %v20713_v16 = vpack.c.bf16 %v27504_v51, %v27503_v50  ;;  %v27509_v22 = vrot.slane %v27364_v33, 1  ;;  %v27510_v2 = vrot.slane %v19939_v34, 1  ;;  %v27514_v51 = vld [vmem:[#allocation12_spill] sm:$0xff]  ;;  %v27522_v34 = vld [vmem:[#allocation83_spill] sm:$0xff] }
 0x30a   : > { %27501 = vst [vmem:[#allocation134_spill] sm:$0xff] %v20707_v61  ;;  %v20720_v49 = vpack.c.bf16 %v27507_v30, %v27506_v20  ;;  %v27512_v61 = vld [vmem:[#allocation21_spill] sm:$0xff]  ;;  %14260 = vmatmul.mubr.msk.bf16.gmra.mrb[48].mxu1 %vm19825_vm2, %v27514_v51  ;;  %v27515_v30 = vrot.slane %v27369_v37, 1  ;;  %v27516_v20 = vrot.slane %v27370_v47, 1  ;;  %14708 = vmatmul.mubr.msk.bf16.gmra.mrb[112].mxu0 %vm19825_vm2, %v27522_v34  ;;  %v20771_v47 = vpop.f32.mrb[64].mxu0 }
 0x30b   : > { %27499 = vst [vmem:[#allocation133_spill] sm:$0xff] %v20702_v40  ;;  %27505 = vst [vmem:[#allocation135_spill] sm:$0xff] %v20713_v16  ;;  %v20726_v53 = vpack.c.bf16 %v27510_v2, %v27509_v22  ;;  %v27513_v40 = vsub.f32 %v27512_v61, %v19556_v12  ;;  %v27520_v61 = vld [vmem:[#allocation20_spill] sm:$0xff]  ;;  %5611 = vmatprep.mubr.bf16.mxu1 %v27457_v62  ;;  %v27529_v62 = vld [vmem:[#allocation78_spill] sm:$0xff] }
 0x30c   : > { %27508 = vst [vmem:[#allocation136_spill] sm:$0xff] %v20720_v49  ;;  %v20740_v16 = vpack.c.bf16 %v27516_v20, %v27515_v30  ;;  %v27518_v49 = vld [vmem:[#allocation23_spill] sm:$0xff]  ;;  %v18613_v30 = vld [vmem:[%s26522_s2 + $0xf0] sm:$0xff]   ;;  %6478 = vmatprep.mubr.bf16.mxu0 %v27529_v62  ;;  %v27567_v33 = vld [vmem:[#allocation69_spill] sm:$0xff] }
 0x30d   : > { %27511 = vst [vmem:[#allocation137_spill] sm:$0xff] %v20726_v53  ;;  %v3089_v50 = vmul.f32 %v19664_v21, %v27513_v40  ;;  %v27519_v22 = vsub.f32 %v27518_v49, %v19556_v12  ;;  %v27521_v40 = vsub.f32 %v27520_v61, %v19556_v12  ;;  %v27525_v61 = vrot.slane %v27371_v35, 1  ;;  %5793 = vmatpush1.bf16.msra.mxu1 %v18613_v30 }
 0x30e   : > { %27517 = vst [vmem:[#allocation21_spill] sm:$0xff] %v20740_v16  ;;  %5794 = vmatprep.subr.bf16.mxu1 %v27166_v41  ;;  %v27568_v54 = vrot.slane %v27567_v33, 1 }
 0x30f   : > { %v3090_v2 = vmul.f32 %v19664_v21, %v27519_v22  ;;  %v3091_v53 = vmul.f32 %v19664_v21, %v27521_v40  ;;  %v20758_v49 = vmax.f32 %v3089_v50, 0.0  ;;  %v27524_v22 = vrot.slane %v20075_v38, 1  ;;  %v27527_v40 = vld [vmem:[#allocation22_spill] sm:$0xff]  ;;  %v27531_v38 = vld [vmem:[#allocation25_spill] sm:$0xff] }
 0x310   : > { %v27528_v16 = vsub.f32 %v27527_v40, %v19556_v12  ;;  %27530 = vst [vmem:[#allocation22_spill] sm:$0xff] %v20771_v47  ;;  %v27532_v35 = vsub.f32 %v27531_v38, %v19556_v12 }
 0x311   : > { %27523 = vst [vmem:[#allocation23_spill] sm:$0xff] %v20758_v49  ;;  %v20764_v8 = vpack.c.bf16 %v27525_v61, %v27524_v22  ;;  %v20774_v20 = vmax.f32 %v3090_v2, 0.0  ;;  %v20776_v50 = vmax.f32 %v3091_v53, 0.0  ;;  %v6378_v61 = vpop.f32.mrb[65].mxu0 }
 0x312   : > { %v3092_v51 = vmul.f32 %v19664_v21, %v27528_v16  ;;  %v3093_v22 = vmul.f32 %v19664_v21, %v27532_v35  ;;  %v20787_v37 = vpop.f32.mrb[66].mxu0  ;;  %14265 = vmatmul.mubr.msk.bf16.gmra.mrb[52].mxu1 %vm19825_vm2, %v27522_v34 }
 0x313   : > { %27526 = vst [vmem:[#allocation20_spill] sm:$0xff] %v20764_v8  ;;  %v26754_v8 = vrot.slane %v20758_v49, 1  ;;  %27533 = vst [vmem:[#allocation25_spill] sm:$0xff] %v20787_v37  ;;  %v26758_v53 = vrot.slane %v20774_v20, 7  ;;  %v20794_v35 = vpack.c.bf16 %v20776_v50, %v20774_v20  ;;  %v6381_v30 = vpop.f32.mrb[67].mxu0  ;;  %v20806_v40 = vpack.c.bf16 %v20774_v20, %v20758_v49  ;;  %v27547_v37 = vld [vmem:[#allocation24_spill] sm:$0xff]  ;;  %5619 = vmatprep.mubr.bf16.mxu1 %v27529_v62 }
 0x314   : > { %v20785_v47 = vmax.f32 %v3092_v51, 0.0  ;;  %v20808_v38 = vpop.f32.mrb[68].mxu0  ;;  %v27538_v2 = vrot.slane %v20776_v50, 7  ;;  %v20816_v61 = vmax.f32 %v3093_v22, 0.0  ;;  %v27540_v16 = vrot.slane %v20774_v20, 1 }
 0x315   : > { %27534 = vst [vmem:[#allocation138_spill] sm:$0xff] %v20794_v35  ;;  %v20801_v51 = vpack.c.bf16 %v26754_v8, %v27381_v13  ;;  %27536 = vst [vmem:[#allocation140_spill] sm:$0xff] %v20806_v40  ;;  %v27541_v35 = vrot.slane %v20776_v50, 1  ;;  %v27545_v22 = vrot.slane %v27373_v11, 1  ;;  %v3029_v8 = vsub.f32 %v27547_v37, %v19556_v12 }
 0x316   : > { %27537 = vst [vmem:[#allocation141_spill] sm:$0xff] %v20808_v38  ;;  %v20814_v30 = vpack.c.bf16 %v27538_v2, %v26758_v53  ;;  %v20828_v38 = vpack.c.bf16 %v20785_v47, %v20776_v50  ;;  %v27544_v2 = vrot.slane %v27372_v45, 1  ;;  %v27558_v62 = vrot.slane %v20785_v47, 7  ;;  %v27565_v45 = vld [vmem:[#allocation39_spill] sm:$0xff] }
 0x317   : > { %27535 = vst [vmem:[#allocation139_spill] sm:$0xff] %v20801_v51  ;;  %v6386_v51 = vpop.f32.mrb[69].mxu0  ;;  %v20824_v40 = vpack.c.bf16 %v27541_v35, %v27540_v16  ;;  %v20844_v35 = vpack.c.bf16 %v20816_v61, %v20785_v47 }
 0x318   : > { %27539 = vst [vmem:[#allocation142_spill] sm:$0xff] %v20814_v30  ;;  %27543 = vst [vmem:[#allocation144_spill] sm:$0xff] %v20828_v38  ;;  %v20834_v53 = vpack.c.bf16 %v27545_v22, %v27544_v2  ;;  %v27549_v38 = vld [vmem:[#allocation27_spill] sm:$0xff]  ;;  %v27551_v22 = vld [vmem:[#allocation88_spill] sm:$0xff]  ;;  %v20855_v37 = vpop.f32.mrb[70].mxu0  ;;  %v27553_v51 = vrot.slane %v27374_v26, 1 }
 0x319   : > { %27542 = vst [vmem:[#allocation143_spill] sm:$0xff] %v20824_v40  ;;  %27548 = vst [vmem:[#allocation24_spill] sm:$0xff] %v20844_v35  ;;  %v27550_v40 = vsub.f32 %v27549_v38, %v19556_v12  ;;  %14713 = vmatmul.mubr.msk.bf16.gmra.mrb[116].mxu0 %vm19825_vm2, %v27551_v22  ;;  %v3095_v35 = vmul.f32 %v19664_v21, %v3029_v8  ;;  %v27554_v30 = vld [vmem:[#allocation38_spill] sm:$0xff]  ;;  %v6389_v11 = vpop.f32.mrb[71].mxu0  ;;  %v27562_v8 = vrot.slane %v20816_v61, 1 }
 0x31a   : > { %27546 = vst [vmem:[#allocation145_spill] sm:$0xff] %v20834_v53  ;;  %27552 = vst [vmem:[#allocation27_spill] sm:$0xff] %v20855_v37  ;;  %v27555_v38 = vrot.slane %v27554_v30, 1  ;;  %v27559_v37 = vrot.slane %v20816_v61, 7  ;;  %v27561_v53 = vrot.slane %v20785_v47, 1  ;;  %14270 = vmatmul.mubr.msk.bf16.gmra.mrb[56].mxu1 %vm19825_vm2, %v27551_v22 }
 0x31b   : > { %v3094_v2 = vmul.f32 %v19664_v21, %v27550_v40  ;;  %v27557_v40 = vld [vmem:[#allocation86_spill] sm:$0xff] }
 0x31c   : > { %v20864_v34 = vpack.c.bf16 %v27555_v38, %v27553_v51  ;;  %6486 = vmatprep.mubr.bf16.mxu0 %v27557_v40  ;;  %v20872_v16 = vpack.c.bf16 %v27559_v37, %v27558_v62  ;;  %v20878_v26 = vpack.c.bf16 %v27562_v8, %v27561_v53  ;;  %v20882_v51 = vpop.f32.mrb[72].mxu0  ;;  %v20885_v38 = vmax.f32 %v3095_v35, 0.0  ;;  %v27579_v8 = vld [vmem:[#allocation42_spill] sm:$0xff]  ;;  %5627 = vmatprep.mubr.bf16.mxu1 %v27557_v40 }
 0x31d   : > { %v20880_v30 = vmax.f32 %v3094_v2, 0.0  ;;  %27564 = vst [vmem:[#allocation149_spill] sm:$0xff] %v20882_v51  ;;  %v27570_v37 = vrot.slane %v27420_v32, 1  ;;  %v6394_v2 = vpop.f32.mrb[73].mxu0  ;;  %v27618_v40 = vrot.slane %v27459_v17, 1 }
 0x31e   : > { %27556 = vst [vmem:[#allocation146_spill] sm:$0xff] %v20864_v34  ;;  %27560 = vst [vmem:[#allocation147_spill] sm:$0xff] %v20872_v16  ;;  %v27566_v34 = vrot.slane %v27565_v45, 1  ;;  %v27571_v16 = vld [vmem:[#allocation40_spill] sm:$0xff]  ;;  %v20906_v51 = vpop.f32.mrb[74].mxu0  ;;  %v27595_v32 = vrot.slane %v20885_v38, 1 }
 0x31f   : > { %27563 = vst [vmem:[#allocation148_spill] sm:$0xff] %v20878_v26  ;;  %v27572_v31 = vrot.slane %v27571_v16, 1  ;;  %v3633_v26 = vrot.slane %v20880_v30, 7  ;;  %v20904_v11 = vpack.c.bf16 %v20880_v30, %v20816_v61  ;;  %27575 = vst [vmem:[#allocation153_spill] sm:$0xff] %v20906_v51  ;;  %v6397_v35 = vpop.f32.mrb[75].mxu0  ;;  %v27582_v51 = vld [vmem:[#allocation44_spill] sm:$0xff] }
 0x320   : > { %v20891_v62 = vpack.c.bf16 %v27568_v54, %v27566_v34  ;;  %v20911_v54 = vpack.c.bf16 %v20885_v38, %v20880_v30  ;;  %v27583_v16 = vrot.slane %v27582_v51, 1  ;;  %v27584_v34 = vld [vmem:[#allocation45_spill] sm:$0xff]  ;;  %v27592_v35 = vrot.slane %v20885_v38, 7 }
 0x321   : > { %v20897_v53 = vpack.c.bf16 %v27572_v31, %v27570_v37  ;;  %27574 = vst [vmem:[#allocation152_spill] sm:$0xff] %v20904_v11  ;;  %v27577_v37 = vld [vmem:[#allocation41_spill] sm:$0xff]  ;;  %v27585_v33 = vrot.slane %v27584_v34, 1  ;;  %v27589_v31 = vrot.slane %v20273_v39, 1  ;;  %v27594_v11 = vrot.slane %v20880_v30, 1 }
 0x322   : > { %27569 = vst [vmem:[#allocation150_spill] sm:$0xff] %v20891_v62  ;;  %27576 = vst [vmem:[#allocation154_spill] sm:$0xff] %v20911_v54  ;;  %v27578_v2 = vrot.slane %v27577_v37, 1  ;;  %v27587_v54 = vld [vmem:[#allocation46_spill] sm:$0xff] }
 0x323   : > { %27573 = vst [vmem:[#allocation151_spill] sm:$0xff] %v20897_v53  ;;  %v27580_v53 = vrot.slane %v27579_v8, 1  ;;  %v20926_v45 = vpack.c.bf16 %v27585_v33, %v27583_v16  ;;  %v27588_v55 = vrot.slane %v27587_v54, 1  ;;  %v20934_v8 = vpop.f32.mrb[76].mxu0  ;;  %v20945_v33 = vpack.c.bf16 %v27595_v32, %v27594_v11 }
 0x324   : > { %27591 = vst [vmem:[#allocation158_spill] sm:$0xff] %v20934_v8  ;;  %v27597_v16 = vrot.slane %v20317_v4, 1  ;;  %v27602_v8 = vrot.slane %v27439_v25, 1  ;;  %v27603_v32 = vrot.slane %v27441_v29, 1  ;;  %v27624_v54 = vrot.slane %v27464_v59, 1 }
 0x325   : > { %v20918_v62 = vpack.c.bf16 %v27580_v53, %v27578_v2  ;;  %27586 = vst [vmem:[#allocation156_spill] sm:$0xff] %v20926_v45  ;;  %v20932_v37 = vpack.c.bf16 %v27589_v31, %v27588_v55  ;;  %v20939_v2 = vpack.c.bf16 %v27592_v35, %v3633_v26  ;;  %27596 = vst [vmem:[#allocation160_spill] sm:$0xff] %v20945_v33  ;;  %v27598_v45 = vrot.slane %v27436_v48, 1  ;;  %v6402_v53 = vpop.f32.mrb[77].mxu0 }
 0x326   : > { %v27600_v31 = vmov 0.0   ;;  %v20964_v11 = vpack.c.bf16 %v27603_v32, %v27602_v8  ;;  %v27605_v33 = vrot.slane %v20010_v7, 1  ;;  %v18614_v53 = vld [vmem:[%s26522_s2 + $0xf8] sm:$0xff]   ;;  %v27610_v8 = vrot.slane %v20018_v42, 1 }
 0x327   : > { %27581 = vst [vmem:[#allocation155_spill] sm:$0xff] %v20918_v62  ;;  %27590 = vst [vmem:[#allocation157_spill] sm:$0xff] %v20932_v37  ;;  %v20951_v55 = vpack.c.bf16 %v27598_v45, %v27597_v16  ;;  %v20958_v35 = vpack.c.bf16 %v27600_v31, %v20273_v39  ;;  %v27606_v45 = vrot.slane %v20016_v43, 1  ;;  %v20979_v37 = vpop.f32.mrb[78].mxu0  ;;  %v27611_v32 = vrot.slane %v20347_v3, 1  ;;  %5795 = vmatpush1.bf16.msra.mxu1 %v18614_v53 }
 0x328   : > { %27593 = vst [vmem:[#allocation159_spill] sm:$0xff] %v20939_v2  ;;  %27604 = vst [vmem:[#allocation163_spill] sm:$0xff] %v20964_v11  ;;  %v27615_v62 = vrot.slane %v20020_v0, 1  ;;  %6053 = vmatprep.subr.bf16.mxu1 %v27166_v41  ;;  %v27630_v53 = vrot.slane %v20041_v36, 1 }
 0x329   : > { %27599 = vst [vmem:[#allocation161_spill] sm:$0xff] %v20951_v55  ;;  %27601 = vst [vmem:[#allocation162_spill] sm:$0xff] %v20958_v35  ;;  %v20970_v16 = vpack.c.bf16 %v27606_v45, %v27605_v33  ;;  %v27608_v55 = vld [vmem:[#allocation15_spill] sm:$0xff]  ;;  %v20985_v11 = vpack.c.bf16 %v27611_v32, %v27610_v8  ;;  %v20990_v33 = vpack.c.bf16 %v20317_v4, %v27600_v31  ;;  %v6405_v45 = vpop.f32.mrb[79].mxu0  ;;  %v27620_v8 = vrot.slane %v20273_v39, 7  ;;  %v27621_v32 = vld [vmem:[#allocation28_spill] sm:$0xff] }
 0x32a   : > { %14718 = vmatmul.mubr.msk.bf16.gmra.mrb[120].mxu0 %vm19825_vm2, %v27608_v55  ;;  %27609 = vst [vmem:[#allocation165_spill] sm:$0xff] %v20979_v37  ;;  %v27617_v37 = vrot.slane %v20025_v58, 1  ;;  %v21031_v45 = vpack.c.bf16 %v20041_v36, %v27471_v24  ;;  %v21051_v36 = vpack.c.bf16 %v20049_v52, %v20047_v9  ;;  %14275 = vmatmul.mubr.msk.bf16.gmra.mrb[60].mxu1 %vm19825_vm2, %v27608_v55 }
 0x32b   : > { %27607 = vst [vmem:[#allocation164_spill] sm:$0xff] %v20970_v16  ;;  %27612 = vst [vmem:[#allocation166_spill] sm:$0xff] %v20985_v11  ;;  %6494 = vmatprep.mubr.bf16.mxu0 %v20958_v35  ;;  %v27614_v16 = vrot.slane %v20349_v28, 1  ;;  %v21007_v35 = vpack.c.bf16 %v27621_v32, %v27620_v8  ;;  %v27623_v11 = vrot.slane %v27462_v15, 1  ;;  %5635 = vmatprep.mubr.bf16.mxu1 %v20990_v33 }
 0x32c   : > { %27613 = vst [vmem:[#allocation167_spill] sm:$0xff] %v20990_v33  ;;  %v21002_v22 = vpack.c.bf16 %v27618_v40, %v27617_v37  ;;  %v27629_v37 = vrot.slane %v27471_v24, 1  ;;  %27632 = vst [vmem:[#allocation174_spill] sm:$0xff] %v21031_v45  ;;  %v27642_v45 = vrot.slane %v20490_v1, 1 }
 0x32d   : > { %v20996_v2 = vpack.c.bf16 %v27615_v62, %v27614_v16  ;;  %27622 = vst [vmem:[#allocation170_spill] sm:$0xff] %v21007_v35  ;;  %v21014_v62 = vpack.c.bf16 %v27624_v54, %v27623_v11  ;;  %v27626_v16 = vrot.slane %v27467_v57, 1  ;;  %v27633_v54 = vrot.slane %v20043_v18, 1  ;;  %27640 = vst [vmem:[#allocation178_spill] sm:$0xff] %v21051_v36 }
 0x32e   : > { %27619 = vst [vmem:[#allocation169_spill] sm:$0xff] %v21002_v22  ;;  %v21027_v8 = vpack.c.bf16 %v27630_v53, %v27629_v37  ;;  %v27634_v11 = vrot.slane %v20045_v10, 1  ;;  %v27641_v53 = vrot.slane %v20051_v63, 1 }
 0x32f   : > { %27616 = vst [vmem:[#allocation168_spill] sm:$0xff] %v20996_v2  ;;  %27625 = vst [vmem:[#allocation171_spill] sm:$0xff] %v21014_v62  ;;  %v27627_v2 = vrot.slane %v20354_v6, 1 }
 0x330   : > { %27631 = vst [vmem:[#allocation173_spill] sm:$0xff] %v21027_v8  ;;  %v21037_v62 = vpack.c.bf16 %v27634_v11, %v27633_v54  ;;  %v21057_v54 = vpack.c.bf16 %v27642_v45, %v27641_v53  ;;  %v27646_v11 = vrot.slane %v20053_v14, 1  ;;  %v27653_v53 = vrot.slane %v20081_v44, 1 }
 0x331   : > { %v21020_v40 = vpack.c.bf16 %v27627_v2, %v27626_v16  ;;  %v21041_v2 = vpack.c.bf16 %v20045_v10, %v20043_v18  ;;  %v27637_v16 = vrot.slane %v20047_v9, 1  ;;  %v21061_v18 = vpack.c.bf16 %v20490_v1, %v20051_v63 }
 0x332   : > { %27635 = vst [vmem:[#allocation175_spill] sm:$0xff] %v21037_v62  ;;  %27643 = vst [vmem:[#allocation179_spill] sm:$0xff] %v21057_v54  ;;  %v27645_v10 = vrot.slane %v20371_v5, 1  ;;  %v27649_v9 = vrot.slane %v20056_v19, 1  ;;  %v21081_v63 = vpack.c.bf16 %v20066_v46, %v20056_v19  ;;  %v27654_v1 = vrot.slane %v20083_v23, 1  ;;  %14723 = vmatmul.mubr.msk.bf16.gmra.mrb[124].mxu0 %vm19825_vm2, %v21007_v35  ;;  %v27739_v62 = vld [vmem:[#allocation6_spill] sm:$0xff] }
 0x333   : > { %27628 = vst [vmem:[#allocation172_spill] sm:$0xff] %v21020_v40  ;;  %27636 = vst [vmem:[#allocation176_spill] sm:$0xff] %v21041_v2  ;;  %v27638_v40 = vrot.slane %v20049_v52, 1  ;;  %v21071_v52 = vpack.c.bf16 %v20053_v14, %v20371_v5  ;;  %v21091_v14 = vpack.c.bf16 %v20083_v23, %v20081_v44  ;;  %v21101_v19 = vpack.c.bf16 %v20543_v27, %v20097_v60 }
 0x334   : > { %27644 = vst [vmem:[#allocation180_spill] sm:$0xff] %v21061_v18  ;;  %27652 = vst [vmem:[#allocation184_spill] sm:$0xff] %v21081_v63  ;;  %v27663_v23 = vrot.slane %v20758_v49, 7  ;;  %v27664_v44 = vrot.slane %v20774_v20, 7  ;;  %v21368_v63 = vpack.c.bf16 %v20371_v5, %v27600_v31  ;;  %v27735_v18 = vld [vmem:[#allocation4_spill] sm:$0xff]  ;;  %v27737_v2 = vrot.slane %v20371_v5, 7 }
 0x335   : > { %v21047_v37 = vpack.c.bf16 %v27638_v40, %v27637_v16  ;;  %v21067_v40 = vpack.c.bf16 %v27646_v11, %v27645_v10  ;;  %27648 = vst [vmem:[#allocation182_spill] sm:$0xff] %v21071_v52  ;;  %v27650_v16 = vrot.slane %v20066_v46, 1  ;;  %v21087_v10 = vpack.c.bf16 %v27654_v1, %v27653_v53  ;;  %27656 = vst [vmem:[#allocation186_spill] sm:$0xff] %v21091_v14  ;;  %v27661_v46 = vld [vmem:[#allocation26_spill] sm:$0xff]  ;;  %v18618_v14 = vld [vmem:[%s26522_s2 + $0x248] sm:$0xff]  }
 0x336   : > { %v27657_v11 = vrot.slane %v20097_v60, 1  ;;  %v27658_v52 = vrot.slane %v20543_v27, 1  ;;  %27660 = vst [vmem:[#allocation188_spill] sm:$0xff] %v21101_v19  ;;  %v21110_v1 = vpack.c.bf16 %v27439_v25, %v27436_v48  ;;  %v21120_v60 = vpack.c.bf16 %v27664_v44, %v27663_v23  ;;  %v27743_v5 = vld [vmem:[#allocation32_spill] sm:$0xff] }
 0x337   : > { %27639 = vst [vmem:[#allocation177_spill] sm:$0xff] %v21047_v37  ;;  %27647 = vst [vmem:[#allocation181_spill] sm:$0xff] %v21067_v40  ;;  %v21077_v45 = vpack.c.bf16 %v27650_v16, %v27649_v9  ;;  %v3030_v16 = vsub.f32 %v27661_v46, %v19556_v12  ;;  %v27666_v12 = vrot.slane %v20776_v50, 7  ;;  %v27671_v27 = vrot.slane %v20758_v49, 1  ;;  %v27733_v40 = vld [vmem:[#allocation7_spill] sm:$0xff] }
 0x338   : > { %27655 = vst [vmem:[#allocation185_spill] sm:$0xff] %v21087_v10  ;;  %v21097_v9 = vpack.c.bf16 %v27658_v52, %v27657_v11  ;;  %27662 = vst [vmem:[#allocation26_spill] sm:$0xff] %v21110_v1  ;;  %v27667_v52 = vrot.slane %v20785_v47, 7  ;;  %v27669_v11 = vrot.slane %v20816_v61, 7  ;;  %6502 = vmatprep.mubr.bf16.mxu0 %v21110_v1  ;;  %v27672_v19 = vrot.slane %v20774_v20, 1  ;;  %v18619_v10 = vld [vmem:[%s26522_s2 + $0x250] sm:$0xff]  }
 0x339   : > { %27651 = vst [vmem:[#allocation183_spill] sm:$0xff] %v21077_v45  ;;  %27665 = vst [vmem:[#allocation189_spill] sm:$0xff] %v21120_v60  ;;  %v3096_v35 = vmul.f32 %v19664_v21, %v3030_v16  ;;  %v27674_v44 = vrot.slane %v20776_v50, 1  ;;  %v27675_v60 = vrot.slane %v20785_v47, 1  ;;  %v27681_v21 = vrot.slane %v20317_v4, 7  ;;  %v18620_v37 = vld [vmem:[%s26522_s2 + $0x258] sm:$0xff]  }
 0x33a   : > { %27659 = vst [vmem:[#allocation187_spill] sm:$0xff] %v21097_v9  ;;  %v21126_v53 = vpack.c.bf16 %v27667_v52, %v27666_v12  ;;  %v21130_v46 = vpack.c.bf16 %v3633_v26, %v27669_v11  ;;  %v21138_v23 = vpack.c.bf16 %v27672_v19, %v27671_v27  ;;  %v27677_v52 = vrot.slane %v20816_v61, 1  ;;  %v27727_v9 = vld [vmem:[#allocation80_spill] sm:$0xff]  ;;  %v27748_v49 = vld [vmem:[#allocation87_spill] sm:$0xff] }
 0x33b   : > { %v21144_v12 = vpack.c.bf16 %v27675_v60, %v27674_v44  ;;  %v27678_v26 = vrot.slane %v20880_v30, 1  ;;  %v21157_v20 = vpack.c.bf16 %v27681_v21, %v27621_v32  ;;  %v27684_v61 = vrot.slane %v27436_v48, 7 }
 0x33c   : > { %27668 = vst [vmem:[#allocation190_spill] sm:$0xff] %v21126_v53  ;;  %27670 = vst [vmem:[#allocation191_spill] sm:$0xff] %v21130_v46  ;;  %v21152_v46 = vmax.f32 %v3096_v35, 0.0  ;;  %v27685_v30 = vrot.slane %v27439_v25, 7  ;;  %v21176_v35 = vpack.c.bf16 %v20010_v7, %v27441_v29  ;;  %v27688_v16 = vrot.slane %v20885_v38, 7  ;;  %v27725_v53 = vld [vmem:[#allocation79_spill] sm:$0xff] }
 0x33d   : > { %27673 = vst [vmem:[#allocation192_spill] sm:$0xff] %v21138_v23  ;;  %27676 = vst [vmem:[#allocation193_spill] sm:$0xff] %v21144_v12  ;;  %v21150_v11 = vpack.c.bf16 %v27678_v26, %v27677_v52  ;;  %14280 = vmatmul.mubr.msk.bf16.gmra.mrb[64].mxu1 %vm19825_vm2, %v21157_v20  ;;  %v27691_v52 = vrot.slane %v20885_v38, 1  ;;  %v27693_v21 = vrot.slane %v27441_v29, 7  ;;  %v27715_v12 = vrot.slane %v27464_v59, 7 }
 0x33e   : > { %27680 = vst [vmem:[#allocation195_spill] sm:$0xff] %v21152_v46  ;;  %27682 = vst [vmem:[#allocation196_spill] sm:$0xff] %v21157_v20  ;;  %v26809_v27 = vrot.slane %v21152_v46, 7  ;;  %v4282_v50 = vrot.slane %v21152_v46, 1  ;;  %v21163_v47 = vpack.c.bf16 %v21152_v46, %v20885_v38  ;;  %v21169_v19 = vpack.c.bf16 %v27685_v30, %v27684_v61  ;;  %5643 = vmatprep.mubr.bf16.mxu1 %v21110_v1 }
 0x33f   : > { %27679 = vst [vmem:[#allocation194_spill] sm:$0xff] %v21150_v11  ;;  %27687 = vst [vmem:[#allocation199_spill] sm:$0xff] %v21176_v35  ;;  %v27694_v61 = vrot.slane %v20010_v7, 7  ;;  %v21207_v38 = vpack.c.bf16 %v20018_v42, %v20016_v43  ;;  %v21287_v11 = vpack.c.bf16 %v27467_v57, %v27464_v59  ;;  %v21305_v23 = vpack.c.bf16 %v27600_v31, %v20354_v6 }
 0x340   : > { %27683 = vst [vmem:[#allocation197_spill] sm:$0xff] %v21163_v47  ;;  %27686 = vst [vmem:[#allocation198_spill] sm:$0xff] %v21169_v19  ;;  %v21182_v60 = vpack.c.bf16 %v26809_v27, %v27688_v16  ;;  %v21185_v44 = vpack.c.bf16 %v27381_v13, %v4282_v50  ;;  %v21189_v26 = vpack.c.bf16 %v4282_v50, %v27691_v52  ;;  %14728 = vmatmul.mubr.msk.bf16.gmra.mrb[128].mxu0 %vm19825_vm2, %v21169_v19 }
 0x341   : > { %6510 = vmatprep.mubr.bf16.mxu0 %v21176_v35  ;;  %v21200_v30 = vpack.c.bf16 %v27694_v61, %v27693_v21  ;;  %27696 = vst [vmem:[#allocation204_spill] sm:$0xff] %v21207_v38  ;;  %v27697_v50 = vrot.slane %v20016_v43, 7  ;;  %v27698_v16 = vrot.slane %v20018_v42, 7  ;;  %v21225_v21 = vpack.c.bf16 %v27600_v31, %v20347_v3  ;;  %27714 = vst [vmem:[#allocation214_spill] sm:$0xff] %v21287_v11 }
 0x342   : > { %27689 = vst [vmem:[#allocation200_spill] sm:$0xff] %v21182_v60  ;;  %27690 = vst [vmem:[#allocation201_spill] sm:$0xff] %v21185_v44  ;;  %v27701_v61 = vrot.slane %v20347_v3, 7  ;;  %v21246_v27 = vpack.c.bf16 %v20025_v58, %v20020_v0  ;;  %v27708_v47 = vrot.slane %v20025_v58, 7  ;;  %v27719_v44 = vrot.slane %v20354_v6, 7  ;;  %v27741_v6 = vld [vmem:[#allocation8_spill] sm:$0xff] }
 0x343   : > { %27692 = vst [vmem:[#allocation202_spill] sm:$0xff] %v21189_v26  ;;  %27695 = vst [vmem:[#allocation203_spill] sm:$0xff] %v21200_v30  ;;  %v21218_v52 = vpack.c.bf16 %v27698_v16, %v27697_v50  ;;  %v21239_v16 = vpack.c.bf16 %v20349_v28, %v27600_v31  ;;  %v27736_v54 = vrot.slane %v27735_v18, 1  ;;  %v27740_v8 = vrot.slane %v27739_v62, 1 }
 0x344   : > { %27700 = vst [vmem:[#allocation206_spill] sm:$0xff] %v21225_v21  ;;  %v21235_v50 = vpack.c.bf16 %v27621_v32, %v27701_v61  ;;  %27704 = vst [vmem:[#allocation209_spill] sm:$0xff] %v21246_v27  ;;  %v27705_v61 = vrot.slane %v20349_v28, 7  ;;  %v27745_v28 = vld [vmem:[#allocation33_spill] sm:$0xff] }
 0x345   : > { %14285 = vmatmul.mubr.msk.bf16.gmra.mrb[68].mxu1 %vm19825_vm2, %v21169_v19  ;;  %27699 = vst [vmem:[#allocation205_spill] sm:$0xff] %v21218_v52  ;;  %27703 = vst [vmem:[#allocation208_spill] sm:$0xff] %v21239_v16 }
 0x346   : > { %5651 = vmatprep.mubr.bf16.mxu1 %v21176_v35  ;;  %27702 = vst [vmem:[#allocation207_spill] sm:$0xff] %v21235_v50  ;;  %v21256_v46 = vpack.c.bf16 %v27705_v61, %v27621_v32  ;;  %v27711_v61 = vrot.slane %v27459_v17, 7  ;;  %27718 = vst [vmem:[#allocation216_spill] sm:$0xff] %v21305_v23 }
 0x348   : > { %14733 = vmatmul.mubr.msk.bf16.gmra.mrb[132].mxu0 %vm19825_vm2, %v21200_v30  ;;  %27706 = vst [vmem:[#allocation210_spill] sm:$0xff] %v21256_v46 }
 0x349   : > { %6518 = vmatprep.mubr.bf16.mxu0 %v21207_v38 }
 0x34d   : > { %14290 = vmatmul.mubr.msk.bf16.gmra.mrb[72].mxu1 %vm19825_vm2, %v21200_v30 }
 0x34e   : > { %5659 = vmatprep.mubr.bf16.mxu1 %v21207_v38 }
 0x350   : > { %14738 = vmatmul.mubr.msk.bf16.gmra.mrb[136].mxu0 %vm19825_vm2, %v21218_v52 }
 0x351   : > { %6526 = vmatprep.mubr.bf16.mxu0 %v21225_v21  ;;  %v27707_v21 = vrot.slane %v20020_v0, 7 }
 0x353   : > { %v21262_v26 = vpack.c.bf16 %v27708_v47, %v27707_v21  ;;  %v27712_v47 = vrot.slane %v27462_v15, 7 }
 0x355   : > { %14295 = vmatmul.mubr.msk.bf16.gmra.mrb[76].mxu1 %vm19825_vm2, %v21218_v52  ;;  %27709 = vst [vmem:[#allocation211_spill] sm:$0xff] %v21262_v26  ;;  %v21280_v21 = vpack.c.bf16 %v27712_v47, %v27711_v61  ;;  %v27716_v61 = vrot.slane %v27467_v57, 7 }
 0x356   : > { %5667 = vmatprep.mubr.bf16.mxu1 %v21239_v16 }
 0x357   : > { %27713 = vst [vmem:[#allocation213_spill] sm:$0xff] %v21280_v21  ;;  %v21298_v47 = vpack.c.bf16 %v27716_v61, %v27715_v12  ;;  %v21315_v12 = vpack.c.bf16 %v27621_v32, %v27719_v44  ;;  %v21319_v61 = vpack.c.bf16 %v27471_v24, %v27600_v31  ;;  %v27723_v44 = vrot.slane %v27471_v24, 7  ;;  %v18617_v24 = vld [vmem:[%s26522_s2 + $0x240] sm:$0xff]   ;;  %v27755_v31 = vld [vmem:[#allocation35_spill] sm:$0xff] }
 0x358   : > { %14743 = vmatmul.mubr.msk.bf16.gmra.mrb[140].mxu0 %vm19825_vm2, %v21235_v50  ;;  %v21269_v50 = vpack.c.bf16 %v27462_v15, %v27459_v17  ;;  %v27756_v62 = vrot.slane %v27755_v31, 1  ;;  %v27760_v31 = vld [vmem:[#allocation37_spill] sm:$0xff] }
 0x359   : > { %6534 = vmatprep.mubr.bf16.mxu0 %v21246_v27  ;;  %27717 = vst [vmem:[#allocation215_spill] sm:$0xff] %v21298_v47  ;;  %27720 = vst [vmem:[#allocation217_spill] sm:$0xff] %v21315_v12  ;;  %v21332_v60 = vpack.c.bf16 %v27723_v44, %v27621_v32  ;;  %v27728_v44 = vld [vmem:[#allocation75_spill] sm:$0xff] }
 0x35a   : > { %27710 = vst [vmem:[#allocation212_spill] sm:$0xff] %v21269_v50  ;;  %27721 = vst [vmem:[#allocation218_spill] sm:$0xff] %v21319_v61 }
 0x35b   : > { %27724 = vst [vmem:[#allocation219_spill] sm:$0xff] %v21332_v60  ;;  %27729 = vst [vmem:[#allocation75_spill] sm:$0xff] %v21368_v63 }
 0x35d   : > { %14300 = vmatmul.mubr.msk.bf16.gmra.mrb[80].mxu1 %vm19825_vm2, %v21256_v46 }
 0x35e   : > { %5675 = vmatprep.mubr.bf16.mxu1 %v21246_v27 }
 0x360   : > { %14748 = vmatmul.mubr.msk.bf16.gmra.mrb[144].mxu0 %vm19825_vm2, %v21262_v26 }
 0x361   : > { %6542 = vmatprep.mubr.bf16.mxu0 %v21269_v50 }
 0x365   : > { %14305 = vmatmul.mubr.msk.bf16.gmra.mrb[84].mxu1 %vm19825_vm2, %v21262_v26 }
 0x366   : > { %5683 = vmatprep.mubr.bf16.mxu1 %v21269_v50 }
 0x368   : > { %14753 = vmatmul.mubr.msk.bf16.gmra.mrb[148].mxu0 %vm19825_vm2, %v21280_v21 }
 0x369   : > { %6550 = vmatprep.mubr.bf16.mxu0 %v21287_v11 }
 0x36d   : > { %14310 = vmatmul.mubr.msk.bf16.gmra.mrb[88].mxu1 %vm19825_vm2, %v21280_v21 }
 0x36e   : > { %5691 = vmatprep.mubr.bf16.mxu1 %v21287_v11 }
 0x370   : > { %14758 = vmatmul.mubr.msk.bf16.gmra.mrb[152].mxu0 %vm19825_vm2, %v21298_v47 }
 0x371   : > { %6558 = vmatprep.mubr.bf16.mxu0 %v21305_v23  ;;  %v27722_v23 = vld [vmem:[#allocation72_spill] sm:$0xff] }
 0x375   : > { %14315 = vmatmul.mubr.msk.bf16.gmra.mrb[92].mxu1 %vm19825_vm2, %v21298_v47 }
 0x376   : > { %5699 = vmatprep.mubr.bf16.mxu1 %v21319_v61 }
 0x378   : > { %14763 = vmatmul.mubr.msk.bf16.gmra.mrb[156].mxu0 %vm19825_vm2, %v21315_v12  ;;  %v27726_v12 = vld [vmem:[#allocation74_spill] sm:$0xff] }
 0x379   : > { %6566 = vmatprep.mubr.bf16.mxu0 %v27722_v23 }
 0x37d   : > { %14320 = vmatmul.mubr.msk.bf16.gmra.mrb[96].mxu1 %vm19825_vm2, %v21332_v60 }
 0x37e   : > { %5707 = vmatprep.mubr.bf16.mxu1 %v27722_v23 }
 0x380   : > { %14768 = vmatmul.mubr.msk.bf16.gmra.mrb[160].mxu0 %vm19825_vm2, %v27725_v53 }
 0x381   : > { %6574 = vmatprep.mubr.bf16.mxu0 %v27726_v12 }
 0x385   : > { %14325 = vmatmul.mubr.msk.bf16.gmra.mrb[100].mxu1 %vm19825_vm2, %v27725_v53 }
 0x386   : > { %5715 = vmatprep.mubr.bf16.mxu1 %v27726_v12 }
 0x388   : > { %14773 = vmatmul.mubr.msk.bf16.gmra.mrb[164].mxu0 %vm19825_vm2, %v27727_v9 }
 0x389   : > { %16864 = vmatprep.mubr.bf16.mxu0 %v27166_v41 }
 0x38d   : > { %14330 = vmatmul.mubr.msk.bf16.gmra.mrb[104].mxu1 %vm19825_vm2, %v27727_v9 }
 0x38e   : > { %5723 = vmatprep.mubr.bf16.mxu1 %v27728_v44 }
 0x390   : > { %16865 = vmatmul.mubr.bf16.vlgmr.msra.gmra.mrb[168].mxu0 %v27166_v41 }
 0x391   : > { %16868 = vmatprep.mubr.bf16.mxu0 %v27166_v41  ;;  %7978 = vmatpush1.bf16.msra.mxu0 %v18617_v24  ;;  %v27732_v24 = vld [vmem:[#allocation84_spill] sm:$0xff] }
 0x392   : > { %7979 = vmatprep.subr.bf16.mxu0 %v27166_v41 }
 0x395   : > { %7980 = vmatpush1.bf16.msra.mxu0 %v18618_v14  ;;  %14335 = vmatmul.mubr.msk.bf16.gmra.mrb[108].mxu1 %vm19825_vm2, %v27732_v24  ;;  %v27734_v14 = vrot.slane %v27733_v40, 1  ;;  %v27764_v40 = vld [vmem:[#allocation38_spill] sm:$0xff] }
 0x396   : > { %7981 = vmatprep.subr.bf16.mxu0 %v27166_v41  ;;  %5731 = vmatprep.mubr.bf16.mxu1 %v21368_v63  ;;  %v27787_v63 = vld [vmem:[#allocation46_spill] sm:$0xff] }
 0x397   : > { %v21382_v36 = vpack.c.bf16 %v27736_v54, %v27734_v14  ;;  %v21396_v54 = vpack.c.bf16 %v27737_v2, %v27621_v32  ;;  %v18622_v14 = vld [vmem:[%s26522_s2 + $0x260] sm:$0xff]   ;;  %v27744_v2 = vrot.slane %v27743_v5, 1  ;;  %v27752_v5 = vld [vmem:[#allocation13_spill] sm:$0xff] }
 0x398   : > { %16869 = vmatmul.mubr.bf16.gmra.mrb[172].mxu0 %v27166_v41 }
 0x399   : > { %16872 = vmatprep.mubr.msk.bf16.mxu0 %vm21370_vm4, %v21382_v36  ;;  %7982 = vmatpush1.bf16.msra.mxu0 %v18619_v10  ;;  %27738 = vst [vmem:[#allocation84_spill] sm:$0xff] %v21396_v54  ;;  %v27742_v10 = vrot.slane %v27741_v6, 1 }
 0x39a   : > { %7983 = vmatprep.subr.bf16.mxu0 %v27166_v41 }
 0x39b   : > { %v21405_v22 = vpack.c.bf16 %v27742_v10, %v27740_v8  ;;  %v18623_v8 = vld [vmem:[%s26522_s2 + $0x268] sm:$0xff]   ;;  %v18624_v10 = vld [vmem:[%s26522_s2 + $0x270] sm:$0xff]  }
 0x39d   : > { %7984 = vmatpush1.bf16.msra.mxu0 %v18620_v37  ;;  %14340 = vmatmul.mubr.msk.bf16.gmra.mrb[112].mxu1 %vm19825_vm2, %v21396_v54  ;;  %v27746_v37 = vrot.slane %v27745_v28, 1 }
 0x39e   : > { %7985 = vmatprep.subr.bf16.mxu0 %v27166_v41  ;;  %5739 = vmatprep.mubr.bf16.mxu1 %v27748_v49 }
 0x39f   : > { %v21415_v32 = vpack.c.bf16 %v27746_v37, %v27744_v2  ;;  %v27749_v2 = vld [vmem:[#allocation55_spill] sm:$0xff] }
 0x3a0   : > { %16873 = vmatmul.mubr.msk.bf16.gmra.mrb[176].mxu0 %vm21370_vm4, %v21405_v22  ;;  %v27750_v37 = vrot.slane %v27749_v2, 1  ;;  %v27757_v2 = vld [vmem:[#allocation90_spill] sm:$0xff] }
 0x3a1   : > { %27747 = vst [vmem:[#allocation220_spill] sm:$0xff] %v21415_v32  ;;  %16876 = vmatprep.mubr.msk.bf16.mxu0 %vm21370_vm4, %v21415_v32  ;;  %7986 = vmatpush1.bf16.msra.mxu0 %v18622_v14  ;;  %v27753_v14 = vld [vmem:[#allocation34_spill] sm:$0xff] }
 0x3a2   : > { %7987 = vmatprep.subr.bf16.mxu0 %v27166_v41  ;;  %v21434_v28 = vpack.c.bf16 %v27381_v13, %v27750_v37  ;;  %v27754_v6 = vrot.slane %v27753_v14, 1  ;;  %v18625_v37 = vld [vmem:[%s26522_s2 + $0x278] sm:$0xff]   ;;  %v27761_v14 = vrot.slane %v27760_v31, 1  ;;  %v27772_v31 = vld [vmem:[#allocation69_spill] sm:$0xff] }
 0x3a4   : > { %27751 = vst [vmem:[#allocation221_spill] sm:$0xff] %v21434_v28 }
 0x3a5   : > { %7988 = vmatpush1.bf16.msra.mxu0 %v18623_v8  ;;  %14345 = vmatmul.mubr.msk.bf16.gmra.mrb[116].mxu1 %vm19825_vm2, %v27752_v5  ;;  %v21444_v8 = vpack.c.bf16 %v27756_v62, %v27754_v6  ;;  %v18627_v6 = vld [vmem:[%s26522_s2 + $0x280] sm:$0xff]   ;;  %v27766_v5 = vld [vmem:[#allocation39_spill] sm:$0xff] }
 0x3a6   : > { %7989 = vmatprep.subr.bf16.mxu0 %v27166_v41  ;;  %5747 = vmatprep.mubr.bf16.mxu1 %v27757_v2  ;;  %v27758_v62 = vld [vmem:[#allocation36_spill] sm:$0xff]  ;;  %v27765_v2 = vrot.slane %v27764_v40, 1 }
 0x3a8   : > { %16877 = vmatmul.mubr.msk.bf16.gmra.mrb[180].mxu0 %vm21370_vm4, %v21434_v28  ;;  %v27759_v28 = vrot.slane %v27758_v62, 1  ;;  %v27769_v62 = vld [vmem:[#allocation16_spill] sm:$0xff] }
 0x3a9   : > { %16880 = vmatprep.mubr.msk.bf16.mxu0 %vm21370_vm4, %v21444_v8  ;;  %7990 = vmatpush1.bf16.msra.mxu0 %v18624_v10  ;;  %v27763_v10 = vld [vmem:[#allocation18_spill] sm:$0xff] }
 0x3aa   : > { %7991 = vmatprep.subr.bf16.mxu0 %v27166_v41  ;;  %v21464_v18 = vpack.c.bf16 %v27761_v14, %v27759_v28  ;;  %v18628_v28 = vld [vmem:[%s26522_s2 + $0x288] sm:$0xff]   ;;  %v21487_v14 = vpop.f32.mrb[80].mxu0 }
 0x3ab   : > { %27770 = vst [vmem:[#allocation224_spill] sm:$0xff] %v21487_v14 }
 0x3ac   : > { %27762 = vst [vmem:[#allocation222_spill] sm:$0xff] %v21464_v18 }
 0x3ad   : > { %7992 = vmatpush1.bf16.msra.mxu0 %v18625_v37  ;;  %14350 = vmatmul.mubr.msk.bf16.gmra.mrb[120].mxu1 %vm19825_vm2, %v27763_v10  ;;  %v27767_v37 = vrot.slane %v27766_v5, 1  ;;  %v18629_v5 = vld [vmem:[%s26522_s2 + $0x290] sm:$0xff]   ;;  %v27775_v10 = vld [vmem:[#allocation95_spill] sm:$0xff] }
 0x3ae   : > { %7993 = vmatprep.subr.bf16.mxu0 %v27166_v41  ;;  %5755 = vmatprep.mubr.bf16.mxu1 %v27769_v62  ;;  %v27773_v62 = vrot.slane %v27772_v31, 1 }
 0x3af   : > { %v21474_v49 = vpack.c.bf16 %v27767_v37, %v27765_v2  ;;  %v6410_v2 = vpop.f32.mrb[81].mxu0 }
 0x3b0   : > { %16881 = vmatmul.mubr.msk.bf16.gmra.mrb[184].mxu0 %vm21370_vm4, %v21464_v18  ;;  %v21489_v37 = vpop.f32.mrb[82].mxu0  ;;  %v27776_v2 = vld [vmem:[#allocation40_spill] sm:$0xff] }
 0x3b1   : > { %27768 = vst [vmem:[#allocation223_spill] sm:$0xff] %v21474_v49  ;;  %16884 = vmatprep.mubr.msk.bf16.mxu0 %vm21370_vm4, %v21474_v49  ;;  %7994 = vmatpush1.bf16.msra.mxu0 %v18627_v6  ;;  %27771 = vst [vmem:[#allocation225_spill] sm:$0xff] %v21489_v37  ;;  %v6413_v40 = vpop.f32.mrb[83].mxu0  ;;  %v21497_v6 = vpack.c.bf16 %v27381_v13, %v27773_v62  ;;  %v27777_v14 = vrot.slane %v27776_v2, 1  ;;  %v27778_v37 = vld [vmem:[#allocation41_spill] sm:$0xff]  ;;  %v27782_v2 = vld [vmem:[#allocation42_spill] sm:$0xff] }
 0x3b2   : > { %7995 = vmatprep.subr.bf16.mxu0 %v27166_v41  ;;  %v18630_v40 = vld [vmem:[%s26522_s2 + $0x298] sm:$0xff]   ;;  %v21520_v62 = vpop.f32.mrb[84].mxu0  ;;  %v27783_v31 = vrot.slane %v27782_v2, 1 }
 0x3b3   : > { %27774 = vst [vmem:[#allocation226_spill] sm:$0xff] %v21497_v6  ;;  %27780 = vst [vmem:[#allocation227_spill] sm:$0xff] %v21520_v62  ;;  %v27786_v62 = vrot.slane %v27584_v34, 1 }
 0x3b5   : > { %7996 = vmatpush1.bf16.msra.mxu0 %v18628_v28  ;;  %14355 = vmatmul.mubr.msk.bf16.gmra.mrb[124].mxu1 %vm19825_vm2, %v27775_v10  ;;  %v27779_v28 = vrot.slane %v27778_v37, 1 }
 0x3b6   : > { %7997 = vmatprep.subr.bf16.mxu0 %v27166_v41  ;;  %5796 = vmatprep.mubr.bf16.mxu1 %v27166_v41 }
 0x3b7   : > { %v21507_v54 = vpack.c.bf16 %v27779_v28, %v27777_v14  ;;  %v6418_v14 = vpop.f32.mrb[85].mxu0  ;;  %v18615_v28 = vld [vmem:[%s26522_s2 + $0x100] sm:$0xff]  }
 0x3b8   : > { %16885 = vmatmul.mubr.msk.bf16.gmra.mrb[188].mxu0 %vm21370_vm4, %v21497_v6  ;;  %v21525_v6 = vpop.f32.mrb[86].mxu0  ;;  %v18632_v14 = vld [vmem:[%s26522_s2 + $0x2a0] sm:$0xff]  }
 0x3b9   : > { %16888 = vmatprep.mubr.msk.bf16.mxu0 %vm21370_vm4, %v21507_v54  ;;  %7998 = vmatpush1.bf16.msra.mxu0 %v18629_v5  ;;  %27781 = vst [vmem:[#allocation228_spill] sm:$0xff] %v21525_v6  ;;  %v6421_v37 = vpop.f32.mrb[87].mxu0  ;;  %v27784_v5 = vrot.slane %v27582_v51, 1  ;;  %v27788_v6 = vrot.slane %v27787_v63, 1  ;;  %v27838_v51 = vld [vmem:[#allocation19_spill] sm:$0xff] }
 0x3ba   : > { %7999 = vmatprep.subr.bf16.mxu0 %v27166_v41  ;;  %v18633_v37 = vld [vmem:[%s26522_s2 + $0x2a8] sm:$0xff]  }
 0x3bb   : > { %v21531_v10 = vpack.c.bf16 %v27784_v5, %v27783_v31  ;;  %v18616_v31 = vld [vmem:[%s26522_s2 + $0x108] sm:$0xff]   ;;  %v18621_v5 = vld [vmem:[%s26522_s2 + $0x110] sm:$0xff]  }
 0x3bd   : > { %8000 = vmatpush1.bf16.msra.mxu0 %v18630_v40  ;;  %27785 = vst [vmem:[#allocation229_spill] sm:$0xff] %v21531_v10  ;;  %5797 = vmatmul.mubr.bf16.vlgmr.msra.gmra.mrb[0].mxu1 %v27166_v41  ;;  %v21542_v40 = vpack.c.bf16 %v27788_v6, %v27786_v62  ;;  %v21558_v6 = vpop.f32.mrb[88].mxu0 }
 0x3be   : > { %8001 = vmatprep.subr.bf16.mxu0 %v27166_v41  ;;  %6054 = vmatpush1.bf16.msra.mxu1 %v18615_v28  ;;  %27790 = vst [vmem:[#allocation231_spill] sm:$0xff] %v21558_v6  ;;  %v6426_v62 = vpop.f32.mrb[89].mxu0 }
 0x3bf   : > { %27789 = vst [vmem:[#allocation230_spill] sm:$0xff] %v21542_v40  ;;  %5804 = vmatprep.mubr.bf16.mxu1 %v27166_v41  ;;  %6055 = vmatprep.subr.bf16.mxu1 %v27166_v41  ;;  %v21561_v28 = vpop.f32.mrb[90].mxu0  ;;  %v18634_v62 = vld [vmem:[%s26522_s2 + $0x2b0] sm:$0xff]  }
 0x3c0   : > { %16889 = vmatmul.mubr.msk.bf16.gmra.mrb[192].mxu0 %vm21370_vm4, %v21531_v10  ;;  %27791 = vst [vmem:[#allocation232_spill] sm:$0xff] %v21561_v28  ;;  %v6429_v63 = vpop.f32.mrb[91].mxu0  ;;  %v27795_v28 = vrot.slane %v27439_v25, 1  ;;  %v27798_v25 = vrot.slane %v27441_v29, 1  ;;  %v27833_v29 = vld [vmem:[#allocation17_spill] sm:$0xff] }
 0x3c1   : > { %16892 = vmatprep.mubr.msk.bf16.mxu0 %vm21370_vm4, %v21542_v40  ;;  %8002 = vmatpush1.bf16.msra.mxu0 %v18632_v14  ;;  %v27792_v14 = vrot.slane %v20273_v39, 1  ;;  %v18626_v63 = vld [vmem:[%s26522_s2 + $0x118] sm:$0xff]   ;;  %v27837_v39 = vld [vmem:[#allocation106_spill] sm:$0xff] }
 0x3c2   : > { %8003 = vmatprep.subr.bf16.mxu0 %v27166_v41  ;;  %6056 = vmatpush1.bf16.msra.mxu1 %v18616_v31  ;;  %v27794_v31 = vrot.slane %v27436_v48, 1 }
 0x3c3   : > { %6057 = vmatprep.subr.bf16.mxu1 %v27166_v41  ;;  %v21570_v34 = vpack.c.bf16 %v27381_v13, %v27792_v14 }
 0x3c4   : > { %v21580_v6 = vpack.c.bf16 %v27795_v28, %v27794_v31  ;;  %v21597_v28 = vpop.f32.mrb[92].mxu0 }
 0x3c5   : > { %27793 = vst [vmem:[#allocation233_spill] sm:$0xff] %v21570_v34  ;;  %8004 = vmatpush1.bf16.msra.mxu0 %v18633_v37  ;;  %5805 = vmatmul.mubr.bf16.gmra.mrb[4].mxu1 %v27166_v41  ;;  %v18635_v37 = vld [vmem:[%s26522_s2 + $0x2b8] sm:$0xff]   ;;  %27796 = vst [vmem:[#allocation234_spill] sm:$0xff] %v21597_v28  ;;  %v6434_v14 = vpop.f32.mrb[93].mxu0  ;;  %v27805_v28 = vrot.slane %v20347_v3, 1 }
 0x3c6   : > { %8005 = vmatprep.subr.bf16.mxu0 %v27166_v41  ;;  %5812 = vmatprep.mubr.bf16.mxu1 %v27166_v41  ;;  %v21600_v31 = vpop.f32.mrb[94].mxu0  ;;  %v27800_v14 = vrot.slane %v20016_v43, 1  ;;  %v27815_v43 = vrot.slane %v27462_v15, 1 }
 0x3c7   : > { %6058 = vmatpush1.bf16.msra.mxu1 %v18621_v5  ;;  %27797 = vst [vmem:[#allocation235_spill] sm:$0xff] %v21600_v31  ;;  %v18631_v5 = vld [vmem:[%s26522_s2 + $0x120] sm:$0xff]  }
 0x3c8   : > { %16893 = vmatmul.mubr.msk.bf16.gmra.mrb[196].mxu0 %vm21370_vm4, %v21570_v34  ;;  %6059 = vmatprep.subr.bf16.mxu1 %v27166_v41  ;;  %v6437_v34 = vpop.f32.mrb[95].mxu0 }
 0x3c9   : > { %16896 = vmatprep.mubr.msk.bf16.mxu0 %vm21370_vm4, %v21580_v6  ;;  %8006 = vmatpush1.bf16.msra.mxu0 %v18634_v62  ;;  %v27799_v62 = vrot.slane %v20010_v7, 1  ;;  %v21631_v34 = vpop.f32.mrb[96].mxu0 }
 0x3ca   : > { %8007 = vmatprep.subr.bf16.mxu0 %v27166_v41  ;;  %27803 = vst [vmem:[#allocation237_spill] sm:$0xff] %v21631_v34  ;;  %v27807_v34 = vrot.slane %v20020_v0, 1 }
 0x3cb   : > { %6060 = vmatpush1.bf16.msra.mxu1 %v18626_v63  ;;  %v21609_v48 = vpack.c.bf16 %v27799_v62, %v27798_v25  ;;  %v27801_v63 = vrot.slane %v20018_v42, 1  ;;  %v18636_v25 = vld [vmem:[%s26522_s2 + $0x128] sm:$0xff]   ;;  %v27814_v42 = vrot.slane %v27459_v17, 1  ;;  %v27832_v17 = vld [vmem:[#allocation112_spill] sm:$0xff] }
 0x3cc   : > { %6061 = vmatprep.subr.bf16.mxu1 %v27166_v41 }
 0x3cd   : > { %8008 = vmatpush1.bf16.msra.mxu0 %v18635_v37  ;;  %5813 = vmatmul.mubr.bf16.gmra.mrb[8].mxu1 %v27166_v41  ;;  %v21617_v31 = vpack.c.bf16 %v27801_v63, %v27800_v14  ;;  %v6442_v37 = vpop.f32.mrb[97].mxu0  ;;  %v18637_v14 = vld [vmem:[%s26522_s2 + $0x130] sm:$0xff]   ;;  %v21680_v7 = vpack.c.bf16 %v27815_v43, %v27814_v42  ;;  %v18640_v43 = vld [vmem:[%s26522_s2 + $0x148] sm:$0xff]  }
 0x3ce   : > { %8266 = vmatprep.subr.bf16.mxu0 %v27166_v41  ;;  %5820 = vmatprep.mubr.bf16.mxu1 %v27166_v41  ;;  %v21633_v62 = vpop.f32.mrb[98].mxu0  ;;  %v27808_v37 = vrot.slane %v20025_v58, 1 }
 0x3cf   : > { %27802 = vst [vmem:[#allocation236_spill] sm:$0xff] %v21617_v31  ;;  %6062 = vmatpush1.bf16.msra.mxu1 %v18631_v5  ;;  %27804 = vst [vmem:[#allocation238_spill] sm:$0xff] %v21633_v62  ;;  %v6445_v63 = vpop.f32.mrb[99].mxu0  ;;  %v21641_v5 = vpack.c.bf16 %v27381_v13, %v27805_v28  ;;  %v18638_v28 = vld [vmem:[%s26522_s2 + $0x138] sm:$0xff]  }
 0x3d0   : > { %16897 = vmatmul.mubr.msk.bf16.gmra.mrb[200].mxu0 %vm21370_vm4, %v21609_v48  ;;  %6063 = vmatprep.subr.bf16.mxu1 %v27166_v41  ;;  %v21649_v62 = vpack.c.bf16 %v27808_v37, %v27807_v34  ;;  %v21664_v34 = vpop.f32.mrb[100].mxu0 }
 0x3d1   : > { %16900 = vmatprep.mubr.msk.bf16.mxu0 %vm21370_vm4, %v21617_v31  ;;  %27806 = vst [vmem:[#allocation239_spill] sm:$0xff] %v21641_v5  ;;  %v6450_v63 = vpop.f32.mrb[101].mxu0 }
 0x3d2   : > { %v21666_v37 = vpop.f32.mrb[102].mxu0 }
 0x3d3   : > { %6064 = vmatpush1.bf16.msra.mxu1 %v18636_v25  ;;  %v27809_v25 = vld [vmem:[#allocation96_spill] sm:$0xff]  ;;  %27811 = vst [vmem:[#allocation240_spill] sm:$0xff] %v21666_v37  ;;  %v6453_v3 = vpop.f32.mrb[103].mxu0  ;;  %v18641_v37 = vld [vmem:[%s26522_s2 + $0x150] sm:$0xff]  }
 0x3d4   : > { %6065 = vmatprep.subr.bf16.mxu1 %v27166_v41  ;;  %27810 = vst [vmem:[#allocation96_spill] sm:$0xff] %v21664_v34  ;;  %v27819_v3 = vld [vmem:[#allocation97_spill] sm:$0xff]  ;;  %v21705_v42 = vpop.f32.mrb[104].mxu0 }
 0x3d5   : > { %5821 = vmatmul.mubr.bf16.gmra.mrb[12].mxu1 %v27166_v41  ;;  %27820 = vst [vmem:[#allocation97_spill] sm:$0xff] %v21705_v42  ;;  %v27823_v42 = vld [vmem:[#allocation98_spill] sm:$0xff] }
 0x3d6   : > { %14360 = vmatprep.mubr.msk.bf16.mxu1 %vm19825_vm2, %v27809_v25 }
 0x3d7   : > { %6066 = vmatpush1.bf16.msra.mxu1 %v18637_v14  ;;  %v18639_v14 = vld [vmem:[%s26522_s2 + $0x140] sm:$0xff]  }
 0x3d8   : > { %16901 = vmatmul.mubr.msk.bf16.gmra.mrb[204].mxu0 %vm21370_vm4, %v21641_v5  ;;  %6067 = vmatprep.subr.bf16.mxu1 %v27166_v41  ;;  %v27812_v5 = vld [vmem:[#allocation5_spill] sm:$0xff] }
 0x3d9   : > { %16904 = vmatprep.mubr.msk.bf16.mxu0 %vm21370_vm4, %v21649_v62  ;;  %v27813_v58 = vrot.slane %v27812_v5, 1 }
 0x3db   : > { %v21671_v0 = vpack.c.bf16 %v27813_v58, %v27381_v13  ;;  %6068 = vmatpush1.bf16.msra.mxu1 %v18638_v28  ;;  %v27816_v58 = vrot.slane %v27464_v59, 1  ;;  %v27817_v28 = vrot.slane %v27467_v57, 1  ;;  %v27828_v59 = vld [vmem:[#allocation100_spill] sm:$0xff] }
 0x3dc   : > { %6069 = vmatprep.subr.bf16.mxu1 %v27166_v41 }
 0x3dd   : > { %14363 = vmatmul.mubr.msk.bf16.gmra.mrb[16].mxu1 %vm21370_vm4, %v21671_v0  ;;  %v21690_v63 = vpack.c.bf16 %v27817_v28, %v27816_v58  ;;  %v6458_v58 = vpop.f32.mrb[105].mxu0 }
 0x3de   : > { %14368 = vmatprep.mubr.msk.bf16.mxu1 %vm19825_vm2, %v27819_v3  ;;  %v21707_v28 = vpop.f32.mrb[106].mxu0 }
 0x3df   : > { %27818 = vst [vmem:[#allocation5_spill] sm:$0xff] %v21690_v63  ;;  %6070 = vmatpush1.bf16.msra.mxu1 %v18639_v14  ;;  %27821 = vst [vmem:[#allocation241_spill] sm:$0xff] %v21707_v28  ;;  %v6461_v34 = vpop.f32.mrb[107].mxu0  ;;  %v27822_v14 = vld [vmem:[#allocation31_spill] sm:$0xff] }
 0x3e0   : > { %16905 = vmatmul.mubr.msk.bf16.gmra.mrb[208].mxu0 %vm21370_vm4, %v21680_v7  ;;  %6071 = vmatprep.subr.bf16.mxu1 %v27166_v41  ;;  %v21726_v34 = vpop.f32.mrb[108].mxu0 }
 0x3e1   : > { %16908 = vmatprep.mubr.msk.bf16.mxu0 %vm21370_vm4, %v21690_v63  ;;  %27825 = vst [vmem:[#allocation98_spill] sm:$0xff] %v21726_v34  ;;  %v6466_v58 = vpop.f32.mrb[109].mxu0 }
 0x3e2   : > { %v21728_v28 = vpop.f32.mrb[110].mxu0  ;;  %v27829_v58 = vld [vmem:[#allocation102_spill] sm:$0xff] }
 0x3e3   : > { %6072 = vmatpush1.bf16.msra.mxu1 %v18640_v43  ;;  %v27824_v43 = vld [vmem:[#allocation99_spill] sm:$0xff]  ;;  %27826 = vst [vmem:[#allocation242_spill] sm:$0xff] %v21728_v28  ;;  %v6469_v57 = vpop.f32.mrb[111].mxu0 }
 0x3e4   : > { %6073 = vmatprep.subr.bf16.mxu1 %v27166_v41  ;;  %v21745_v57 = vpop.f32.mrb[112].mxu0 }
 0x3e5   : > { %14371 = vmatmul.mubr.msk.bf16.gmra.mrb[20].mxu1 %vm21370_vm4, %v21382_v36  ;;  %27830 = vst [vmem:[#allocation100_spill] sm:$0xff] %v21745_v57  ;;  %v6474_v28 = vpop.f32.mrb[113].mxu0 }
 0x3e6   : > { %14376 = vmatprep.mubr.msk.bf16.mxu1 %vm19825_vm2, %v27823_v42  ;;  %v21748_v34 = vpop.f32.mrb[114].mxu0 }
 0x3e7   : > { %6074 = vmatpush1.bf16.msra.mxu1 %v18641_v37  ;;  %v18642_v37 = vld [vmem:[%s26522_s2 + $0x158] sm:$0xff]   ;;  %27831 = vst [vmem:[#allocation243_spill] sm:$0xff] %v21748_v34  ;;  %v6477_v15 = vpop.f32.mrb[115].mxu0 }
 0x3e8   : > { %16909 = vmatmul.mubr.msk.bf16.gmra.mrb[212].mxu0 %vm21370_vm4, %v27822_v14  ;;  %6075 = vmatprep.subr.bf16.mxu1 %v27166_v41  ;;  %v27827_v14 = vld [vmem:[#allocation101_spill] sm:$0xff] }
 0x3e9   : > { %16912 = vmatprep.mubr.msk.bf16.mxu0 %vm21370_vm4, %v27824_v43 }
 0x3eb   : > { %6076 = vmatpush1.bf16.msra.mxu1 %v18642_v37  ;;  %v27834_v37 = vld [vmem:[#allocation105_spill] sm:$0xff] }
 0x3ec   : > { %6077 = vmatprep.subr.bf16.mxu1 %v27166_v41  ;;  %v21762_v28 = vpop.f32.mrb[116].mxu0 }
 0x3ed   : > { %14379 = vmatmul.mubr.msk.bf16.gmra.mrb[24].mxu1 %vm21370_vm4, %v21405_v22  ;;  %27835 = vst [vmem:[#allocation244_spill] sm:$0xff] %v21762_v28  ;;  %v6482_v34 = vpop.f32.mrb[117].mxu0  ;;  %v18643_v28 = vld [vmem:[%s26522_s2 + $0x160] sm:$0xff]  }
 0x3ee   : > { %14384 = vmatprep.mubr.msk.bf16.mxu1 %vm19825_vm2, %v27828_v59  ;;  %v21764_v15 = vpop.f32.mrb[118].mxu0  ;;  %v27840_v34 = vld [vmem:[#allocation109_spill] sm:$0xff] }
 0x3ef   : > { %27836 = vst [vmem:[#allocation245_spill] sm:$0xff] %v21764_v15  ;;  %v6485_v57 = vpop.f32.mrb[119].mxu0  ;;  %6078 = vmatpush1.bf16.msra.mxu1 %v18643_v28  ;;  %v27845_v28 = vld [vmem:[#allocation10_spill] sm:$0xff] }
 0x3f0   : > { %16913 = vmatmul.mubr.msk.bf16.gmra.mrb[216].mxu0 %vm21370_vm4, %v27827_v14  ;;  %6079 = vmatprep.subr.bf16.mxu1 %v27166_v41 }
 0x3f1   : > { %16916 = vmatprep.mubr.msk.bf16.mxu0 %vm21370_vm4, %v27829_v58 }
 0x3f5   : > { %14387 = vmatmul.mubr.msk.bf16.gmra.mrb[28].mxu1 %vm21370_vm4, %v21415_v32  ;;  %v27844_v32 = vld [vmem:[#allocation107_spill] sm:$0xff] }
 0x3f6   : > { %14392 = vmatprep.mubr.msk.bf16.mxu1 %vm19825_vm2, %v27833_v29 }
 0x3f8   : > { %16917 = vmatmul.mubr.msk.bf16.gmra.mrb[220].mxu0 %vm21370_vm4, %v27832_v17  ;;  %v27839_v17 = vld [vmem:[#allocation104_spill] sm:$0xff] }
 0x3f9   : > { %16920 = vmatprep.mubr.msk.bf16.mxu0 %vm21370_vm4, %v27834_v37 }
 0x3fd   : > { %14395 = vmatmul.mubr.msk.bf16.gmra.mrb[32].mxu1 %vm21370_vm4, %v27837_v39  ;;  %v21781_v57 = vpop.f32.mrb[120].mxu0 }
 0x3fe   : > { %14400 = vmatprep.mubr.msk.bf16.mxu1 %vm19825_vm2, %v27839_v17  ;;  %27841 = vst [vmem:[#allocation246_spill] sm:$0xff] %v21781_v57  ;;  %v6490_v15 = vpop.f32.mrb[121].mxu0  ;;  %v27843_v17 = vld [vmem:[#allocation121_spill] sm:$0xff] }
 0x3ff   : > { %v21784_v39 = vpop.f32.mrb[122].mxu0 }
 0x400   : > { %16921 = vmatmul.mubr.msk.bf16.gmra.mrb[224].mxu0 %vm21370_vm4, %v27838_v51  ;;  %27842 = vst [vmem:[#allocation247_spill] sm:$0xff] %v21784_v39  ;;  %v6493_v29 = vpop.f32.mrb[123].mxu0  ;;  %v27848_v39 = vld [vmem:[#allocation14_spill] sm:$0xff] }
 0x401   : > { %16924 = vmatprep.mubr.msk.bf16.mxu0 %vm21370_vm4, %v27840_v34 }
 0x405   : > { %14403 = vmatmul.mubr.msk.bf16.gmra.mrb[36].mxu1 %vm21370_vm4, %v21444_v8  ;;  %v21796_v57 = vpop.f32.mrb[124].mxu0 }
 0x406   : > { %14408 = vmatprep.mubr.msk.bf16.mxu1 %vm19825_vm2, %v27844_v32  ;;  %27846 = vst [vmem:[#allocation10_spill] sm:$0xff] %v21796_v57  ;;  %v6498_v15 = vpop.f32.mrb[125].mxu0 }
 0x407   : > { %v21798_v2 = vpop.f32.mrb[126].mxu0  ;;  %v27850_v15 = vld [vmem:[#allocation11_spill] sm:$0xff] }
 0x408   : > { %16925 = vmatmul.mubr.msk.bf16.gmra.mrb[228].mxu0 %vm21370_vm4, %v27843_v17  ;;  %27847 = vst [vmem:[#allocation248_spill] sm:$0xff] %v21798_v2  ;;  %v6501_v29 = vpop.f32.mrb[127].mxu0  ;;  %v27849_v17 = vld [vmem:[#allocation108_spill] sm:$0xff] }
 0x409   : > { %8009 = vmatprep.mubr.bf16.mxu0 %v27845_v28  ;;  %v18644_v28 = vld [vmem:[%s26522_s2 + $0x168] sm:$0xff]  }
 0x40a   : > { %6080 = vmatpush1.bf16.msra.mxu1 %v18644_v28  ;;  %v27855_v28 = vld [vmem:[#allocation30_spill] sm:$0xff] }
 0x40b   : > { %6081 = vmatprep.subr.bf16.mxu1 %v27166_v41 }
 0x40d   : > { %14411 = vmatmul.mubr.msk.bf16.gmra.mrb[40].mxu1 %vm21370_vm4, %v21464_v18 }
 0x40e   : > { %14416 = vmatprep.mubr.msk.bf16.mxu1 %vm19825_vm2, %v27849_v17  ;;  %v27854_v17 = vld [vmem:[#allocation111_spill] sm:$0xff] }
 0x410   : > { %14892 = vmatmul.mubr.msk.bf16.vlgmr.msra.gmra.mrb[232].mxu0 %vm19825_vm2, %v27848_v39  ;;  %v27853_v39 = vld [vmem:[#allocation29_spill] sm:$0xff] }
 0x411   : > { %8017 = vmatprep.mubr.bf16.mxu0 %v27850_v15 }
 0x413   : > { %v21813_v29 = vpop.f32.mrb[128].mxu0 }
 0x414   : > { %27851 = vst [vmem:[#allocation14_spill] sm:$0xff] %v21813_v29  ;;  %v6506_v2 = vpop.f32.mrb[129].mxu0 }
 0x415   : > { %v21816_v57 = vpop.f32.mrb[130].mxu0  ;;  %14419 = vmatmul.mubr.msk.bf16.gmra.mrb[44].mxu1 %vm21370_vm4, %v21474_v49 }
 0x416   : > { %27852 = vst [vmem:[#allocation249_spill] sm:$0xff] %v21816_v57  ;;  %v6509_v18 = vpop.f32.mrb[131].mxu0  ;;  %14424 = vmatprep.mubr.msk.bf16.mxu1 %vm19825_vm2, %v27854_v17 }
 0x417   : > { %v27858_v18 = vld [vmem:[#allocation73_spill] sm:$0xff] }
 0x418   : > { %14897 = vmatmul.mubr.msk.bf16.gmra.mrb[236].mxu0 %vm19825_vm2, %v27853_v39  ;;  %v27859_v57 = vrot.slane %v27858_v18, 1  ;;  %v27861_v39 = vld [vmem:[#allocation43_spill] sm:$0xff] }
 0x419   : > { %8025 = vmatprep.mubr.bf16.mxu0 %v27855_v28  ;;  %v27862_v28 = vld [vmem:[#allocation113_spill] sm:$0xff] }
 0x41a   : > { %v21835_v32 = vpack.c.bf16 %v27859_v57, %v27381_v13 }
 0x41b   : > { %v21828_v15 = vpop.f32.mrb[132].mxu0 }
 0x41c   : > { %27856 = vst [vmem:[#allocation250_spill] sm:$0xff] %v21828_v15  ;;  %v6514_v2 = vpop.f32.mrb[133].mxu0  ;;  %27860 = vst [vmem:[#allocation73_spill] sm:$0xff] %v21835_v32 }
 0x41d   : > { %v21830_v29 = vpop.f32.mrb[134].mxu0  ;;  %14427 = vmatmul.mubr.msk.bf16.gmra.mrb[48].mxu1 %vm21370_vm4, %v21835_v32  ;;  %v18645_v2 = vld [vmem:[%s26522_s2 + $0x170] sm:$0xff]  }
 0x41e   : > { %27857 = vst [vmem:[#allocation251_spill] sm:$0xff] %v21830_v29  ;;  %v6517_v49 = vpop.f32.mrb[135].mxu0  ;;  %14432 = vmatprep.mubr.msk.bf16.mxu1 %vm19825_vm2, %v27862_v28  ;;  %v27863_v29 = vld [vmem:[#allocation47_spill] sm:$0xff]  ;;  %6082 = vmatpush1.bf16.msra.mxu1 %v18645_v2  ;;  %v27867_v28 = vld [vmem:[#allocation114_spill] sm:$0xff]  ;;  %v27868_v2 = vld [vmem:[#allocation68_spill] sm:$0xff] }
 0x41f   : > { %6083 = vmatprep.subr.bf16.mxu1 %v27166_v41 }
 0x420   : > { %14902 = vmatmul.mubr.msk.bf16.gmra.mrb[240].mxu0 %vm19825_vm2, %v27861_v39  ;;  %v27866_v39 = vld [vmem:[#allocation61_spill] sm:$0xff] }
 0x421   : > { %8033 = vmatprep.mubr.bf16.mxu0 %v27863_v29 }
 0x423   : > { %v21850_v49 = vpop.f32.mrb[136].mxu0 }
 0x424   : > { %27864 = vst [vmem:[#allocation252_spill] sm:$0xff] %v21850_v49  ;;  %v6522_v57 = vpop.f32.mrb[137].mxu0 }
 0x425   : > { %v21853_v15 = vpop.f32.mrb[138].mxu0  ;;  %14435 = vmatmul.mubr.msk.bf16.gmra.mrb[52].mxu1 %vm21370_vm4, %v21507_v54 }
 0x426   : > { %27865 = vst [vmem:[#allocation253_spill] sm:$0xff] %v21853_v15  ;;  %v6525_v32 = vpop.f32.mrb[139].mxu0  ;;  %14440 = vmatprep.mubr.msk.bf16.mxu1 %vm19825_vm2, %v27867_v28  ;;  %v27871_v15 = vld [vmem:[#allocation76_spill] sm:$0xff] }
 0x428   : > { %14907 = vmatmul.mubr.msk.bf16.gmra.mrb[244].mxu0 %vm19825_vm2, %v27866_v39  ;;  %v27872_v39 = vld [vmem:[#allocation115_spill] sm:$0xff] }
 0x429   : > { %8041 = vmatprep.mubr.bf16.mxu0 %v27868_v2  ;;  %v18646_v2 = vld [vmem:[%s26522_s2 + $0x178] sm:$0xff]  }
 0x42a   : > { %6084 = vmatpush1.bf16.msra.mxu1 %v18646_v2  ;;  %v27878_v2 = vld [vmem:[#allocation66_spill] sm:$0xff] }
 0x42b   : > { %v21865_v29 = vpop.f32.mrb[140].mxu0  ;;  %17168 = vmatprep.subr.bf16.mxu1 %v27166_v41 }
 0x42c   : > { %27869 = vst [vmem:[#allocation254_spill] sm:$0xff] %v21865_v29  ;;  %v6530_v57 = vpop.f32.mrb[141].mxu0 }
 0x42d   : > { %v21867_v49 = vpop.f32.mrb[142].mxu0  ;;  %14443 = vmatmul.mubr.msk.bf16.gmra.mrb[56].mxu1 %vm21370_vm4, %v21531_v10  ;;  %v27873_v57 = vld [vmem:[#allocation64_spill] sm:$0xff] }
 0x42e   : > { %27870 = vst [vmem:[#allocation255_spill] sm:$0xff] %v21867_v49  ;;  %v6533_v32 = vpop.f32.mrb[143].mxu0  ;;  %14448 = vmatprep.mubr.msk.bf16.mxu1 %vm19825_vm2, %v27872_v39  ;;  %v27877_v39 = vld [vmem:[#allocation116_spill] sm:$0xff] }
 0x430   : > { %14912 = vmatmul.mubr.msk.bf16.gmra.mrb[248].mxu0 %vm19825_vm2, %v27871_v15  ;;  %v27876_v15 = vld [vmem:[#allocation65_spill] sm:$0xff] }
 0x431   : > { %8049 = vmatprep.mubr.bf16.mxu0 %v27873_v57 }
 0x433   : > { %v21882_v32 = vpop.f32.mrb[144].mxu0 }
 0x434   : > { %27874 = vst [vmem:[#allocation256_spill] sm:$0xff] %v21882_v32  ;;  %v6538_v49 = vpop.f32.mrb[145].mxu0 }
 0x435   : > { %v21885_v29 = vpop.f32.mrb[146].mxu0  ;;  %14451 = vmatmul.mubr.msk.bf16.gmra.mrb[60].mxu1 %vm21370_vm4, %v21542_v40 }
 0x436   : > { %27875 = vst [vmem:[#allocation257_spill] sm:$0xff] %v21885_v29  ;;  %v6541_v10 = vpop.f32.mrb[147].mxu0  ;;  %14456 = vmatprep.mubr.msk.bf16.mxu1 %vm19825_vm2, %v27877_v39 }
 0x437   : > { %v27881_v10 = vrot.slane %v20317_v4, 1 }
 0x438   : > { %14917 = vmatmul.mubr.msk.bf16.gmra.mrb[252].mxu0 %vm19825_vm2, %v27876_v15  ;;  %v27883_v15 = vld [vmem:[#allocation70_spill] sm:$0xff] }
 0x439   : > { %8057 = vmatprep.mubr.bf16.mxu0 %v27878_v2  ;;  %v21904_v29 = vpack.c.bf16 %v27881_v10, %v27381_v13  ;;  %v27884_v2 = vld [vmem:[#allocation117_spill] sm:$0xff] }
 0x43a   : > { %v27888_v10 = vld [vmem:[#allocation77_spill] sm:$0xff] }
 0x43b   : > { %v21897_v57 = vpop.f32.mrb[148].mxu0  ;;  %27882 = vst [vmem:[#allocation260_spill] sm:$0xff] %v21904_v29 }
 0x43c   : > { %27879 = vst [vmem:[#allocation258_spill] sm:$0xff] %v21897_v57  ;;  %v6546_v49 = vpop.f32.mrb[149].mxu0 }
 0x43d   : > { %v21899_v32 = vpop.f32.mrb[150].mxu0  ;;  %14459 = vmatmul.mubr.msk.bf16.gmra.mrb[64].mxu1 %vm21370_vm4, %v21904_v29  ;;  %v27885_v49 = vld [vmem:[#allocation67_spill] sm:$0xff] }
 0x43e   : > { %27880 = vst [vmem:[#allocation259_spill] sm:$0xff] %v21899_v32  ;;  %v6549_v40 = vpop.f32.mrb[151].mxu0  ;;  %14464 = vmatprep.mubr.msk.bf16.mxu1 %vm19825_vm2, %v27884_v2  ;;  %v27890_v2 = vld [vmem:[#allocation82_spill] sm:$0xff] }
 0x440   : > { %14922 = vmatmul.mubr.msk.bf16.gmra.mrb[0].mxu0 %vm19825_vm2, %v27883_v15  ;;  %v27889_v15 = vld [vmem:[#allocation118_spill] sm:$0xff] }
 0x441   : > { %8065 = vmatprep.mubr.bf16.mxu0 %v27885_v49 }
 0x443   : > { %v21916_v32 = vpop.f32.mrb[152].mxu0 }
 0x444   : > { %27886 = vst [vmem:[#allocation261_spill] sm:$0xff] %v21916_v32  ;;  %v6554_v57 = vpop.f32.mrb[153].mxu0 }
 0x445   : > { %v21918_v13 = vpop.f32.mrb[154].mxu0  ;;  %14467 = vmatmul.mubr.msk.bf16.gmra.mrb[68].mxu1 %vm21370_vm4, %v21580_v6 }
 0x446   : > { %27887 = vst [vmem:[#allocation262_spill] sm:$0xff] %v21918_v13  ;;  %v6557_v40 = vpop.f32.mrb[155].mxu0  ;;  %14472 = vmatprep.mubr.msk.bf16.mxu1 %vm19825_vm2, %v27889_v15  ;;  %v27893_v13 = vld [vmem:[#allocation12_spill] sm:$0xff]  ;;  %v27895_v15 = vld [vmem:[#allocation71_spill] sm:$0xff] }
 0x448   : > { %14927 = vmatmul.mubr.msk.bf16.gmra.mrb[4].mxu0 %vm19825_vm2, %v27888_v10  ;;  %v27894_v10 = vld [vmem:[#allocation119_spill] sm:$0xff] }
 0x449   : > { %8073 = vmatprep.mubr.bf16.mxu0 %v27890_v2 }
 0x44b   : > { %v21930_v49 = vpop.f32.mrb[156].mxu0 }
 0x44c   : > { %27891 = vst [vmem:[#allocation263_spill] sm:$0xff] %v21930_v49  ;;  %v6562_v57 = vpop.f32.mrb[157].mxu0 }
 0x44d   : > { %v21932_v32 = vpop.f32.mrb[158].mxu0  ;;  %14475 = vmatmul.mubr.msk.bf16.gmra.mrb[72].mxu1 %vm21370_vm4, %v21609_v48  ;;  %v18647_v57 = vld [vmem:[%s26522_s2 + $0x2c0] sm:$0xff]  }
 0x44e   : > { %27892 = vst [vmem:[#allocation264_spill] sm:$0xff] %v21932_v32  ;;  %v6565_v40 = vpop.f32.mrb[159].mxu0  ;;  %14480 = vmatprep.mubr.msk.bf16.mxu1 %vm19825_vm2, %v27894_v10  ;;  %8267 = vmatpush1.bf16.msra.mxu0 %v18647_v57  ;;  %v27899_v57 = vld [vmem:[#allocation120_spill] sm:$0xff] }
 0x44f   : > { %8268 = vmatprep.subr.bf16.mxu0 %v27166_v41 }
 0x450   : > { %14932 = vmatmul.mubr.msk.bf16.gmra.mrb[8].mxu0 %vm19825_vm2, %v27893_v13  ;;  %v18648_v13 = vld [vmem:[%s26522_s2 + $0x2c8] sm:$0xff]  }
 0x451   : > { %8081 = vmatprep.mubr.bf16.mxu0 %v27895_v15  ;;  %v27898_v15 = vld [vmem:[#allocation83_spill] sm:$0xff] }
 0x452   : > { %8269 = vmatpush1.bf16.msra.mxu0 %v18648_v13 }
 0x453   : > { %v21947_v2 = vpop.f32.mrb[160].mxu0  ;;  %8270 = vmatprep.subr.bf16.mxu0 %v27166_v41 }
 0x454   : > { %27896 = vst [vmem:[#allocation265_spill] sm:$0xff] %v21947_v2  ;;  %v6570_v40 = vpop.f32.mrb[161].mxu0 }
 0x455   : > { %v21950_v32 = vpop.f32.mrb[162].mxu0  ;;  %14483 = vmatmul.mubr.msk.bf16.gmra.mrb[76].mxu1 %vm21370_vm4, %v21617_v31  ;;  %v27900_v40 = vld [vmem:[#allocation78_spill] sm:$0xff]  ;;  %v27904_v31 = vld [vmem:[#allocation88_spill] sm:$0xff] }
 0x456   : > { %27897 = vst [vmem:[#allocation266_spill] sm:$0xff] %v21950_v32  ;;  %v6573_v49 = vpop.f32.mrb[163].mxu0  ;;  %14488 = vmatprep.mubr.msk.bf16.mxu1 %vm19825_vm2, %v27899_v57 }
 0x457   : > { %v18649_v49 = vld [vmem:[%s26522_s2 + $0x2d0] sm:$0xff]  }
 0x458   : > { %14937 = vmatmul.mubr.msk.bf16.gmra.mrb[12].mxu0 %vm19825_vm2, %v27898_v15  ;;  %v18650_v15 = vld [vmem:[%s26522_s2 + $0x2d8] sm:$0xff]  }
 0x459   : > { %8089 = vmatprep.mubr.bf16.mxu0 %v27900_v40  ;;  %8271 = vmatpush1.bf16.msra.mxu0 %v18649_v49  ;;  %v27903_v40 = vld [vmem:[#allocation125_spill] sm:$0xff]  ;;  %v27905_v49 = vld [vmem:[#allocation122_spill] sm:$0xff] }
 0x45a   : > { %8272 = vmatprep.subr.bf16.mxu0 %v27166_v41 }
 0x45b   : > { %v21969_v32 = vpop.f32.mrb[164].mxu0 }
 0x45c   : > { %27901 = vst [vmem:[#allocation267_spill] sm:$0xff] %v21969_v32  ;;  %v6578_v13 = vpop.f32.mrb[165].mxu0 }
 0x45d   : > { %v21972_v2 = vpop.f32.mrb[166].mxu0  ;;  %14491 = vmatmul.mubr.msk.bf16.gmra.mrb[80].mxu1 %vm21370_vm4, %v27903_v40  ;;  %8273 = vmatpush1.bf16.msra.mxu0 %v18650_v15  ;;  %v27906_v13 = vld [vmem:[#allocation86_spill] sm:$0xff]  ;;  %v18652_v15 = vld [vmem:[%s26522_s2 + $0x2e8] sm:$0xff]  }
 0x45e   : > { %27902 = vst [vmem:[#allocation268_spill] sm:$0xff] %v21972_v2  ;;  %v6581_v57 = vpop.f32.mrb[167].mxu0  ;;  %14496 = vmatprep.mubr.msk.bf16.mxu1 %vm19825_vm2, %v27905_v49  ;;  %8274 = vmatprep.subr.bf16.mxu0 %v27166_v41 }
 0x45f   : > { %v18651_v57 = vld [vmem:[%s26522_s2 + $0x2e0] sm:$0xff]  }
 0x460   : > { %14942 = vmatmul.mubr.msk.bf16.gmra.mrb[16].mxu0 %vm19825_vm2, %v27904_v31 }
 0x461   : > { %8097 = vmatprep.mubr.bf16.mxu0 %v27906_v13  ;;  %8275 = vmatpush1.bf16.msra.mxu0 %v18651_v57  ;;  %v27909_v57 = vld [vmem:[#allocation123_spill] sm:$0xff] }
 0x462   : > { %8276 = vmatprep.subr.bf16.mxu0 %v27166_v41 }
 0x463   : > { %v21991_v2 = vpop.f32.mrb[168].mxu0 }
 0x464   : > { %27907 = vst [vmem:[#allocation269_spill] sm:$0xff] %v21991_v2  ;;  %v21996_v31 = vpop.f32.mrb[169].mxu0 }
 0x465   : > { %v21999_v32 = vpop.f32.mrb[170].mxu0  ;;  %14499 = vmatmul.mubr.msk.bf16.gmra.mrb[84].mxu1 %vm21370_vm4, %v21649_v62  ;;  %8277 = vmatpush1.bf16.msra.mxu0 %v18652_v15  ;;  %v18654_v15 = vld [vmem:[%s26522_s2 + $0x2f8] sm:$0xff]  }
 0x466   : > { %27908 = vst [vmem:[#allocation270_spill] sm:$0xff] %v21999_v32  ;;  %v22001_v13 = vpop.f32.mrb[171].mxu0  ;;  %14504 = vmatprep.mubr.msk.bf16.mxu1 %vm19825_vm2, %v27909_v57  ;;  %8278 = vmatprep.subr.bf16.mxu0 %v27166_v41  ;;  %v18653_v32 = vld [vmem:[%s26522_s2 + $0x2f0] sm:$0xff]  }
 0x468   : > { %14947 = vmatmul.mubr.msk.bf16.gmra.mrb[20].mxu0 %vm19825_vm2, %v27608_v55 }
 0x469   : > { %8105 = vmatprep.mubr.bf16.mxu0 %v20990_v33  ;;  %8279 = vmatpush1.bf16.msra.mxu0 %v18653_v32  ;;  %v27913_v32 = vld [vmem:[#allocation124_spill] sm:$0xff] }
 0x46a   : > { %8280 = vmatprep.subr.bf16.mxu0 %v27166_v41 }
 0x46b   : > { %v22017_v2 = vpop.f32.mrb[172].mxu0 }
 0x46c   : > { %27910 = vst [vmem:[#allocation271_spill] sm:$0xff] %v22017_v2  ;;  %v22022_v55 = vpop.f32.mrb[173].mxu0 }
 0x46d   : > { %v22025_v57 = vpop.f32.mrb[174].mxu0  ;;  %14507 = vmatmul.mubr.msk.bf16.gmra.mrb[88].mxu1 %vm21370_vm4, %v21680_v7  ;;  %8281 = vmatpush1.bf16.msra.mxu0 %v18654_v15  ;;  %v18656_v15 = vld [vmem:[%s26522_s2 + $0x308] sm:$0xff]  }
 0x46e   : > { %27911 = vst [vmem:[#allocation272_spill] sm:$0xff] %v22025_v57  ;;  %v22027_v33 = vpop.f32.mrb[175].mxu0  ;;  %14512 = vmatprep.mubr.msk.bf16.mxu1 %vm19825_vm2, %v27913_v32  ;;  %8282 = vmatprep.subr.bf16.mxu0 %v27166_v41  ;;  %v18655_v57 = vld [vmem:[%s26522_s2 + $0x300] sm:$0xff]  }
 0x46f   : > { %27912 = vst [vmem:[#allocation273_spill] sm:$0xff] %v22027_v33 }
 0x470   : > { %14952 = vmatmul.mubr.msk.bf16.gmra.mrb[24].mxu0 %vm19825_vm2, %v21157_v20 }
 0x471   : > { %8113 = vmatprep.mubr.bf16.mxu0 %v21110_v1  ;;  %8283 = vmatpush1.bf16.msra.mxu0 %v18655_v57  ;;  %v27918_v57 = vld [vmem:[#allocation94_spill] sm:$0xff] }
 0x472   : > { %8284 = vmatprep.subr.bf16.mxu0 %v27166_v41 }
 0x473   : > { %v22043_v2 = vpop.f32.mrb[176].mxu0 }
 0x474   : > { %27914 = vst [vmem:[#allocation274_spill] sm:$0xff] %v22043_v2  ;;  %v22048_v20 = vpop.f32.mrb[177].mxu0 }
 0x475   : > { %27915 = vst [vmem:[#allocation275_spill] sm:$0xff] %v22048_v20  ;;  %v22051_v33 = vpop.f32.mrb[178].mxu0  ;;  %14515 = vmatmul.mubr.msk.bf16.gmra.mrb[92].mxu1 %vm21370_vm4, %v21690_v63  ;;  %8285 = vmatpush1.bf16.msra.mxu0 %v18656_v15  ;;  %v18658_v15 = vld [vmem:[%s26522_s2 + $0x318] sm:$0xff]   ;;  %v27922_v20 = vld [vmem:[#allocation130_spill] sm:$0xff] }
 0x476   : > { %27916 = vst [vmem:[#allocation276_spill] sm:$0xff] %v22051_v33  ;;  %v22053_v1 = vpop.f32.mrb[179].mxu0  ;;  %14520 = vmatprep.mubr.msk.bf16.mxu1 %vm19825_vm2, %v27918_v57  ;;  %8286 = vmatprep.subr.bf16.mxu0 %v27166_v41  ;;  %v18657_v33 = vld [vmem:[%s26522_s2 + $0x310] sm:$0xff]  }
 0x477   : > { %27917 = vst [vmem:[#allocation277_spill] sm:$0xff] %v22053_v1 }
 0x478   : > { %14957 = vmatmul.mubr.msk.bf16.gmra.mrb[28].mxu0 %vm19825_vm2, %v21169_v19 }
 0x479   : > { %8121 = vmatprep.mubr.bf16.mxu0 %v21176_v35  ;;  %8287 = vmatpush1.bf16.msra.mxu0 %v18657_v33  ;;  %v27923_v33 = vld [vmem:[#allocation126_spill] sm:$0xff] }
 0x47a   : > { %8288 = vmatprep.subr.bf16.mxu0 %v27166_v41 }
 0x47b   : > { %v22069_v2 = vpop.f32.mrb[180].mxu0 }
 0x47c   : > { %27919 = vst [vmem:[#allocation278_spill] sm:$0xff] %v22069_v2  ;;  %v22074_v19 = vpop.f32.mrb[181].mxu0 }
 0x47d   : > { %v22077_v1 = vpop.f32.mrb[182].mxu0  ;;  %14523 = vmatmul.mubr.msk.bf16.gmra.mrb[96].mxu1 %vm21370_vm4, %v27922_v20  ;;  %8289 = vmatpush1.bf16.msra.mxu0 %v18658_v15  ;;  %v18660_v15 = vld [vmem:[%s26522_s2 + $0x328] sm:$0xff]  }
 0x47e   : > { %27920 = vst [vmem:[#allocation279_spill] sm:$0xff] %v22077_v1  ;;  %v22079_v35 = vpop.f32.mrb[183].mxu0  ;;  %14528 = vmatprep.mubr.msk.bf16.mxu1 %vm19825_vm2, %v27923_v33  ;;  %8290 = vmatprep.subr.bf16.mxu0 %v27166_v41  ;;  %v18659_v1 = vld [vmem:[%s26522_s2 + $0x320] sm:$0xff]  }
 0x47f   : > { %27921 = vst [vmem:[#allocation280_spill] sm:$0xff] %v22079_v35 }
 0x480   : > { %14962 = vmatmul.mubr.msk.bf16.gmra.mrb[32].mxu0 %vm19825_vm2, %v21200_v30 }
 0x481   : > { %8129 = vmatprep.mubr.bf16.mxu0 %v21207_v38  ;;  %8291 = vmatpush1.bf16.msra.mxu0 %v18659_v1  ;;  %v27928_v1 = vld [vmem:[#allocation127_spill] sm:$0xff] }
 0x482   : > { %8292 = vmatprep.subr.bf16.mxu0 %v27166_v41 }
 0x483   : > { %v22095_v2 = vpop.f32.mrb[184].mxu0 }
 0x484   : > { %27924 = vst [vmem:[#allocation281_spill] sm:$0xff] %v22095_v2  ;;  %v22100_v30 = vpop.f32.mrb[185].mxu0  ;;  %v18661_v2 = vld [vmem:[%s26522_s2 + $0x330] sm:$0xff]  }
 0x485   : > { %27925 = vst [vmem:[#allocation282_spill] sm:$0xff] %v22100_v30  ;;  %v22103_v35 = vpop.f32.mrb[186].mxu0  ;;  %14531 = vmatmul.mubr.msk.bf16.gmra.mrb[100].mxu1 %vm21370_vm4, %v27824_v43  ;;  %8293 = vmatpush1.bf16.msra.mxu0 %v18660_v15  ;;  %v18662_v15 = vld [vmem:[%s26522_s2 + $0x338] sm:$0xff]  }
 0x486   : > { %27926 = vst [vmem:[#allocation283_spill] sm:$0xff] %v22103_v35  ;;  %v22105_v38 = vpop.f32.mrb[187].mxu0  ;;  %14536 = vmatprep.mubr.msk.bf16.mxu1 %vm19825_vm2, %v27928_v1  ;;  %8294 = vmatprep.subr.bf16.mxu0 %v27166_v41 }
 0x487   : > { %27927 = vst [vmem:[#allocation284_spill] sm:$0xff] %v22105_v38 }
 0x488   : > { %14967 = vmatmul.mubr.msk.bf16.gmra.mrb[36].mxu0 %vm19825_vm2, %v21218_v52 }
 0x489   : > { %8137 = vmatprep.mubr.bf16.mxu0 %v21239_v16  ;;  %8295 = vmatpush1.bf16.msra.mxu0 %v18661_v2  ;;  %v27933_v2 = vld [vmem:[#allocation133_spill] sm:$0xff] }
 0x48a   : > { %8296 = vmatprep.subr.bf16.mxu0 %v27166_v41 }
 0x48b   : > { %v22121_v35 = vpop.f32.mrb[188].mxu0 }
 0x48c   : > { %27929 = vst [vmem:[#allocation285_spill] sm:$0xff] %v22121_v35  ;;  %v22126_v52 = vpop.f32.mrb[189].mxu0 }
 0x48d   : > { %27930 = vst [vmem:[#allocation286_spill] sm:$0xff] %v22126_v52  ;;  %v22129_v38 = vpop.f32.mrb[190].mxu0  ;;  %14539 = vmatmul.mubr.msk.bf16.gmra.mrb[104].mxu1 %vm21370_vm4, %v27827_v14  ;;  %8297 = vmatpush1.bf16.msra.mxu0 %v18662_v15  ;;  %v27938_v15 = vld [vmem:[#allocation128_spill] sm:$0xff] }
 0x48e   : > { %27931 = vst [vmem:[#allocation287_spill] sm:$0xff] %v22129_v38  ;;  %v22131_v30 = vpop.f32.mrb[191].mxu0  ;;  %14544 = vmatprep.mubr.msk.bf16.mxu1 %vm19825_vm2, %v27933_v2  ;;  %8555 = vmatprep.subr.bf16.mxu0 %v27166_v41  ;;  %v28001_v52 = vld [vmem:[#allocation28_spill] sm:$0xff] }
 0x48f   : > { %27932 = vst [vmem:[#allocation288_spill] sm:$0xff] %v22131_v30 }
 0x490   : > { %14972 = vmatmul.mubr.msk.bf16.gmra.mrb[40].mxu0 %vm19825_vm2, %v21256_v46 }
 0x491   : > { %8145 = vmatprep.mubr.bf16.mxu0 %v21246_v27 }
 0x493   : > { %v22144_v16 = vpop.f32.mrb[192].mxu0 }
 0x494   : > { %27934 = vst [vmem:[#allocation289_spill] sm:$0xff] %v22144_v16  ;;  %v22146_v38 = vpop.f32.mrb[193].mxu0 }
 0x495   : > { %27935 = vst [vmem:[#allocation290_spill] sm:$0xff] %v22146_v38  ;;  %v22148_v35 = vpop.f32.mrb[194].mxu0  ;;  %14547 = vmatmul.mubr.msk.bf16.gmra.mrb[108].mxu1 %vm21370_vm4, %v27829_v58  ;;  %v27997_v38 = vld [vmem:[#allocation137_spill] sm:$0xff] }
 0x496   : > { %27936 = vst [vmem:[#allocation291_spill] sm:$0xff] %v22148_v35  ;;  %v22150_v30 = vpop.f32.mrb[195].mxu0  ;;  %14552 = vmatprep.mubr.msk.bf16.mxu1 %vm19825_vm2, %v27938_v15 }
 0x497   : > { %27937 = vst [vmem:[#allocation292_spill] sm:$0xff] %v22150_v30  ;;  %v27943_v30 = vld [vmem:[#allocation134_spill] sm:$0xff] }
 0x498   : > { %14977 = vmatmul.mubr.msk.bf16.gmra.mrb[44].mxu0 %vm19825_vm2, %v21262_v26  ;;  %v27944_v26 = vld [vmem:[#allocation129_spill] sm:$0xff] }
 0x499   : > { %8153 = vmatprep.mubr.bf16.mxu0 %v21269_v50 }
 0x49b   : > { %v22162_v27 = vpop.f32.mrb[196].mxu0 }
 0x49c   : > { %27939 = vst [vmem:[#allocation293_spill] sm:$0xff] %v22162_v27  ;;  %v22164_v46 = vpop.f32.mrb[197].mxu0 }
 0x49d   : > { %27940 = vst [vmem:[#allocation294_spill] sm:$0xff] %v22164_v46  ;;  %v22166_v35 = vpop.f32.mrb[198].mxu0  ;;  %14555 = vmatmul.mubr.msk.bf16.gmra.mrb[112].mxu1 %vm21370_vm4, %v27943_v30 }
 0x49e   : > { %27941 = vst [vmem:[#allocation295_spill] sm:$0xff] %v22166_v35  ;;  %v22168_v16 = vpop.f32.mrb[199].mxu0  ;;  %14560 = vmatprep.mubr.msk.bf16.mxu1 %vm19825_vm2, %v27944_v26 }
 0x49f   : > { %27942 = vst [vmem:[#allocation296_spill] sm:$0xff] %v22168_v16 }
 0x4a0   : > { %14982 = vmatmul.mubr.msk.bf16.gmra.mrb[48].mxu0 %vm19825_vm2, %v21280_v21  ;;  %v27949_v21 = vld [vmem:[#allocation131_spill] sm:$0xff] }
 0x4a1   : > { %8161 = vmatprep.mubr.bf16.mxu0 %v21287_v11 }
 0x4a3   : > { %v22180_v50 = vpop.f32.mrb[200].mxu0 }
 0x4a4   : > { %27945 = vst [vmem:[#allocation297_spill] sm:$0xff] %v22180_v50  ;;  %v22182_v27 = vpop.f32.mrb[201].mxu0 }
 0x4a5   : > { %27946 = vst [vmem:[#allocation298_spill] sm:$0xff] %v22182_v27  ;;  %v22184_v35 = vpop.f32.mrb[202].mxu0  ;;  %14563 = vmatmul.mubr.msk.bf16.gmra.mrb[116].mxu1 %vm21370_vm4, %v27834_v37  ;;  %v18826_v27 = vld [vmem:[%s26522_s2 + $0x1b8] sm:$0xff]  }
 0x4a6   : > { %27947 = vst [vmem:[#allocation299_spill] sm:$0xff] %v22184_v35  ;;  %v22186_v16 = vpop.f32.mrb[203].mxu0  ;;  %14568 = vmatprep.mubr.msk.bf16.mxu1 %vm19825_vm2, %v27949_v21 }
 0x4a7   : > { %27948 = vst [vmem:[#allocation300_spill] sm:$0xff] %v22186_v16 }
 0x4a8   : > { %14987 = vmatmul.mubr.msk.bf16.gmra.mrb[52].mxu0 %vm19825_vm2, %v21298_v47  ;;  %v27954_v47 = vld [vmem:[#allocation136_spill] sm:$0xff] }
 0x4a9   : > { %8169 = vmatprep.mubr.bf16.mxu0 %v21319_v61 }
 0x4ab   : > { %v22198_v11 = vpop.f32.mrb[204].mxu0 }
 0x4ac   : > { %27950 = vst [vmem:[#allocation301_spill] sm:$0xff] %v22198_v11  ;;  %v22200_v50 = vpop.f32.mrb[205].mxu0 }
 0x4ad   : > { %27951 = vst [vmem:[#allocation302_spill] sm:$0xff] %v22200_v50  ;;  %v22202_v35 = vpop.f32.mrb[206].mxu0  ;;  %14571 = vmatmul.mubr.msk.bf16.gmra.mrb[120].mxu1 %vm21370_vm4, %v27838_v51 }
 0x4ae   : > { %27952 = vst [vmem:[#allocation303_spill] sm:$0xff] %v22202_v35  ;;  %v22204_v16 = vpop.f32.mrb[207].mxu0  ;;  %14576 = vmatprep.mubr.msk.bf16.mxu1 %vm19825_vm2, %v27954_v47  ;;  %v28021_v47 = vld [vmem:[#allocation159_spill] sm:$0xff] }
 0x4af   : > { %27953 = vst [vmem:[#allocation304_spill] sm:$0xff] %v22204_v16 }
 0x4b0   : > { %14992 = vmatmul.mubr.msk.bf16.gmra.mrb[56].mxu0 %vm19825_vm2, %v21332_v60 }
 0x4b1   : > { %8177 = vmatprep.mubr.bf16.mxu0 %v27722_v23 }
 0x4b3   : > { %v22216_v61 = vpop.f32.mrb[208].mxu0 }
 0x4b4   : > { %27955 = vst [vmem:[#allocation305_spill] sm:$0xff] %v22216_v61  ;;  %v22218_v11 = vpop.f32.mrb[209].mxu0 }
 0x4b5   : > { %27956 = vst [vmem:[#allocation306_spill] sm:$0xff] %v22218_v11  ;;  %v22220_v35 = vpop.f32.mrb[210].mxu0  ;;  %14579 = vmatmul.mubr.msk.bf16.gmra.mrb[124].mxu1 %vm21370_vm4, %v27840_v34  ;;  %v27984_v11 = vld [vmem:[#allocation7_spill] sm:$0xff] }
 0x4b6   : > { %27957 = vst [vmem:[#allocation307_spill] sm:$0xff] %v22220_v35  ;;  %v22222_v16 = vpop.f32.mrb[211].mxu0  ;;  %6085 = vmatprep.mubr.bf16.mxu1 %v27166_v41  ;;  %v22326_v50 = vpack.c.bf16 %v27984_v11, %v27812_v5  ;;  %v27989_v11 = vld [vmem:[#allocation16_spill] sm:$0xff]  ;;  %v18830_v34 = vld [vmem:[%s26522_s2 + $0x1d8] sm:$0xff]  }
 0x4b7   : > { %27958 = vst [vmem:[#allocation308_spill] sm:$0xff] %v22222_v16  ;;  %v27990_v5 = vld [vmem:[#allocation4_spill] sm:$0xff] }
 0x4b8   : > { %14997 = vmatmul.mubr.msk.bf16.gmra.mrb[60].mxu0 %vm19825_vm2, %v27725_v53  ;;  %v18819_v53 = vld [vmem:[%s26522_s2 + $0x180] sm:$0xff]   ;;  %27985 = vst [vmem:[#allocation7_spill] sm:$0xff] %v22326_v50 }
 0x4b9   : > { %8185 = vmatprep.mubr.bf16.mxu0 %v27726_v12 }
 0x4bb   : > { %v22232_v23 = vpop.f32.mrb[212].mxu0 }
 0x4bc   : > { %27959 = vst [vmem:[#allocation309_spill] sm:$0xff] %v22232_v23  ;;  %v22234_v60 = vpop.f32.mrb[213].mxu0  ;;  %v18820_v23 = vld [vmem:[%s26522_s2 + $0x188] sm:$0xff]  }
 0x4bd   : > { %27960 = vst [vmem:[#allocation310_spill] sm:$0xff] %v22234_v60  ;;  %v22236_v61 = vpop.f32.mrb[214].mxu0  ;;  %6086 = vmatmul.mubr.bf16.vlgmr.msra.gmra.mrb[0].mxu1 %v27166_v41 }
 0x4be   : > { %27961 = vst [vmem:[#allocation311_spill] sm:$0xff] %v22236_v61  ;;  %v22238_v35 = vpop.f32.mrb[215].mxu0  ;;  %17184 = vmatpush1.bf16.msra.mxu1 %v18819_v53  ;;  %6093 = vmatprep.mubr.bf16.mxu1 %v27166_v41 }
 0x4bf   : > { %27962 = vst [vmem:[#allocation312_spill] sm:$0xff] %v22238_v35  ;;  %17169 = vmatprep.subr.bf16.mxu1 %v27166_v41  ;;  %v18822_v35 = vld [vmem:[%s26522_s2 + $0x198] sm:$0xff]  }
 0x4c0   : > { %15002 = vmatmul.mubr.msk.bf16.gmra.mrb[64].mxu0 %vm19825_vm2, %v27727_v9 }
 0x4c1   : > { %8193 = vmatprep.mubr.bf16.mxu0 %v27728_v44 }
 0x4c2   : > { %17185 = vmatpush1.bf16.msra.mxu1 %v18820_v23  ;;  %v18821_v23 = vld [vmem:[%s26522_s2 + $0x190] sm:$0xff]  }
 0x4c3   : > { %v22250_v12 = vpop.f32.mrb[216].mxu0  ;;  %17170 = vmatprep.subr.bf16.mxu1 %v27166_v41 }
 0x4c4   : > { %27963 = vst [vmem:[#allocation313_spill] sm:$0xff] %v22250_v12  ;;  %v22252_v61 = vpop.f32.mrb[217].mxu0  ;;  %v27967_v12 = vld [vmem:[#allocation75_spill] sm:$0xff] }
 0x4c5   : > { %27964 = vst [vmem:[#allocation314_spill] sm:$0xff] %v22252_v61  ;;  %v22257_v9 = vpop.f32.mrb[218].mxu0  ;;  %6094 = vmatmul.mubr.bf16.gmra.mrb[4].mxu1 %v27166_v41 }
 0x4c6   : > { %27965 = vst [vmem:[#allocation315_spill] sm:$0xff] %v22257_v9  ;;  %v22260_v53 = vpop.f32.mrb[219].mxu0  ;;  %6101 = vmatprep.mubr.bf16.mxu1 %v27166_v41  ;;  %17186 = vmatpush1.bf16.msra.mxu1 %v18821_v23  ;;  %v27972_v23 = vld [vmem:[#allocation84_spill] sm:$0xff] }
 0x4c7   : > { %27966 = vst [vmem:[#allocation316_spill] sm:$0xff] %v22260_v53  ;;  %17171 = vmatprep.subr.bf16.mxu1 %v27166_v41 }
 0x4c8   : > { %15007 = vmatmul.mubr.msk.bf16.gmra.mrb[68].mxu0 %vm19825_vm2, %v27732_v24 }
 0x4c9   : > { %8201 = vmatprep.mubr.bf16.mxu0 %v27967_v12  ;;  %v27973_v12 = vld [vmem:[#allocation87_spill] sm:$0xff] }
 0x4ca   : > { %17187 = vmatpush1.bf16.msra.mxu1 %v18822_v35 }
 0x4cb   : > { %v22272_v9 = vpop.f32.mrb[220].mxu0  ;;  %17172 = vmatprep.subr.bf16.mxu1 %v27166_v41 }
 0x4cc   : > { %27968 = vst [vmem:[#allocation317_spill] sm:$0xff] %v22272_v9  ;;  %v22274_v53 = vpop.f32.mrb[221].mxu0 }
 0x4cd   : > { %27969 = vst [vmem:[#allocation318_spill] sm:$0xff] %v22274_v53  ;;  %v22276_v61 = vpop.f32.mrb[222].mxu0  ;;  %6102 = vmatmul.mubr.bf16.gmra.mrb[8].mxu1 %v27166_v41 }
 0x4ce   : > { %27970 = vst [vmem:[#allocation319_spill] sm:$0xff] %v22276_v61  ;;  %v22281_v60 = vpop.f32.mrb[223].mxu0  ;;  %6109 = vmatprep.mubr.bf16.mxu1 %v27166_v41  ;;  %v18823_v61 = vld [vmem:[%s26522_s2 + $0x1a0] sm:$0xff]  }
 0x4cf   : > { %27971 = vst [vmem:[#allocation320_spill] sm:$0xff] %v22281_v60  ;;  %17188 = vmatpush1.bf16.msra.mxu1 %v18823_v61  ;;  %v27978_v61 = vld [vmem:[#allocation13_spill] sm:$0xff] }
 0x4d0   : > { %15012 = vmatmul.mubr.msk.bf16.gmra.mrb[72].mxu0 %vm19825_vm2, %v27972_v23  ;;  %17173 = vmatprep.subr.bf16.mxu1 %v27166_v41  ;;  %v18824_v23 = vld [vmem:[%s26522_s2 + $0x1a8] sm:$0xff]  }
 0x4d1   : > { %8209 = vmatprep.mubr.bf16.mxu0 %v27973_v12 }
 0x4d3   : > { %v22294_v35 = vpop.f32.mrb[224].mxu0  ;;  %17189 = vmatpush1.bf16.msra.mxu1 %v18824_v23  ;;  %v18825_v23 = vld [vmem:[%s26522_s2 + $0x1b0] sm:$0xff]  }
 0x4d4   : > { %27974 = vst [vmem:[#allocation321_spill] sm:$0xff] %v22294_v35  ;;  %v22296_v9 = vpop.f32.mrb[225].mxu0  ;;  %17174 = vmatprep.subr.bf16.mxu1 %v27166_v41  ;;  %v27979_v35 = vld [vmem:[#allocation132_spill] sm:$0xff] }
 0x4d5   : > { %27975 = vst [vmem:[#allocation322_spill] sm:$0xff] %v22296_v9  ;;  %v22298_v60 = vpop.f32.mrb[226].mxu0  ;;  %6110 = vmatmul.mubr.bf16.gmra.mrb[12].mxu1 %v27166_v41 }
 0x4d6   : > { %27976 = vst [vmem:[#allocation323_spill] sm:$0xff] %v22298_v60  ;;  %v22303_v53 = vpop.f32.mrb[227].mxu0  ;;  %14582 = vmatprep.mubr.msk.bf16.mxu1 %vm21370_vm4, %v27979_v35  ;;  %v27980_v60 = vld [vmem:[#allocation90_spill] sm:$0xff] }
 0x4d7   : > { %27977 = vst [vmem:[#allocation324_spill] sm:$0xff] %v22303_v53  ;;  %17190 = vmatpush1.bf16.msra.mxu1 %v18825_v23  ;;  %v27987_v23 = vld [vmem:[#allocation18_spill] sm:$0xff] }
 0x4d8   : > { %15017 = vmatmul.mubr.msk.bf16.gmra.mrb[76].mxu0 %vm19825_vm2, %v27978_v61  ;;  %17175 = vmatprep.subr.bf16.mxu1 %v27166_v41 }
 0x4d9   : > { %8217 = vmatprep.mubr.bf16.mxu0 %v27980_v60 }
 0x4db   : > { %v22318_v53 = vpop.f32.mrb[228].mxu0  ;;  %17191 = vmatpush1.bf16.msra.mxu1 %v18826_v27  ;;  %v18827_v27 = vld [vmem:[%s26522_s2 + $0x1c0] sm:$0xff]  }
 0x4dc   : > { %27981 = vst [vmem:[#allocation325_spill] sm:$0xff] %v22318_v53  ;;  %v22320_v9 = vpop.f32.mrb[229].mxu0  ;;  %17176 = vmatprep.subr.bf16.mxu1 %v27166_v41  ;;  %v27991_v53 = vld [vmem:[#allocation6_spill] sm:$0xff] }
 0x4dd   : > { %27982 = vst [vmem:[#allocation326_spill] sm:$0xff] %v22320_v9  ;;  %v22322_v16 = vpop.f32.mrb[230].mxu0  ;;  %6118 = vmatmul.mubr.bf16.gmra.mrb[16].mxu1 %v22326_v50  ;;  %v18828_v9 = vld [vmem:[%s26522_s2 + $0x1c8] sm:$0xff]   ;;  %v27994_v50 = vld [vmem:[#allocation23_spill] sm:$0xff] }
 0x4de   : > { %27983 = vst [vmem:[#allocation327_spill] sm:$0xff] %v22322_v16  ;;  %v22331_v35 = vpop.f32.mrb[231].mxu0  ;;  %v27988_v16 = vld [vmem:[#allocation135_spill] sm:$0xff] }
 0x4df   : > { %27986 = vst [vmem:[#allocation328_spill] sm:$0xff] %v22331_v35  ;;  %14585 = vmatprep.mubr.msk.bf16.mxu1 %vm21370_vm4, %v27988_v16  ;;  %17192 = vmatpush1.bf16.msra.mxu1 %v18827_v27  ;;  %v22348_v35 = vpack.c.bf16 %v27991_v53, %v27990_v5  ;;  %v27993_v16 = vmov 0.0   ;;  %v27996_v27 = vld [vmem:[#allocation95_spill] sm:$0xff]  ;;  %v27998_v53 = vld [vmem:[#allocation8_spill] sm:$0xff] }
 0x4e0   : > { %15022 = vmatmul.mubr.msk.bf16.gmra.mrb[80].mxu0 %vm19825_vm2, %v27987_v23  ;;  %17177 = vmatprep.subr.bf16.mxu1 %v27166_v41  ;;  %v22357_v46 = vpack.c.bf16 %v27994_v50, %v27993_v16  ;;  %v27999_v5 = vld [vmem:[#allocation32_spill] sm:$0xff] }
 0x4e1   : > { %8225 = vmatprep.mubr.bf16.mxu0 %v27989_v11  ;;  %27992 = vst [vmem:[#allocation4_spill] sm:$0xff] %v22348_v35 }
 0x4e2   : > { %27995 = vst [vmem:[#allocation6_spill] sm:$0xff] %v22357_v46 }
 0x4e3   : > { %17193 = vmatpush1.bf16.msra.mxu1 %v18828_v9  ;;  %v18829_v9 = vld [vmem:[%s26522_s2 + $0x1d0] sm:$0xff]  }
 0x4e4   : > { %17178 = vmatprep.subr.bf16.mxu1 %v27166_v41 }
 0x4e5   : > { %6126 = vmatmul.mubr.bf16.gmra.mrb[20].mxu1 %v22348_v35  ;;  %v22372_v35 = vpack.c.bf16 %v27999_v5, %v27998_v53  ;;  %v28005_v53 = vld [vmem:[#allocation138_spill] sm:$0xff] }
 0x4e6   : > { %14588 = vmatprep.mubr.msk.bf16.mxu1 %vm21370_vm4, %v27997_v38  ;;  %v28002_v38 = vrot.slane %v27994_v50, 7  ;;  %v18831_v50 = vld [vmem:[%s26522_s2 + $0x1e0] sm:$0xff]  }
 0x4e7   : > { %17194 = vmatpush1.bf16.msra.mxu1 %v18829_v9  ;;  %28000 = vst [vmem:[#allocation23_spill] sm:$0xff] %v22372_v35  ;;  %v28004_v9 = vld [vmem:[#allocation21_spill] sm:$0xff] }
 0x4e8   : > { %15027 = vmatmul.mubr.msk.bf16.gmra.mrb[84].mxu0 %vm19825_vm2, %v27996_v27  ;;  %17179 = vmatprep.subr.bf16.mxu1 %v27166_v41 }
 0x4e9   : > { %8233 = vmatprep.mubr.bf16.mxu0 %v22357_v46  ;;  %v22380_v46 = vpack.c.bf16 %v28002_v38, %v28001_v52  ;;  %v28006_v38 = vld [vmem:[#allocation33_spill] sm:$0xff] }
 0x4eb   : > { %17195 = vmatpush1.bf16.msra.mxu1 %v18830_v34  ;;  %28003 = vst [vmem:[#allocation8_spill] sm:$0xff] %v22380_v46  ;;  %v28007_v34 = vld [vmem:[#allocation55_spill] sm:$0xff] }
 0x4ec   : > { %17180 = vmatprep.subr.bf16.mxu1 %v27166_v41  ;;  %v22397_v5 = vpack.c.bf16 %v28007_v34, %v28006_v38  ;;  %v18833_v38 = vld [vmem:[%s26522_s2 + $0x1f0] sm:$0xff]  }
 0x4ed   : > { %6134 = vmatmul.mubr.bf16.gmra.mrb[24].mxu1 %v22372_v35  ;;  %v28013_v34 = vld [vmem:[#allocation34_spill] sm:$0xff]  ;;  %v28018_v35 = vld [vmem:[#allocation35_spill] sm:$0xff] }
 0x4ee   : > { %14591 = vmatprep.mubr.msk.bf16.mxu1 %vm21370_vm4, %v28004_v9  ;;  %28008 = vst [vmem:[#allocation32_spill] sm:$0xff] %v22397_v5  ;;  %v28011_v9 = vld [vmem:[#allocation24_spill] sm:$0xff] }
 0x4ef   : > { %17196 = vmatpush1.bf16.msra.mxu1 %v18831_v50  ;;  %v28010_v50 = vld [vmem:[#allocation20_spill] sm:$0xff] }
 0x4f0   : > { %15032 = vmatmul.mubr.msk.bf16.gmra.mrb[88].mxu0 %vm19825_vm2, %v22380_v46  ;;  %17181 = vmatprep.subr.bf16.mxu1 %v27166_v41  ;;  %v18832_v46 = vld [vmem:[%s26522_s2 + $0x1e8] sm:$0xff]  }
 0x4f1   : > { %8241 = vmatprep.mubr.bf16.mxu0 %v28005_v53  ;;  %v28009_v53 = vld [vmem:[#allocation142_spill] sm:$0xff] }
 0x4f3   : > { %17197 = vmatpush1.bf16.msra.mxu1 %v18832_v46  ;;  %v28012_v46 = vld [vmem:[#allocation63_spill] sm:$0xff] }
 0x4f4   : > { %17182 = vmatprep.subr.bf16.mxu1 %v27166_v41 }
 0x4f5   : > { %6142 = vmatmul.mubr.bf16.gmra.mrb[28].mxu1 %v22397_v5  ;;  %v22417_v5 = vpack.c.bf16 %v28013_v34, %v28012_v46  ;;  %v28019_v46 = vld [vmem:[#allocation36_spill] sm:$0xff] }
 0x4f6   : > { %14594 = vmatprep.mubr.msk.bf16.mxu1 %vm21370_vm4, %v28010_v50  ;;  %v28015_v50 = vld [vmem:[#allocation147_spill] sm:$0xff]  ;;  %v22432_v34 = vpack.c.bf16 %v28019_v46, %v28018_v35  ;;  %v28026_v35 = vld [vmem:[#allocation150_spill] sm:$0xff] }
 0x4f7   : > { %17198 = vmatpush1.bf16.msra.mxu1 %v18833_v38  ;;  %28014 = vst [vmem:[#allocation33_spill] sm:$0xff] %v22417_v5  ;;  %v28017_v38 = vld [vmem:[#allocation154_spill] sm:$0xff]  ;;  %v28027_v46 = vld [vmem:[#allocation39_spill] sm:$0xff] }
 0x4f8   : > { %15037 = vmatmul.mubr.msk.bf16.gmra.mrb[92].mxu0 %vm19825_vm2, %v28009_v53  ;;  %17183 = vmatprep.subr.bf16.mxu1 %v27166_v41  ;;  %v18834_v53 = vld [vmem:[%s26522_s2 + $0x1f8] sm:$0xff]   ;;  %28020 = vst [vmem:[#allocation55_spill] sm:$0xff] %v22432_v34 }
 0x4f9   : > { %8249 = vmatprep.mubr.bf16.mxu0 %v28011_v9  ;;  %v28016_v9 = vld [vmem:[#allocation145_spill] sm:$0xff] }
 0x4fb   : > { %17199 = vmatpush1.bf16.msra.mxu1 %v18834_v53  ;;  %v28022_v53 = vld [vmem:[#allocation146_spill] sm:$0xff] }
 0x4fd   : > { %6150 = vmatmul.mubr.bf16.gmra.mrb[32].mxu1 %v22417_v5 }
 0x4fe   : > { %14597 = vmatprep.mubr.msk.bf16.mxu1 %vm21370_vm4, %v28016_v9 }
 0x500   : > { %15042 = vmatmul.mubr.msk.bf16.gmra.mrb[96].mxu0 %vm19825_vm2, %v28015_v50  ;;  %v28023_v50 = vld [vmem:[#allocation37_spill] sm:$0xff] }
 0x501   : > { %8257 = vmatprep.mubr.bf16.mxu0 %v28017_v38  ;;  %v28024_v38 = vld [vmem:[#allocation38_spill] sm:$0xff] }
 0x502   : > { %v22446_v9 = vpack.c.bf16 %v28024_v38, %v28023_v50  ;;  %v28030_v50 = vld [vmem:[#allocation151_spill] sm:$0xff] }
 0x503   : > { %v28033_v38 = vld [vmem:[#allocation155_spill] sm:$0xff] }
 0x504   : > { %28025 = vst [vmem:[#allocation63_spill] sm:$0xff] %v22446_v9 }
 0x505   : > { %6158 = vmatmul.mubr.bf16.gmra.mrb[36].mxu1 %v22432_v34 }
 0x506   : > { %14600 = vmatprep.mubr.msk.bf16.mxu1 %vm21370_vm4, %v28022_v53 }
 0x508   : > { %15047 = vmatmul.mubr.msk.bf16.gmra.mrb[100].mxu0 %vm19825_vm2, %v28021_v47 }
 0x509   : > { %15052 = vmatprep.mubr.msk.bf16.mxu0 %vm19825_vm2, %v27809_v25  ;;  %v28028_v25 = vld [vmem:[#allocation69_spill] sm:$0xff] }
 0x50a   : > { %v22460_v47 = vpack.c.bf16 %v28028_v25, %v28027_v46  ;;  %v28034_v46 = vld [vmem:[#allocation41_spill] sm:$0xff] }
 0x50c   : > { %28029 = vst [vmem:[#allocation34_spill] sm:$0xff] %v22460_v47 }
 0x50d   : > { %6166 = vmatmul.mubr.bf16.gmra.mrb[40].mxu1 %v22446_v9 }
 0x50e   : > { %14603 = vmatprep.mubr.msk.bf16.mxu1 %vm21370_vm4, %v28026_v35  ;;  %v28103_v35 = vld [vmem:[#allocation180_spill] sm:$0xff] }
 0x510   : > { %15055 = vmatmul.mubr.msk.bf16.vlgmr.msra.gmra.mrb[232].mxu0 %vm21370_vm4, %v21671_v0  ;;  %v28031_v0 = vld [vmem:[#allocation40_spill] sm:$0xff] }
 0x511   : > { %15060 = vmatprep.mubr.msk.bf16.mxu0 %vm19825_vm2, %v27819_v3  ;;  %v22474_v3 = vpack.c.bf16 %v28031_v0, %v27858_v18  ;;  %v28037_v18 = vld [vmem:[#allocation220_spill] sm:$0xff] }
 0x512   : > { %v28038_v0 = vld [vmem:[#allocation156_spill] sm:$0xff] }
 0x513   : > { %28032 = vst [vmem:[#allocation35_spill] sm:$0xff] %v22474_v3 }
 0x515   : > { %6174 = vmatmul.mubr.bf16.gmra.mrb[44].mxu1 %v22460_v47 }
 0x516   : > { %14606 = vmatprep.mubr.msk.bf16.mxu1 %vm21370_vm4, %v28030_v50 }
 0x518   : > { %15063 = vmatmul.mubr.msk.bf16.gmra.mrb[236].mxu0 %vm21370_vm4, %v21382_v36 }
 0x519   : > { %15068 = vmatprep.mubr.msk.bf16.mxu0 %vm19825_vm2, %v27823_v42  ;;  %v28035_v42 = vld [vmem:[#allocation42_spill] sm:$0xff] }
 0x51a   : > { %v22488_v25 = vpack.c.bf16 %v28035_v42, %v28034_v46  ;;  %v28043_v46 = vld [vmem:[#allocation106_spill] sm:$0xff]  ;;  %v28044_v42 = vld [vmem:[#allocation157_spill] sm:$0xff] }
 0x51c   : > { %28036 = vst [vmem:[#allocation36_spill] sm:$0xff] %v22488_v25 }
 0x51d   : > { %6182 = vmatmul.mubr.bf16.gmra.mrb[48].mxu1 %v22474_v3  ;;  %v28039_v3 = vld [vmem:[#allocation17_spill] sm:$0xff] }
 0x51e   : > { %14609 = vmatprep.mubr.msk.bf16.mxu1 %vm21370_vm4, %v28033_v38  ;;  %v28040_v38 = vld [vmem:[#allocation44_spill] sm:$0xff] }
 0x520   : > { %15071 = vmatmul.mubr.msk.bf16.gmra.mrb[240].mxu0 %vm21370_vm4, %v21405_v22 }
 0x521   : > { %15076 = vmatprep.mubr.msk.bf16.mxu0 %vm19825_vm2, %v27828_v59  ;;  %v28041_v59 = vld [vmem:[#allocation45_spill] sm:$0xff] }
 0x522   : > { %v22502_v50 = vpack.c.bf16 %v28041_v59, %v28040_v38  ;;  %v28049_v38 = vld [vmem:[#allocation161_spill] sm:$0xff]  ;;  %v28050_v59 = vld [vmem:[#allocation107_spill] sm:$0xff] }
 0x524   : > { %28042 = vst [vmem:[#allocation37_spill] sm:$0xff] %v22502_v50 }
 0x525   : > { %6190 = vmatmul.mubr.bf16.gmra.mrb[52].mxu1 %v22488_v25  ;;  %v28045_v25 = vld [vmem:[#allocation104_spill] sm:$0xff] }
 0x526   : > { %14612 = vmatprep.mubr.msk.bf16.mxu1 %vm21370_vm4, %v28038_v0  ;;  %v28046_v0 = vld [vmem:[#allocation46_spill] sm:$0xff] }
 0x528   : > { %15079 = vmatmul.mubr.msk.bf16.gmra.mrb[244].mxu0 %vm21370_vm4, %v28037_v18 }
 0x529   : > { %15084 = vmatprep.mubr.msk.bf16.mxu0 %vm19825_vm2, %v28039_v3  ;;  %v28047_v3 = vld [vmem:[#allocation89_spill] sm:$0xff] }
 0x52a   : > { %v22516_v47 = vpack.c.bf16 %v28047_v3, %v28046_v0  ;;  %v28053_v3 = vld [vmem:[#allocation222_spill] sm:$0xff]  ;;  %v28054_v0 = vld [vmem:[#allocation163_spill] sm:$0xff] }
 0x52c   : > { %28048 = vst [vmem:[#allocation38_spill] sm:$0xff] %v22516_v47 }
 0x52d   : > { %6198 = vmatmul.mubr.bf16.gmra.mrb[56].mxu1 %v22502_v50 }
 0x52e   : > { %14615 = vmatprep.mubr.msk.bf16.mxu1 %vm21370_vm4, %v28044_v42  ;;  %v28062_v42 = vld [vmem:[#allocation52_spill] sm:$0xff] }
 0x530   : > { %15087 = vmatmul.mubr.msk.bf16.gmra.mrb[248].mxu0 %vm21370_vm4, %v28043_v46 }
 0x531   : > { %15092 = vmatprep.mubr.msk.bf16.mxu0 %vm19825_vm2, %v28045_v25  ;;  %v28051_v25 = vld [vmem:[#allocation48_spill] sm:$0xff] }
 0x532   : > { %v22530_v46 = vpack.c.bf16 %v28051_v25, %v20317_v4  ;;  %v28056_v4 = vld [vmem:[#allocation49_spill] sm:$0xff]  ;;  %v28057_v25 = vld [vmem:[#allocation50_spill] sm:$0xff] }
 0x534   : > { %28052 = vst [vmem:[#allocation39_spill] sm:$0xff] %v22530_v46 }
 0x535   : > { %6206 = vmatmul.mubr.bf16.gmra.mrb[60].mxu1 %v22516_v47  ;;  %v28059_v47 = vld [vmem:[#allocation223_spill] sm:$0xff] }
 0x536   : > { %14618 = vmatprep.mubr.msk.bf16.mxu1 %vm21370_vm4, %v28049_v38  ;;  %v22542_v38 = vld [vmem:[%s26522_s2 + $0x440] sm:$0xff]  }
 0x537   : > { %16928 = vmatprep.subr.bf16.mxu1 %v22542_v38 }
 0x538   : > { %15095 = vmatmul.mubr.msk.bf16.gmra.mrb[252].mxu0 %vm21370_vm4, %v21444_v8 }
 0x539   : > { %15100 = vmatprep.mubr.msk.bf16.mxu0 %vm19825_vm2, %v28050_v59  ;;  %v28055_v59 = vld [vmem:[#allocation108_spill] sm:$0xff] }
 0x53d   : > { %6214 = vmatmul.mubr.bf16.gmra.mrb[64].mxu1 %v22530_v46  ;;  %v22550_v46 = vpack.c.bf16 %v28057_v25, %v28056_v4  ;;  %v28064_v4 = vld [vmem:[#allocation73_spill] sm:$0xff]  ;;  %v28065_v25 = vld [vmem:[#allocation166_spill] sm:$0xff] }
 0x53e   : > { %14621 = vmatprep.mubr.msk.bf16.mxu1 %vm21370_vm4, %v28054_v0  ;;  %v28060_v0 = vld [vmem:[#allocation164_spill] sm:$0xff] }
 0x53f   : > { %28058 = vst [vmem:[#allocation69_spill] sm:$0xff] %v22550_v46 }
 0x540   : > { %15103 = vmatmul.mubr.msk.bf16.gmra.mrb[0].mxu0 %vm21370_vm4, %v28053_v3 }
 0x541   : > { %15108 = vmatprep.mubr.msk.bf16.mxu0 %vm19825_vm2, %v28055_v59  ;;  %v28061_v59 = vld [vmem:[#allocation51_spill] sm:$0xff] }
 0x542   : > { %v22564_v50 = vpack.c.bf16 %v28062_v42, %v28061_v59  ;;  %v18668_v42 = vld [vmem:[%s26522_s2 + $0x348] sm:$0xff]  }
 0x543   : > { %v28067_v59 = vld [vmem:[#allocation53_spill] sm:$0xff] }
 0x544   : > { %28063 = vst [vmem:[#allocation40_spill] sm:$0xff] %v22564_v50 }
 0x545   : > { %6222 = vmatmul.mubr.bf16.gmra.mrb[68].mxu1 %v22550_v46  ;;  %v28066_v46 = vld [vmem:[#allocation113_spill] sm:$0xff] }
 0x546   : > { %14624 = vmatprep.mubr.msk.bf16.mxu1 %vm21370_vm4, %v28060_v0 }
 0x548   : > { %15111 = vmatmul.mubr.msk.bf16.gmra.mrb[4].mxu0 %vm21370_vm4, %v28059_v47 }
 0x549   : > { %15116 = vmatprep.mubr.msk.bf16.mxu0 %vm19825_vm2, %v27854_v17  ;;  %v18666_v17 = vld [vmem:[%s26522_s2 + $0x340] sm:$0xff]  }
 0x54a   : > { %8556 = vmatpush1.bf16.msra.mxu0 %v18666_v17  ;;  %v18670_v17 = vld [vmem:[%s26522_s2 + $0x350] sm:$0xff]  }
 0x54b   : > { %8557 = vmatprep.subr.bf16.mxu0 %v27166_v41 }
 0x54d   : > { %6230 = vmatmul.mubr.bf16.gmra.mrb[72].mxu1 %v22564_v50 }
 0x54e   : > { %14627 = vmatprep.mubr.msk.bf16.mxu1 %vm21370_vm4, %v28065_v25  ;;  %8558 = vmatpush1.bf16.msra.mxu0 %v18668_v42  ;;  %v28071_v42 = vld [vmem:[#allocation92_spill] sm:$0xff]  ;;  %v28081_v25 = vld [vmem:[#allocation171_spill] sm:$0xff] }
 0x54f   : > { %8559 = vmatprep.subr.bf16.mxu0 %v27166_v41 }
 0x550   : > { %15119 = vmatmul.mubr.msk.bf16.gmra.mrb[8].mxu0 %vm21370_vm4, %v28064_v4  ;;  %v28068_v4 = vld [vmem:[#allocation91_spill] sm:$0xff] }
 0x551   : > { %15124 = vmatprep.mubr.msk.bf16.mxu0 %vm19825_vm2, %v28066_v46  ;;  %v22585_v50 = vpack.c.bf16 %v28068_v4, %v28067_v59  ;;  %v28070_v46 = vld [vmem:[#allocation168_spill] sm:$0xff]  ;;  %v18671_v4 = vld [vmem:[%s26522_s2 + $0x358] sm:$0xff]   ;;  %v28072_v59 = vld [vmem:[#allocation54_spill] sm:$0xff] }
 0x552   : > { %8560 = vmatpush1.bf16.msra.mxu0 %v18670_v17  ;;  %v28076_v17 = vld [vmem:[#allocation115_spill] sm:$0xff] }
 0x553   : > { %28069 = vst [vmem:[#allocation41_spill] sm:$0xff] %v22585_v50  ;;  %8561 = vmatprep.subr.bf16.mxu0 %v27166_v41 }
 0x555   : > { %6238 = vmatmul.mubr.bf16.gmra.mrb[76].mxu1 %v22585_v50  ;;  %v28075_v50 = vld [vmem:[#allocation169_spill] sm:$0xff] }
 0x556   : > { %14630 = vmatprep.mubr.msk.bf16.mxu1 %vm21370_vm4, %v28070_v46  ;;  %v22607_v46 = vpack.c.bf16 %v28072_v59, %v28071_v42  ;;  %8562 = vmatpush1.bf16.msra.mxu0 %v18671_v4  ;;  %v18673_v42 = vld [vmem:[%s26522_s2 + $0x360] sm:$0xff]   ;;  %v18675_v4 = vld [vmem:[%s26522_s2 + $0x368] sm:$0xff]  }
 0x557   : > { %8563 = vmatprep.subr.bf16.mxu0 %v27166_v41  ;;  %v28077_v59 = vld [vmem:[#allocation56_spill] sm:$0xff] }
 0x558   : > { %15127 = vmatmul.mubr.msk.bf16.gmra.mrb[12].mxu0 %vm21370_vm4, %v21507_v54  ;;  %28073 = vst [vmem:[#allocation42_spill] sm:$0xff] %v22607_v46 }
 0x559   : > { %15132 = vmatprep.mubr.msk.bf16.mxu0 %vm19825_vm2, %v27867_v28  ;;  %v28074_v28 = vld [vmem:[#allocation229_spill] sm:$0xff] }
 0x55a   : > { %8564 = vmatpush1.bf16.msra.mxu0 %v18673_v42  ;;  %v18678_v42 = vld [vmem:[%s26522_s2 + $0x378] sm:$0xff]  }
 0x55b   : > { %8565 = vmatprep.subr.bf16.mxu0 %v27166_v41 }
 0x55d   : > { %6246 = vmatmul.mubr.bf16.gmra.mrb[80].mxu1 %v22607_v46  ;;  %v28078_v46 = vld [vmem:[#allocation57_spill] sm:$0xff] }
 0x55e   : > { %14633 = vmatprep.mubr.msk.bf16.mxu1 %vm21370_vm4, %v28075_v50  ;;  %v22629_v50 = vpack.c.bf16 %v28078_v46, %v28077_v59  ;;  %8566 = vmatpush1.bf16.msra.mxu0 %v18675_v4  ;;  %v18676_v46 = vld [vmem:[%s26522_s2 + $0x370] sm:$0xff]   ;;  %v28083_v59 = vld [vmem:[#allocation59_spill] sm:$0xff] }
 0x55f   : > { %8567 = vmatprep.subr.bf16.mxu0 %v27166_v41  ;;  %v28082_v4 = vld [vmem:[#allocation58_spill] sm:$0xff] }
 0x560   : > { %15135 = vmatmul.mubr.msk.bf16.gmra.mrb[16].mxu0 %vm21370_vm4, %v28074_v28  ;;  %28079 = vst [vmem:[#allocation220_spill] sm:$0xff] %v22629_v50 }
 0x561   : > { %15140 = vmatprep.mubr.msk.bf16.mxu0 %vm19825_vm2, %v28076_v17  ;;  %v28080_v17 = vld [vmem:[#allocation230_spill] sm:$0xff] }
 0x562   : > { %8568 = vmatpush1.bf16.msra.mxu0 %v18676_v46  ;;  %v28086_v46 = vld [vmem:[#allocation117_spill] sm:$0xff] }
 0x563   : > { %8569 = vmatprep.subr.bf16.mxu0 %v27166_v41 }
 0x565   : > { %6254 = vmatmul.mubr.bf16.gmra.mrb[84].mxu1 %v22629_v50 }
 0x566   : > { %14636 = vmatprep.mubr.msk.bf16.mxu1 %vm21370_vm4, %v28081_v25  ;;  %v22651_v25 = vpack.c.bf16 %v28083_v59, %v28082_v4  ;;  %8570 = vmatpush1.bf16.msra.mxu0 %v18678_v42  ;;  %v18679_v4 = vld [vmem:[%s26522_s2 + $0x380] sm:$0xff]   ;;  %v18681_v42 = vld [vmem:[%s26522_s2 + $0x388] sm:$0xff]  }
 0x567   : > { %8571 = vmatprep.subr.bf16.mxu0 %v27166_v41  ;;  %v28087_v59 = vld [vmem:[#allocation60_spill] sm:$0xff] }
 0x568   : > { %15143 = vmatmul.mubr.msk.bf16.gmra.mrb[20].mxu0 %vm21370_vm4, %v28080_v17  ;;  %28084 = vst [vmem:[#allocation44_spill] sm:$0xff] %v22651_v25 }
 0x569   : > { %15148 = vmatprep.mubr.msk.bf16.mxu0 %vm19825_vm2, %v27877_v39  ;;  %v28085_v39 = vld [vmem:[#allocation172_spill] sm:$0xff] }
 0x56a   : > { %8572 = vmatpush1.bf16.msra.mxu0 %v18679_v4  ;;  %v28091_v4 = vld [vmem:[#allocation118_spill] sm:$0xff] }
 0x56b   : > { %8573 = vmatprep.subr.bf16.mxu0 %v27166_v41 }
 0x56d   : > { %6262 = vmatmul.mubr.bf16.gmra.mrb[88].mxu1 %v22651_v25 }
 0x56e   : > { %14639 = vmatprep.mubr.msk.bf16.mxu1 %vm21370_vm4, %v28085_v39  ;;  %8574 = vmatpush1.bf16.msra.mxu0 %v18681_v42  ;;  %v18684_v42 = vld [vmem:[%s26522_s2 + $0x398] sm:$0xff]  }
 0x56f   : > { %8575 = vmatprep.subr.bf16.mxu0 %v27166_v41 }
 0x570   : > { %15151 = vmatmul.mubr.msk.bf16.gmra.mrb[24].mxu0 %vm21370_vm4, %v21904_v29  ;;  %v28088_v29 = vld [vmem:[#allocation93_spill] sm:$0xff] }
 0x571   : > { %15156 = vmatprep.mubr.msk.bf16.mxu0 %vm19825_vm2, %v28086_v46  ;;  %v22673_v39 = vpack.c.bf16 %v28088_v29, %v28087_v59  ;;  %v28090_v46 = vld [vmem:[#allocation173_spill] sm:$0xff]  ;;  %v18682_v29 = vld [vmem:[%s26522_s2 + $0x390] sm:$0xff]  }
 0x572   : > { %8576 = vmatpush1.bf16.msra.mxu0 %v18682_v29  ;;  %v28092_v59 = vld [vmem:[#allocation174_spill] sm:$0xff]  ;;  %v18685_v29 = vld [vmem:[%s26522_s2 + $0x3a0] sm:$0xff]  }
 0x573   : > { %28089 = vst [vmem:[#allocation45_spill] sm:$0xff] %v22673_v39  ;;  %8577 = vmatprep.subr.bf16.mxu0 %v27166_v41 }
 0x575   : > { %6270 = vmatmul.mubr.bf16.gmra.mrb[92].mxu1 %v22673_v39  ;;  %v28100_v39 = vld [vmem:[#allocation22_spill] sm:$0xff] }
 0x576   : > { %14642 = vmatprep.mubr.msk.bf16.mxu1 %vm21370_vm4, %v28090_v46  ;;  %8578 = vmatpush1.bf16.msra.mxu0 %v18684_v42  ;;  %v18687_v42 = vld [vmem:[%s26522_s2 + $0x3a8] sm:$0xff]   ;;  %v28097_v46 = vld [vmem:[#allocation120_spill] sm:$0xff] }
 0x577   : > { %8579 = vmatprep.subr.bf16.mxu0 %v27166_v41 }
 0x578   : > { %15159 = vmatmul.mubr.msk.bf16.gmra.mrb[28].mxu0 %vm21370_vm4, %v21580_v6 }
 0x579   : > { %15164 = vmatprep.mubr.msk.bf16.mxu0 %vm19825_vm2, %v28091_v4  ;;  %v28093_v4 = vld [vmem:[#allocation175_spill] sm:$0xff] }
 0x57a   : > { %8580 = vmatpush1.bf16.msra.mxu0 %v18685_v29  ;;  %v18688_v29 = vld [vmem:[%s26522_s2 + $0x3b0] sm:$0xff]  }
 0x57b   : > { %8581 = vmatprep.subr.bf16.mxu0 %v27166_v41 }
 0x57d   : > { %6278 = vmatmul.mubr.bf16.gmra.mrb[96].mxu1 %v28092_v59  ;;  %v28094_v59 = vld [vmem:[#allocation176_spill] sm:$0xff] }
 0x57e   : > { %14645 = vmatprep.mubr.msk.bf16.mxu1 %vm21370_vm4, %v28093_v4  ;;  %8582 = vmatpush1.bf16.msra.mxu0 %v18687_v42  ;;  %v28095_v4 = vld [vmem:[#allocation236_spill] sm:$0xff]  ;;  %v18690_v42 = vld [vmem:[%s26522_s2 + $0x3b8] sm:$0xff]  }
 0x57f   : > { %8583 = vmatprep.subr.bf16.mxu0 %v27166_v41 }
 0x580   : > { %15167 = vmatmul.mubr.msk.bf16.gmra.mrb[32].mxu0 %vm21370_vm4, %v21609_v48 }
 0x581   : > { %15172 = vmatprep.mubr.msk.bf16.mxu0 %vm19825_vm2, %v27894_v10  ;;  %v28096_v10 = vld [vmem:[#allocation177_spill] sm:$0xff] }
 0x582   : > { %8584 = vmatpush1.bf16.msra.mxu0 %v18688_v29 }
 0x583   : > { %8585 = vmatprep.subr.bf16.mxu0 %v27166_v41 }
 0x585   : > { %6286 = vmatmul.mubr.bf16.gmra.mrb[100].mxu1 %v28094_v59  ;;  %v28098_v59 = vld [vmem:[#allocation178_spill] sm:$0xff] }
 0x586   : > { %14648 = vmatprep.mubr.msk.bf16.mxu1 %vm21370_vm4, %v28096_v10  ;;  %8586 = vmatpush1.bf16.msra.mxu0 %v18690_v42  ;;  %v28099_v10 = vld [vmem:[#allocation179_spill] sm:$0xff] }
 0x587   : > { %8844 = vmatprep.subr.bf16.mxu0 %v27166_v41 }
 0x588   : > { %15175 = vmatmul.mubr.msk.bf16.gmra.mrb[36].mxu0 %vm21370_vm4, %v28095_v4 }
 0x589   : > { %15180 = vmatprep.mubr.msk.bf16.mxu0 %vm19825_vm2, %v28097_v46 }
 0x58d   : > { %6294 = vmatmul.mubr.bf16.gmra.mrb[104].mxu1 %v28098_v59 }
 0x58e   : > { %14651 = vmatprep.mubr.msk.bf16.mxu1 %vm21370_vm4, %v28099_v10 }
 0x590   : > { %15183 = vmatmul.mubr.msk.bf16.gmra.mrb[40].mxu0 %vm21370_vm4, %v27903_v40  ;;  %v6087_v29 = vpop.f32.mrb[0].mxu1  ;;  %v28102_v40 = vld [vmem:[#allocation25_spill] sm:$0xff] }
 0x591   : > { %15188 = vmatprep.mubr.msk.bf16.mxu0 %vm19825_vm2, %v27905_v49  ;;  %v6089_v46 = vpop.f32.mrb[1].mxu1  ;;  %v17200_v25 = vadd.f32 %v28100_v39, %v6087_v29  ;;  %v28105_v49 = vld [vmem:[#allocation181_spill] sm:$0xff]  ;;  %v28106_v39 = vld [vmem:[#allocation123_spill] sm:$0xff] }
 0x592   : > { %v6090_v59 = vpop.f32.mrb[2].mxu1 }
 0x593   : > { %v6092_v42 = vpop.f32.mrb[3].mxu1  ;;  %v22742_v50 = vadd.f32 %v17200_v25, %v21996_v31  ;;  %v17201_v0 = vadd.f32 %v28102_v40, %v6090_v59  ;;  %v28107_v40 = vld [vmem:[#allocation141_spill] sm:$0xff] }
 0x594   : > { %v28110_v42 = vld [vmem:[#allocation27_spill] sm:$0xff] }
 0x595   : > { %28101 = vst [vmem:[#allocation46_spill] sm:$0xff] %v22742_v50  ;;  %6302 = vmatmul.mubr.bf16.gmra.mrb[108].mxu1 %v28103_v35  ;;  %v22747_v10 = vadd.f32 %v17201_v0, %v22001_v13  ;;  %v28108_v13 = vld [vmem:[#allocation269_spill] sm:$0xff]  ;;  %v28111_v50 = vld [vmem:[#allocation182_spill] sm:$0xff] }
 0x596   : > { %14654 = vmatprep.mubr.msk.bf16.mxu1 %vm21370_vm4, %v28105_v49  ;;  %v28112_v35 = vld [vmem:[#allocation270_spill] sm:$0xff] }
 0x597   : > { %28104 = vst [vmem:[#allocation89_spill] sm:$0xff] %v22747_v10 }
 0x598   : > { %15191 = vmatmul.mubr.msk.bf16.gmra.mrb[44].mxu0 %vm21370_vm4, %v21649_v62  ;;  %v6095_v31 = vpop.f32.mrb[4].mxu1 }
 0x599   : > { %15196 = vmatprep.mubr.msk.bf16.mxu0 %vm19825_vm2, %v28106_v39  ;;  %v6097_v25 = vpop.f32.mrb[5].mxu1  ;;  %v17202_v46 = vadd.f32 %v28107_v40, %v6095_v31  ;;  %v28114_v39 = vld [vmem:[#allocation183_spill] sm:$0xff]  ;;  %v28115_v40 = vld [vmem:[#allocation149_spill] sm:$0xff] }
 0x59a   : > { %v6098_v59 = vpop.f32.mrb[6].mxu1 }
 0x59b   : > { %v6100_v29 = vpop.f32.mrb[7].mxu1  ;;  %v22760_v0 = vadd.f32 %v17202_v46, %v28108_v13  ;;  %v17203_v10 = vadd.f32 %v28110_v42, %v6098_v59  ;;  %v28118_v42 = vld [vmem:[#allocation184_spill] sm:$0xff] }
 0x59d   : > { %28109 = vst [vmem:[#allocation48_spill] sm:$0xff] %v22760_v0  ;;  %6310 = vmatmul.mubr.bf16.gmra.mrb[112].mxu1 %v28111_v50  ;;  %v22765_v9 = vadd.f32 %v17203_v10, %v28112_v35  ;;  %v28117_v35 = vld [vmem:[#allocation153_spill] sm:$0xff] }
 0x59e   : > { %14657 = vmatprep.mubr.msk.bf16.mxu1 %vm21370_vm4, %v28114_v39 }
 0x59f   : > { %28113 = vst [vmem:[#allocation222_spill] sm:$0xff] %v22765_v9  ;;  %v28119_v9 = vld [vmem:[#allocation273_spill] sm:$0xff] }
 0x5a0   : > { %15199 = vmatmul.mubr.msk.bf16.gmra.mrb[48].mxu0 %vm21370_vm4, %v21680_v7  ;;  %v6103_v31 = vpop.f32.mrb[8].mxu1 }
 0x5a1   : > { %15204 = vmatprep.mubr.msk.bf16.mxu0 %vm19825_vm2, %v27913_v32  ;;  %v6105_v25 = vpop.f32.mrb[9].mxu1  ;;  %v17204_v46 = vadd.f32 %v28115_v40, %v6103_v31  ;;  %v28121_v32 = vld [vmem:[#allocation185_spill] sm:$0xff] }
 0x5a2   : > { %v6106_v59 = vpop.f32.mrb[10].mxu1  ;;  %v28122_v25 = vld [vmem:[#allocation158_spill] sm:$0xff] }
 0x5a3   : > { %v6108_v29 = vpop.f32.mrb[11].mxu1  ;;  %v22778_v10 = vadd.f32 %v17204_v46, %v22022_v55  ;;  %v17205_v13 = vadd.f32 %v28117_v35, %v6106_v59  ;;  %v28125_v35 = vld [vmem:[#allocation165_spill] sm:$0xff] }
 0x5a5   : > { %28116 = vst [vmem:[#allocation49_spill] sm:$0xff] %v22778_v10  ;;  %6318 = vmatmul.mubr.bf16.gmra.mrb[116].mxu1 %v28118_v42  ;;  %v22783_v0 = vadd.f32 %v17205_v13, %v28119_v9  ;;  %v28123_v9 = vld [vmem:[#allocation271_spill] sm:$0xff]  ;;  %v28127_v10 = vld [vmem:[#allocation272_spill] sm:$0xff] }
 0x5a6   : > { %14660 = vmatprep.mubr.msk.bf16.mxu1 %vm21370_vm4, %v28121_v32 }
 0x5a7   : > { %28120 = vst [vmem:[#allocation50_spill] sm:$0xff] %v22783_v0  ;;  %v28126_v0 = vld [vmem:[#allocation186_spill] sm:$0xff] }
 0x5a8   : > { %15207 = vmatmul.mubr.msk.bf16.gmra.mrb[52].mxu0 %vm21370_vm4, %v21690_v63  ;;  %v6111_v55 = vpop.f32.mrb[12].mxu1 }
 0x5a9   : > { %15212 = vmatprep.mubr.msk.bf16.mxu0 %vm19825_vm2, %v27918_v57  ;;  %v6113_v31 = vpop.f32.mrb[13].mxu1  ;;  %v17206_v40 = vadd.f32 %v28122_v25, %v6111_v55  ;;  %v28129_v57 = vld [vmem:[#allocation187_spill] sm:$0xff]  ;;  %v28130_v25 = vld [vmem:[#allocation224_spill] sm:$0xff] }
 0x5aa   : > { %v6114_v46 = vpop.f32.mrb[14].mxu1 }
 0x5ab   : > { %v6116_v59 = vpop.f32.mrb[15].mxu1  ;;  %v22796_v29 = vadd.f32 %v17206_v40, %v28123_v9  ;;  %v17207_v13 = vadd.f32 %v28125_v35, %v6114_v46  ;;  %v28133_v35 = vld [vmem:[#allocation225_spill] sm:$0xff] }
 0x5ad   : > { %28124 = vst [vmem:[#allocation223_spill] sm:$0xff] %v22796_v29  ;;  %6326 = vmatmul.mubr.bf16.gmra.mrb[120].mxu1 %v28126_v0  ;;  %v22801_v42 = vadd.f32 %v17207_v13, %v28127_v10  ;;  %v28131_v10 = vld [vmem:[#allocation275_spill] sm:$0xff]  ;;  %v28135_v29 = vld [vmem:[#allocation277_spill] sm:$0xff] }
 0x5ae   : > { %14663 = vmatprep.mubr.msk.bf16.mxu1 %vm21370_vm4, %v28129_v57 }
 0x5af   : > { %28128 = vst [vmem:[#allocation51_spill] sm:$0xff] %v22801_v42  ;;  %v28134_v42 = vld [vmem:[#allocation188_spill] sm:$0xff] }
 0x5b0   : > { %15215 = vmatmul.mubr.msk.bf16.gmra.mrb[56].mxu0 %vm21370_vm4, %v27922_v20  ;;  %v6119_v55 = vpop.f32.mrb[16].mxu1 }
 0x5b1   : > { %15220 = vmatprep.mubr.msk.bf16.mxu0 %vm19825_vm2, %v27923_v33  ;;  %v6121_v31 = vpop.f32.mrb[17].mxu1  ;;  %v17208_v40 = vadd.f32 %v28130_v25, %v6119_v55  ;;  %v28137_v25 = vld [vmem:[#allocation227_spill] sm:$0xff]  ;;  %v18664_v33 = vld [vmem:[%s26522_s2 + $0x448] sm:$0xff]  }
 0x5b2   : > { %v6122_v46 = vpop.f32.mrb[18].mxu1 }
 0x5b3   : > { %v6124_v59 = vpop.f32.mrb[19].mxu1  ;;  %v22814_v9 = vadd.f32 %v17208_v40, %v28131_v10  ;;  %v17209_v13 = vadd.f32 %v28133_v35, %v6122_v46  ;;  %v28138_v10 = vld [vmem:[#allocation274_spill] sm:$0xff] }
 0x5b5   : > { %28132 = vst [vmem:[#allocation52_spill] sm:$0xff] %v22814_v9  ;;  %6334 = vmatmul.mubr.bf16.gmra.mrb[124].mxu1 %v28134_v42  ;;  %v22819_v20 = vadd.f32 %v17209_v13, %v28135_v29  ;;  %v28140_v29 = vld [vmem:[#allocation228_spill] sm:$0xff] }
 0x5b6   : > { %6582 = vmatprep.mubr.bf16.mxu1 %v27728_v44 }
 0x5b7   : > { %28136 = vst [vmem:[#allocation53_spill] sm:$0xff] %v22819_v20  ;;  %v28141_v20 = vld [vmem:[#allocation103_spill] sm:$0xff] }
 0x5b8   : > { %15223 = vmatmul.mubr.msk.bf16.gmra.mrb[60].mxu0 %vm21370_vm4, %v27824_v43  ;;  %v6127_v55 = vpop.f32.mrb[20].mxu1  ;;  %v22835_v9 = vpack.c.bf16 %v27993_v16, %v28141_v20 }
 0x5b9   : > { %15228 = vmatprep.mubr.msk.bf16.mxu0 %vm19825_vm2, %v27928_v1  ;;  %v6129_v31 = vpop.f32.mrb[21].mxu1  ;;  %v17210_v40 = vadd.f32 %v28137_v25, %v6127_v55  ;;  %v28143_v55 = vld [vmem:[#allocation276_spill] sm:$0xff]  ;;  %v28388_v1 = vld [vmem:[#allocation210_spill] sm:$0xff] }
 0x5ba   : > { %v6130_v46 = vpop.f32.mrb[22].mxu1  ;;  %28142 = vst [vmem:[#allocation92_spill] sm:$0xff] %v22835_v9 }
 0x5bb   : > { %v6132_v59 = vpop.f32.mrb[23].mxu1  ;;  %v22830_v35 = vadd.f32 %v17210_v40, %v28138_v10  ;;  %v17211_v13 = vadd.f32 %v28140_v29, %v6130_v46  ;;  %v18665_v40 = vld [vmem:[%s26522_s2 + $0x450] sm:$0xff]  }
 0x5bc   : > { %v28145_v59 = vld [vmem:[#allocation231_spill] sm:$0xff] }
 0x5bd   : > { %28139 = vst [vmem:[#allocation91_spill] sm:$0xff] %v22830_v35  ;;  %14778 = vmatmul.mubr.msk.bf16.vlgmr.msra.gmra.mrb[104].mxu1 %vm19825_vm2, %v27732_v24  ;;  %v22844_v31 = vadd.f32 %v17211_v13, %v28143_v55  ;;  %v28146_v55 = vrot.slane %v28141_v20, 7 }
 0x5be   : > { %6590 = vmatprep.mubr.bf16.mxu1 %v22835_v9  ;;  %16929 = vmatpush3.bf16.msra.mxu1 %v22542_v38  ;;  %v28149_v38 = vld [vmem:[#allocation232_spill] sm:$0xff] }
 0x5bf   : > { %28144 = vst [vmem:[#allocation54_spill] sm:$0xff] %v22844_v31  ;;  %16930 = vmatprep.subr.bf16.mxu1 %v18664_v33  ;;  %v22861_v31 = vpack.c.bf16 %v28001_v52, %v28146_v55  ;;  %v28153_v55 = vld [vmem:[#allocation278_spill] sm:$0xff] }
 0x5c0   : > { %15231 = vmatmul.mubr.msk.bf16.gmra.mrb[64].mxu0 %vm21370_vm4, %v27827_v14  ;;  %v6135_v25 = vpop.f32.mrb[24].mxu1 }
 0x5c1   : > { %15236 = vmatprep.mubr.msk.bf16.mxu0 %vm19825_vm2, %v27933_v2  ;;  %v6137_v46 = vpop.f32.mrb[25].mxu1  ;;  %v17212_v10 = vadd.f32 %v28145_v59, %v6135_v25  ;;  %28147 = vst [vmem:[#allocation229_spill] sm:$0xff] %v22861_v31 }
 0x5c2   : > { %v6138_v29 = vpop.f32.mrb[26].mxu1  ;;  %16931 = vmatpush3.bf16.msra.mxu1 %v18664_v33  ;;  %v18667_v46 = vld [vmem:[%s26522_s2 + $0x458] sm:$0xff]   ;;  %v28150_v33 = vld [vmem:[#allocation280_spill] sm:$0xff] }
 0x5c3   : > { %v6140_v13 = vpop.f32.mrb[27].mxu1  ;;  %v22864_v35 = vadd.f32 %v17212_v10, %v22074_v19  ;;  %v17213_v2 = vadd.f32 %v28149_v38, %v6138_v29  ;;  %16932 = vmatprep.subr.bf16.mxu1 %v18665_v40  ;;  %v18669_v19 = vld [vmem:[%s26522_s2 + $0x460] sm:$0xff]  }
 0x5c5   : > { %28148 = vst [vmem:[#allocation56_spill] sm:$0xff] %v22864_v35  ;;  %14783 = vmatmul.mubr.msk.bf16.gmra.mrb[108].mxu1 %vm19825_vm2, %v22861_v31  ;;  %v22874_v25 = vadd.f32 %v17213_v2, %v28150_v33  ;;  %v28152_v2 = vld [vmem:[#allocation234_spill] sm:$0xff]  ;;  %v28155_v33 = vld [vmem:[#allocation235_spill] sm:$0xff] }
 0x5c6   : > { %6598 = vmatprep.mubr.bf16.mxu1 %v27973_v12  ;;  %16933 = vmatpush3.bf16.msra.mxu1 %v18665_v40  ;;  %v18672_v40 = vld [vmem:[%s26522_s2 + $0x468] sm:$0xff]  }
 0x5c7   : > { %28151 = vst [vmem:[#allocation57_spill] sm:$0xff] %v22874_v25  ;;  %16934 = vmatprep.subr.bf16.mxu1 %v18667_v46 }
 0x5c8   : > { %15239 = vmatmul.mubr.msk.bf16.gmra.mrb[68].mxu0 %vm21370_vm4, %v27829_v58  ;;  %v6143_v20 = vpop.f32.mrb[28].mxu1 }
 0x5c9   : > { %15244 = vmatprep.mubr.msk.bf16.mxu0 %vm19825_vm2, %v27938_v15  ;;  %v6145_v59 = vpop.f32.mrb[29].mxu1  ;;  %v17214_v10 = vadd.f32 %v28152_v2, %v6143_v20  ;;  %v18674_v20 = vld [vmem:[%s26522_s2 + $0x470] sm:$0xff]   ;;  %v28231_v15 = vld [vmem:[#allocation233_spill] sm:$0xff] }
 0x5ca   : > { %v6146_v29 = vpop.f32.mrb[30].mxu1  ;;  %16935 = vmatpush3.bf16.msra.mxu1 %v18667_v46  ;;  %v28156_v59 = vld [vmem:[#allocation279_spill] sm:$0xff] }
 0x5cb   : > { %v6148_v13 = vpop.f32.mrb[31].mxu1  ;;  %v22888_v38 = vadd.f32 %v17214_v10, %v28153_v55  ;;  %v17215_v25 = vadd.f32 %v28155_v33, %v6146_v29  ;;  %16936 = vmatprep.subr.bf16.mxu1 %v18669_v19  ;;  %v28159_v55 = vld [vmem:[#allocation282_spill] sm:$0xff] }
 0x5cd   : > { %28154 = vst [vmem:[#allocation230_spill] sm:$0xff] %v22888_v38  ;;  %14788 = vmatmul.mubr.msk.bf16.gmra.mrb[112].mxu1 %vm19825_vm2, %v27978_v61  ;;  %v22898_v35 = vadd.f32 %v17215_v25, %v28156_v59  ;;  %v28158_v25 = vld [vmem:[#allocation237_spill] sm:$0xff]  ;;  %v28161_v59 = vld [vmem:[#allocation238_spill] sm:$0xff] }
 0x5ce   : > { %6606 = vmatprep.mubr.bf16.mxu1 %v27980_v60  ;;  %16937 = vmatpush3.bf16.msra.mxu1 %v18669_v19  ;;  %v18677_v19 = vld [vmem:[%s26522_s2 + $0x478] sm:$0xff]  }
 0x5cf   : > { %28157 = vst [vmem:[#allocation58_spill] sm:$0xff] %v22898_v35  ;;  %16938 = vmatprep.subr.bf16.mxu1 %v18672_v40 }
 0x5d0   : > { %15247 = vmatmul.mubr.msk.bf16.gmra.mrb[72].mxu0 %vm21370_vm4, %v27943_v30  ;;  %v6151_v46 = vpop.f32.mrb[32].mxu1 }
 0x5d1   : > { %15252 = vmatprep.mubr.msk.bf16.mxu0 %vm19825_vm2, %v27944_v26  ;;  %v6153_v2 = vpop.f32.mrb[33].mxu1  ;;  %v17216_v10 = vadd.f32 %v28158_v25, %v6151_v46  ;;  %v28164_v25 = vld [vmem:[#allocation96_spill] sm:$0xff] }
 0x5d2   : > { %v6154_v29 = vpop.f32.mrb[34].mxu1  ;;  %16939 = vmatpush3.bf16.msra.mxu1 %v18672_v40  ;;  %v28162_v2 = vld [vmem:[#allocation284_spill] sm:$0xff] }
 0x5d3   : > { %v6156_v13 = vpop.f32.mrb[35].mxu1  ;;  %v22912_v33 = vadd.f32 %v17216_v10, %v28159_v55  ;;  %v17217_v35 = vadd.f32 %v28161_v59, %v6154_v29  ;;  %16940 = vmatprep.subr.bf16.mxu1 %v18674_v20  ;;  %v28167_v59 = vld [vmem:[#allocation240_spill] sm:$0xff] }
 0x5d5   : > { %28160 = vst [vmem:[#allocation59_spill] sm:$0xff] %v22912_v33  ;;  %14793 = vmatmul.mubr.msk.bf16.gmra.mrb[116].mxu1 %vm19825_vm2, %v27987_v23  ;;  %v22922_v38 = vadd.f32 %v17217_v35, %v28162_v2  ;;  %v28165_v35 = vld [vmem:[#allocation281_spill] sm:$0xff] }
 0x5d6   : > { %6614 = vmatprep.mubr.bf16.mxu1 %v27989_v11  ;;  %16941 = vmatpush3.bf16.msra.mxu1 %v18674_v20  ;;  %v28170_v20 = vld [vmem:[#allocation283_spill] sm:$0xff] }
 0x5d7   : > { %28163 = vst [vmem:[#allocation60_spill] sm:$0xff] %v22922_v38  ;;  %16942 = vmatprep.subr.bf16.mxu1 %v18677_v19  ;;  %v28168_v38 = vld [vmem:[#allocation110_spill] sm:$0xff] }
 0x5d8   : > { %15255 = vmatmul.mubr.msk.bf16.gmra.mrb[76].mxu0 %vm21370_vm4, %v27834_v37  ;;  %v6159_v40 = vpop.f32.mrb[36].mxu1  ;;  %v22938_v33 = vpack.c.bf16 %v27993_v16, %v28168_v38  ;;  %v28377_v16 = vld [vmem:[#allocation204_spill] sm:$0xff] }
 0x5d9   : > { %15260 = vmatprep.mubr.msk.bf16.mxu0 %vm19825_vm2, %v27949_v21  ;;  %v6161_v46 = vpop.f32.mrb[37].mxu1  ;;  %v17218_v10 = vadd.f32 %v28164_v25, %v6159_v40 }
 0x5da   : > { %v6162_v29 = vpop.f32.mrb[38].mxu1  ;;  %16943 = vmatpush3.bf16.msra.mxu1 %v18677_v19  ;;  %28169 = vst [vmem:[#allocation236_spill] sm:$0xff] %v22938_v33  ;;  %v28172_v19 = vld [vmem:[#allocation136_spill] sm:$0xff] }
 0x5db   : > { %v6164_v13 = vpop.f32.mrb[39].mxu1  ;;  %v22933_v55 = vadd.f32 %v17218_v10, %v28165_v35  ;;  %v17219_v2 = vadd.f32 %v28167_v59, %v6162_v29  ;;  %10480 = vmatprep.subr.bf16.mxu1 %v27166_v41  ;;  %v28173_v10 = vld [vmem:[#allocation97_spill] sm:$0xff]  ;;  %v28174_v59 = vrot.slane %v28168_v38, 7 }
 0x5dc   : > { %v28182_v38 = vld [vmem:[#allocation189_spill] sm:$0xff] }
 0x5dd   : > { %28166 = vst [vmem:[#allocation93_spill] sm:$0xff] %v22933_v55  ;;  %14798 = vmatmul.mubr.msk.bf16.gmra.mrb[120].mxu1 %vm19825_vm2, %v27996_v27  ;;  %v22945_v40 = vadd.f32 %v17219_v2, %v28170_v20  ;;  %v22958_v2 = vpack.c.bf16 %v28001_v52, %v28174_v59  ;;  %v28176_v20 = vld [vmem:[#allocation286_spill] sm:$0xff]  ;;  %v28178_v55 = vld [vmem:[#allocation241_spill] sm:$0xff] }
 0x5de   : > { %6622 = vmatprep.mubr.bf16.mxu1 %v22938_v33  ;;  %v28370_v52 = vld [vmem:[#allocation177_spill] sm:$0xff] }
 0x5df   : > { %28171 = vst [vmem:[#allocation22_spill] sm:$0xff] %v22945_v40  ;;  %28175 = vst [vmem:[#allocation25_spill] sm:$0xff] %v22958_v2 }
 0x5e0   : > { %15263 = vmatmul.mubr.msk.bf16.gmra.mrb[80].mxu0 %vm21370_vm4, %v27838_v51  ;;  %v6167_v46 = vpop.f32.mrb[40].mxu1 }
 0x5e1   : > { %15268 = vmatprep.mubr.msk.bf16.mxu0 %vm19825_vm2, %v28172_v19  ;;  %v6169_v25 = vpop.f32.mrb[41].mxu1  ;;  %v17220_v29 = vadd.f32 %v28173_v10, %v6167_v46  ;;  %v28179_v19 = vld [vmem:[#allocation288_spill] sm:$0xff]  ;;  %v28181_v46 = vld [vmem:[#allocation109_spill] sm:$0xff] }
 0x5e2   : > { %v6170_v13 = vpop.f32.mrb[42].mxu1 }
 0x5e3   : > { %v6172_v35 = vpop.f32.mrb[43].mxu1  ;;  %v22961_v40 = vadd.f32 %v17220_v29, %v28176_v20  ;;  %v17221_v21 = vadd.f32 %v28178_v55, %v6170_v13  ;;  %v28183_v29 = vld [vmem:[#allocation98_spill] sm:$0xff] }
 0x5e5   : > { %28177 = vst [vmem:[#allocation141_spill] sm:$0xff] %v22961_v40  ;;  %14803 = vmatmul.mubr.msk.bf16.gmra.mrb[124].mxu1 %vm19825_vm2, %v22958_v2  ;;  %v22968_v25 = vadd.f32 %v17221_v21, %v28179_v19  ;;  %v18680_v21 = vld [vmem:[%s26522_s2 + $0x480] sm:$0xff]   ;;  %v28184_v19 = vld [vmem:[#allocation285_spill] sm:$0xff]  ;;  %v28439_v2 = vld [vmem:[#allocation11_spill] sm:$0xff] }
 0x5e6   : > { %16944 = vmatprep.mubr.msk.bf16.mxu1 %vm21370_vm4, %v21382_v36  ;;  %v28187_v36 = vld [vmem:[#allocation287_spill] sm:$0xff] }
 0x5e7   : > { %28180 = vst [vmem:[#allocation269_spill] sm:$0xff] %v22968_v25  ;;  %v28186_v25 = vld [vmem:[#allocation242_spill] sm:$0xff] }
 0x5e8   : > { %15271 = vmatmul.mubr.msk.bf16.gmra.mrb[84].mxu0 %vm21370_vm4, %v28181_v46  ;;  %v6175_v55 = vpop.f32.mrb[44].mxu1 }
 0x5e9   : > { %15276 = vmatprep.mubr.msk.bf16.mxu0 %vm19825_vm2, %v28182_v38  ;;  %v6177_v10 = vpop.f32.mrb[45].mxu1  ;;  %v17222_v13 = vadd.f32 %v28183_v29, %v6175_v55  ;;  %v28190_v55 = vld [vmem:[#allocation190_spill] sm:$0xff]  ;;  %v28191_v29 = vld [vmem:[#allocation100_spill] sm:$0xff] }
 0x5ea   : > { %v6178_v35 = vpop.f32.mrb[46].mxu1  ;;  %v28189_v10 = vld [vmem:[#allocation139_spill] sm:$0xff] }
 0x5eb   : > { %v6180_v59 = vpop.f32.mrb[47].mxu1  ;;  %v22984_v20 = vadd.f32 %v17222_v13, %v28184_v19  ;;  %v17223_v40 = vadd.f32 %v28186_v25, %v6178_v35  ;;  %v28192_v19 = vld [vmem:[#allocation290_spill] sm:$0xff] }
 0x5ed   : > { %28185 = vst [vmem:[#allocation27_spill] sm:$0xff] %v22984_v20  ;;  %16945 = vmatmul.mubr.msk.bf16.vlgmr.msra.gmra.mrb[128].mxu1 %vm21370_vm4, %v21405_v22  ;;  %v22991_v38 = vadd.f32 %v17223_v40, %v28187_v36  ;;  %v18683_v22 = vld [vmem:[%s26522_s2 + $0x488] sm:$0xff]  }
 0x5ee   : > { %16948 = vmatprep.mubr.msk.bf16.mxu1 %vm21370_vm4, %v28037_v18  ;;  %10481 = vmatpush1.bf16.msra.mxu1 %v18680_v21  ;;  %v18686_v18 = vld [vmem:[%s26522_s2 + $0x490] sm:$0xff]   ;;  %v28194_v21 = vld [vmem:[#allocation243_spill] sm:$0xff]  ;;  %v28195_v20 = vld [vmem:[#allocation221_spill] sm:$0xff] }
 0x5ef   : > { %28188 = vst [vmem:[#allocation270_spill] sm:$0xff] %v22991_v38  ;;  %10482 = vmatprep.subr.bf16.mxu1 %v27166_v41 }
 0x5f0   : > { %15279 = vmatmul.mubr.msk.bf16.gmra.mrb[88].mxu0 %vm21370_vm4, %v28189_v10  ;;  %v6183_v25 = vpop.f32.mrb[48].mxu1  ;;  %v28212_v10 = vld [vmem:[#allocation226_spill] sm:$0xff] }
 0x5f1   : > { %15284 = vmatprep.mubr.msk.bf16.mxu0 %vm19825_vm2, %v28190_v55  ;;  %v6185_v40 = vpop.f32.mrb[49].mxu1  ;;  %v17224_v13 = vadd.f32 %v28191_v29, %v6183_v25  ;;  %v28198_v29 = vld [vmem:[#allocation143_spill] sm:$0xff] }
 0x5f2   : > { %v6186_v35 = vpop.f32.mrb[50].mxu1  ;;  %10483 = vmatpush1.bf16.msra.mxu1 %v18683_v22  ;;  %v28196_v40 = vld [vmem:[#allocation292_spill] sm:$0xff]  ;;  %v28199_v22 = vld [vmem:[#allocation191_spill] sm:$0xff] }
 0x5f3   : > { %v6188_v59 = vpop.f32.mrb[51].mxu1  ;;  %v23011_v36 = vadd.f32 %v17224_v13, %v28192_v19  ;;  %v17225_v38 = vadd.f32 %v28194_v21, %v6186_v35  ;;  %10484 = vmatprep.subr.bf16.mxu1 %v27166_v41  ;;  %v28200_v35 = vld [vmem:[#allocation244_spill] sm:$0xff] }
 0x5f5   : > { %28193 = vst [vmem:[#allocation149_spill] sm:$0xff] %v23011_v36  ;;  %16949 = vmatmul.mubr.msk.bf16.gmra.mrb[132].mxu1 %vm21370_vm4, %v28195_v20  ;;  %v23019_v25 = vadd.f32 %v17225_v38, %v28196_v40  ;;  %v18689_v20 = vld [vmem:[%s26522_s2 + $0x498] sm:$0xff]   ;;  %v18691_v40 = vld [vmem:[%s26522_s2 + $0x4a0] sm:$0xff]  }
 0x5f6   : > { %16952 = vmatprep.mubr.msk.bf16.mxu1 %vm21370_vm4, %v21444_v8  ;;  %10485 = vmatpush1.bf16.msra.mxu1 %v18686_v18  ;;  %v28203_v18 = vld [vmem:[#allocation245_spill] sm:$0xff] }
 0x5f7   : > { %28197 = vst [vmem:[#allocation153_spill] sm:$0xff] %v23019_v25  ;;  %10486 = vmatprep.subr.bf16.mxu1 %v27166_v41  ;;  %v28201_v25 = vld [vmem:[#allocation289_spill] sm:$0xff] }
 0x5f8   : > { %15287 = vmatmul.mubr.msk.bf16.gmra.mrb[92].mxu0 %vm21370_vm4, %v28198_v29  ;;  %v6191_v13 = vpop.f32.mrb[52].mxu1 }
 0x5f9   : > { %15292 = vmatprep.mubr.msk.bf16.mxu0 %vm19825_vm2, %v28199_v22  ;;  %v6193_v38 = vpop.f32.mrb[53].mxu1  ;;  %v17226_v59 = vadd.f32 %v28200_v35, %v6191_v13  ;;  %v28206_v35 = vld [vmem:[#allocation148_spill] sm:$0xff] }
 0x5fa   : > { %v6194_v19 = vpop.f32.mrb[54].mxu1  ;;  %10487 = vmatpush1.bf16.msra.mxu1 %v18689_v20  ;;  %v28204_v38 = vld [vmem:[#allocation291_spill] sm:$0xff]  ;;  %v18692_v20 = vld [vmem:[%s26522_s2 + $0x4a8] sm:$0xff]  }
 0x5fb   : > { %v6196_v21 = vpop.f32.mrb[55].mxu1  ;;  %v23039_v36 = vadd.f32 %v17226_v59, %v28201_v25  ;;  %v17227_v22 = vadd.f32 %v28203_v18, %v6194_v19  ;;  %10488 = vmatprep.subr.bf16.mxu1 %v27166_v41  ;;  %v28207_v25 = vld [vmem:[#allocation200_spill] sm:$0xff]  ;;  %v28208_v19 = vld [vmem:[#allocation246_spill] sm:$0xff] }
 0x5fd   : > { %28202 = vst [vmem:[#allocation273_spill] sm:$0xff] %v23039_v36  ;;  %16953 = vmatmul.mubr.msk.bf16.gmra.mrb[136].mxu1 %vm21370_vm4, %v28053_v3  ;;  %v23047_v13 = vadd.f32 %v17227_v22, %v28204_v38  ;;  %v28209_v36 = vld [vmem:[#allocation294_spill] sm:$0xff] }
 0x5fe   : > { %16956 = vmatprep.mubr.msk.bf16.mxu1 %vm21370_vm4, %v28059_v47  ;;  %10489 = vmatpush1.bf16.msra.mxu1 %v18691_v40  ;;  %v28211_v40 = vld [vmem:[#allocation247_spill] sm:$0xff] }
 0x5ff   : > { %28205 = vst [vmem:[#allocation158_spill] sm:$0xff] %v23047_v13  ;;  %10490 = vmatprep.subr.bf16.mxu1 %v27166_v41  ;;  %v18693_v13 = vld [vmem:[%s26522_s2 + $0x4b0] sm:$0xff]  }
 0x600   : > { %15295 = vmatmul.mubr.msk.bf16.gmra.mrb[96].mxu0 %vm21370_vm4, %v28206_v35  ;;  %v6199_v59 = vpop.f32.mrb[56].mxu1 }
 0x601   : > { %15300 = vmatprep.mubr.msk.bf16.mxu0 %vm19825_vm2, %v28207_v25  ;;  %v6201_v22 = vpop.f32.mrb[57].mxu1  ;;  %v17228_v21 = vadd.f32 %v28208_v19, %v6199_v59  ;;  %v28215_v19 = vld [vmem:[#allocation160_spill] sm:$0xff] }
 0x602   : > { %v6202_v18 = vpop.f32.mrb[58].mxu1  ;;  %10491 = vmatpush1.bf16.msra.mxu1 %v18692_v20  ;;  %v28213_v22 = vld [vmem:[#allocation296_spill] sm:$0xff]  ;;  %v18694_v20 = vld [vmem:[%s26522_s2 + $0x4b8] sm:$0xff]  }
 0x603   : > { %v6204_v38 = vpop.f32.mrb[59].mxu1  ;;  %v23067_v25 = vadd.f32 %v17228_v21, %v28209_v36  ;;  %v17229_v55 = vadd.f32 %v28211_v40, %v6202_v18  ;;  %10492 = vmatprep.subr.bf16.mxu1 %v27166_v41  ;;  %v28216_v36 = vld [vmem:[#allocation132_spill] sm:$0xff]  ;;  %v28217_v18 = vld [vmem:[#allocation10_spill] sm:$0xff] }
 0x605   : > { %28210 = vst [vmem:[#allocation271_spill] sm:$0xff] %v23067_v25  ;;  %16957 = vmatmul.mubr.msk.bf16.gmra.mrb[140].mxu1 %vm21370_vm4, %v28212_v10  ;;  %v23075_v59 = vadd.f32 %v17229_v55, %v28213_v22  ;;  %v28218_v25 = vld [vmem:[#allocation293_spill] sm:$0xff] }
 0x606   : > { %16960 = vmatprep.mubr.msk.bf16.mxu1 %vm21370_vm4, %v21507_v54  ;;  %10493 = vmatpush1.bf16.msra.mxu1 %v18693_v13  ;;  %v28220_v13 = vld [vmem:[#allocation248_spill] sm:$0xff] }
 0x607   : > { %28214 = vst [vmem:[#allocation165_spill] sm:$0xff] %v23075_v59  ;;  %10494 = vmatprep.subr.bf16.mxu1 %v27166_v41  ;;  %v18695_v59 = vld [vmem:[%s26522_s2 + $0x4c0] sm:$0xff]  }
 0x608   : > { %15303 = vmatmul.mubr.msk.bf16.gmra.mrb[100].mxu0 %vm21370_vm4, %v28215_v19  ;;  %v6207_v21 = vpop.f32.mrb[60].mxu1 }
 0x609   : > { %15306 = vmatprep.mubr.msk.bf16.mxu0 %vm21370_vm4, %v28216_v36  ;;  %v6209_v55 = vpop.f32.mrb[61].mxu1  ;;  %v17230_v38 = vadd.f32 %v28217_v18, %v6207_v21  ;;  %v28223_v18 = vld [vmem:[#allocation7_spill] sm:$0xff] }
 0x60a   : > { %v6210_v40 = vpop.f32.mrb[62].mxu1  ;;  %10495 = vmatpush1.bf16.msra.mxu1 %v18694_v20  ;;  %v28221_v55 = vld [vmem:[#allocation295_spill] sm:$0xff] }
 0x60b   : > { %v6212_v22 = vpop.f32.mrb[63].mxu1  ;;  %v23095_v36 = vadd.f32 %v17230_v38, %v28218_v25  ;;  %v17231_v10 = vadd.f32 %v28220_v13, %v6210_v40  ;;  %10496 = vmatprep.subr.bf16.mxu1 %v27166_v41  ;;  %v28224_v20 = vld [vmem:[#allocation135_spill] sm:$0xff]  ;;  %v18696_v25 = vld [vmem:[%s26522_s2 + $0x4c8] sm:$0xff]  }
 0x60d   : > { %28219 = vst [vmem:[#allocation272_spill] sm:$0xff] %v23095_v36  ;;  %16961 = vmatmul.mubr.msk.bf16.gmra.mrb[144].mxu1 %vm21370_vm4, %v28074_v28  ;;  %v23103_v21 = vadd.f32 %v17231_v10, %v28221_v55  ;;  %v28225_v10 = vld [vmem:[#allocation14_spill] sm:$0xff] }
 0x60e   : > { %16964 = vmatprep.mubr.msk.bf16.mxu1 %vm21370_vm4, %v28080_v17  ;;  %10497 = vmatpush1.bf16.msra.mxu1 %v18695_v59  ;;  %v28226_v55 = vld [vmem:[#allocation298_spill] sm:$0xff] }
 0x60f   : > { %28222 = vst [vmem:[#allocation224_spill] sm:$0xff] %v23103_v21  ;;  %10498 = vmatprep.subr.bf16.mxu1 %v27166_v41  ;;  %v28228_v21 = vld [vmem:[#allocation249_spill] sm:$0xff]  ;;  %v18697_v59 = vld [vmem:[%s26522_s2 + $0x4d0] sm:$0xff]  }
 0x610   : > { %8588 = vmatmul.mubr.bf16.vlgmr.msra.gmra.mrb[232].mxu0 %v28223_v18  ;;  %v6215_v38 = vpop.f32.mrb[64].mxu1 }
 0x611   : > { %15309 = vmatprep.mubr.msk.bf16.mxu0 %vm21370_vm4, %v28224_v20  ;;  %v17232_v40 = vadd.f32 %v28225_v10, %v6215_v38  ;;  %v6217_v22 = vpop.f32.mrb[65].mxu1  ;;  %v28229_v20 = vld [vmem:[#allocation300_spill] sm:$0xff] }
 0x612   : > { %v6218_v13 = vpop.f32.mrb[66].mxu1  ;;  %10499 = vmatpush1.bf16.msra.mxu1 %v18696_v25  ;;  %v28232_v38 = vld [vmem:[#allocation4_spill] sm:$0xff]  ;;  %v28234_v25 = vld [vmem:[#allocation250_spill] sm:$0xff] }
 0x613   : > { %v23118_v18 = vadd.f32 %v17232_v40, %v28226_v55  ;;  %v17233_v36 = vadd.f32 %v28228_v21, %v6218_v13  ;;  %v6220_v26 = vpop.f32.mrb[67].mxu1  ;;  %10500 = vmatprep.subr.bf16.mxu1 %v27166_v41  ;;  %v28235_v13 = vld [vmem:[#allocation297_spill] sm:$0xff] }
 0x614   : > { %v28233_v26 = vld [vmem:[#allocation137_spill] sm:$0xff] }
 0x615   : > { %28227 = vst [vmem:[#allocation275_spill] sm:$0xff] %v23118_v18  ;;  %v23126_v30 = vadd.f32 %v17233_v36, %v28229_v20  ;;  %16965 = vmatmul.mubr.msk.bf16.gmra.mrb[148].mxu1 %vm21370_vm4, %v28231_v15  ;;  %v18698_v36 = vld [vmem:[%s26522_s2 + $0x4d8] sm:$0xff]  }
 0x616   : > { %16968 = vmatprep.mubr.msk.bf16.mxu1 %vm21370_vm4, %v21580_v6  ;;  %10501 = vmatpush1.bf16.msra.mxu1 %v18697_v59  ;;  %v28237_v20 = vld [vmem:[#allocation251_spill] sm:$0xff]  ;;  %v18699_v59 = vld [vmem:[%s26522_s2 + $0x4e0] sm:$0xff]  }
 0x617   : > { %28230 = vst [vmem:[#allocation225_spill] sm:$0xff] %v23126_v30  ;;  %10502 = vmatprep.subr.bf16.mxu1 %v27166_v41  ;;  %v28248_v15 = vld [vmem:[#allocation239_spill] sm:$0xff] }
 0x618   : > { %8596 = vmatmul.mubr.bf16.gmra.mrb[236].mxu0 %v28232_v38  ;;  %v6223_v21 = vpop.f32.mrb[68].mxu1 }
 0x619   : > { %15312 = vmatprep.mubr.msk.bf16.mxu0 %vm21370_vm4, %v28233_v26  ;;  %v17234_v10 = vadd.f32 %v28234_v25, %v6223_v21  ;;  %v6225_v40 = vpop.f32.mrb[69].mxu1  ;;  %v28238_v26 = vld [vmem:[#allocation299_spill] sm:$0xff] }
 0x61a   : > { %v6226_v22 = vpop.f32.mrb[70].mxu1  ;;  %10503 = vmatpush1.bf16.msra.mxu1 %v18698_v36  ;;  %v28240_v21 = vld [vmem:[#allocation23_spill] sm:$0xff]  ;;  %v18700_v36 = vld [vmem:[%s26522_s2 + $0x4e8] sm:$0xff]  }
 0x61b   : > { %v23144_v55 = vadd.f32 %v17234_v10, %v28235_v13  ;;  %v17235_v38 = vadd.f32 %v28237_v20, %v6226_v22  ;;  %v6228_v30 = vpop.f32.mrb[71].mxu1  ;;  %10504 = vmatprep.subr.bf16.mxu1 %v27166_v41  ;;  %v28242_v10 = vld [vmem:[#allocation252_spill] sm:$0xff]  ;;  %v28243_v20 = vld [vmem:[#allocation302_spill] sm:$0xff] }
 0x61c   : > { %v28241_v30 = vld [vmem:[#allocation21_spill] sm:$0xff] }
 0x61d   : > { %28236 = vst [vmem:[#allocation277_spill] sm:$0xff] %v23144_v55  ;;  %v23152_v18 = vadd.f32 %v17235_v38, %v28238_v26  ;;  %16969 = vmatmul.mubr.msk.bf16.gmra.mrb[152].mxu1 %vm21370_vm4, %v21609_v48  ;;  %v28245_v26 = vld [vmem:[#allocation253_spill] sm:$0xff] }
 0x61e   : > { %16972 = vmatprep.mubr.msk.bf16.mxu1 %vm21370_vm4, %v28095_v4  ;;  %10505 = vmatpush1.bf16.msra.mxu1 %v18699_v59  ;;  %v18701_v59 = vld [vmem:[%s26522_s2 + $0x4f0] sm:$0xff]  }
 0x61f   : > { %28239 = vst [vmem:[#allocation227_spill] sm:$0xff] %v23152_v18  ;;  %10506 = vmatprep.subr.bf16.mxu1 %v27166_v41 }
 0x620   : > { %8604 = vmatmul.mubr.bf16.gmra.mrb[240].mxu0 %v28240_v21  ;;  %v6231_v25 = vpop.f32.mrb[72].mxu1 }
 0x621   : > { %15315 = vmatprep.mubr.msk.bf16.mxu0 %vm21370_vm4, %v28241_v30  ;;  %v17236_v40 = vadd.f32 %v28242_v10, %v6231_v25  ;;  %v6233_v22 = vpop.f32.mrb[73].mxu1  ;;  %v28246_v30 = vld [vmem:[#allocation304_spill] sm:$0xff] }
 0x622   : > { %v6234_v13 = vpop.f32.mrb[74].mxu1  ;;  %10507 = vmatpush1.bf16.msra.mxu1 %v18700_v36  ;;  %v28249_v25 = vld [vmem:[#allocation32_spill] sm:$0xff]  ;;  %v18702_v36 = vld [vmem:[%s26522_s2 + $0x4f8] sm:$0xff]  }
 0x623   : > { %v23170_v38 = vadd.f32 %v17236_v40, %v28243_v20  ;;  %v17237_v21 = vadd.f32 %v28245_v26, %v6234_v13  ;;  %v6236_v18 = vpop.f32.mrb[75].mxu1  ;;  %10508 = vmatprep.subr.bf16.mxu1 %v27166_v41  ;;  %v28251_v40 = vld [vmem:[#allocation254_spill] sm:$0xff]  ;;  %v28252_v26 = vld [vmem:[#allocation301_spill] sm:$0xff] }
 0x624   : > { %v28250_v18 = vld [vmem:[#allocation20_spill] sm:$0xff] }
 0x625   : > { %28244 = vst [vmem:[#allocation274_spill] sm:$0xff] %v23170_v38  ;;  %v23178_v55 = vadd.f32 %v17237_v21, %v28246_v30  ;;  %16973 = vmatmul.mubr.msk.bf16.gmra.mrb[156].mxu1 %vm21370_vm4, %v28248_v15  ;;  %v28254_v30 = vld [vmem:[#allocation255_spill] sm:$0xff] }
 0x626   : > { %16976 = vmatprep.mubr.msk.bf16.mxu1 %vm21370_vm4, %v21649_v62  ;;  %10509 = vmatpush1.bf16.msra.mxu1 %v18701_v59  ;;  %v28255_v59 = vld [vmem:[#allocation303_spill] sm:$0xff] }
 0x627   : > { %28247 = vst [vmem:[#allocation228_spill] sm:$0xff] %v23178_v55  ;;  %10510 = vmatprep.subr.bf16.mxu1 %v27166_v41 }
 0x628   : > { %8612 = vmatmul.mubr.bf16.gmra.mrb[244].mxu0 %v28249_v25  ;;  %v6239_v10 = vpop.f32.mrb[76].mxu1 }
 0x629   : > { %15318 = vmatprep.mubr.msk.bf16.mxu0 %vm21370_vm4, %v28250_v18  ;;  %v17238_v22 = vadd.f32 %v28251_v40, %v6239_v10  ;;  %v6241_v13 = vpop.f32.mrb[77].mxu1  ;;  %v28257_v10 = vld [vmem:[#allocation145_spill] sm:$0xff] }
 0x62a   : > { %v6242_v20 = vpop.f32.mrb[78].mxu1  ;;  %10511 = vmatpush1.bf16.msra.mxu1 %v18702_v36  ;;  %v28258_v36 = vld [vmem:[#allocation256_spill] sm:$0xff]  ;;  %v28296_v18 = vld [vmem:[#allocation121_spill] sm:$0xff] }
 0x62b   : > { %v23196_v21 = vadd.f32 %v17238_v22, %v28252_v26  ;;  %v17239_v25 = vadd.f32 %v28254_v30, %v6242_v20  ;;  %v6244_v55 = vpop.f32.mrb[79].mxu1  ;;  %10769 = vmatprep.subr.bf16.mxu1 %v27166_v41  ;;  %v28259_v20 = vld [vmem:[#allocation306_spill] sm:$0xff]  ;;  %v28261_v30 = vld [vmem:[#allocation257_spill] sm:$0xff] }
 0x62d   : > { %28253 = vst [vmem:[#allocation103_spill] sm:$0xff] %v23196_v21  ;;  %v23201_v38 = vadd.f32 %v17239_v25, %v28255_v59  ;;  %16977 = vmatmul.mubr.msk.bf16.gmra.mrb[160].mxu1 %vm21370_vm4, %v21680_v7 }
 0x62e   : > { %16980 = vmatprep.mubr.msk.bf16.mxu1 %vm21370_vm4, %v21690_v63 }
 0x62f   : > { %28256 = vst [vmem:[#allocation276_spill] sm:$0xff] %v23201_v38  ;;  %v28262_v38 = vld [vmem:[#allocation308_spill] sm:$0xff] }
 0x630   : > { %8620 = vmatmul.mubr.bf16.gmra.mrb[248].mxu0 %v22417_v5  ;;  %v6247_v55 = vpop.f32.mrb[80].mxu1  ;;  %v28264_v5 = vld [vmem:[#allocation31_spill] sm:$0xff] }
 0x631   : > { %15321 = vmatprep.mubr.msk.bf16.mxu0 %vm21370_vm4, %v28257_v10  ;;  %v17240_v40 = vadd.f32 %v28258_v36, %v6247_v55  ;;  %v6249_v22 = vpop.f32.mrb[81].mxu1  ;;  %v28265_v36 = vld [vmem:[#allocation258_spill] sm:$0xff] }
 0x632   : > { %v6250_v13 = vpop.f32.mrb[82].mxu1  ;;  %v28280_v10 = vld [vmem:[#allocation34_spill] sm:$0xff] }
 0x633   : > { %v23215_v26 = vadd.f32 %v17240_v40, %v28259_v20  ;;  %v17241_v25 = vadd.f32 %v28261_v30, %v6250_v13  ;;  %v6252_v59 = vpop.f32.mrb[83].mxu1  ;;  %v28266_v13 = vld [vmem:[#allocation305_spill] sm:$0xff]  ;;  %v28268_v30 = vld [vmem:[#allocation259_spill] sm:$0xff] }
 0x635   : > { %28260 = vst [vmem:[#allocation231_spill] sm:$0xff] %v23215_v26  ;;  %v23219_v21 = vadd.f32 %v17241_v25, %v28262_v38  ;;  %16981 = vmatmul.mubr.msk.bf16.gmra.mrb[164].mxu1 %vm21370_vm4, %v28264_v5 }
 0x636   : > { %16984 = vmatprep.mubr.msk.bf16.mxu1 %vm21370_vm4, %v27824_v43  ;;  %v28396_v43 = vld [vmem:[#allocation212_spill] sm:$0xff] }
 0x637   : > { %28263 = vst [vmem:[#allocation232_spill] sm:$0xff] %v23219_v21  ;;  %v28269_v21 = vld [vmem:[#allocation307_spill] sm:$0xff] }
 0x638   : > { %8628 = vmatmul.mubr.bf16.gmra.mrb[252].mxu0 %v22432_v34  ;;  %v6255_v55 = vpop.f32.mrb[84].mxu1  ;;  %v28271_v34 = vld [vmem:[#allocation63_spill] sm:$0xff] }
 0x639   : > { %15324 = vmatprep.mubr.msk.bf16.mxu0 %vm21370_vm4, %v28022_v53  ;;  %v17242_v40 = vadd.f32 %v28265_v36, %v6255_v55  ;;  %v6257_v22 = vpop.f32.mrb[85].mxu1  ;;  %v28272_v55 = vld [vmem:[#allocation150_spill] sm:$0xff]  ;;  %v28279_v53 = vld [vmem:[#allocation112_spill] sm:$0xff] }
 0x63a   : > { %v6258_v38 = vpop.f32.mrb[86].mxu1 }
 0x63b   : > { %v23233_v20 = vadd.f32 %v17242_v40, %v28266_v13  ;;  %v17243_v25 = vadd.f32 %v28268_v30, %v6258_v38  ;;  %v6260_v59 = vpop.f32.mrb[87].mxu1  ;;  %v28273_v40 = vld [vmem:[#allocation261_spill] sm:$0xff]  ;;  %v28274_v13 = vld [vmem:[#allocation310_spill] sm:$0xff] }
 0x63d   : > { %28267 = vst [vmem:[#allocation280_spill] sm:$0xff] %v23233_v20  ;;  %v23237_v26 = vadd.f32 %v17243_v25, %v28269_v21  ;;  %16985 = vmatmul.mubr.msk.bf16.gmra.mrb[168].mxu1 %vm21370_vm4, %v27827_v14  ;;  %v28276_v25 = vld [vmem:[#allocation262_spill] sm:$0xff]  ;;  %v28277_v20 = vld [vmem:[#allocation312_spill] sm:$0xff]  ;;  %v28378_v14 = vld [vmem:[#allocation179_spill] sm:$0xff] }
 0x63e   : > { %16988 = vmatprep.mubr.msk.bf16.mxu1 %vm21370_vm4, %v27829_v58  ;;  %v28362_v58 = vld [vmem:[#allocation175_spill] sm:$0xff] }
 0x63f   : > { %28270 = vst [vmem:[#allocation234_spill] sm:$0xff] %v23237_v26 }
 0x640   : > { %8636 = vmatmul.mubr.bf16.gmra.mrb[0].mxu0 %v28271_v34  ;;  %v6263_v36 = vpop.f32.mrb[88].mxu1 }
 0x641   : > { %15327 = vmatprep.mubr.msk.bf16.mxu0 %vm21370_vm4, %v28272_v55  ;;  %v17244_v22 = vadd.f32 %v28273_v40, %v6263_v36  ;;  %v6265_v38 = vpop.f32.mrb[89].mxu1  ;;  %v28281_v36 = vld [vmem:[#allocation151_spill] sm:$0xff] }
 0x642   : > { %v6266_v21 = vpop.f32.mrb[90].mxu1  ;;  %v28288_v55 = vld [vmem:[#allocation35_spill] sm:$0xff] }
 0x643   : > { %v23251_v30 = vadd.f32 %v17244_v22, %v28274_v13  ;;  %v17245_v59 = vadd.f32 %v28276_v25, %v6266_v21  ;;  %v6268_v26 = vpop.f32.mrb[91].mxu1  ;;  %v28282_v22 = vld [vmem:[#allocation263_spill] sm:$0xff]  ;;  %v28283_v21 = vld [vmem:[#allocation309_spill] sm:$0xff]  ;;  %v28285_v25 = vld [vmem:[#allocation264_spill] sm:$0xff] }
 0x645   : > { %28275 = vst [vmem:[#allocation278_spill] sm:$0xff] %v23251_v30  ;;  %v23255_v34 = vadd.f32 %v17245_v59, %v28277_v20  ;;  %16989 = vmatmul.mubr.msk.bf16.gmra.mrb[172].mxu1 %vm21370_vm4, %v28279_v53  ;;  %v28286_v30 = vld [vmem:[#allocation311_spill] sm:$0xff] }
 0x646   : > { %16992 = vmatprep.mubr.msk.bf16.mxu1 %vm21370_vm4, %v27834_v37  ;;  %v28354_v37 = vld [vmem:[#allocation173_spill] sm:$0xff] }
 0x647   : > { %28278 = vst [vmem:[#allocation235_spill] sm:$0xff] %v23255_v34 }
 0x648   : > { %8644 = vmatmul.mubr.bf16.gmra.mrb[4].mxu0 %v28280_v10  ;;  %v6271_v40 = vpop.f32.mrb[92].mxu1 }
 0x649   : > { %15330 = vmatprep.mubr.msk.bf16.mxu0 %vm21370_vm4, %v28281_v36  ;;  %v17246_v26 = vadd.f32 %v28282_v22, %v6271_v40  ;;  %v6273_v38 = vpop.f32.mrb[93].mxu1  ;;  %v28289_v40 = vld [vmem:[#allocation155_spill] sm:$0xff]  ;;  %v28290_v22 = vld [vmem:[#allocation265_spill] sm:$0xff] }
 0x64a   : > { %v6274_v20 = vpop.f32.mrb[94].mxu1 }
 0x64b   : > { %v23269_v13 = vadd.f32 %v17246_v26, %v28283_v21  ;;  %v17247_v59 = vadd.f32 %v28285_v25, %v6274_v20  ;;  %v6276_v34 = vpop.f32.mrb[95].mxu1  ;;  %v18711_v20 = vld [vmem:[%s26522_s2 + $0x3c8] sm:$0xff]   ;;  %v28291_v25 = vld [vmem:[#allocation314_spill] sm:$0xff] }
 0x64c   : > { %v18709_v34 = vld [vmem:[%s26522_s2 + $0x3c0] sm:$0xff]  }
 0x64d   : > { %28284 = vst [vmem:[#allocation279_spill] sm:$0xff] %v23269_v13  ;;  %v23273_v10 = vadd.f32 %v17247_v59, %v28286_v30  ;;  %16993 = vmatmul.mubr.msk.bf16.gmra.mrb[176].mxu1 %vm21370_vm4, %v27838_v51  ;;  %8845 = vmatpush1.bf16.msra.mxu0 %v18709_v34  ;;  %v28297_v34 = vld [vmem:[#allocation36_spill] sm:$0xff]  ;;  %v28353_v51 = vld [vmem:[#allocation167_spill] sm:$0xff] }
 0x64e   : > { %16996 = vmatprep.mubr.msk.bf16.mxu1 %vm21370_vm4, %v28181_v46  ;;  %8846 = vmatprep.subr.bf16.mxu0 %v27166_v41  ;;  %v28351_v46 = vld [vmem:[#allocation15_spill] sm:$0xff] }
 0x64f   : > { %28287 = vst [vmem:[#allocation237_spill] sm:$0xff] %v23273_v10  ;;  %v28293_v10 = vld [vmem:[#allocation266_spill] sm:$0xff] }
 0x650   : > { %8652 = vmatmul.mubr.bf16.gmra.mrb[8].mxu0 %v28288_v55  ;;  %v6279_v30 = vpop.f32.mrb[96].mxu1  ;;  %v28294_v55 = vld [vmem:[#allocation316_spill] sm:$0xff] }
 0x651   : > { %15333 = vmatprep.mubr.msk.bf16.mxu0 %vm21370_vm4, %v28289_v40  ;;  %v17248_v26 = vadd.f32 %v28290_v22, %v6279_v30  ;;  %v6281_v38 = vpop.f32.mrb[97].mxu1  ;;  %8847 = vmatpush1.bf16.msra.mxu0 %v18711_v20  ;;  %v28298_v30 = vld [vmem:[#allocation156_spill] sm:$0xff]  ;;  %v28300_v20 = vld [vmem:[#allocation313_spill] sm:$0xff] }
 0x652   : > { %v6282_v21 = vpop.f32.mrb[98].mxu1  ;;  %8848 = vmatprep.subr.bf16.mxu0 %v27166_v41 }
 0x653   : > { %v23294_v59 = vadd.f32 %v17248_v26, %v28291_v25  ;;  %v17249_v13 = vadd.f32 %v28293_v10, %v6282_v21  ;;  %v6284_v40 = vpop.f32.mrb[99].mxu1  ;;  %v18712_v10 = vld [vmem:[%s26522_s2 + $0x3d0] sm:$0xff]   ;;  %v18713_v26 = vld [vmem:[%s26522_s2 + $0x3d8] sm:$0xff]   ;;  %v28302_v25 = vld [vmem:[#allocation268_spill] sm:$0xff] }
 0x655   : > { %28292 = vst [vmem:[#allocation282_spill] sm:$0xff] %v23294_v59  ;;  %v23298_v36 = vadd.f32 %v17249_v13, %v28294_v55  ;;  %16997 = vmatmul.mubr.msk.bf16.gmra.mrb[180].mxu1 %vm21370_vm4, %v28296_v18  ;;  %v28299_v13 = vld [vmem:[#allocation267_spill] sm:$0xff]  ;;  %8849 = vmatpush1.bf16.msra.mxu0 %v18712_v10  ;;  %v28305_v10 = vld [vmem:[#allocation37_spill] sm:$0xff]  ;;  %v28331_v18 = vld [vmem:[#allocation318_spill] sm:$0xff] }
 0x656   : > { %17000 = vmatprep.mubr.msk.bf16.mxu1 %vm21370_vm4, %v28198_v29  ;;  %8850 = vmatprep.subr.bf16.mxu0 %v27166_v41  ;;  %v28344_v29 = vld [vmem:[#allocation44_spill] sm:$0xff] }
 0x657   : > { %28295 = vst [vmem:[#allocation238_spill] sm:$0xff] %v23298_v36 }
 0x658   : > { %8660 = vmatmul.mubr.bf16.gmra.mrb[12].mxu0 %v28297_v34  ;;  %v6287_v55 = vpop.f32.mrb[100].mxu1 }
 0x659   : > { %15336 = vmatprep.mubr.msk.bf16.mxu0 %vm21370_vm4, %v28298_v30  ;;  %v17250_v40 = vadd.f32 %v28299_v13, %v6287_v55  ;;  %v6289_v22 = vpop.f32.mrb[101].mxu1  ;;  %v28303_v30 = vld [vmem:[#allocation315_spill] sm:$0xff]  ;;  %8851 = vmatpush1.bf16.msra.mxu0 %v18713_v26  ;;  %v28306_v55 = vld [vmem:[#allocation157_spill] sm:$0xff]  ;;  %v28308_v13 = vld [vmem:[#allocation38_spill] sm:$0xff] }
 0x65a   : > { %v6290_v38 = vpop.f32.mrb[102].mxu1  ;;  %8852 = vmatprep.subr.bf16.mxu0 %v27166_v41  ;;  %v28310_v22 = vld [vmem:[#allocation161_spill] sm:$0xff]  ;;  %v18717_v26 = vld [vmem:[%s26522_s2 + $0x3f0] sm:$0xff]  }
 0x65b   : > { %v23320_v21 = vadd.f32 %v17250_v40, %v28300_v20  ;;  %v17251_v36 = vadd.f32 %v28302_v25, %v6290_v38  ;;  %v6292_v59 = vpop.f32.mrb[103].mxu1  ;;  %v28309_v40 = vld [vmem:[#allocation68_spill] sm:$0xff]  ;;  %v18718_v38 = vld [vmem:[%s26522_s2 + $0x3f8] sm:$0xff]  }
 0x65c   : > { %v18716_v59 = vld [vmem:[%s26522_s2 + $0x3e8] sm:$0xff]   ;;  %v18703_v20 = vld [vmem:[%s26522_s2 + $0x500] sm:$0xff]  }
 0x65d   : > { %28301 = vst [vmem:[#allocation284_spill] sm:$0xff] %v23320_v21  ;;  %v23324_v34 = vadd.f32 %v17251_v36, %v28303_v30  ;;  %17001 = vmatmul.mubr.msk.bf16.gmra.mrb[184].mxu1 %vm21370_vm4, %v28206_v35  ;;  %v18714_v36 = vld [vmem:[%s26522_s2 + $0x3e0] sm:$0xff]   ;;  %v28307_v30 = vld [vmem:[#allocation201_spill] sm:$0xff]  ;;  %v18722_v21 = vld [vmem:[%s26522_s2 + $0x410] sm:$0xff]  }
 0x65e   : > { %17004 = vmatprep.mubr.msk.bf16.mxu1 %vm21370_vm4, %v28215_v19  ;;  %8853 = vmatpush1.bf16.msra.mxu0 %v18714_v36  ;;  %v28311_v25 = vld [vmem:[#allocation76_spill] sm:$0xff]  ;;  %v28312_v36 = vld [vmem:[#allocation39_spill] sm:$0xff] }
 0x65f   : > { %28304 = vst [vmem:[#allocation96_spill] sm:$0xff] %v23324_v34  ;;  %8854 = vmatprep.subr.bf16.mxu0 %v27166_v41  ;;  %v18719_v34 = vld [vmem:[%s26522_s2 + $0x400] sm:$0xff]  }
 0x660   : > { %8668 = vmatmul.mubr.bf16.gmra.mrb[16].mxu0 %v28305_v10  ;;  %v18715_v10 = vld [vmem:[%s26522_s2 + $0x538] sm:$0xff]   ;;  %v28336_v35 = vld [vmem:[#allocation220_spill] sm:$0xff] }
 0x661   : > { %15339 = vmatprep.mubr.msk.bf16.mxu0 %vm21370_vm4, %v28306_v55  ;;  %v18727_v55 = vld [vmem:[%s26522_s2 + $0x430] sm:$0xff]  }
 0x662   : > { %8855 = vmatpush1.bf16.msra.mxu0 %v18716_v59  ;;  %v28313_v59 = vld [vmem:[#allocation64_spill] sm:$0xff] }
 0x663   : > { %8856 = vmatprep.subr.bf16.mxu0 %v27166_v41 }
 0x665   : > { %17005 = vmatmul.mubr.msk.bf16.gmra.mrb[188].mxu1 %vm21370_vm4, %v28307_v30 }
 0x666   : > { %10512 = vmatprep.mubr.bf16.mxu1 %v28309_v40  ;;  %8857 = vmatpush1.bf16.msra.mxu0 %v18717_v26  ;;  %v28314_v40 = vld [vmem:[#allocation163_spill] sm:$0xff]  ;;  %v18704_v26 = vld [vmem:[%s26522_s2 + $0x508] sm:$0xff]  }
 0x667   : > { %8858 = vmatprep.subr.bf16.mxu0 %v27166_v41 }
 0x668   : > { %8676 = vmatmul.mubr.bf16.gmra.mrb[20].mxu0 %v28308_v13  ;;  %v18724_v13 = vld [vmem:[%s26522_s2 + $0x420] sm:$0xff]  }
 0x669   : > { %15342 = vmatprep.mubr.msk.bf16.mxu0 %vm21370_vm4, %v28310_v22  ;;  %v28322_v22 = vld [vmem:[#allocation166_spill] sm:$0xff] }
 0x66a   : > { %8859 = vmatpush1.bf16.msra.mxu0 %v18718_v38  ;;  %v18721_v38 = vld [vmem:[%s26522_s2 + $0x408] sm:$0xff]  }
 0x66b   : > { %8860 = vmatprep.subr.bf16.mxu0 %v27166_v41 }
 0x66d   : > { %15660 = vmatmul.mubr.msk.bf16.vlgmr.msra.gmra.mrb[192].mxu1 %vm19825_vm2, %v28311_v25  ;;  %v28315_v25 = vld [vmem:[#allocation65_spill] sm:$0xff] }
 0x66e   : > { %10520 = vmatprep.mubr.bf16.mxu1 %v28313_v59  ;;  %10770 = vmatpush1.bf16.msra.mxu1 %v18703_v20  ;;  %v18705_v20 = vld [vmem:[%s26522_s2 + $0x510] sm:$0xff]  }
 0x66f   : > { %10771 = vmatprep.subr.bf16.mxu1 %v27166_v41  ;;  %8861 = vmatpush1.bf16.msra.mxu0 %v18719_v34  ;;  %v28317_v34 = vld [vmem:[#allocation66_spill] sm:$0xff] }
 0x670   : > { %8684 = vmatmul.mubr.bf16.gmra.mrb[24].mxu0 %v28312_v36  ;;  %8862 = vmatprep.subr.bf16.mxu0 %v27166_v41  ;;  %v28318_v36 = vld [vmem:[#allocation164_spill] sm:$0xff] }
 0x671   : > { %15345 = vmatprep.mubr.msk.bf16.mxu0 %vm21370_vm4, %v28314_v40  ;;  %v28316_v40 = vld [vmem:[#allocation69_spill] sm:$0xff] }
 0x672   : > { %10772 = vmatpush1.bf16.msra.mxu1 %v18704_v26  ;;  %v18706_v26 = vld [vmem:[%s26522_s2 + $0x518] sm:$0xff]  }
 0x673   : > { %10773 = vmatprep.subr.bf16.mxu1 %v27166_v41  ;;  %8863 = vmatpush1.bf16.msra.mxu0 %v18721_v38  ;;  %v18723_v38 = vld [vmem:[%s26522_s2 + $0x418] sm:$0xff]  }
 0x674   : > { %8864 = vmatprep.subr.bf16.mxu0 %v27166_v41 }
 0x675   : > { %15665 = vmatmul.mubr.msk.bf16.gmra.mrb[196].mxu1 %vm19825_vm2, %v28315_v25 }
 0x676   : > { %10528 = vmatprep.mubr.bf16.mxu1 %v28317_v34  ;;  %10774 = vmatpush1.bf16.msra.mxu1 %v18705_v20  ;;  %v18707_v20 = vld [vmem:[%s26522_s2 + $0x520] sm:$0xff]  }
 0x677   : > { %10775 = vmatprep.subr.bf16.mxu1 %v27166_v41  ;;  %8865 = vmatpush1.bf16.msra.mxu0 %v18722_v21  ;;  %v28321_v21 = vld [vmem:[#allocation67_spill] sm:$0xff] }
 0x678   : > { %8692 = vmatmul.mubr.bf16.gmra.mrb[28].mxu0 %v28316_v40  ;;  %8866 = vmatprep.subr.bf16.mxu0 %v27166_v41  ;;  %v28320_v40 = vld [vmem:[#allocation40_spill] sm:$0xff] }
 0x679   : > { %15348 = vmatprep.mubr.msk.bf16.mxu0 %vm21370_vm4, %v28318_v36  ;;  %v28319_v36 = vld [vmem:[#allocation70_spill] sm:$0xff] }
 0x67a   : > { %10776 = vmatpush1.bf16.msra.mxu1 %v18706_v26  ;;  %v18708_v26 = vld [vmem:[%s26522_s2 + $0x528] sm:$0xff]  }
 0x67b   : > { %10777 = vmatprep.subr.bf16.mxu1 %v27166_v41  ;;  %8867 = vmatpush1.bf16.msra.mxu0 %v18723_v38  ;;  %v18726_v38 = vld [vmem:[%s26522_s2 + $0x428] sm:$0xff]  }
 0x67c   : > { %8868 = vmatprep.subr.bf16.mxu0 %v27166_v41 }
 0x67d   : > { %15670 = vmatmul.mubr.msk.bf16.gmra.mrb[200].mxu1 %vm19825_vm2, %v28319_v36 }
 0x67e   : > { %10536 = vmatprep.mubr.bf16.mxu1 %v28321_v21  ;;  %10778 = vmatpush1.bf16.msra.mxu1 %v18707_v20  ;;  %v18710_v20 = vld [vmem:[%s26522_s2 + $0x530] sm:$0xff]  }
 0x67f   : > { %10779 = vmatprep.subr.bf16.mxu1 %v27166_v41  ;;  %8869 = vmatpush1.bf16.msra.mxu0 %v18724_v13  ;;  %v28325_v13 = vld [vmem:[#allocation82_spill] sm:$0xff] }
 0x680   : > { %8700 = vmatmul.mubr.bf16.gmra.mrb[32].mxu0 %v28320_v40  ;;  %8870 = vmatprep.subr.bf16.mxu0 %v27166_v41  ;;  %v28324_v40 = vld [vmem:[#allocation41_spill] sm:$0xff] }
 0x681   : > { %15351 = vmatprep.mubr.msk.bf16.mxu0 %vm21370_vm4, %v28322_v22  ;;  %v28323_v22 = vld [vmem:[#allocation77_spill] sm:$0xff] }
 0x682   : > { %10780 = vmatpush1.bf16.msra.mxu1 %v18708_v26  ;;  %v28326_v26 = vld [vmem:[#allocation168_spill] sm:$0xff] }
 0x683   : > { %10781 = vmatprep.subr.bf16.mxu1 %v27166_v41  ;;  %8871 = vmatpush1.bf16.msra.mxu0 %v18726_v38  ;;  %v18728_v38 = vld [vmem:[%s26522_s2 + $0x438] sm:$0xff]  }
 0x684   : > { %8872 = vmatprep.subr.bf16.mxu0 %v27166_v41 }
 0x685   : > { %15675 = vmatmul.mubr.msk.bf16.gmra.mrb[204].mxu1 %vm19825_vm2, %v28323_v22 }
 0x686   : > { %10544 = vmatprep.mubr.bf16.mxu1 %v28325_v13  ;;  %10782 = vmatpush1.bf16.msra.mxu1 %v18710_v20  ;;  %v18720_v20 = vld [vmem:[%s26522_s2 + $0x540] sm:$0xff]  }
 0x687   : > { %10783 = vmatprep.subr.bf16.mxu1 %v27166_v41  ;;  %8873 = vmatpush1.bf16.msra.mxu0 %v18727_v55  ;;  %v28327_v13 = vld [vmem:[#allocation12_spill] sm:$0xff]  ;;  %v28329_v55 = vld [vmem:[#allocation71_spill] sm:$0xff] }
 0x688   : > { %8708 = vmatmul.mubr.bf16.gmra.mrb[36].mxu0 %v28324_v40  ;;  %8874 = vmatprep.subr.bf16.mxu0 %v27166_v41  ;;  %v28330_v40 = vld [vmem:[#allocation169_spill] sm:$0xff] }
 0x689   : > { %15354 = vmatprep.mubr.msk.bf16.mxu0 %vm21370_vm4, %v28326_v26  ;;  %v28328_v26 = vld [vmem:[#allocation42_spill] sm:$0xff] }
 0x68a   : > { %10784 = vmatpush1.bf16.msra.mxu1 %v18715_v10  ;;  %v18725_v10 = vld [vmem:[%s26522_s2 + $0x548] sm:$0xff]  }
 0x68b   : > { %10785 = vmatprep.subr.bf16.mxu1 %v27166_v41  ;;  %8875 = vmatpush1.bf16.msra.mxu0 %v18728_v38 }
 0x68d   : > { %15680 = vmatmul.mubr.msk.bf16.gmra.mrb[208].mxu1 %vm19825_vm2, %v28327_v13 }
 0x68e   : > { %10552 = vmatprep.mubr.bf16.mxu1 %v28329_v55  ;;  %10786 = vmatpush1.bf16.msra.mxu1 %v18720_v20  ;;  %v18729_v20 = vld [vmem:[%s26522_s2 + $0x550] sm:$0xff]  }
 0x68f   : > { %10787 = vmatprep.subr.bf16.mxu1 %v27166_v41 }
 0x690   : > { %8716 = vmatmul.mubr.bf16.gmra.mrb[40].mxu0 %v28328_v26  ;;  %v6584_v30 = vpop.f32.mrb[104].mxu1  ;;  %v28333_v26 = vld [vmem:[#allocation320_spill] sm:$0xff] }
 0x691   : > { %15357 = vmatprep.mubr.msk.bf16.mxu0 %vm21370_vm4, %v28330_v40  ;;  %v23472_v53 = vadd.f32 %v28331_v18, %v6584_v30  ;;  %v6586_v38 = vpop.f32.mrb[105].mxu1  ;;  %v28335_v40 = vld [vmem:[#allocation83_spill] sm:$0xff]  ;;  %v28337_v18 = vld [vmem:[#allocation78_spill] sm:$0xff] }
 0x692   : > { %v6587_v13 = vpop.f32.mrb[106].mxu1  ;;  %10788 = vmatpush1.bf16.msra.mxu1 %v18725_v10  ;;  %v28338_v30 = vld [vmem:[#allocation171_spill] sm:$0xff] }
 0x693   : > { %28332 = vst [vmem:[#allocation281_spill] sm:$0xff] %v23472_v53  ;;  %v23475_v5 = vadd.f32 %v28333_v26, %v6587_v13  ;;  %v6589_v19 = vpop.f32.mrb[107].mxu1  ;;  %10789 = vmatprep.subr.bf16.mxu1 %v27166_v41  ;;  %v28339_v26 = vld [vmem:[#allocation317_spill] sm:$0xff] }
 0x695   : > { %28334 = vst [vmem:[#allocation240_spill] sm:$0xff] %v23475_v5  ;;  %15685 = vmatmul.mubr.msk.bf16.gmra.mrb[212].mxu1 %vm19825_vm2, %v28335_v40  ;;  %v28341_v5 = vld [vmem:[#allocation319_spill] sm:$0xff] }
 0x696   : > { %10560 = vmatprep.mubr.bf16.mxu1 %v28337_v18  ;;  %10790 = vmatpush1.bf16.msra.mxu1 %v18729_v20  ;;  %v28346_v20 = vld [vmem:[#allocation172_spill] sm:$0xff] }
 0x697   : > { %10791 = vmatprep.subr.bf16.mxu1 %v27166_v41 }
 0x698   : > { %8724 = vmatmul.mubr.bf16.gmra.mrb[44].mxu0 %v28336_v35  ;;  %v6592_v19 = vpop.f32.mrb[108].mxu1  ;;  %v28343_v35 = vld [vmem:[#allocation88_spill] sm:$0xff] }
 0x699   : > { %15360 = vmatprep.mubr.msk.bf16.mxu0 %vm21370_vm4, %v28338_v30  ;;  %v23491_v10 = vadd.f32 %v28339_v26, %v6592_v19  ;;  %v6594_v38 = vpop.f32.mrb[109].mxu1  ;;  %v28345_v30 = vld [vmem:[#allocation86_spill] sm:$0xff]  ;;  %v18730_v19 = vld [vmem:[%s26522_s2 + $0x558] sm:$0xff]  }
 0x69a   : > { %v6595_v13 = vpop.f32.mrb[110].mxu1  ;;  %10792 = vmatpush1.bf16.msra.mxu1 %v18730_v19 }
 0x69b   : > { %28340 = vst [vmem:[#allocation110_spill] sm:$0xff] %v23491_v10  ;;  %v23494_v53 = vadd.f32 %v28341_v5, %v6595_v13  ;;  %v6597_v15 = vpop.f32.mrb[111].mxu1  ;;  %v28347_v5 = vld [vmem:[#allocation322_spill] sm:$0xff]  ;;  %10793 = vmatprep.subr.bf16.mxu1 %v27166_v41 }
 0x69d   : > { %28342 = vst [vmem:[#allocation283_spill] sm:$0xff] %v23494_v53  ;;  %15690 = vmatmul.mubr.msk.bf16.gmra.mrb[216].mxu1 %vm19825_vm2, %v28343_v35 }
 0x69e   : > { %10568 = vmatprep.mubr.bf16.mxu1 %v28345_v30 }
 0x6a0   : > { %8732 = vmatmul.mubr.bf16.gmra.mrb[48].mxu0 %v28344_v29  ;;  %v6600_v26 = vpop.f32.mrb[112].mxu1  ;;  %v28349_v29 = vld [vmem:[#allocation324_spill] sm:$0xff] }
 0x6a1   : > { %15363 = vmatprep.mubr.msk.bf16.mxu0 %vm21370_vm4, %v28346_v20  ;;  %v23508_v38 = vadd.f32 %v28347_v5, %v6600_v26  ;;  %v6602_v15 = vpop.f32.mrb[113].mxu1  ;;  %v28352_v20 = vld [vmem:[#allocation45_spill] sm:$0xff] }
 0x6a2   : > { %v6603_v13 = vpop.f32.mrb[114].mxu1  ;;  %v28355_v26 = vld [vmem:[#allocation321_spill] sm:$0xff] }
 0x6a3   : > { %28348 = vst [vmem:[#allocation97_spill] sm:$0xff] %v23508_v38  ;;  %v23512_v53 = vadd.f32 %v28349_v29, %v6603_v13  ;;  %v6605_v10 = vpop.f32.mrb[115].mxu1  ;;  %v28357_v13 = vld [vmem:[#allocation323_spill] sm:$0xff]  ;;  %v28359_v38 = vld [vmem:[#allocation196_spill] sm:$0xff] }
 0x6a5   : > { %28350 = vst [vmem:[#allocation286_spill] sm:$0xff] %v23512_v53  ;;  %15695 = vmatmul.mubr.msk.bf16.gmra.mrb[220].mxu1 %vm19825_vm2, %v28351_v46 }
 0x6a6   : > { %10576 = vmatprep.mubr.bf16.mxu1 %v28353_v51  ;;  %v28361_v51 = vld [vmem:[#allocation26_spill] sm:$0xff] }
 0x6a8   : > { %8740 = vmatmul.mubr.bf16.gmra.mrb[52].mxu0 %v28352_v20  ;;  %v6608_v19 = vpop.f32.mrb[116].mxu1  ;;  %v28360_v20 = vld [vmem:[#allocation174_spill] sm:$0xff] }
 0x6a9   : > { %15366 = vmatprep.mubr.msk.bf16.mxu0 %vm21370_vm4, %v28354_v37  ;;  %v23523_v5 = vadd.f32 %v28355_v26, %v6608_v19  ;;  %v6610_v15 = vpop.f32.mrb[117].mxu1  ;;  %v18731_v19 = vld [vmem:[%s26522_s2 + $0x560] sm:$0xff]  }
 0x6aa   : > { %v6611_v29 = vpop.f32.mrb[118].mxu1  ;;  %v28363_v15 = vld [vmem:[#allocation326_spill] sm:$0xff]  ;;  %10794 = vmatpush1.bf16.msra.mxu1 %v18731_v19 }
 0x6ab   : > { %28356 = vst [vmem:[#allocation241_spill] sm:$0xff] %v23523_v5  ;;  %v23526_v10 = vadd.f32 %v28357_v13, %v6611_v29  ;;  %v6613_v53 = vpop.f32.mrb[119].mxu1  ;;  %10795 = vmatprep.subr.bf16.mxu1 %v27166_v41  ;;  %v28369_v5 = vld [vmem:[#allocation199_spill] sm:$0xff] }
 0x6ad   : > { %28358 = vst [vmem:[#allocation288_spill] sm:$0xff] %v23526_v10  ;;  %15700 = vmatmul.mubr.msk.bf16.gmra.mrb[224].mxu1 %vm19825_vm2, %v28359_v38  ;;  %v28365_v38 = vld [vmem:[#allocation328_spill] sm:$0xff]  ;;  %v28367_v10 = vld [vmem:[#allocation198_spill] sm:$0xff] }
 0x6ae   : > { %10584 = vmatprep.mubr.bf16.mxu1 %v28361_v51 }
 0x6b0   : > { %8748 = vmatmul.mubr.bf16.gmra.mrb[56].mxu0 %v28360_v20  ;;  %v6616_v26 = vpop.f32.mrb[120].mxu1 }
 0x6b1   : > { %15369 = vmatprep.mubr.msk.bf16.mxu0 %vm21370_vm4, %v28362_v58  ;;  %v23540_v29 = vadd.f32 %v28363_v15, %v6616_v26  ;;  %v6618_v53 = vpop.f32.mrb[121].mxu1  ;;  %v28368_v58 = vld [vmem:[#allocation176_spill] sm:$0xff]  ;;  %v28371_v26 = vld [vmem:[#allocation325_spill] sm:$0xff] }
 0x6b2   : > { %v6619_v13 = vpop.f32.mrb[122].mxu1 }
 0x6b3   : > { %28364 = vst [vmem:[#allocation98_spill] sm:$0xff] %v23540_v29  ;;  %v23544_v20 = vadd.f32 %v28365_v38, %v6619_v13  ;;  %v6621_v37 = vpop.f32.mrb[123].mxu1  ;;  %v28373_v38 = vld [vmem:[#allocation327_spill] sm:$0xff] }
 0x6b4   : > { %v28375_v29 = vld [vmem:[#allocation203_spill] sm:$0xff] }
 0x6b5   : > { %28366 = vst [vmem:[#allocation285_spill] sm:$0xff] %v23544_v20  ;;  %15705 = vmatmul.mubr.msk.bf16.gmra.mrb[228].mxu1 %vm19825_vm2, %v28367_v10 }
 0x6b6   : > { %10592 = vmatprep.mubr.bf16.mxu1 %v28369_v5 }
 0x6b8   : > { %8756 = vmatmul.mubr.bf16.gmra.mrb[60].mxu0 %v28368_v58  ;;  %v6624_v19 = vpop.f32.mrb[124].mxu1  ;;  %v28376_v58 = vld [vmem:[#allocation178_spill] sm:$0xff] }
 0x6b9   : > { %15372 = vmatprep.mubr.msk.bf16.mxu0 %vm21370_vm4, %v28370_v52  ;;  %v23555_v15 = vadd.f32 %v28371_v26, %v6624_v19  ;;  %v6626_v53 = vpop.f32.mrb[125].mxu1  ;;  %v18732_v19 = vld [vmem:[%s26522_s2 + $0x568] sm:$0xff]  }
 0x6ba   : > { %v6627_v13 = vpop.f32.mrb[126].mxu1  ;;  %10796 = vmatpush1.bf16.msra.mxu1 %v18732_v19 }
 0x6bb   : > { %28372 = vst [vmem:[#allocation242_spill] sm:$0xff] %v23555_v15  ;;  %v23558_v37 = vadd.f32 %v28373_v38, %v6627_v13  ;;  %v6629_v20 = vpop.f32.mrb[127].mxu1  ;;  %10797 = vmatprep.subr.bf16.mxu1 %v27166_v41  ;;  %v28381_v38 = vld [vmem:[#allocation205_spill] sm:$0xff] }
 0x6bd   : > { %28374 = vst [vmem:[#allocation287_spill] sm:$0xff] %v23558_v37  ;;  %15710 = vmatmul.mubr.msk.bf16.gmra.mrb[232].mxu1 %vm19825_vm2, %v28375_v29 }
 0x6be   : > { %10600 = vmatprep.mubr.bf16.mxu1 %v28377_v16 }
 0x6c0   : > { %8764 = vmatmul.mubr.bf16.gmra.mrb[64].mxu0 %v28376_v58  ;;  %v23571_v26 = vpop.f32.mrb[128].mxu1  ;;  %v28383_v58 = vld [vmem:[#allocation208_spill] sm:$0xff] }
 0x6c1   : > { %15375 = vmatprep.mubr.msk.bf16.mxu0 %vm21370_vm4, %v28378_v14  ;;  %28379 = vst [vmem:[#allocation100_spill] sm:$0xff] %v23571_v26  ;;  %v23573_v53 = vpop.f32.mrb[129].mxu1  ;;  %v28382_v14 = vld [vmem:[#allocation180_spill] sm:$0xff] }
 0x6c2   : > { %v23575_v20 = vpop.f32.mrb[130].mxu1  ;;  %v28431_v26 = vld [vmem:[#allocation152_spill] sm:$0xff] }
 0x6c3   : > { %28380 = vst [vmem:[#allocation290_spill] sm:$0xff] %v23575_v20  ;;  %v23578_v13 = vpop.f32.mrb[131].mxu1  ;;  %v28425_v20 = vld [vmem:[#allocation194_spill] sm:$0xff] }
 0x6c5   : > { %15715 = vmatmul.mubr.msk.bf16.gmra.mrb[236].mxu1 %vm19825_vm2, %v28381_v38 }
 0x6c6   : > { %10608 = vmatprep.mubr.bf16.mxu1 %v28383_v58  ;;  %v18733_v58 = vld [vmem:[%s26522_s2 + $0x570] sm:$0xff]  }
 0x6c7   : > { %10798 = vmatpush1.bf16.msra.mxu1 %v18733_v58 }
 0x6c8   : > { %8772 = vmatmul.mubr.bf16.gmra.mrb[68].mxu0 %v28382_v14  ;;  %v23588_v52 = vpop.f32.mrb[132].mxu1  ;;  %v28389_v14 = vld [vmem:[#allocation209_spill] sm:$0xff]  ;;  %10799 = vmatprep.subr.bf16.mxu1 %v27166_v41 }
 0x6c9   : > { %15378 = vmatprep.mubr.msk.bf16.mxu0 %vm21370_vm4, %v28105_v49  ;;  %28384 = vst [vmem:[#allocation243_spill] sm:$0xff] %v23588_v52  ;;  %v23590_v19 = vpop.f32.mrb[133].mxu1 }
 0x6ca   : > { %28385 = vst [vmem:[#allocation221_spill] sm:$0xff] %v23590_v19  ;;  %v23592_v37 = vpop.f32.mrb[134].mxu1  ;;  %v28415_v19 = vld [vmem:[#allocation140_spill] sm:$0xff] }
 0x6cb   : > { %28386 = vst [vmem:[#allocation292_spill] sm:$0xff] %v23592_v37  ;;  %v23594_v15 = vpop.f32.mrb[135].mxu1 }
 0x6cc   : > { %28387 = vst [vmem:[#allocation244_spill] sm:$0xff] %v23594_v15  ;;  %v28409_v15 = vld [vmem:[#allocation192_spill] sm:$0xff] }
 0x6cd   : > { %15720 = vmatmul.mubr.msk.bf16.gmra.mrb[240].mxu1 %vm19825_vm2, %v28388_v1 }
 0x6ce   : > { %10616 = vmatprep.mubr.bf16.mxu1 %v28389_v14 }
 0x6d0   : > { %8780 = vmatmul.mubr.bf16.gmra.mrb[72].mxu0 %v28111_v50  ;;  %v23607_v49 = vpop.f32.mrb[136].mxu1  ;;  %v28394_v50 = vld [vmem:[#allocation211_spill] sm:$0xff] }
 0x6d1   : > { %15381 = vmatprep.mubr.msk.bf16.mxu0 %vm21370_vm4, %v28114_v39  ;;  %28390 = vst [vmem:[#allocation289_spill] sm:$0xff] %v23607_v49  ;;  %v23609_v37 = vpop.f32.mrb[137].mxu1  ;;  %v28395_v39 = vld [vmem:[#allocation184_spill] sm:$0xff] }
 0x6d2   : > { %28391 = vst [vmem:[#allocation245_spill] sm:$0xff] %v23609_v37  ;;  %v23611_v52 = vpop.f32.mrb[138].mxu1 }
 0x6d3   : > { %28392 = vst [vmem:[#allocation291_spill] sm:$0xff] %v23611_v52  ;;  %v23614_v1 = vpop.f32.mrb[139].mxu1 }
 0x6d4   : > { %28393 = vst [vmem:[#allocation246_spill] sm:$0xff] %v23614_v1  ;;  %v28401_v1 = vld [vmem:[#allocation213_spill] sm:$0xff] }
 0x6d5   : > { %15725 = vmatmul.mubr.msk.bf16.gmra.mrb[244].mxu1 %vm19825_vm2, %v28394_v50 }
 0x6d6   : > { %10624 = vmatprep.mubr.bf16.mxu1 %v28396_v43 }
 0x6d8   : > { %8788 = vmatmul.mubr.bf16.gmra.mrb[76].mxu0 %v28395_v39  ;;  %v23624_v49 = vpop.f32.mrb[140].mxu1  ;;  %v28402_v39 = vld [vmem:[#allocation214_spill] sm:$0xff] }
 0x6d9   : > { %15384 = vmatprep.mubr.msk.bf16.mxu0 %vm21370_vm4, %v28121_v32  ;;  %28397 = vst [vmem:[#allocation294_spill] sm:$0xff] %v23624_v49  ;;  %v23626_v58 = vpop.f32.mrb[141].mxu1  ;;  %v18734_v32 = vld [vmem:[%s26522_s2 + $0x578] sm:$0xff]  }
 0x6da   : > { %28398 = vst [vmem:[#allocation247_spill] sm:$0xff] %v23626_v58  ;;  %v23628_v52 = vpop.f32.mrb[142].mxu1  ;;  %10800 = vmatpush1.bf16.msra.mxu1 %v18734_v32  ;;  %v28407_v58 = vld [vmem:[#allocation215_spill] sm:$0xff] }
 0x6db   : > { %28399 = vst [vmem:[#allocation296_spill] sm:$0xff] %v23628_v52  ;;  %v23630_v37 = vpop.f32.mrb[143].mxu1  ;;  %11058 = vmatprep.subr.bf16.mxu1 %v27166_v41 }
 0x6dc   : > { %28400 = vst [vmem:[#allocation132_spill] sm:$0xff] %v23630_v37 }
 0x6dd   : > { %15730 = vmatmul.mubr.msk.bf16.gmra.mrb[248].mxu1 %vm19825_vm2, %v28401_v1 }
 0x6de   : > { %10632 = vmatprep.mubr.bf16.mxu1 %v28402_v39 }
 0x6e0   : > { %8796 = vmatmul.mubr.bf16.gmra.mrb[80].mxu0 %v28126_v0  ;;  %v23643_v49 = vpop.f32.mrb[144].mxu1 }
 0x6e1   : > { %15387 = vmatprep.mubr.msk.bf16.mxu0 %vm21370_vm4, %v28129_v57  ;;  %28403 = vst [vmem:[#allocation10_spill] sm:$0xff] %v23643_v49  ;;  %v23645_v52 = vpop.f32.mrb[145].mxu1  ;;  %v28408_v57 = vld [vmem:[#allocation218_spill] sm:$0xff] }
 0x6e2   : > { %28404 = vst [vmem:[#allocation293_spill] sm:$0xff] %v23645_v52  ;;  %v23647_v37 = vpop.f32.mrb[146].mxu1 }
 0x6e3   : > { %28405 = vst [vmem:[#allocation248_spill] sm:$0xff] %v23647_v37  ;;  %v23650_v0 = vpop.f32.mrb[147].mxu1 }
 0x6e4   : > { %28406 = vst [vmem:[#allocation295_spill] sm:$0xff] %v23650_v0  ;;  %v28414_v0 = vld [vmem:[#allocation219_spill] sm:$0xff] }
 0x6e5   : > { %15735 = vmatmul.mubr.msk.bf16.gmra.mrb[252].mxu1 %vm19825_vm2, %v28407_v58 }
 0x6e6   : > { %10640 = vmatprep.mubr.bf16.mxu1 %v28408_v57  ;;  %v28417_v57 = vld [vmem:[#allocation193_spill] sm:$0xff] }
 0x6e8   : > { %8804 = vmatmul.mubr.bf16.gmra.mrb[84].mxu0 %v28134_v42  ;;  %v23660_v49 = vpop.f32.mrb[148].mxu1  ;;  %v28416_v42 = vld [vmem:[#allocation72_spill] sm:$0xff] }
 0x6e9   : > { %15390 = vmatprep.mubr.msk.bf16.mxu0 %vm21370_vm4, %v28409_v15  ;;  %28410 = vst [vmem:[#allocation7_spill] sm:$0xff] %v23660_v49  ;;  %v23662_v32 = vpop.f32.mrb[149].mxu1 }
 0x6ea   : > { %28411 = vst [vmem:[#allocation135_spill] sm:$0xff] %v23662_v32  ;;  %v23664_v37 = vpop.f32.mrb[150].mxu1 }
 0x6eb   : > { %28412 = vst [vmem:[#allocation14_spill] sm:$0xff] %v23664_v37  ;;  %v23666_v52 = vpop.f32.mrb[151].mxu1 }
 0x6ec   : > { %28413 = vst [vmem:[#allocation298_spill] sm:$0xff] %v23666_v52  ;;  %v28422_v52 = vld [vmem:[#allocation79_spill] sm:$0xff] }
 0x6ed   : > { %15740 = vmatmul.mubr.msk.bf16.gmra.mrb[0].mxu1 %vm19825_vm2, %v28414_v0  ;;  %v28423_v0 = vld [vmem:[#allocation144_spill] sm:$0xff] }
 0x6ee   : > { %10648 = vmatprep.mubr.bf16.mxu1 %v28416_v42 }
 0x6f0   : > { %8812 = vmatmul.mubr.bf16.gmra.mrb[88].mxu0 %v28415_v19  ;;  %v23676_v15 = vpop.f32.mrb[152].mxu1  ;;  %v28424_v19 = vld [vmem:[#allocation74_spill] sm:$0xff] }
 0x6f1   : > { %15393 = vmatprep.mubr.msk.bf16.mxu0 %vm21370_vm4, %v28417_v57  ;;  %28418 = vst [vmem:[#allocation249_spill] sm:$0xff] %v23676_v15  ;;  %v23678_v49 = vpop.f32.mrb[153].mxu1 }
 0x6f2   : > { %28419 = vst [vmem:[#allocation300_spill] sm:$0xff] %v23678_v49  ;;  %v23680_v32 = vpop.f32.mrb[154].mxu1 }
 0x6f3   : > { %28420 = vst [vmem:[#allocation4_spill] sm:$0xff] %v23680_v32  ;;  %v23682_v37 = vpop.f32.mrb[155].mxu1 }
 0x6f4   : > { %28421 = vst [vmem:[#allocation137_spill] sm:$0xff] %v23682_v37  ;;  %v28430_v37 = vld [vmem:[#allocation80_spill] sm:$0xff] }
 0x6f5   : > { %15745 = vmatmul.mubr.msk.bf16.gmra.mrb[4].mxu1 %vm19825_vm2, %v28422_v52 }
 0x6f6   : > { %10656 = vmatprep.mubr.bf16.mxu1 %v28424_v19 }
 0x6f8   : > { %8820 = vmatmul.mubr.bf16.gmra.mrb[92].mxu0 %v28423_v0  ;;  %v23692_v57 = vpop.f32.mrb[156].mxu1  ;;  %v28432_v0 = vld [vmem:[#allocation202_spill] sm:$0xff] }
 0x6f9   : > { %15396 = vmatprep.mubr.msk.bf16.mxu0 %vm21370_vm4, %v28425_v20  ;;  %28426 = vst [vmem:[#allocation250_spill] sm:$0xff] %v23692_v57  ;;  %v23694_v15 = vpop.f32.mrb[157].mxu1 }
 0x6fa   : > { %28427 = vst [vmem:[#allocation297_spill] sm:$0xff] %v23694_v15  ;;  %v23696_v49 = vpop.f32.mrb[158].mxu1 }
 0x6fb   : > { %28428 = vst [vmem:[#allocation251_spill] sm:$0xff] %v23696_v49  ;;  %v23698_v32 = vpop.f32.mrb[159].mxu1 }
 0x6fc   : > { %28429 = vst [vmem:[#allocation299_spill] sm:$0xff] %v23698_v32  ;;  %v28437_v32 = vld [vmem:[#allocation197_spill] sm:$0xff] }
 0x6fd   : > { %15750 = vmatmul.mubr.msk.bf16.gmra.mrb[8].mxu1 %vm19825_vm2, %v28430_v37 }
 0x6fe   : > { %10664 = vmatprep.mubr.bf16.mxu1 %v27728_v44 }
 0x700   : > { %8828 = vmatmul.mubr.bf16.gmra.mrb[96].mxu0 %v28431_v26  ;;  %v23708_v20 = vpop.f32.mrb[160].mxu1  ;;  %v28438_v26 = vld [vmem:[#allocation75_spill] sm:$0xff] }
 0x701   : > { %15399 = vmatprep.mubr.msk.bf16.mxu0 %vm21370_vm4, %v28432_v0  ;;  %28433 = vst [vmem:[#allocation23_spill] sm:$0xff] %v23708_v20  ;;  %v23710_v57 = vpop.f32.mrb[161].mxu1 }
 0x702   : > { %28434 = vst [vmem:[#allocation21_spill] sm:$0xff] %v23710_v57  ;;  %v23712_v15 = vpop.f32.mrb[162].mxu1 }
 0x703   : > { %28435 = vst [vmem:[#allocation252_spill] sm:$0xff] %v23712_v15  ;;  %v23714_v49 = vpop.f32.mrb[163].mxu1  ;;  %v28442_v15 = vld [vmem:[#allocation84_spill] sm:$0xff] }
 0x704   : > { %28436 = vst [vmem:[#allocation302_spill] sm:$0xff] %v23714_v49  ;;  %v28443_v49 = vld [vmem:[#allocation29_spill] sm:$0xff] }
 0x705   : > { %15755 = vmatmul.mubr.msk.bf16.gmra.mrb[12].mxu1 %vm19825_vm2, %v27732_v24 }
 0x706   : > { %10672 = vmatprep.mubr.bf16.mxu1 %v28438_v26  ;;  %v28444_v26 = vld [vmem:[#allocation30_spill] sm:$0xff] }
 0x708   : > { %8836 = vmatmul.mubr.bf16.gmra.mrb[100].mxu0 %v28437_v32  ;;  %v23722_v63 = vpop.f32.mrb[164].mxu1 }
 0x709   : > { %8876 = vmatprep.mubr.bf16.mxu0 %v28439_v2  ;;  %28440 = vst [vmem:[#allocation253_spill] sm:$0xff] %v23722_v63  ;;  %v23724_v0 = vpop.f32.mrb[165].mxu1 }
 0x70a   : > { %v23726_v20 = vpop.f32.mrb[166].mxu1 }
 0x70b   : > { %28441 = vst [vmem:[#allocation304_spill] sm:$0xff] %v23726_v20  ;;  %v23728_v57 = vpop.f32.mrb[167].mxu1 }
 0x70d   : > { %15760 = vmatmul.mubr.msk.bf16.gmra.mrb[16].mxu1 %vm19825_vm2, %v28442_v15  ;;  %v28449_v15 = vld [vmem:[#allocation43_spill] sm:$0xff] }
 0x70e   : > { %10680 = vmatprep.mubr.bf16.mxu1 %v27973_v12 }
 0x710   : > { %15404 = vmatmul.mubr.msk.bf16.vlgmr.msra.gmra.mrb[232].mxu0 %vm19825_vm2, %v28443_v49  ;;  %v23738_v2 = vpop.f32.mrb[168].mxu1  ;;  %v28450_v49 = vld [vmem:[#allocation47_spill] sm:$0xff] }
 0x711   : > { %8884 = vmatprep.mubr.bf16.mxu0 %v28444_v26  ;;  %28445 = vst [vmem:[#allocation32_spill] sm:$0xff] %v23738_v2  ;;  %v23740_v32 = vpop.f32.mrb[169].mxu1 }
 0x712   : > { %28446 = vst [vmem:[#allocation254_spill] sm:$0xff] %v23740_v32  ;;  %v23742_v63 = vpop.f32.mrb[170].mxu1 }
 0x713   : > { %28447 = vst [vmem:[#allocation301_spill] sm:$0xff] %v23742_v63  ;;  %v23744_v20 = vpop.f32.mrb[171].mxu1 }
 0x714   : > { %28448 = vst [vmem:[#allocation255_spill] sm:$0xff] %v23744_v20  ;;  %v28455_v20 = vld [vmem:[#allocation61_spill] sm:$0xff] }
 0x715   : > { %15765 = vmatmul.mubr.msk.bf16.gmra.mrb[20].mxu1 %vm19825_vm2, %v27978_v61 }
 0x716   : > { %10688 = vmatprep.mubr.bf16.mxu1 %v27980_v60 }
 0x718   : > { %15409 = vmatmul.mubr.msk.bf16.gmra.mrb[236].mxu0 %vm19825_vm2, %v28449_v15  ;;  %v23754_v26 = vpop.f32.mrb[172].mxu1  ;;  %v28456_v15 = vld [vmem:[#allocation62_spill] sm:$0xff] }
 0x719   : > { %8892 = vmatprep.mubr.bf16.mxu0 %v28450_v49  ;;  %28451 = vst [vmem:[#allocation303_spill] sm:$0xff] %v23754_v26  ;;  %v23756_v2 = vpop.f32.mrb[173].mxu1 }
 0x71a   : > { %28452 = vst [vmem:[#allocation256_spill] sm:$0xff] %v23756_v2  ;;  %v23758_v32 = vpop.f32.mrb[174].mxu1 }
 0x71b   : > { %28453 = vst [vmem:[#allocation306_spill] sm:$0xff] %v23758_v32  ;;  %v23760_v63 = vpop.f32.mrb[175].mxu1 }
 0x71c   : > { %28454 = vst [vmem:[#allocation257_spill] sm:$0xff] %v23760_v63  ;;  %v28461_v63 = vld [vmem:[#allocation9_spill] sm:$0xff] }
 0x71d   : > { %15770 = vmatmul.mubr.msk.bf16.gmra.mrb[24].mxu1 %vm19825_vm2, %v27987_v23 }
 0x71e   : > { %10696 = vmatprep.mubr.bf16.mxu1 %v27989_v11 }
 0x720   : > { %15414 = vmatmul.mubr.msk.bf16.gmra.mrb[240].mxu0 %vm19825_vm2, %v28455_v20  ;;  %v23770_v49 = vpop.f32.mrb[176].mxu1  ;;  %v28462_v20 = vld [vmem:[#allocation6_spill] sm:$0xff] }
 0x721   : > { %8900 = vmatprep.mubr.bf16.mxu0 %v28456_v15  ;;  %28457 = vst [vmem:[#allocation308_spill] sm:$0xff] %v23770_v49  ;;  %v23772_v26 = vpop.f32.mrb[177].mxu1 }
 0x722   : > { %28458 = vst [vmem:[#allocation258_spill] sm:$0xff] %v23772_v26  ;;  %v23774_v2 = vpop.f32.mrb[178].mxu1 }
 0x723   : > { %28459 = vst [vmem:[#allocation305_spill] sm:$0xff] %v23774_v2  ;;  %v23776_v32 = vpop.f32.mrb[179].mxu1 }
 0x724   : > { %28460 = vst [vmem:[#allocation259_spill] sm:$0xff] %v23776_v32  ;;  %v28466_v32 = vld [vmem:[#allocation8_spill] sm:$0xff] }
 0x725   : > { %15775 = vmatmul.mubr.msk.bf16.gmra.mrb[28].mxu1 %vm19825_vm2, %v27996_v27 }
 0x726   : > { %10704 = vmatprep.mubr.bf16.mxu1 %v28462_v20 }
 0x728   : > { %15419 = vmatmul.mubr.msk.bf16.gmra.mrb[244].mxu0 %vm19825_vm2, %v28461_v63  ;;  %v23786_v15 = vpop.f32.mrb[180].mxu1  ;;  %v28467_v63 = vld [vmem:[#allocation138_spill] sm:$0xff] }
 0x729   : > { %8908 = vmatprep.mubr.bf16.mxu0 %v28313_v59  ;;  %28463 = vst [vmem:[#allocation307_spill] sm:$0xff] %v23786_v15  ;;  %v23788_v49 = vpop.f32.mrb[181].mxu1 }
 0x72a   : > { %v23790_v26 = vpop.f32.mrb[182].mxu1 }
 0x72b   : > { %28464 = vst [vmem:[#allocation261_spill] sm:$0xff] %v23790_v26  ;;  %v23792_v2 = vpop.f32.mrb[183].mxu1 }
 0x72c   : > { %28465 = vst [vmem:[#allocation310_spill] sm:$0xff] %v23792_v2  ;;  %v28472_v2 = vld [vmem:[#allocation142_spill] sm:$0xff] }
 0x72d   : > { %15780 = vmatmul.mubr.msk.bf16.gmra.mrb[32].mxu1 %vm19825_vm2, %v28466_v32  ;;  %v28473_v32 = vld [vmem:[#allocation24_spill] sm:$0xff] }
 0x72e   : > { %10712 = vmatprep.mubr.bf16.mxu1 %v28467_v63 }
 0x730   : > { %15424 = vmatmul.mubr.msk.bf16.gmra.mrb[248].mxu0 %vm19825_vm2, %v28315_v25  ;;  %v23802_v20 = vpop.f32.mrb[184].mxu1 }
 0x731   : > { %8916 = vmatprep.mubr.bf16.mxu0 %v28317_v34  ;;  %28468 = vst [vmem:[#allocation262_spill] sm:$0xff] %v23802_v20  ;;  %v23804_v59 = vpop.f32.mrb[185].mxu1 }
 0x732   : > { %28469 = vst [vmem:[#allocation312_spill] sm:$0xff] %v23804_v59  ;;  %v23806_v15 = vpop.f32.mrb[186].mxu1  ;;  %v28477_v59 = vld [vmem:[#allocation81_spill] sm:$0xff] }
 0x733   : > { %28470 = vst [vmem:[#allocation263_spill] sm:$0xff] %v23806_v15  ;;  %v23808_v26 = vpop.f32.mrb[187].mxu1 }
 0x734   : > { %28471 = vst [vmem:[#allocation309_spill] sm:$0xff] %v23808_v26  ;;  %v28475_v26 = vld [vmem:[#allocation147_spill] sm:$0xff] }
 0x735   : > { %15785 = vmatmul.mubr.msk.bf16.gmra.mrb[36].mxu1 %vm19825_vm2, %v28472_v2 }
 0x736   : > { %10720 = vmatprep.mubr.bf16.mxu1 %v28473_v32 }
 0x738   : > { %15429 = vmatmul.mubr.msk.bf16.gmra.mrb[252].mxu0 %vm19825_vm2, %v28319_v36  ;;  %v23818_v34 = vpop.f32.mrb[188].mxu1  ;;  %v28476_v36 = vld [vmem:[#allocation154_spill] sm:$0xff] }
 0x739   : > { %8924 = vmatprep.mubr.bf16.mxu0 %v28321_v21  ;;  %28474 = vst [vmem:[#allocation264_spill] sm:$0xff] %v23818_v34  ;;  %v23820_v25 = vpop.f32.mrb[189].mxu1  ;;  %v28478_v21 = vld [vmem:[#allocation159_spill] sm:$0xff]  ;;  %v28479_v34 = vld [vmem:[#allocation85_spill] sm:$0xff] }
 0x73a   : > { %v23822_v20 = vpop.f32.mrb[190].mxu1 }
 0x73b   : > { %v23824_v15 = vpop.f32.mrb[191].mxu1 }
 0x73d   : > { %15790 = vmatmul.mubr.msk.bf16.gmra.mrb[40].mxu1 %vm19825_vm2, %v28475_v26 }
 0x73e   : > { %10728 = vmatprep.mubr.bf16.mxu1 %v28476_v36 }
 0x740   : > { %15434 = vmatmul.mubr.msk.bf16.gmra.mrb[0].mxu0 %vm19825_vm2, %v28323_v22 }
 0x741   : > { %8932 = vmatprep.mubr.bf16.mxu0 %v28477_v59 }
 0x745   : > { %15795 = vmatmul.mubr.msk.bf16.gmra.mrb[44].mxu1 %vm19825_vm2, %v28478_v21 }
 0x746   : > { %10736 = vmatprep.mubr.bf16.mxu1 %v27166_v41 }
 0x748   : > { %15439 = vmatmul.mubr.msk.bf16.gmra.mrb[4].mxu0 %vm19825_vm2, %v28479_v34 }
 0x749   : > { %8940 = vmatprep.mubr.bf16.mxu0 %v28329_v55 }
 0x74d   : > { %10737 = vmatmul.mubr.bf16.gmra.mrb[48].mxu1 %v27166_v41 }
 0x74e   : > { %10744 = vmatprep.mubr.bf16.mxu1 %v27166_v41 }
 0x750   : > { %15444 = vmatmul.mubr.msk.bf16.gmra.mrb[8].mxu0 %vm19825_vm2, %v28335_v40  ;;  %v28480_v40 = vld [vmem:[#allocation162_spill] sm:$0xff] }
 0x751   : > { %8948 = vmatprep.mubr.bf16.mxu0 %v28337_v18  ;;  %v28481_v18 = vld [vmem:[#allocation170_spill] sm:$0xff] }
 0x755   : > { %10745 = vmatmul.mubr.bf16.gmra.mrb[52].mxu1 %v27166_v41 }
 0x756   : > { %10752 = vmatprep.mubr.bf16.mxu1 %v27166_v41 }
 0x758   : > { %15449 = vmatmul.mubr.msk.bf16.gmra.mrb[12].mxu0 %vm19825_vm2, %v28343_v35  ;;  %v28482_v35 = vld [vmem:[#allocation17_spill] sm:$0xff] }
 0x759   : > { %8956 = vmatprep.mubr.bf16.mxu0 %v28345_v30  ;;  %v28483_v30 = vld [vmem:[#allocation106_spill] sm:$0xff] }
 0x75d   : > { %10753 = vmatmul.mubr.bf16.gmra.mrb[56].mxu1 %v27166_v41 }
 0x75e   : > { %10760 = vmatprep.mubr.bf16.mxu1 %v27166_v41 }
 0x760   : > { %15454 = vmatmul.mubr.msk.bf16.gmra.mrb[16].mxu0 %vm19825_vm2, %v28351_v46  ;;  %v18735_v46 = vld [vmem:[%s26522_s2 + $0x580] sm:$0xff]  }
 0x761   : > { %8964 = vmatprep.mubr.bf16.mxu0 %v28480_v40  ;;  %v28484_v40 = vld [vmem:[#allocation104_spill] sm:$0xff] }
 0x765   : > { %10761 = vmatmul.mubr.bf16.gmra.mrb[60].mxu1 %v27166_v41 }
 0x766   : > { %15800 = vmatprep.mubr.msk.bf16.mxu1 %vm19825_vm2, %v28482_v35  ;;  %v18743_v35 = vld [vmem:[%s26522_s2 + $0x680] sm:$0xff]  }
 0x767   : > { %17008 = vmatprep.subr.bf16.mxu0 %v18743_v35 }
 0x768   : > { %15459 = vmatmul.mubr.msk.bf16.gmra.mrb[20].mxu0 %vm19825_vm2, %v28481_v18 }
 0x769   : > { %8972 = vmatprep.mubr.bf16.mxu0 %v28361_v51  ;;  %v18736_v51 = vld [vmem:[%s26522_s2 + $0x588] sm:$0xff]   ;;  %17009 = vmatpush3.bf16.msra.mxu0 %v18743_v35  ;;  %v18738_v35 = vld [vmem:[%s26522_s2 + $0x598] sm:$0xff]  }
 0x76d   : > { %15803 = vmatmul.mubr.msk.bf16.vlgmr.msra.gmra.mrb[192].mxu1 %vm21370_vm4, %v28483_v30  ;;  %v18745_v30 = vld [vmem:[%s26522_s2 + $0x688] sm:$0xff]  }
 0x76e   : > { %15808 = vmatprep.mubr.msk.bf16.mxu1 %vm19825_vm2, %v28484_v40  ;;  %11059 = vmatpush1.bf16.msra.mxu1 %v18735_v46  ;;  %v18737_v40 = vld [vmem:[%s26522_s2 + $0x590] sm:$0xff]   ;;  %v28485_v46 = vld [vmem:[#allocation107_spill] sm:$0xff] }
 0x76f   : > { %11060 = vmatprep.subr.bf16.mxu1 %v27166_v41  ;;  %17010 = vmatprep.subr.bf16.mxu0 %v18745_v30 }
 0x770   : > { %15464 = vmatmul.mubr.msk.bf16.gmra.mrb[24].mxu0 %vm19825_vm2, %v28367_v10 }
 0x771   : > { %8980 = vmatprep.mubr.bf16.mxu0 %v28369_v5  ;;  %17011 = vmatpush3.bf16.msra.mxu0 %v18745_v30  ;;  %v28486_v30 = vld [vmem:[#allocation108_spill] sm:$0xff] }
 0x772   : > { %11061 = vmatpush1.bf16.msra.mxu1 %v18736_v51  ;;  %v18746_v51 = vld [vmem:[%s26522_s2 + $0x690] sm:$0xff]  }
 0x773   : > { %11062 = vmatprep.subr.bf16.mxu1 %v27166_v41  ;;  %17012 = vmatprep.subr.bf16.mxu0 %v18746_v51 }
 0x775   : > { %15811 = vmatmul.mubr.msk.bf16.gmra.mrb[196].mxu1 %vm21370_vm4, %v21444_v8  ;;  %17013 = vmatpush3.bf16.msra.mxu0 %v18746_v51  ;;  %v18741_v51 = vld [vmem:[%s26522_s2 + $0x5b0] sm:$0xff]  }
 0x776   : > { %15816 = vmatprep.mubr.msk.bf16.mxu1 %vm19825_vm2, %v28485_v46  ;;  %11063 = vmatpush1.bf16.msra.mxu1 %v18737_v40  ;;  %v18739_v46 = vld [vmem:[%s26522_s2 + $0x5a0] sm:$0xff]   ;;  %v18747_v40 = vld [vmem:[%s26522_s2 + $0x698] sm:$0xff]  }
 0x777   : > { %11064 = vmatprep.subr.bf16.mxu1 %v27166_v41  ;;  %17014 = vmatprep.subr.bf16.mxu0 %v18747_v40 }
 0x778   : > { %15469 = vmatmul.mubr.msk.bf16.gmra.mrb[28].mxu0 %vm19825_vm2, %v28375_v29  ;;  %v18740_v29 = vld [vmem:[%s26522_s2 + $0x5a8] sm:$0xff]  }
 0x779   : > { %8988 = vmatprep.mubr.bf16.mxu0 %v28377_v16  ;;  %v28487_v16 = vld [vmem:[#allocation206_spill] sm:$0xff]  ;;  %17015 = vmatpush3.bf16.msra.mxu0 %v18747_v40 }
 0x77a   : > { %11065 = vmatpush1.bf16.msra.mxu1 %v18738_v35  ;;  %v18748_v35 = vld [vmem:[%s26522_s2 + $0x6a0] sm:$0xff]   ;;  %v18751_v40 = vld [vmem:[%s26522_s2 + $0x6b0] sm:$0xff]  }
 0x77b   : > { %11066 = vmatprep.subr.bf16.mxu1 %v27166_v41  ;;  %17016 = vmatprep.subr.bf16.mxu0 %v18748_v35 }
 0x77d   : > { %15819 = vmatmul.mubr.msk.bf16.gmra.mrb[200].mxu1 %vm21370_vm4, %v28053_v3  ;;  %17017 = vmatpush3.bf16.msra.mxu0 %v18748_v35  ;;  %v18744_v35 = vld [vmem:[%s26522_s2 + $0x5c0] sm:$0xff]  }
 0x77e   : > { %15824 = vmatprep.mubr.msk.bf16.mxu1 %vm19825_vm2, %v28486_v30  ;;  %11067 = vmatpush1.bf16.msra.mxu1 %v18739_v46  ;;  %v18750_v46 = vld [vmem:[%s26522_s2 + $0x6a8] sm:$0xff]   ;;  %v28488_v30 = vld [vmem:[#allocation207_spill] sm:$0xff] }
 0x77f   : > { %11068 = vmatprep.subr.bf16.mxu1 %v27166_v41  ;;  %17018 = vmatprep.subr.bf16.mxu0 %v18750_v46 }
 0x780   : > { %15474 = vmatmul.mubr.msk.bf16.gmra.mrb[32].mxu0 %vm19825_vm2, %v28381_v38 }
 0x781   : > { %8996 = vmatprep.mubr.bf16.mxu0 %v28487_v16  ;;  %v18742_v16 = vld [vmem:[%s26522_s2 + $0x5b8] sm:$0xff]   ;;  %17019 = vmatpush3.bf16.msra.mxu0 %v18750_v46  ;;  %v18749_v46 = vld [vmem:[%s26522_s2 + $0x5c8] sm:$0xff]  }
 0x782   : > { %11069 = vmatpush1.bf16.msra.mxu1 %v18740_v29  ;;  %v28489_v29 = vld [vmem:[#allocation111_spill] sm:$0xff]  ;;  %17020 = vmatprep.subr.bf16.mxu0 %v18751_v40 }
 0x783   : > { %11070 = vmatprep.subr.bf16.mxu1 %v27166_v41 }
 0x785   : > { %15827 = vmatmul.mubr.msk.bf16.gmra.mrb[204].mxu1 %vm21370_vm4, %v28059_v47  ;;  %17021 = vmatpush3.bf16.msra.mxu0 %v18751_v40  ;;  %v18753_v40 = vld [vmem:[%s26522_s2 + $0x5d0] sm:$0xff]  }
 0x786   : > { %15832 = vmatprep.mubr.msk.bf16.mxu1 %vm19825_vm2, %v28489_v29  ;;  %11071 = vmatpush1.bf16.msra.mxu1 %v18741_v51  ;;  %v18752_v51 = vld [vmem:[%s26522_s2 + $0x6b8] sm:$0xff]   ;;  %v28490_v29 = vld [vmem:[#allocation73_spill] sm:$0xff] }
 0x787   : > { %11072 = vmatprep.subr.bf16.mxu1 %v27166_v41  ;;  %17022 = vmatprep.subr.bf16.mxu0 %v18752_v51 }
 0x788   : > { %15479 = vmatmul.mubr.msk.bf16.gmra.mrb[36].mxu0 %vm19825_vm2, %v28488_v30 }
 0x789   : > { %9004 = vmatprep.mubr.bf16.mxu0 %v28389_v14  ;;  %17023 = vmatpush3.bf16.msra.mxu0 %v18752_v51  ;;  %v28493_v51 = vld [vmem:[#allocation115_spill] sm:$0xff] }
 0x78a   : > { %11073 = vmatpush1.bf16.msra.mxu1 %v18742_v16  ;;  %v28491_v16 = vld [vmem:[#allocation113_spill] sm:$0xff] }
 0x78b   : > { %11074 = vmatprep.subr.bf16.mxu1 %v27166_v41 }
 0x78d   : > { %15835 = vmatmul.mubr.msk.bf16.gmra.mrb[208].mxu1 %vm21370_vm4, %v28490_v29  ;;  %v18754_v29 = vld [vmem:[%s26522_s2 + $0x5d8] sm:$0xff]  }
 0x78e   : > { %15840 = vmatprep.mubr.msk.bf16.mxu1 %vm19825_vm2, %v28491_v16  ;;  %11075 = vmatpush1.bf16.msra.mxu1 %v18744_v35  ;;  %v28492_v35 = vld [vmem:[#allocation114_spill] sm:$0xff]  ;;  %v28494_v16 = vld [vmem:[#allocation216_spill] sm:$0xff] }
 0x78f   : > { %11076 = vmatprep.subr.bf16.mxu1 %v27166_v41 }
 0x790   : > { %15484 = vmatmul.mubr.msk.bf16.gmra.mrb[40].mxu0 %vm19825_vm2, %v28394_v50 }
 0x791   : > { %9012 = vmatprep.mubr.bf16.mxu0 %v28396_v43 }
 0x792   : > { %11077 = vmatpush1.bf16.msra.mxu1 %v18749_v46  ;;  %v28495_v46 = vld [vmem:[#allocation217_spill] sm:$0xff] }
 0x793   : > { %11078 = vmatprep.subr.bf16.mxu1 %v27166_v41 }
 0x795   : > { %15843 = vmatmul.mubr.msk.bf16.gmra.mrb[212].mxu1 %vm21370_vm4, %v21507_v54 }
 0x796   : > { %15848 = vmatprep.mubr.msk.bf16.mxu1 %vm19825_vm2, %v28492_v35  ;;  %11079 = vmatpush1.bf16.msra.mxu1 %v18753_v40  ;;  %v28496_v40 = vld [vmem:[#allocation116_spill] sm:$0xff] }
 0x797   : > { %11080 = vmatprep.subr.bf16.mxu1 %v27166_v41  ;;  %v28497_v35 = vld [vmem:[#allocation260_spill] sm:$0xff] }
 0x798   : > { %15489 = vmatmul.mubr.msk.bf16.gmra.mrb[44].mxu0 %vm19825_vm2, %v28401_v1 }
 0x799   : > { %9020 = vmatprep.mubr.bf16.mxu0 %v28402_v39 }
 0x79a   : > { %11081 = vmatpush1.bf16.msra.mxu1 %v18754_v29  ;;  %v18755_v29 = vld [vmem:[%s26522_s2 + $0x5e0] sm:$0xff]  }
 0x79b   : > { %11082 = vmatprep.subr.bf16.mxu1 %v27166_v41 }
 0x79d   : > { %15851 = vmatmul.mubr.msk.bf16.gmra.mrb[216].mxu1 %vm21370_vm4, %v28074_v28 }
 0x79e   : > { %15856 = vmatprep.mubr.msk.bf16.mxu1 %vm19825_vm2, %v28493_v51  ;;  %v28498_v51 = vld [vmem:[#allocation117_spill] sm:$0xff]  ;;  %11083 = vmatpush1.bf16.msra.mxu1 %v18755_v29  ;;  %v28501_v29 = vld [vmem:[#allocation120_spill] sm:$0xff] }
 0x79f   : > { %11084 = vmatprep.subr.bf16.mxu1 %v27166_v41 }
 0x7a0   : > { %15494 = vmatmul.mubr.msk.bf16.gmra.mrb[48].mxu0 %vm19825_vm2, %v28407_v58 }
 0x7a1   : > { %9028 = vmatprep.mubr.bf16.mxu0 %v28494_v16 }
 0x7a5   : > { %15859 = vmatmul.mubr.msk.bf16.gmra.mrb[220].mxu1 %vm21370_vm4, %v28080_v17 }
 0x7a6   : > { %15864 = vmatprep.mubr.msk.bf16.mxu1 %vm19825_vm2, %v28496_v40  ;;  %v28499_v40 = vld [vmem:[#allocation118_spill] sm:$0xff] }
 0x7a8   : > { %15499 = vmatmul.mubr.msk.bf16.gmra.mrb[52].mxu0 %vm19825_vm2, %v28495_v46 }
 0x7a9   : > { %9036 = vmatprep.mubr.bf16.mxu0 %v28416_v42 }
 0x7ad   : > { %15867 = vmatmul.mubr.msk.bf16.gmra.mrb[224].mxu1 %vm21370_vm4, %v28497_v35  ;;  %v28500_v35 = vld [vmem:[#allocation119_spill] sm:$0xff] }
 0x7ae   : > { %15872 = vmatprep.mubr.msk.bf16.mxu1 %vm19825_vm2, %v28498_v51  ;;  %v18756_v51 = vld [vmem:[%s26522_s2 + $0x5e8] sm:$0xff]  }
 0x7af   : > { %11085 = vmatpush1.bf16.msra.mxu1 %v18756_v51  ;;  %v18757_v51 = vld [vmem:[%s26522_s2 + $0x5f0] sm:$0xff]  }
 0x7b0   : > { %15504 = vmatmul.mubr.msk.bf16.gmra.mrb[56].mxu0 %vm19825_vm2, %v28422_v52  ;;  %11086 = vmatprep.subr.bf16.mxu1 %v27166_v41 }
 0x7b1   : > { %9044 = vmatprep.mubr.bf16.mxu0 %v28424_v19 }
 0x7b3   : > { %11087 = vmatpush1.bf16.msra.mxu1 %v18757_v51 }
 0x7b4   : > { %11088 = vmatprep.subr.bf16.mxu1 %v27166_v41 }
 0x7b5   : > { %15875 = vmatmul.mubr.msk.bf16.gmra.mrb[228].mxu1 %vm21370_vm4, %v21580_v6 }
 0x7b6   : > { %15880 = vmatprep.mubr.msk.bf16.mxu1 %vm19825_vm2, %v28499_v40  ;;  %v28502_v40 = vld [vmem:[#allocation125_spill] sm:$0xff] }
 0x7b8   : > { %15509 = vmatmul.mubr.msk.bf16.gmra.mrb[60].mxu0 %vm19825_vm2, %v28430_v37 }
 0x7b9   : > { %9052 = vmatprep.mubr.bf16.mxu0 %v27728_v44 }
 0x7bd   : > { %15883 = vmatmul.mubr.msk.bf16.gmra.mrb[232].mxu1 %vm21370_vm4, %v21609_v48 }
 0x7be   : > { %15888 = vmatprep.mubr.msk.bf16.mxu1 %vm19825_vm2, %v28500_v35  ;;  %v28503_v35 = vld [vmem:[#allocation122_spill] sm:$0xff] }
 0x7c0   : > { %15514 = vmatmul.mubr.msk.bf16.gmra.mrb[64].mxu0 %vm19825_vm2, %v27732_v24 }
 0x7c1   : > { %9060 = vmatprep.mubr.bf16.mxu0 %v22835_v9 }
 0x7c5   : > { %15891 = vmatmul.mubr.msk.bf16.gmra.mrb[236].mxu1 %vm21370_vm4, %v28095_v4 }
 0x7c6   : > { %15896 = vmatprep.mubr.msk.bf16.mxu1 %vm19825_vm2, %v28501_v29  ;;  %v28504_v29 = vld [vmem:[#allocation123_spill] sm:$0xff] }
 0x7c8   : > { %15519 = vmatmul.mubr.msk.bf16.gmra.mrb[68].mxu0 %vm19825_vm2, %v22861_v31  ;;  %v28509_v31 = vld [vmem:[#allocation89_spill] sm:$0xff] }
 0x7c9   : > { %9068 = vmatprep.mubr.bf16.mxu0 %v27973_v12  ;;  %v28508_v12 = vld [vmem:[#allocation5_spill] sm:$0xff] }
 0x7cd   : > { %15899 = vmatmul.mubr.msk.bf16.gmra.mrb[240].mxu1 %vm21370_vm4, %v28502_v40  ;;  %v28505_v40 = vld [vmem:[#allocation124_spill] sm:$0xff] }
 0x7ce   : > { %15904 = vmatprep.mubr.msk.bf16.mxu1 %vm19825_vm2, %v28503_v35  ;;  %v18758_v35 = vld [vmem:[%s26522_s2 + $0x5f8] sm:$0xff]  }
 0x7cf   : > { %11089 = vmatpush1.bf16.msra.mxu1 %v18758_v35  ;;  %v28511_v35 = vld [vmem:[#allocation25_spill] sm:$0xff] }
 0x7d0   : > { %15524 = vmatmul.mubr.msk.bf16.gmra.mrb[72].mxu0 %vm19825_vm2, %v27978_v61  ;;  %11347 = vmatprep.subr.bf16.mxu1 %v27166_v41 }
 0x7d1   : > { %9076 = vmatprep.mubr.bf16.mxu0 %v27980_v60  ;;  %v28506_v60 = vld [vmem:[#allocation46_spill] sm:$0xff] }
 0x7d5   : > { %15907 = vmatmul.mubr.msk.bf16.gmra.mrb[244].mxu1 %vm21370_vm4, %v21649_v62 }
 0x7d6   : > { %15912 = vmatprep.mubr.msk.bf16.mxu1 %vm19825_vm2, %v28504_v29 }
 0x7d8   : > { %15529 = vmatmul.mubr.msk.bf16.gmra.mrb[76].mxu0 %vm19825_vm2, %v27987_v23 }
 0x7d9   : > { %9084 = vmatprep.mubr.bf16.mxu0 %v27989_v11 }
 0x7dd   : > { %15915 = vmatmul.mubr.msk.bf16.gmra.mrb[248].mxu1 %vm21370_vm4, %v21680_v7 }
 0x7de   : > { %15920 = vmatprep.mubr.msk.bf16.mxu1 %vm19825_vm2, %v28505_v40 }
 0x7e0   : > { %15534 = vmatmul.mubr.msk.bf16.gmra.mrb[80].mxu0 %vm19825_vm2, %v27996_v27 }
 0x7e1   : > { %9092 = vmatprep.mubr.bf16.mxu0 %v22938_v33 }
 0x7e3   : > { %v8878_v51 = vpop.f32.mrb[232].mxu0 }
 0x7e4   : > { %v9168_v29 = vadd.f32 %v23573_v53, %v8878_v51  ;;  %v8880_v11 = vpop.f32.mrb[233].mxu0  ;;  %v28512_v53 = vld [vmem:[#allocation94_spill] sm:$0xff] }
 0x7e5   : > { %v8881_v23 = vpop.f32.mrb[234].mxu0  ;;  %15923 = vmatmul.mubr.msk.bf16.gmra.mrb[252].mxu1 %vm21370_vm4, %v28508_v12 }
 0x7e6   : > { %v24108_v27 = vadd.f32 %v9168_v29, %v28506_v60  ;;  %v9171_v61 = vadd.f32 %v23578_v13, %v8881_v23  ;;  %v8883_v40 = vpop.f32.mrb[235].mxu0  ;;  %15928 = vmatprep.mubr.msk.bf16.mxu1 %vm19825_vm2, %v28512_v53  ;;  %v28513_v23 = vld [vmem:[#allocation100_spill] sm:$0xff]  ;;  %v28520_v53 = vld [vmem:[#allocation126_spill] sm:$0xff] }
 0x7e7   : > { %v28514_v29 = vld [vmem:[#allocation48_spill] sm:$0xff] }
 0x7e8   : > { %28507 = vst [vmem:[#allocation311_spill] sm:$0xff] %v24108_v27  ;;  %v24115_v33 = vadd.f32 %v9171_v61, %v28509_v31  ;;  %15539 = vmatmul.mubr.msk.bf16.gmra.mrb[84].mxu0 %vm19825_vm2, %v28511_v35  ;;  %v28516_v61 = vld [vmem:[#allocation290_spill] sm:$0xff] }
 0x7e9   : > { %9100 = vmatprep.mubr.bf16.mxu0 %v28467_v63  ;;  %v28517_v27 = vld [vmem:[#allocation130_spill] sm:$0xff] }
 0x7ea   : > { %28510 = vst [vmem:[#allocation265_spill] sm:$0xff] %v24115_v33  ;;  %v28518_v35 = vld [vmem:[#allocation222_spill] sm:$0xff] }
 0x7eb   : > { %v8886_v60 = vpop.f32.mrb[236].mxu0 }
 0x7ec   : > { %v9176_v11 = vadd.f32 %v28513_v23, %v8886_v60  ;;  %v8888_v13 = vpop.f32.mrb[237].mxu0  ;;  %v28521_v23 = vld [vmem:[#allocation221_spill] sm:$0xff] }
 0x7ed   : > { %v8889_v51 = vpop.f32.mrb[238].mxu0  ;;  %15931 = vmatmul.mubr.msk.bf16.gmra.mrb[0].mxu1 %vm21370_vm4, %v28517_v27 }
 0x7ee   : > { %v24126_v40 = vadd.f32 %v9176_v11, %v28514_v29  ;;  %v9179_v31 = vadd.f32 %v28516_v61, %v8889_v51  ;;  %v8891_v33 = vpop.f32.mrb[239].mxu0  ;;  %15936 = vmatprep.mubr.msk.bf16.mxu1 %vm19825_vm2, %v28520_v53  ;;  %v28522_v51 = vld [vmem:[#allocation49_spill] sm:$0xff]  ;;  %v28528_v53 = vld [vmem:[#allocation127_spill] sm:$0xff] }
 0x7f0   : > { %28515 = vst [vmem:[#allocation314_spill] sm:$0xff] %v24126_v40  ;;  %v24133_v9 = vadd.f32 %v9179_v31, %v28518_v35  ;;  %15544 = vmatmul.mubr.msk.bf16.gmra.mrb[88].mxu0 %vm19825_vm2, %v28472_v2  ;;  %v28524_v35 = vld [vmem:[#allocation244_spill] sm:$0xff]  ;;  %v28525_v31 = vld [vmem:[#allocation99_spill] sm:$0xff]  ;;  %v28545_v2 = vld [vmem:[#allocation102_spill] sm:$0xff] }
 0x7f1   : > { %9108 = vmatprep.mubr.bf16.mxu0 %v28473_v32 }
 0x7f2   : > { %28519 = vst [vmem:[#allocation266_spill] sm:$0xff] %v24133_v9  ;;  %v28526_v9 = vld [vmem:[#allocation50_spill] sm:$0xff] }
 0x7f3   : > { %v8894_v60 = vpop.f32.mrb[240].mxu0 }
 0x7f4   : > { %v9184_v33 = vadd.f32 %v28521_v23, %v8894_v60  ;;  %v8896_v11 = vpop.f32.mrb[241].mxu0  ;;  %v28529_v23 = vld [vmem:[#allocation243_spill] sm:$0xff] }
 0x7f5   : > { %v8897_v13 = vpop.f32.mrb[242].mxu0  ;;  %15939 = vmatmul.mubr.msk.bf16.gmra.mrb[4].mxu1 %vm21370_vm4, %v28525_v31 }
 0x7f6   : > { %v24144_v27 = vadd.f32 %v9184_v33, %v28522_v51  ;;  %v9187_v29 = vadd.f32 %v28524_v35, %v8897_v13  ;;  %v8899_v61 = vpop.f32.mrb[243].mxu0  ;;  %15944 = vmatprep.mubr.msk.bf16.mxu1 %vm19825_vm2, %v28528_v53  ;;  %v28530_v51 = vld [vmem:[#allocation223_spill] sm:$0xff] }
 0x7f8   : > { %28523 = vst [vmem:[#allocation316_spill] sm:$0xff] %v24144_v27  ;;  %v24151_v40 = vadd.f32 %v9187_v29, %v28526_v9  ;;  %15549 = vmatmul.mubr.msk.bf16.gmra.mrb[92].mxu0 %vm19825_vm2, %v28475_v26  ;;  %v28532_v9 = vld [vmem:[#allocation292_spill] sm:$0xff]  ;;  %v28534_v27 = vld [vmem:[#allocation195_spill] sm:$0xff]  ;;  %v28535_v26 = vmov 0.0  }
 0x7f9   : > { %9116 = vmatprep.mubr.bf16.mxu0 %v28476_v36  ;;  %v24170_v53 = vpack.c.bf16 %v28535_v26, %v28534_v27  ;;  %v28537_v36 = vld [vmem:[#allocation51_spill] sm:$0xff]  ;;  %v28541_v26 = vrot.slane %v28534_v27, 7  ;;  %v28547_v27 = vld [vmem:[#allocation128_spill] sm:$0xff] }
 0x7fa   : > { %28527 = vst [vmem:[#allocation267_spill] sm:$0xff] %v24151_v40  ;;  %v28533_v40 = vld [vmem:[#allocation101_spill] sm:$0xff] }
 0x7fb   : > { %v8902_v60 = vpop.f32.mrb[244].mxu0  ;;  %28536 = vst [vmem:[#allocation268_spill] sm:$0xff] %v24170_v53 }
 0x7fc   : > { %v9192_v33 = vadd.f32 %v28529_v23, %v8902_v60  ;;  %v8904_v11 = vpop.f32.mrb[245].mxu0  ;;  %v28539_v60 = vld [vmem:[#allocation133_spill] sm:$0xff] }
 0x7fd   : > { %v8905_v13 = vpop.f32.mrb[246].mxu0  ;;  %15947 = vmatmul.mubr.msk.bf16.gmra.mrb[8].mxu1 %vm21370_vm4, %v28533_v40 }
 0x7fe   : > { %v24162_v35 = vadd.f32 %v9192_v33, %v28530_v51  ;;  %v9195_v29 = vadd.f32 %v28532_v9, %v8905_v13  ;;  %v8907_v61 = vpop.f32.mrb[247].mxu0  ;;  %15952 = vmatprep.mubr.msk.bf16.mxu1 %vm19825_vm2, %v28539_v60  ;;  %v28540_v33 = vld [vmem:[#allocation245_spill] sm:$0xff]  ;;  %v28542_v9 = vld [vmem:[#allocation28_spill] sm:$0xff] }
 0x7ff   : > { %v28546_v60 = vld [vmem:[#allocation53_spill] sm:$0xff] }
 0x800   : > { %28531 = vst [vmem:[#allocation313_spill] sm:$0xff] %v24162_v35  ;;  %v24173_v32 = vadd.f32 %v9195_v29, %v28537_v36  ;;  %15554 = vmatmul.mubr.msk.bf16.gmra.mrb[96].mxu0 %vm19825_vm2, %v28478_v21  ;;  %v24186_v36 = vpack.c.bf16 %v28542_v9, %v28541_v26  ;;  %v28543_v29 = vld [vmem:[#allocation52_spill] sm:$0xff] }
 0x801   : > { %9124 = vmatprep.mubr.bf16.mxu0 %v24170_v53 }
 0x802   : > { %28538 = vst [vmem:[#allocation315_spill] sm:$0xff] %v24173_v32  ;;  %v28544_v32 = vld [vmem:[#allocation246_spill] sm:$0xff] }
 0x803   : > { %v8910_v23 = vpop.f32.mrb[248].mxu0 }
 0x804   : > { %v9200_v11 = vadd.f32 %v28540_v33, %v8910_v23  ;;  %v8912_v13 = vpop.f32.mrb[249].mxu0 }
 0x805   : > { %v8913_v51 = vpop.f32.mrb[250].mxu0  ;;  %15955 = vmatmul.mubr.msk.bf16.gmra.mrb[12].mxu1 %vm21370_vm4, %v28545_v2  ;;  %v28549_v13 = vld [vmem:[#allocation91_spill] sm:$0xff] }
 0x806   : > { %v24189_v61 = vadd.f32 %v9200_v11, %v28543_v29  ;;  %v9203_v35 = vadd.f32 %v28544_v32, %v8913_v51  ;;  %v8915_v21 = vpop.f32.mrb[251].mxu0  ;;  %15960 = vmatprep.mubr.msk.bf16.mxu1 %vm19825_vm2, %v28547_v27  ;;  %v28548_v32 = vld [vmem:[#allocation289_spill] sm:$0xff]  ;;  %v28550_v51 = vld [vmem:[#allocation291_spill] sm:$0xff]  ;;  %v28551_v29 = vld [vmem:[#allocation134_spill] sm:$0xff] }
 0x808   : > { %v24196_v53 = vadd.f32 %v9203_v35, %v28546_v60  ;;  %15559 = vmatmul.mubr.msk.bf16.gmra.mrb[100].mxu0 %vm19825_vm2, %v24186_v36  ;;  %v28552_v60 = vld [vmem:[#allocation54_spill] sm:$0xff] }
 0x809   : > { %17024 = vmatprep.mubr.msk.bf16.mxu0 %vm21370_vm4, %v21444_v8  ;;  %v28554_v8 = vld [vmem:[#allocation129_spill] sm:$0xff] }
 0x80b   : > { %v8918_v21 = vpop.f32.mrb[252].mxu0 }
 0x80c   : > { %v9208_v23 = vadd.f32 %v28548_v32, %v8918_v21  ;;  %v8920_v33 = vpop.f32.mrb[253].mxu0  ;;  %v28555_v32 = vld [vmem:[#allocation247_spill] sm:$0xff] }
 0x80d   : > { %v8921_v11 = vpop.f32.mrb[254].mxu0  ;;  %15963 = vmatmul.mubr.msk.bf16.gmra.mrb[16].mxu1 %vm21370_vm4, %v28551_v29 }
 0x80e   : > { %v24209_v35 = vadd.f32 %v9208_v23, %v28549_v13  ;;  %v9211_v26 = vadd.f32 %v28550_v51, %v8921_v11  ;;  %v8923_v9 = vpop.f32.mrb[255].mxu0  ;;  %15968 = vmatprep.mubr.msk.bf16.mxu1 %vm19825_vm2, %v28554_v8  ;;  %v28556_v13 = vld [vmem:[#allocation56_spill] sm:$0xff] }
 0x810   : > { %v24216_v27 = vadd.f32 %v9211_v26, %v28552_v60  ;;  %17025 = vmatmul.mubr.msk.bf16.vlgmr.msra.gmra.mrb[104].mxu0 %vm21370_vm4, %v28053_v3  ;;  %v28557_v26 = vld [vmem:[#allocation132_spill] sm:$0xff]  ;;  %v28558_v3 = vld [vmem:[#allocation105_spill] sm:$0xff] }
 0x811   : > { %17028 = vmatprep.mubr.msk.bf16.mxu0 %vm21370_vm4, %v28059_v47  ;;  %v28559_v60 = vld [vmem:[#allocation57_spill] sm:$0xff]  ;;  %v28562_v47 = vld [vmem:[#allocation131_spill] sm:$0xff] }
 0x812   : > { %28553 = vst [vmem:[#allocation68_spill] sm:$0xff] %v24216_v27  ;;  %v28561_v27 = vld [vmem:[#allocation226_spill] sm:$0xff] }
 0x813   : > { %v8926_v21 = vpop.f32.mrb[0].mxu0 }
 0x814   : > { %v9216_v23 = vadd.f32 %v28555_v32, %v8926_v21  ;;  %v8928_v33 = vpop.f32.mrb[1].mxu0  ;;  %v28563_v32 = vld [vmem:[#allocation294_spill] sm:$0xff] }
 0x815   : > { %v8929_v11 = vpop.f32.mrb[2].mxu0  ;;  %15971 = vmatmul.mubr.msk.bf16.gmra.mrb[20].mxu1 %vm21370_vm4, %v28558_v3 }
 0x816   : > { %v24229_v51 = vadd.f32 %v9216_v23, %v28556_v13  ;;  %v9219_v9 = vadd.f32 %v28557_v26, %v8929_v11  ;;  %v8931_v29 = vpop.f32.mrb[3].mxu0  ;;  %15976 = vmatprep.mubr.msk.bf16.mxu1 %vm19825_vm2, %v28562_v47  ;;  %v28564_v13 = vld [vmem:[#allocation230_spill] sm:$0xff] }
 0x817   : > { %v28568_v47 = vld [vmem:[#allocation58_spill] sm:$0xff] }
 0x818   : > { %v24236_v8 = vadd.f32 %v9219_v9, %v28559_v60  ;;  %17029 = vmatmul.mubr.msk.bf16.gmra.mrb[108].mxu0 %vm21370_vm4, %v28561_v27  ;;  %v28566_v9 = vld [vmem:[#allocation296_spill] sm:$0xff]  ;;  %v28567_v27 = vld [vmem:[#allocation19_spill] sm:$0xff] }
 0x819   : > { %17032 = vmatprep.mubr.msk.bf16.mxu0 %vm21370_vm4, %v21507_v54  ;;  %v28570_v54 = vld [vmem:[#allocation136_spill] sm:$0xff] }
 0x81a   : > { %28560 = vst [vmem:[#allocation76_spill] sm:$0xff] %v24236_v8 }
 0x81b   : > { %v8934_v21 = vpop.f32.mrb[4].mxu0 }
 0x81c   : > { %v9224_v23 = vadd.f32 %v28563_v32, %v8934_v21  ;;  %v8936_v33 = vpop.f32.mrb[5].mxu0  ;;  %v28571_v32 = vld [vmem:[#allocation293_spill] sm:$0xff] }
 0x81d   : > { %v8937_v11 = vpop.f32.mrb[6].mxu0  ;;  %15979 = vmatmul.mubr.msk.bf16.gmra.mrb[24].mxu1 %vm21370_vm4, %v28567_v27 }
 0x81e   : > { %v24249_v26 = vadd.f32 %v9224_v23, %v28564_v13  ;;  %v9227_v29 = vadd.f32 %v28566_v9, %v8937_v11  ;;  %v8939_v60 = vpop.f32.mrb[7].mxu0  ;;  %15984 = vmatprep.mubr.msk.bf16.mxu1 %vm19825_vm2, %v28570_v54  ;;  %v28572_v13 = vld [vmem:[#allocation59_spill] sm:$0xff]  ;;  %v28575_v54 = vld [vmem:[#allocation60_spill] sm:$0xff] }
 0x820   : > { %28565 = vst [vmem:[#allocation77_spill] sm:$0xff] %v24249_v26  ;;  %v24256_v8 = vadd.f32 %v9227_v29, %v28568_v47  ;;  %17033 = vmatmul.mubr.msk.bf16.gmra.mrb[112].mxu0 %vm21370_vm4, %v28074_v28  ;;  %v28573_v29 = vld [vmem:[#allocation295_spill] sm:$0xff]  ;;  %v28574_v28 = vld [vmem:[#allocation109_spill] sm:$0xff] }
 0x821   : > { %17036 = vmatprep.mubr.msk.bf16.mxu0 %vm21370_vm4, %v28080_v17  ;;  %v28577_v26 = vld [vmem:[#allocation233_spill] sm:$0xff] }
 0x822   : > { %28569 = vst [vmem:[#allocation82_spill] sm:$0xff] %v24256_v8  ;;  %v28578_v17 = vld [vmem:[#allocation189_spill] sm:$0xff] }
 0x823   : > { %v8942_v21 = vpop.f32.mrb[8].mxu0 }
 0x824   : > { %v9232_v23 = vadd.f32 %v28571_v32, %v8942_v21  ;;  %v8944_v33 = vpop.f32.mrb[9].mxu0  ;;  %v28579_v32 = vld [vmem:[#allocation10_spill] sm:$0xff] }
 0x825   : > { %v8945_v11 = vpop.f32.mrb[10].mxu0  ;;  %15987 = vmatmul.mubr.msk.bf16.gmra.mrb[28].mxu1 %vm21370_vm4, %v28574_v28 }
 0x826   : > { %v24269_v9 = vadd.f32 %v9232_v23, %v28572_v13  ;;  %v9235_v60 = vadd.f32 %v28573_v29, %v8945_v11  ;;  %v8947_v47 = vpop.f32.mrb[11].mxu0  ;;  %15992 = vmatprep.mubr.msk.bf16.mxu1 %vm19825_vm2, %v28578_v17  ;;  %v28580_v13 = vld [vmem:[#allocation93_spill] sm:$0xff]  ;;  %v28583_v17 = vld [vmem:[#allocation22_spill] sm:$0xff] }
 0x828   : > { %v24276_v8 = vadd.f32 %v9235_v60, %v28575_v54  ;;  %17037 = vmatmul.mubr.msk.bf16.gmra.mrb[116].mxu0 %vm21370_vm4, %v28577_v26  ;;  %v28581_v60 = vld [vmem:[#allocation248_spill] sm:$0xff]  ;;  %v28582_v26 = vld [vmem:[#allocation139_spill] sm:$0xff] }
 0x829   : > { %17040 = vmatprep.mubr.msk.bf16.mxu0 %vm21370_vm4, %v21580_v6  ;;  %v28585_v6 = vld [vmem:[#allocation190_spill] sm:$0xff] }
 0x82a   : > { %28576 = vst [vmem:[#allocation12_spill] sm:$0xff] %v24276_v8 }
 0x82b   : > { %v8950_v21 = vpop.f32.mrb[12].mxu0 }
 0x82c   : > { %v9240_v23 = vadd.f32 %v28579_v32, %v8950_v21  ;;  %v8952_v33 = vpop.f32.mrb[13].mxu0  ;;  %v28586_v32 = vld [vmem:[#allocation135_spill] sm:$0xff] }
 0x82d   : > { %v8953_v11 = vpop.f32.mrb[14].mxu0  ;;  %15995 = vmatmul.mubr.msk.bf16.gmra.mrb[32].mxu1 %vm21370_vm4, %v28582_v26 }
 0x82e   : > { %v24289_v29 = vadd.f32 %v9240_v23, %v28580_v13  ;;  %v9243_v47 = vadd.f32 %v28581_v60, %v8953_v11  ;;  %v8955_v54 = vpop.f32.mrb[15].mxu0  ;;  %16000 = vmatprep.mubr.msk.bf16.mxu1 %vm19825_vm2, %v28585_v6  ;;  %v28587_v13 = vld [vmem:[#allocation141_spill] sm:$0xff] }
 0x830   : > { %v24296_v8 = vadd.f32 %v9243_v47, %v28583_v17  ;;  %17041 = vmatmul.mubr.msk.bf16.gmra.mrb[120].mxu0 %vm21370_vm4, %v21609_v48  ;;  %v28589_v47 = vld [vmem:[#allocation298_spill] sm:$0xff]  ;;  %v28590_v48 = vld [vmem:[#allocation143_spill] sm:$0xff]  ;;  %v28591_v17 = vld [vmem:[#allocation269_spill] sm:$0xff] }
 0x831   : > { %17044 = vmatprep.mubr.msk.bf16.mxu0 %vm21370_vm4, %v28095_v4  ;;  %v28594_v4 = vld [vmem:[#allocation191_spill] sm:$0xff] }
 0x832   : > { %28584 = vst [vmem:[#allocation71_spill] sm:$0xff] %v24296_v8  ;;  %v28593_v8 = vld [vmem:[#allocation239_spill] sm:$0xff] }
 0x833   : > { %v8958_v21 = vpop.f32.mrb[16].mxu0 }
 0x834   : > { %v9248_v23 = vadd.f32 %v28586_v32, %v8958_v21  ;;  %v8960_v33 = vpop.f32.mrb[17].mxu0  ;;  %v28595_v32 = vld [vmem:[#allocation7_spill] sm:$0xff] }
 0x835   : > { %v8961_v11 = vpop.f32.mrb[18].mxu0  ;;  %16003 = vmatmul.mubr.msk.bf16.gmra.mrb[36].mxu1 %vm21370_vm4, %v28590_v48 }
 0x836   : > { %v24309_v60 = vadd.f32 %v9248_v23, %v28587_v13  ;;  %v9251_v54 = vadd.f32 %v28589_v47, %v8961_v11  ;;  %v8963_v26 = vpop.f32.mrb[19].mxu0  ;;  %16008 = vmatprep.mubr.msk.bf16.mxu1 %vm19825_vm2, %v28594_v4  ;;  %v28596_v13 = vld [vmem:[#allocation27_spill] sm:$0xff]  ;;  %v28600_v4 = vld [vmem:[#allocation270_spill] sm:$0xff] }
 0x838   : > { %28588 = vst [vmem:[#allocation318_spill] sm:$0xff] %v24309_v60  ;;  %v24316_v6 = vadd.f32 %v9251_v54, %v28591_v17  ;;  %17045 = vmatmul.mubr.msk.bf16.gmra.mrb[124].mxu0 %vm21370_vm4, %v28593_v8  ;;  %v28598_v54 = vld [vmem:[#allocation14_spill] sm:$0xff]  ;;  %v28599_v8 = vld [vmem:[#allocation148_spill] sm:$0xff] }
 0x839   : > { %17048 = vmatprep.mubr.msk.bf16.mxu0 %vm21370_vm4, %v21649_v62  ;;  %v28602_v62 = vld [vmem:[#allocation200_spill] sm:$0xff] }
 0x83a   : > { %28592 = vst [vmem:[#allocation320_spill] sm:$0xff] %v24316_v6 }
 0x83b   : > { %v8966_v21 = vpop.f32.mrb[20].mxu0 }
 0x83c   : > { %v9256_v23 = vadd.f32 %v28595_v32, %v8966_v21  ;;  %v8968_v33 = vpop.f32.mrb[21].mxu0  ;;  %v28603_v32 = vld [vmem:[#allocation300_spill] sm:$0xff] }
 0x83d   : > { %v8969_v11 = vpop.f32.mrb[22].mxu0  ;;  %16011 = vmatmul.mubr.msk.bf16.gmra.mrb[40].mxu1 %vm21370_vm4, %v28599_v8 }
 0x83e   : > { %v24329_v47 = vadd.f32 %v9256_v23, %v28596_v13  ;;  %v9259_v26 = vadd.f32 %v28598_v54, %v8969_v11  ;;  %v8971_v17 = vpop.f32.mrb[23].mxu0  ;;  %16016 = vmatprep.mubr.msk.bf16.mxu1 %vm19825_vm2, %v28602_v62  ;;  %v28604_v13 = vld [vmem:[#allocation149_spill] sm:$0xff] }
 0x83f   : > { %v28608_v62 = vld [vmem:[#allocation153_spill] sm:$0xff] }
 0x840   : > { %28597 = vst [vmem:[#allocation317_spill] sm:$0xff] %v24329_v47  ;;  %v24336_v6 = vadd.f32 %v9259_v26, %v28600_v4  ;;  %17049 = vmatmul.mubr.msk.bf16.gmra.mrb[128].mxu0 %vm21370_vm4, %v21680_v7  ;;  %v28606_v26 = vld [vmem:[#allocation137_spill] sm:$0xff]  ;;  %v28607_v7 = vld [vmem:[#allocation160_spill] sm:$0xff]  ;;  %v28610_v47 = vld [vmem:[#allocation31_spill] sm:$0xff] }
 0x841   : > { %17052 = vmatprep.mubr.msk.bf16.mxu0 %vm21370_vm4, %v28508_v12 }
 0x842   : > { %28601 = vst [vmem:[#allocation319_spill] sm:$0xff] %v24336_v6 }
 0x843   : > { %v8974_v21 = vpop.f32.mrb[24].mxu0 }
 0x844   : > { %v9264_v23 = vadd.f32 %v28603_v32, %v8974_v21  ;;  %v8976_v33 = vpop.f32.mrb[25].mxu0  ;;  %v28611_v21 = vld [vmem:[#allocation249_spill] sm:$0xff] }
 0x845   : > { %v8977_v11 = vpop.f32.mrb[26].mxu0  ;;  %16019 = vmatmul.mubr.msk.bf16.gmra.mrb[44].mxu1 %vm21370_vm4, %v28607_v7 }
 0x846   : > { %v24349_v54 = vadd.f32 %v9264_v23, %v28604_v13  ;;  %v9267_v17 = vadd.f32 %v28606_v26, %v8977_v11  ;;  %v8979_v4 = vpop.f32.mrb[27].mxu0  ;;  %11025 = vmatprep.mubr.bf16.mxu1 %v27166_v41  ;;  %v28612_v11 = vld [vmem:[#allocation273_spill] sm:$0xff]  ;;  %v28614_v26 = vld [vmem:[#allocation4_spill] sm:$0xff] }
 0x848   : > { %28605 = vst [vmem:[#allocation322_spill] sm:$0xff] %v24349_v54  ;;  %v24356_v6 = vadd.f32 %v9267_v17, %v28608_v62  ;;  %17053 = vmatmul.mubr.msk.bf16.gmra.mrb[132].mxu0 %vm21370_vm4, %v28610_v47  ;;  %v28615_v47 = vld [vmem:[#allocation158_spill] sm:$0xff] }
 0x849   : > { %17056 = vmatprep.mubr.msk.bf16.mxu0 %vm21370_vm4, %v28525_v31 }
 0x84a   : > { %28609 = vst [vmem:[#allocation324_spill] sm:$0xff] %v24356_v6  ;;  %v28768_v6 = vld [vmem:[#allocation183_spill] sm:$0xff] }
 0x84b   : > { %v8982_v12 = vpop.f32.mrb[28].mxu0 }
 0x84c   : > { %v9272_v32 = vadd.f32 %v28611_v21, %v8982_v12  ;;  %v8984_v23 = vpop.f32.mrb[29].mxu0  ;;  %v28617_v12 = vld [vmem:[#allocation297_spill] sm:$0xff] }
 0x84d   : > { %v8985_v33 = vpop.f32.mrb[30].mxu0  ;;  %11026 = vmatmul.mubr.bf16.gmra.mrb[48].mxu1 %v27166_v41 }
 0x84e   : > { %v24367_v13 = vadd.f32 %v9272_v32, %v28612_v11  ;;  %v9275_v17 = vadd.f32 %v28614_v26, %v8985_v33  ;;  %v8987_v4 = vpop.f32.mrb[31].mxu0  ;;  %11033 = vmatprep.mubr.bf16.mxu1 %v27166_v41  ;;  %v28618_v33 = vld [vmem:[#allocation271_spill] sm:$0xff] }
 0x84f   : > { %v28620_v26 = vld [vmem:[#allocation299_spill] sm:$0xff] }
 0x850   : > { %28613 = vst [vmem:[#allocation167_spill] sm:$0xff] %v24367_v13  ;;  %v24372_v62 = vadd.f32 %v9275_v17, %v28615_v47  ;;  %17057 = vmatmul.mubr.msk.bf16.gmra.mrb[136].mxu0 %vm21370_vm4, %v28533_v40  ;;  %v28621_v40 = vld [vmem:[#allocation165_spill] sm:$0xff]  ;;  %v28767_v13 = vld [vmem:[#allocation182_spill] sm:$0xff] }
 0x851   : > { %17060 = vmatprep.mubr.msk.bf16.mxu0 %vm21370_vm4, %v28545_v2 }
 0x852   : > { %28616 = vst [vmem:[#allocation321_spill] sm:$0xff] %v24372_v62  ;;  %v28623_v62 = vld [vmem:[#allocation112_spill] sm:$0xff] }
 0x853   : > { %v8990_v31 = vpop.f32.mrb[32].mxu0 }
 0x854   : > { %v9280_v21 = vadd.f32 %v28617_v12, %v8990_v31  ;;  %v8992_v32 = vpop.f32.mrb[33].mxu0  ;;  %v28624_v31 = vld [vmem:[#allocation250_spill] sm:$0xff] }
 0x855   : > { %v8993_v23 = vpop.f32.mrb[34].mxu0  ;;  %11034 = vmatmul.mubr.bf16.gmra.mrb[52].mxu1 %v27166_v41 }
 0x856   : > { %v24383_v11 = vadd.f32 %v9280_v21, %v28618_v33  ;;  %v9283_v17 = vadd.f32 %v28620_v26, %v8993_v23  ;;  %v8995_v4 = vpop.f32.mrb[35].mxu0  ;;  %11041 = vmatprep.mubr.bf16.mxu1 %v27166_v41  ;;  %v28625_v23 = vld [vmem:[#allocation272_spill] sm:$0xff]  ;;  %v28627_v26 = vld [vmem:[#allocation251_spill] sm:$0xff] }
 0x858   : > { %28619 = vst [vmem:[#allocation323_spill] sm:$0xff] %v24383_v11  ;;  %v24388_v47 = vadd.f32 %v9283_v17, %v28621_v40  ;;  %17061 = vmatmul.mubr.msk.bf16.gmra.mrb[140].mxu0 %vm21370_vm4, %v28623_v62  ;;  %v28628_v62 = vld [vmem:[#allocation224_spill] sm:$0xff] }
 0x859   : > { %17064 = vmatprep.mubr.msk.bf16.mxu0 %vm21370_vm4, %v28558_v3 }
 0x85a   : > { %28622 = vst [vmem:[#allocation196_spill] sm:$0xff] %v24388_v47 }
 0x85b   : > { %v8998_v2 = vpop.f32.mrb[36].mxu0 }
 0x85c   : > { %v9288_v12 = vadd.f32 %v28624_v31, %v8998_v2  ;;  %v9000_v21 = vpop.f32.mrb[37].mxu0  ;;  %v28630_v2 = vld [vmem:[#allocation21_spill] sm:$0xff] }
 0x85d   : > { %v9001_v32 = vpop.f32.mrb[38].mxu0  ;;  %11042 = vmatmul.mubr.bf16.gmra.mrb[56].mxu1 %v27166_v41 }
 0x85e   : > { %v24399_v33 = vadd.f32 %v9288_v12, %v28625_v23  ;;  %v9291_v17 = vadd.f32 %v28627_v26, %v9001_v32  ;;  %v9003_v4 = vpop.f32.mrb[39].mxu0  ;;  %11049 = vmatprep.mubr.bf16.mxu1 %v27166_v41  ;;  %v28631_v32 = vld [vmem:[#allocation275_spill] sm:$0xff]  ;;  %v28633_v26 = vld [vmem:[#allocation302_spill] sm:$0xff] }
 0x860   : > { %28626 = vst [vmem:[#allocation326_spill] sm:$0xff] %v24399_v33  ;;  %v24404_v40 = vadd.f32 %v9291_v17, %v28628_v62  ;;  %17065 = vmatmul.mubr.msk.bf16.gmra.mrb[144].mxu0 %vm21370_vm4, %v28567_v27  ;;  %v28634_v27 = vld [vmem:[#allocation225_spill] sm:$0xff] }
 0x861   : > { %17068 = vmatprep.mubr.msk.bf16.mxu0 %vm21370_vm4, %v28574_v28  ;;  %v28637_v28 = vld [vmem:[#allocation20_spill] sm:$0xff]  ;;  %v28762_v33 = vld [vmem:[#allocation181_spill] sm:$0xff] }
 0x862   : > { %28629 = vst [vmem:[#allocation328_spill] sm:$0xff] %v24404_v40  ;;  %v28636_v40 = vld [vmem:[#allocation121_spill] sm:$0xff] }
 0x863   : > { %v9006_v3 = vpop.f32.mrb[40].mxu0 }
 0x864   : > { %v9296_v31 = vadd.f32 %v28630_v2, %v9006_v3  ;;  %v9008_v12 = vpop.f32.mrb[41].mxu0  ;;  %v28638_v2 = vld [vmem:[#allocation23_spill] sm:$0xff] }
 0x865   : > { %v9009_v21 = vpop.f32.mrb[42].mxu0  ;;  %11050 = vmatmul.mubr.bf16.gmra.mrb[60].mxu1 %v27166_v41 }
 0x866   : > { %v24415_v23 = vadd.f32 %v9296_v31, %v28631_v32  ;;  %v9299_v17 = vadd.f32 %v28633_v26, %v9009_v21  ;;  %v9011_v4 = vpop.f32.mrb[43].mxu0  ;;  %16022 = vmatprep.mubr.msk.bf16.mxu1 %vm21370_vm4, %v28637_v28  ;;  %v18759_v32 = vld [vmem:[%s26522_s2 + $0x600] sm:$0xff]   ;;  %v28639_v26 = vld [vmem:[#allocation277_spill] sm:$0xff] }
 0x867   : > { %v28642_v28 = vld [vmem:[#allocation33_spill] sm:$0xff] }
 0x868   : > { %28632 = vst [vmem:[#allocation198_spill] sm:$0xff] %v24415_v23  ;;  %v24420_v62 = vadd.f32 %v9299_v17, %v28634_v27  ;;  %17069 = vmatmul.mubr.msk.bf16.gmra.mrb[148].mxu0 %vm21370_vm4, %v28636_v40  ;;  %v28641_v40 = vld [vmem:[#allocation252_spill] sm:$0xff] }
 0x869   : > { %17072 = vmatprep.mubr.msk.bf16.mxu0 %vm21370_vm4, %v28590_v48  ;;  %v28645_v48 = vld [vmem:[#allocation145_spill] sm:$0xff] }
 0x86a   : > { %28635 = vst [vmem:[#allocation199_spill] sm:$0xff] %v24420_v62  ;;  %v28643_v62 = vld [vmem:[#allocation227_spill] sm:$0xff] }
 0x86b   : > { %v9014_v3 = vpop.f32.mrb[44].mxu0 }
 0x86c   : > { %v9304_v31 = vadd.f32 %v28638_v2, %v9014_v3  ;;  %v9016_v12 = vpop.f32.mrb[45].mxu0  ;;  %v18760_v3 = vld [vmem:[%s26522_s2 + $0x608] sm:$0xff]  }
 0x86d   : > { %v9017_v21 = vpop.f32.mrb[46].mxu0  ;;  %11091 = vmatmul.mubr.bf16.vlgmr.msra.gmra.mrb[192].mxu1 %v28642_v28  ;;  %v18761_v12 = vld [vmem:[%s26522_s2 + $0x610] sm:$0xff]  }
 0x86e   : > { %v24436_v17 = vadd.f32 %v9304_v31, %v28639_v26  ;;  %v9307_v4 = vadd.f32 %v28641_v40, %v9017_v21  ;;  %v9019_v27 = vpop.f32.mrb[47].mxu0  ;;  %16025 = vmatprep.mubr.msk.bf16.mxu1 %vm21370_vm4, %v28645_v48  ;;  %11348 = vmatpush1.bf16.msra.mxu1 %v18759_v32  ;;  %v28646_v21 = vld [vmem:[#allocation274_spill] sm:$0xff]  ;;  %v28648_v40 = vld [vmem:[#allocation55_spill] sm:$0xff] }
 0x86f   : > { %11349 = vmatprep.subr.bf16.mxu1 %v27166_v41  ;;  %v28652_v28 = vld [vmem:[#allocation146_spill] sm:$0xff] }
 0x870   : > { %28640 = vst [vmem:[#allocation325_spill] sm:$0xff] %v24436_v17  ;;  %v24441_v23 = vadd.f32 %v9307_v4, %v28643_v62  ;;  %17073 = vmatmul.mubr.msk.bf16.gmra.mrb[152].mxu0 %vm21370_vm4, %v28599_v8  ;;  %v28649_v4 = vld [vmem:[#allocation228_spill] sm:$0xff] }
 0x871   : > { %17076 = vmatprep.mubr.msk.bf16.mxu0 %vm21370_vm4, %v28607_v7  ;;  %v28761_v17 = vld [vmem:[#allocation180_spill] sm:$0xff] }
 0x872   : > { %28644 = vst [vmem:[#allocation327_spill] sm:$0xff] %v24441_v23  ;;  %11350 = vmatpush1.bf16.msra.mxu1 %v18760_v3  ;;  %v28653_v3 = vld [vmem:[#allocation253_spill] sm:$0xff] }
 0x873   : > { %v9022_v62 = vpop.f32.mrb[48].mxu0  ;;  %11351 = vmatprep.subr.bf16.mxu1 %v27166_v41 }
 0x874   : > { %v9312_v2 = vadd.f32 %v23724_v0, %v9022_v62  ;;  %v9024_v31 = vpop.f32.mrb[49].mxu0  ;;  %v28651_v0 = vld [vmem:[#allocation201_spill] sm:$0xff] }
 0x875   : > { %v9025_v8 = vpop.f32.mrb[50].mxu0  ;;  %11099 = vmatmul.mubr.bf16.gmra.mrb[196].mxu1 %v28648_v40 }
 0x876   : > { %v24461_v32 = vadd.f32 %v9312_v2, %v28646_v21  ;;  %v9315_v7 = vadd.f32 %v23728_v57, %v9025_v8  ;;  %v9027_v26 = vpop.f32.mrb[51].mxu0  ;;  %16028 = vmatprep.mubr.msk.bf16.mxu1 %vm21370_vm4, %v28652_v28  ;;  %11352 = vmatpush1.bf16.msra.mxu1 %v18761_v12  ;;  %v18762_v57 = vld [vmem:[%s26522_s2 + $0x618] sm:$0xff]   ;;  %v18763_v8 = vld [vmem:[%s26522_s2 + $0x620] sm:$0xff]  }
 0x877   : > { %11353 = vmatprep.subr.bf16.mxu1 %v27166_v41  ;;  %v28654_v21 = vld [vmem:[#allocation103_spill] sm:$0xff] }
 0x878   : > { %28647 = vst [vmem:[#allocation205_spill] sm:$0xff] %v24461_v32  ;;  %v24467_v27 = vadd.f32 %v9315_v7, %v28649_v4  ;;  %17077 = vmatmul.mubr.msk.bf16.gmra.mrb[156].mxu0 %vm21370_vm4, %v28651_v0  ;;  %v28656_v7 = vld [vmem:[#allocation304_spill] sm:$0xff]  ;;  %v28657_v4 = vld [vmem:[#allocation63_spill] sm:$0xff] }
 0x879   : > { %17080 = vmatprep.mubr.bf16.mxu0 %v27166_v41  ;;  %v28658_v0 = vld [vmem:[#allocation276_spill] sm:$0xff] }
 0x87a   : > { %28650 = vst [vmem:[#allocation208_spill] sm:$0xff] %v24467_v27  ;;  %11354 = vmatpush1.bf16.msra.mxu1 %v18762_v57  ;;  %v18764_v57 = vld [vmem:[%s26522_s2 + $0x628] sm:$0xff]   ;;  %v28701_v27 = vld [vmem:[#allocation308_spill] sm:$0xff] }
 0x87b   : > { %v9030_v48 = vpop.f32.mrb[52].mxu0  ;;  %11355 = vmatprep.subr.bf16.mxu1 %v27166_v41  ;;  %v28702_v32 = vld [vmem:[#allocation284_spill] sm:$0xff] }
 0x87c   : > { %v9320_v62 = vadd.f32 %v28653_v3, %v9030_v48  ;;  %v9032_v2 = vpop.f32.mrb[53].mxu0  ;;  %v28660_v48 = vld [vmem:[#allocation150_spill] sm:$0xff] }
 0x87d   : > { %v9033_v31 = vpop.f32.mrb[54].mxu0  ;;  %11107 = vmatmul.mubr.bf16.gmra.mrb[200].mxu1 %v28657_v4 }
 0x87e   : > { %v24485_v12 = vadd.f32 %v9320_v62, %v28654_v21  ;;  %v9323_v26 = vadd.f32 %v28656_v7, %v9033_v31  ;;  %v9035_v40 = vpop.f32.mrb[55].mxu0  ;;  %16031 = vmatprep.mubr.msk.bf16.mxu1 %vm21370_vm4, %v28660_v48  ;;  %11356 = vmatpush1.bf16.msra.mxu1 %v18763_v8  ;;  %v28661_v62 = vld [vmem:[#allocation254_spill] sm:$0xff] }
 0x87f   : > { %11357 = vmatprep.subr.bf16.mxu1 %v27166_v41  ;;  %v18765_v7 = vld [vmem:[%s26522_s2 + $0x630] sm:$0xff]   ;;  %v28664_v40 = vld [vmem:[#allocation255_spill] sm:$0xff] }
 0x880   : > { %28655 = vst [vmem:[#allocation210_spill] sm:$0xff] %v24485_v12  ;;  %v24491_v28 = vadd.f32 %v9323_v26, %v28658_v0  ;;  %17081 = vmatmul.mubr.bf16.gmra.mrb[160].mxu0 %v27166_v41  ;;  %v28662_v26 = vld [vmem:[#allocation231_spill] sm:$0xff]  ;;  %v28665_v48 = vld [vmem:[#allocation34_spill] sm:$0xff] }
 0x881   : > { %17084 = vmatprep.mubr.bf16.mxu0 %v27166_v41 }
 0x882   : > { %28659 = vst [vmem:[#allocation209_spill] sm:$0xff] %v24491_v28  ;;  %11358 = vmatpush1.bf16.msra.mxu1 %v18764_v57  ;;  %v28666_v28 = vld [vmem:[#allocation232_spill] sm:$0xff]  ;;  %v18766_v57 = vld [vmem:[%s26522_s2 + $0x638] sm:$0xff]  }
 0x883   : > { %v9038_v3 = vpop.f32.mrb[56].mxu0  ;;  %11359 = vmatprep.subr.bf16.mxu1 %v27166_v41 }
 0x884   : > { %v9328_v2 = vadd.f32 %v28661_v62, %v9038_v3  ;;  %v9040_v31 = vpop.f32.mrb[57].mxu0  ;;  %v28668_v3 = vld [vmem:[#allocation151_spill] sm:$0xff] }
 0x885   : > { %v9041_v21 = vpop.f32.mrb[58].mxu0  ;;  %11115 = vmatmul.mubr.bf16.gmra.mrb[204].mxu1 %v28665_v48 }
 0x886   : > { %v24507_v8 = vadd.f32 %v9328_v2, %v28662_v26  ;;  %v9331_v4 = vadd.f32 %v28664_v40, %v9041_v21  ;;  %v9043_v0 = vpop.f32.mrb[59].mxu0  ;;  %16034 = vmatprep.mubr.msk.bf16.mxu1 %vm21370_vm4, %v28668_v3  ;;  %11360 = vmatpush1.bf16.msra.mxu1 %v18765_v7  ;;  %v28669_v2 = vld [vmem:[#allocation32_spill] sm:$0xff]  ;;  %v28672_v7 = vld [vmem:[#allocation301_spill] sm:$0xff]  ;;  %v28673_v3 = vld [vmem:[#allocation35_spill] sm:$0xff] }
 0x887   : > { %11361 = vmatprep.subr.bf16.mxu1 %v27166_v41  ;;  %v28670_v40 = vld [vmem:[#allocation280_spill] sm:$0xff] }
 0x888   : > { %28663 = vst [vmem:[#allocation211_spill] sm:$0xff] %v24507_v8  ;;  %v24513_v12 = vadd.f32 %v9331_v4, %v28666_v28  ;;  %17085 = vmatmul.mubr.bf16.gmra.mrb[164].mxu0 %v27166_v41  ;;  %v18767_v28 = vld [vmem:[%s26522_s2 + $0x640] sm:$0xff]  }
 0x88a   : > { %28667 = vst [vmem:[#allocation212_spill] sm:$0xff] %v24513_v12  ;;  %11362 = vmatpush1.bf16.msra.mxu1 %v18766_v57  ;;  %v28674_v12 = vld [vmem:[#allocation234_spill] sm:$0xff]  ;;  %v18768_v57 = vld [vmem:[%s26522_s2 + $0x648] sm:$0xff]  }
 0x88b   : > { %v9046_v62 = vpop.f32.mrb[60].mxu0  ;;  %11363 = vmatprep.subr.bf16.mxu1 %v27166_v41 }
 0x88c   : > { %v9336_v31 = vadd.f32 %v28669_v2, %v9046_v62  ;;  %v9048_v21 = vpop.f32.mrb[61].mxu0  ;;  %v28676_v62 = vld [vmem:[#allocation155_spill] sm:$0xff] }
 0x88d   : > { %v9049_v26 = vpop.f32.mrb[62].mxu0  ;;  %11123 = vmatmul.mubr.bf16.gmra.mrb[208].mxu1 %v28673_v3 }
 0x88e   : > { %v24528_v4 = vadd.f32 %v9336_v31, %v28670_v40  ;;  %v9339_v0 = vadd.f32 %v28672_v7, %v9049_v26  ;;  %v9051_v48 = vpop.f32.mrb[63].mxu0  ;;  %16037 = vmatprep.mubr.msk.bf16.mxu1 %vm21370_vm4, %v28676_v62  ;;  %11364 = vmatpush1.bf16.msra.mxu1 %v18767_v28  ;;  %v28677_v31 = vld [vmem:[#allocation256_spill] sm:$0xff]  ;;  %v28678_v7 = vld [vmem:[#allocation278_spill] sm:$0xff]  ;;  %v28680_v28 = vld [vmem:[#allocation257_spill] sm:$0xff] }
 0x88f   : > { %11365 = vmatprep.subr.bf16.mxu1 %v27166_v41  ;;  %v28681_v62 = vld [vmem:[#allocation36_spill] sm:$0xff] }
 0x890   : > { %28671 = vst [vmem:[#allocation213_spill] sm:$0xff] %v24528_v4  ;;  %v24534_v8 = vadd.f32 %v9339_v0, %v28674_v12  ;;  %v18769_v12 = vld [vmem:[%s26522_s2 + $0x650] sm:$0xff]  }
 0x892   : > { %28675 = vst [vmem:[#allocation214_spill] sm:$0xff] %v24534_v8  ;;  %11366 = vmatpush1.bf16.msra.mxu1 %v18768_v57  ;;  %v28682_v8 = vld [vmem:[#allocation235_spill] sm:$0xff] }
 0x893   : > { %v9054_v2 = vpop.f32.mrb[64].mxu0  ;;  %11367 = vmatprep.subr.bf16.mxu1 %v27166_v41 }
 0x894   : > { %v9344_v21 = vadd.f32 %v28677_v31, %v9054_v2  ;;  %v9056_v26 = vpop.f32.mrb[65].mxu0  ;;  %v28684_v2 = vld [vmem:[#allocation156_spill] sm:$0xff]  ;;  %v28685_v31 = vld [vmem:[#allocation303_spill] sm:$0xff] }
 0x895   : > { %v9057_v40 = vpop.f32.mrb[66].mxu0  ;;  %11131 = vmatmul.mubr.bf16.gmra.mrb[212].mxu1 %v28681_v62 }
 0x896   : > { %v24548_v0 = vadd.f32 %v9344_v21, %v28678_v7  ;;  %v9347_v48 = vadd.f32 %v28680_v28, %v9057_v40  ;;  %v9059_v3 = vpop.f32.mrb[67].mxu0  ;;  %16040 = vmatprep.mubr.msk.bf16.mxu1 %vm21370_vm4, %v28684_v2  ;;  %11368 = vmatpush1.bf16.msra.mxu1 %v18769_v12  ;;  %v28686_v7 = vld [vmem:[#allocation279_spill] sm:$0xff]  ;;  %v28692_v2 = vld [vmem:[#allocation157_spill] sm:$0xff] }
 0x897   : > { %11369 = vmatprep.subr.bf16.mxu1 %v27166_v41  ;;  %v28688_v3 = vld [vmem:[#allocation306_spill] sm:$0xff]  ;;  %v18770_v12 = vld [vmem:[%s26522_s2 + $0x658] sm:$0xff]  }
 0x898   : > { %28679 = vst [vmem:[#allocation215_spill] sm:$0xff] %v24548_v0  ;;  %v24554_v4 = vadd.f32 %v9347_v48, %v28682_v8  ;;  %v28689_v8 = vld [vmem:[#allocation37_spill] sm:$0xff] }
 0x899   : > { %v28690_v48 = vld [vmem:[#allocation237_spill] sm:$0xff] }
 0x89a   : > { %28683 = vst [vmem:[#allocation218_spill] sm:$0xff] %v24554_v4  ;;  %11370 = vmatpush1.bf16.msra.mxu1 %v18770_v12 }
 0x89b   : > { %v9062_v57 = vpop.f32.mrb[68].mxu0  ;;  %11371 = vmatprep.subr.bf16.mxu1 %v27166_v41 }
 0x89c   : > { %v9352_v21 = vadd.f32 %v28685_v31, %v9062_v57  ;;  %v9064_v26 = vpop.f32.mrb[69].mxu0  ;;  %v28693_v31 = vld [vmem:[#allocation258_spill] sm:$0xff] }
 0x89d   : > { %v9065_v40 = vpop.f32.mrb[70].mxu0  ;;  %11139 = vmatmul.mubr.bf16.gmra.mrb[216].mxu1 %v28689_v8 }
 0x89e   : > { %v24562_v28 = vadd.f32 %v9352_v21, %v28686_v7  ;;  %v9355_v62 = vadd.f32 %v28688_v3, %v9065_v40  ;;  %v9067_v0 = vpop.f32.mrb[71].mxu0  ;;  %16043 = vmatprep.mubr.msk.bf16.mxu1 %vm21370_vm4, %v28692_v2  ;;  %v28694_v40 = vld [vmem:[#allocation282_spill] sm:$0xff]  ;;  %v28696_v3 = vld [vmem:[#allocation259_spill] sm:$0xff] }
 0x89f   : > { %v28698_v2 = vld [vmem:[#allocation238_spill] sm:$0xff] }
 0x8a0   : > { %28687 = vst [vmem:[#allocation219_spill] sm:$0xff] %v24562_v28  ;;  %v24567_v4 = vadd.f32 %v9355_v62, %v28690_v48  ;;  %v28697_v48 = vld [vmem:[#allocation38_spill] sm:$0xff]  ;;  %v28700_v28 = vld [vmem:[#allocation161_spill] sm:$0xff] }
 0x8a2   : > { %28691 = vst [vmem:[#allocation72_spill] sm:$0xff] %v24567_v4 }
 0x8a3   : > { %v9070_v57 = vpop.f32.mrb[72].mxu0 }
 0x8a4   : > { %v9360_v21 = vadd.f32 %v28693_v31, %v9070_v57  ;;  %v9072_v0 = vpop.f32.mrb[73].mxu0 }
 0x8a5   : > { %v9073_v26 = vpop.f32.mrb[74].mxu0  ;;  %11147 = vmatmul.mubr.bf16.gmra.mrb[220].mxu1 %v28697_v48  ;;  %v28706_v48 = vld [vmem:[#allocation96_spill] sm:$0xff] }
 0x8a6   : > { %v24578_v7 = vadd.f32 %v9360_v21, %v28694_v40  ;;  %v9363_v62 = vadd.f32 %v28696_v3, %v9073_v26  ;;  %v9075_v8 = vpop.f32.mrb[75].mxu0  ;;  %16046 = vmatprep.mubr.msk.bf16.mxu1 %vm21370_vm4, %v28700_v28  ;;  %v28704_v40 = vld [vmem:[#allocation305_spill] sm:$0xff] }
 0x8a7   : > { %v28705_v8 = vld [vmem:[#allocation39_spill] sm:$0xff] }
 0x8a8   : > { %28695 = vst [vmem:[#allocation79_spill] sm:$0xff] %v24578_v7  ;;  %v24583_v4 = vadd.f32 %v9363_v62, %v28698_v2  ;;  %v28708_v2 = vld [vmem:[#allocation163_spill] sm:$0xff] }
 0x8aa   : > { %28699 = vst [vmem:[#allocation74_spill] sm:$0xff] %v24583_v4  ;;  %v28717_v4 = vld [vmem:[#allocation110_spill] sm:$0xff] }
 0x8ab   : > { %v9078_v12 = vpop.f32.mrb[76].mxu0 }
 0x8ac   : > { %v9368_v57 = vadd.f32 %v28701_v27, %v9078_v12  ;;  %v9080_v31 = vpop.f32.mrb[77].mxu0  ;;  %v18771_v27 = vld [vmem:[%s26522_s2 + $0x660] sm:$0xff]  }
 0x8ad   : > { %v9081_v0 = vpop.f32.mrb[78].mxu0  ;;  %11155 = vmatmul.mubr.bf16.gmra.mrb[224].mxu1 %v28705_v8  ;;  %v28709_v31 = vld [vmem:[#allocation281_spill] sm:$0xff] }
 0x8ae   : > { %v24590_v21 = vadd.f32 %v9368_v57, %v28702_v32  ;;  %v9371_v26 = vadd.f32 %v28704_v40, %v9081_v0  ;;  %v9083_v3 = vpop.f32.mrb[79].mxu0  ;;  %16049 = vmatprep.mubr.msk.bf16.mxu1 %vm21370_vm4, %v28708_v2  ;;  %11372 = vmatpush1.bf16.msra.mxu1 %v18771_v27  ;;  %v28711_v40 = vld [vmem:[#allocation310_spill] sm:$0xff]  ;;  %v28712_v8 = vld [vmem:[#allocation69_spill] sm:$0xff] }
 0x8af   : > { %11373 = vmatprep.subr.bf16.mxu1 %v27166_v41 }
 0x8b0   : > { %28703 = vst [vmem:[#allocation80_spill] sm:$0xff] %v24590_v21  ;;  %v24595_v62 = vadd.f32 %v9371_v26, %v28706_v48  ;;  %v28713_v48 = vld [vmem:[#allocation240_spill] sm:$0xff]  ;;  %v28716_v21 = vld [vmem:[#allocation307_spill] sm:$0xff] }
 0x8b2   : > { %28707 = vst [vmem:[#allocation75_spill] sm:$0xff] %v24595_v62  ;;  %v28715_v62 = vld [vmem:[#allocation164_spill] sm:$0xff] }
 0x8b3   : > { %v9086_v28 = vpop.f32.mrb[80].mxu0 }
 0x8b4   : > { %v9376_v32 = vadd.f32 %v23788_v49, %v9086_v28  ;;  %v9088_v12 = vpop.f32.mrb[81].mxu0 }
 0x8b5   : > { %v9089_v57 = vpop.f32.mrb[82].mxu0  ;;  %11163 = vmatmul.mubr.bf16.gmra.mrb[228].mxu1 %v28712_v8  ;;  %v28721_v8 = vld [vmem:[#allocation283_spill] sm:$0xff] }
 0x8b6   : > { %v24606_v0 = vadd.f32 %v9376_v32, %v28709_v31  ;;  %v9379_v26 = vadd.f32 %v28711_v40, %v9089_v57  ;;  %v9091_v3 = vpop.f32.mrb[83].mxu0  ;;  %16052 = vmatprep.mubr.msk.bf16.mxu1 %vm21370_vm4, %v28715_v62  ;;  %v28719_v31 = vld [vmem:[#allocation261_spill] sm:$0xff] }
 0x8b7   : > { %v28720_v3 = vld [vmem:[#allocation40_spill] sm:$0xff] }
 0x8b8   : > { %28710 = vst [vmem:[#allocation11_spill] sm:$0xff] %v24606_v0  ;;  %v24611_v2 = vadd.f32 %v9379_v26, %v28713_v48  ;;  %v28723_v48 = vld [vmem:[#allocation166_spill] sm:$0xff]  ;;  %v28733_v0 = vld [vmem:[#allocation241_spill] sm:$0xff] }
 0x8ba   : > { %28714 = vst [vmem:[#allocation84_spill] sm:$0xff] %v24611_v2  ;;  %v28732_v2 = vld [vmem:[#allocation262_spill] sm:$0xff] }
 0x8bb   : > { %v9094_v27 = vpop.f32.mrb[84].mxu0 }
 0x8bc   : > { %v9384_v49 = vadd.f32 %v28716_v21, %v9094_v27  ;;  %v9096_v28 = vpop.f32.mrb[85].mxu0  ;;  %v18772_v21 = vld [vmem:[%s26522_s2 + $0x668] sm:$0xff]  }
 0x8bd   : > { %v9097_v12 = vpop.f32.mrb[86].mxu0  ;;  %11171 = vmatmul.mubr.bf16.gmra.mrb[232].mxu1 %v28720_v3 }
 0x8be   : > { %v24618_v32 = vadd.f32 %v9384_v49, %v28717_v4  ;;  %v9387_v57 = vadd.f32 %v28719_v31, %v9097_v12  ;;  %v9099_v40 = vpop.f32.mrb[87].mxu0  ;;  %16055 = vmatprep.mubr.msk.bf16.mxu1 %vm21370_vm4, %v28723_v48  ;;  %11374 = vmatpush1.bf16.msra.mxu1 %v18772_v21  ;;  %v28724_v4 = vld [vmem:[#allocation312_spill] sm:$0xff]  ;;  %v28725_v12 = vld [vmem:[#allocation97_spill] sm:$0xff]  ;;  %v28729_v48 = vld [vmem:[#allocation286_spill] sm:$0xff] }
 0x8bf   : > { %11375 = vmatprep.subr.bf16.mxu1 %v27166_v41 }
 0x8c0   : > { %28718 = vst [vmem:[#allocation29_spill] sm:$0xff] %v24618_v32  ;;  %v24623_v26 = vadd.f32 %v9387_v57, %v28721_v8  ;;  %v28727_v57 = vld [vmem:[#allocation309_spill] sm:$0xff]  ;;  %v28731_v32 = vld [vmem:[#allocation168_spill] sm:$0xff] }
 0x8c1   : > { %v28728_v8 = vld [vmem:[#allocation41_spill] sm:$0xff] }
 0x8c2   : > { %28722 = vst [vmem:[#allocation30_spill] sm:$0xff] %v24623_v26 }
 0x8c3   : > { %v9102_v62 = vpop.f32.mrb[88].mxu0 }
 0x8c4   : > { %v9392_v27 = vadd.f32 %v28724_v4, %v9102_v62  ;;  %v9104_v49 = vpop.f32.mrb[89].mxu0 }
 0x8c5   : > { %v9105_v28 = vpop.f32.mrb[90].mxu0  ;;  %11179 = vmatmul.mubr.bf16.gmra.mrb[236].mxu1 %v28728_v8  ;;  %v28737_v8 = vld [vmem:[#allocation288_spill] sm:$0xff] }
 0x8c6   : > { %v24634_v31 = vadd.f32 %v9392_v27, %v28725_v12  ;;  %v9395_v40 = vadd.f32 %v28727_v57, %v9105_v28  ;;  %v9107_v3 = vpop.f32.mrb[91].mxu0  ;;  %16058 = vmatprep.mubr.msk.bf16.mxu1 %vm21370_vm4, %v28731_v32  ;;  %v28735_v12 = vld [vmem:[#allocation263_spill] sm:$0xff]  ;;  %v28739_v32 = vld [vmem:[#allocation169_spill] sm:$0xff] }
 0x8c7   : > { %v28736_v3 = vld [vmem:[#allocation42_spill] sm:$0xff] }
 0x8c8   : > { %28726 = vst [vmem:[#allocation43_spill] sm:$0xff] %v24634_v31  ;;  %v24639_v26 = vadd.f32 %v9395_v40, %v28729_v48  ;;  %v18773_v40 = vld [vmem:[%s26522_s2 + $0x670] sm:$0xff]   ;;  %v28760_v31 = vld [vmem:[#allocation179_spill] sm:$0xff] }
 0x8c9   : > { %11376 = vmatpush1.bf16.msra.mxu1 %v18773_v40 }
 0x8ca   : > { %28730 = vst [vmem:[#allocation47_spill] sm:$0xff] %v24639_v26  ;;  %11377 = vmatprep.subr.bf16.mxu1 %v27166_v41  ;;  %v28759_v26 = vld [vmem:[#allocation178_spill] sm:$0xff] }
 0x8cb   : > { %v9110_v21 = vpop.f32.mrb[92].mxu0 }
 0x8cc   : > { %v9400_v62 = vadd.f32 %v28732_v2, %v9110_v21  ;;  %v9112_v4 = vpop.f32.mrb[93].mxu0 }
 0x8cd   : > { %v9113_v49 = vpop.f32.mrb[94].mxu0  ;;  %11187 = vmatmul.mubr.bf16.gmra.mrb[240].mxu1 %v28736_v3  ;;  %v28740_v4 = vld [vmem:[#allocation98_spill] sm:$0xff]  ;;  %v28743_v3 = vld [vmem:[#allocation285_spill] sm:$0xff] }
 0x8ce   : > { %v24646_v27 = vadd.f32 %v9400_v62, %v28733_v0  ;;  %v9403_v28 = vadd.f32 %v28735_v12, %v9113_v49  ;;  %v9115_v57 = vpop.f32.mrb[95].mxu0  ;;  %16061 = vmatprep.mubr.msk.bf16.mxu1 %vm21370_vm4, %v28739_v32  ;;  %v28745_v32 = vld [vmem:[#allocation171_spill] sm:$0xff] }
 0x8d0   : > { %28734 = vst [vmem:[#allocation61_spill] sm:$0xff] %v24646_v27  ;;  %v24654_v48 = vadd.f32 %v9403_v28, %v28737_v8  ;;  %v28742_v28 = vld [vmem:[#allocation220_spill] sm:$0xff]  ;;  %v28747_v27 = vld [vmem:[#allocation242_spill] sm:$0xff] }
 0x8d2   : > { %28738 = vst [vmem:[#allocation62_spill] sm:$0xff] %v24654_v48  ;;  %v28746_v48 = vld [vmem:[#allocation264_spill] sm:$0xff] }
 0x8d3   : > { %v9118_v0 = vpop.f32.mrb[96].mxu0 }
 0x8d4   : > { %v9408_v2 = vadd.f32 %v23820_v25, %v9118_v0  ;;  %v9120_v21 = vpop.f32.mrb[97].mxu0 }
 0x8d5   : > { %v9121_v62 = vpop.f32.mrb[98].mxu0  ;;  %11195 = vmatmul.mubr.bf16.gmra.mrb[244].mxu1 %v28742_v28 }
 0x8d6   : > { %v24662_v49 = vadd.f32 %v9408_v2, %v28740_v4  ;;  %v9411_v12 = vadd.f32 %v23824_v15, %v9121_v62  ;;  %v9123_v57 = vpop.f32.mrb[99].mxu0  ;;  %16064 = vmatprep.mubr.msk.bf16.mxu1 %vm21370_vm4, %v28745_v32  ;;  %v28749_v4 = vld [vmem:[#allocation44_spill] sm:$0xff] }
 0x8d7   : > { %v28750_v57 = vld [vmem:[#allocation287_spill] sm:$0xff] }
 0x8d8   : > { %28741 = vst [vmem:[#allocation9_spill] sm:$0xff] %v24662_v49  ;;  %v24667_v8 = vadd.f32 %v9411_v12, %v28743_v3  ;;  %v18774_v12 = vld [vmem:[%s26522_s2 + $0x678] sm:$0xff]   ;;  %v28752_v3 = vld [vmem:[#allocation172_spill] sm:$0xff] }
 0x8d9   : > { %11378 = vmatpush1.bf16.msra.mxu1 %v18774_v12  ;;  %v28756_v12 = vld [vmem:[#allocation175_spill] sm:$0xff] }
 0x8da   : > { %28744 = vst [vmem:[#allocation6_spill] sm:$0xff] %v24667_v8 }
 0x8db   : > { %v9126_v40 = vpop.f32.mrb[100].mxu0 }
 0x8dc   : > { %v9416_v25 = vadd.f32 %v28746_v48, %v9126_v40  ;;  %v9128_v0 = vpop.f32.mrb[101].mxu0  ;;  %v28753_v40 = vld [vmem:[#allocation45_spill] sm:$0xff] }
 0x8dd   : > { %v9129_v21 = vpop.f32.mrb[102].mxu0  ;;  %11203 = vmatmul.mubr.bf16.gmra.mrb[248].mxu1 %v28749_v4  ;;  %v28755_v4 = vld [vmem:[#allocation174_spill] sm:$0xff] }
 0x8de   : > { %v24674_v2 = vadd.f32 %v9416_v25, %v28747_v27  ;;  %v9419_v15 = vadd.f32 %v23822_v20, %v9129_v21  ;;  %v9131_v62 = vpop.f32.mrb[103].mxu0  ;;  %16067 = vmatprep.mubr.msk.bf16.mxu1 %vm21370_vm4, %v28752_v3  ;;  %v28754_v25 = vld [vmem:[#allocation173_spill] sm:$0xff] }
 0x8e0   : > { %28748 = vst [vmem:[#allocation8_spill] sm:$0xff] %v24674_v2  ;;  %v24682_v28 = vadd.f32 %v9419_v15, %v28750_v57  ;;  %v28758_v2 = vld [vmem:[#allocation177_spill] sm:$0xff] }
 0x8e2   : > { %28751 = vst [vmem:[#allocation138_spill] sm:$0xff] %v24682_v28  ;;  %v28757_v28 = vld [vmem:[#allocation176_spill] sm:$0xff] }
 0x8e3   : > { %v24687_v48 = vpop.f32.mrb[104].mxu0 }
 0x8e4   : > { %v24689_v27 = vpop.f32.mrb[105].mxu0 }
 0x8e5   : > { %v24691_v20 = vpop.f32.mrb[106].mxu0  ;;  %11211 = vmatmul.mubr.bf16.gmra.mrb[252].mxu1 %v28753_v40 }
 0x8e6   : > { %v24693_v32 = vpop.f32.mrb[107].mxu0  ;;  %16070 = vmatprep.mubr.msk.bf16.mxu1 %vm21370_vm4, %v28754_v25 }
 0x8eb   : > { %v24699_v0 = vpop.f32.mrb[108].mxu0 }
 0x8ec   : > { %v24701_v21 = vpop.f32.mrb[109].mxu0 }
 0x8ed   : > { %v24703_v15 = vpop.f32.mrb[110].mxu0  ;;  %11219 = vmatmul.mubr.bf16.gmra.mrb[0].mxu1 %v28755_v4 }
 0x8ee   : > { %v24705_v62 = vpop.f32.mrb[111].mxu0  ;;  %16073 = vmatprep.mubr.msk.bf16.mxu1 %vm21370_vm4, %v28756_v12 }
 0x8f3   : > { %v24711_v57 = vpop.f32.mrb[112].mxu0 }
 0x8f4   : > { %v24713_v3 = vpop.f32.mrb[113].mxu0 }
 0x8f5   : > { %v24715_v40 = vpop.f32.mrb[114].mxu0  ;;  %11227 = vmatmul.mubr.bf16.gmra.mrb[4].mxu1 %v28757_v28 }
 0x8f6   : > { %v24717_v25 = vpop.f32.mrb[115].mxu0  ;;  %16076 = vmatprep.mubr.msk.bf16.mxu1 %vm21370_vm4, %v28758_v2 }
 0x8fb   : > { %v24723_v8 = vpop.f32.mrb[116].mxu0 }
 0x8fc   : > { %v24725_v4 = vpop.f32.mrb[117].mxu0 }
 0x8fd   : > { %v24727_v49 = vpop.f32.mrb[118].mxu0  ;;  %11235 = vmatmul.mubr.bf16.gmra.mrb[8].mxu1 %v28759_v26 }
 0x8fe   : > { %v24729_v12 = vpop.f32.mrb[119].mxu0  ;;  %16079 = vmatprep.mubr.msk.bf16.mxu1 %vm21370_vm4, %v28760_v31 }
 0x903   : > { %v24735_v7 = vpop.f32.mrb[120].mxu0 }
 0x904   : > { %v24737_v28 = vpop.f32.mrb[121].mxu0 }
 0x905   : > { %v24739_v23 = vpop.f32.mrb[122].mxu0  ;;  %11243 = vmatmul.mubr.bf16.gmra.mrb[12].mxu1 %v28761_v17  ;;  %v18775_v17 = vld [vmem:[%s26523_s3] sm:$0xff]  }
 0x906   : > { %v24741_v2 = vpop.f32.mrb[123].mxu0  ;;  %16082 = vmatprep.mubr.msk.bf16.mxu1 %vm21370_vm4, %v28762_v33  ;;  %17088 = vmatprep.subr.bf16.mxu0 %v18775_v17 }
 0x907   : > { %17089 = vmatpush3.bf16.msra.mxu0 %v18775_v17  ;;  %v28779_v17 = vld [vmem:[#allocation186_spill] sm:$0xff] }
 0x90b   : > { %v24747_v47 = vpop.f32.mrb[124].mxu0 }
 0x90c   : > { %28763 = vst [vmem:[#allocation81_spill] sm:$0xff] %v24747_v47  ;;  %v24749_v26 = vpop.f32.mrb[125].mxu0 }
 0x90d   : > { %28764 = vst [vmem:[#allocation85_spill] sm:$0xff] %v24749_v26  ;;  %v24751_v11 = vpop.f32.mrb[126].mxu0  ;;  %11251 = vmatmul.mubr.bf16.gmra.mrb[16].mxu1 %v28767_v13  ;;  %v28774_v13 = vld [vmem:[#allocation185_spill] sm:$0xff] }
 0x90e   : > { %28765 = vst [vmem:[#allocation170_spill] sm:$0xff] %v24751_v11  ;;  %v24753_v31 = vpop.f32.mrb[127].mxu0  ;;  %16085 = vmatprep.mubr.msk.bf16.mxu1 %vm21370_vm4, %v28768_v6 }
 0x90f   : > { %28766 = vst [vmem:[#allocation17_spill] sm:$0xff] %v24753_v31  ;;  %v28773_v31 = vld [vmem:[#allocation184_spill] sm:$0xff] }
 0x913   : > { %v24762_v33 = vpop.f32.mrb[128].mxu0 }
 0x914   : > { %28769 = vst [vmem:[#allocation106_spill] sm:$0xff] %v24762_v33  ;;  %v24764_v54 = vpop.f32.mrb[129].mxu0 }
 0x915   : > { %28770 = vst [vmem:[#allocation104_spill] sm:$0xff] %v24764_v54  ;;  %v24766_v47 = vpop.f32.mrb[130].mxu0  ;;  %11259 = vmatmul.mubr.bf16.gmra.mrb[20].mxu1 %v28773_v31  ;;  %v28780_v54 = vld [vmem:[#allocation187_spill] sm:$0xff]  ;;  %v18776_v31 = vld [vmem:[%s26523_s3 + $0x8] sm:$0xff]  }
 0x916   : > { %28771 = vst [vmem:[#allocation107_spill] sm:$0xff] %v24766_v47  ;;  %v24768_v11 = vpop.f32.mrb[131].mxu0  ;;  %16088 = vmatprep.mubr.msk.bf16.mxu1 %vm21370_vm4, %v28774_v13  ;;  %17090 = vmatprep.subr.bf16.mxu0 %v18776_v31 }
 0x917   : > { %28772 = vst [vmem:[#allocation108_spill] sm:$0xff] %v24768_v11  ;;  %17091 = vmatpush3.bf16.msra.mxu0 %v18776_v31  ;;  %v28791_v31 = vld [vmem:[#allocation140_spill] sm:$0xff] }
 0x91b   : > { %v24774_v6 = vpop.f32.mrb[132].mxu0 }
 0x91c   : > { %28775 = vst [vmem:[#allocation207_spill] sm:$0xff] %v24774_v6  ;;  %v24776_v60 = vpop.f32.mrb[133].mxu0 }
 0x91d   : > { %28776 = vst [vmem:[#allocation111_spill] sm:$0xff] %v24776_v60  ;;  %v24778_v26 = vpop.f32.mrb[134].mxu0  ;;  %11267 = vmatmul.mubr.bf16.gmra.mrb[24].mxu1 %v28779_v17  ;;  %v28786_v17 = vld [vmem:[#allocation192_spill] sm:$0xff] }
 0x91e   : > { %28777 = vst [vmem:[#allocation73_spill] sm:$0xff] %v24778_v26  ;;  %v24780_v33 = vpop.f32.mrb[135].mxu0  ;;  %16091 = vmatprep.mubr.msk.bf16.mxu1 %vm21370_vm4, %v28780_v54 }
 0x91f   : > { %28778 = vst [vmem:[#allocation113_spill] sm:$0xff] %v24780_v33  ;;  %v28785_v33 = vld [vmem:[#allocation188_spill] sm:$0xff] }
 0x923   : > { %v24789_v13 = vpop.f32.mrb[136].mxu0 }
 0x924   : > { %28781 = vst [vmem:[#allocation114_spill] sm:$0xff] %v24789_v13  ;;  %v24791_v6 = vpop.f32.mrb[137].mxu0 }
 0x925   : > { %28782 = vst [vmem:[#allocation115_spill] sm:$0xff] %v24791_v6  ;;  %v24793_v60 = vpop.f32.mrb[138].mxu0  ;;  %11275 = vmatmul.mubr.bf16.gmra.mrb[28].mxu1 %v28785_v33  ;;  %v28792_v6 = vld [vmem:[#allocation193_spill] sm:$0xff]  ;;  %v18777_v33 = vld [vmem:[%s26523_s3 + $0x10] sm:$0xff]  }
 0x926   : > { %28783 = vst [vmem:[#allocation216_spill] sm:$0xff] %v24793_v60  ;;  %v24795_v26 = vpop.f32.mrb[139].mxu0  ;;  %16094 = vmatprep.mubr.msk.bf16.mxu1 %vm21370_vm4, %v28786_v17  ;;  %17092 = vmatprep.subr.bf16.mxu0 %v18777_v33 }
 0x927   : > { %28784 = vst [vmem:[#allocation217_spill] sm:$0xff] %v24795_v26  ;;  %17093 = vmatpush3.bf16.msra.mxu0 %v18777_v33  ;;  %v28802_v33 = vld [vmem:[#allocation152_spill] sm:$0xff] }
 0x92b   : > { %v24801_v54 = vpop.f32.mrb[140].mxu0 }
 0x92c   : > { %28787 = vst [vmem:[#allocation116_spill] sm:$0xff] %v24801_v54  ;;  %v24803_v47 = vpop.f32.mrb[141].mxu0 }
 0x92d   : > { %28788 = vst [vmem:[#allocation260_spill] sm:$0xff] %v24803_v47  ;;  %v24805_v11 = vpop.f32.mrb[142].mxu0  ;;  %11283 = vmatmul.mubr.bf16.gmra.mrb[32].mxu1 %v28791_v31  ;;  %v28797_v31 = vld [vmem:[#allocation194_spill] sm:$0xff] }
 0x92e   : > { %28789 = vst [vmem:[#allocation117_spill] sm:$0xff] %v24805_v11  ;;  %v24807_v13 = vpop.f32.mrb[143].mxu0  ;;  %16097 = vmatprep.mubr.msk.bf16.mxu1 %vm21370_vm4, %v28792_v6 }
 0x92f   : > { %28790 = vst [vmem:[#allocation118_spill] sm:$0xff] %v24807_v13  ;;  %v28796_v13 = vld [vmem:[#allocation144_spill] sm:$0xff] }
 0x933   : > { %v24816_v17 = vpop.f32.mrb[144].mxu0 }
 0x934   : > { %28793 = vst [vmem:[#allocation119_spill] sm:$0xff] %v24816_v17  ;;  %v24818_v54 = vpop.f32.mrb[145].mxu0 }
 0x935   : > { %28794 = vst [vmem:[#allocation120_spill] sm:$0xff] %v24818_v54  ;;  %v24820_v47 = vpop.f32.mrb[146].mxu0  ;;  %11291 = vmatmul.mubr.bf16.gmra.mrb[36].mxu1 %v28796_v13  ;;  %v28803_v54 = vld [vmem:[#allocation202_spill] sm:$0xff]  ;;  %v18778_v13 = vld [vmem:[%s26523_s3 + $0x18] sm:$0xff]  }
 0x936   : > { %28795 = vst [vmem:[#allocation125_spill] sm:$0xff] %v24820_v47  ;;  %v24822_v11 = vpop.f32.mrb[147].mxu0  ;;  %16100 = vmatprep.mubr.msk.bf16.mxu1 %vm21370_vm4, %v28797_v31  ;;  %17094 = vmatprep.subr.bf16.mxu0 %v18778_v13 }
 0x937   : > { %17095 = vmatpush3.bf16.msra.mxu0 %v18778_v13  ;;  %v18779_v13 = vld [vmem:[%s26523_s3 + $0x20] sm:$0xff]  }
 0x938   : > { %17096 = vmatprep.subr.bf16.mxu0 %v18779_v13 }
 0x93b   : > { %v24828_v6 = vpop.f32.mrb[148].mxu0  ;;  %17097 = vmatpush3.bf16.msra.mxu0 %v18779_v13  ;;  %v28811_v13 = vld [vmem:[#allocation66_spill] sm:$0xff] }
 0x93c   : > { %28798 = vst [vmem:[#allocation122_spill] sm:$0xff] %v24828_v6  ;;  %v24830_v60 = vpop.f32.mrb[149].mxu0 }
 0x93d   : > { %28799 = vst [vmem:[#allocation123_spill] sm:$0xff] %v24830_v60  ;;  %v24832_v26 = vpop.f32.mrb[150].mxu0  ;;  %11299 = vmatmul.mubr.bf16.gmra.mrb[40].mxu1 %v28802_v33 }
 0x93e   : > { %28800 = vst [vmem:[#allocation124_spill] sm:$0xff] %v24832_v26  ;;  %v24834_v17 = vpop.f32.mrb[151].mxu0  ;;  %16103 = vmatprep.mubr.msk.bf16.mxu1 %vm21370_vm4, %v28803_v54 }
 0x93f   : > { %28801 = vst [vmem:[#allocation46_spill] sm:$0xff] %v24834_v17  ;;  %v28804_v17 = vld [vmem:[#allocation197_spill] sm:$0xff] }
 0x943   : > { %v24843_v31 = vpop.f32.mrb[152].mxu0 }
 0x944   : > { %v24845_v6 = vpop.f32.mrb[153].mxu0 }
 0x945   : > { %v24847_v60 = vpop.f32.mrb[154].mxu0  ;;  %11307 = vmatmul.mubr.bf16.gmra.mrb[44].mxu1 %v28804_v17  ;;  %v18780_v17 = vld [vmem:[%s26523_s3 + $0x28] sm:$0xff]  }
 0x946   : > { %v24849_v26 = vpop.f32.mrb[155].mxu0  ;;  %11314 = vmatprep.mubr.bf16.mxu1 %v27166_v41  ;;  %17098 = vmatprep.subr.bf16.mxu0 %v18780_v17 }
 0x947   : > { %17099 = vmatpush3.bf16.msra.mxu0 %v18780_v17  ;;  %v28813_v17 = vld [vmem:[#allocation67_spill] sm:$0xff] }
 0x94b   : > { %v24853_v45 = vpop.f32.mrb[156].mxu0 }
 0x94c   : > { %28805 = vst [vmem:[#allocation5_spill] sm:$0xff] %v24853_v45  ;;  %v24855_v54 = vpop.f32.mrb[157].mxu0  ;;  %v28810_v45 = vld [vmem:[#allocation65_spill] sm:$0xff] }
 0x94d   : > { %28806 = vst [vmem:[#allocation89_spill] sm:$0xff] %v24855_v54  ;;  %v24857_v33 = vpop.f32.mrb[158].mxu0  ;;  %11315 = vmatmul.mubr.bf16.gmra.mrb[48].mxu1 %v27166_v41  ;;  %v28812_v54 = vld [vmem:[#allocation70_spill] sm:$0xff] }
 0x94e   : > { %28807 = vst [vmem:[#allocation94_spill] sm:$0xff] %v24857_v33  ;;  %v24859_v47 = vpop.f32.mrb[159].mxu0  ;;  %11322 = vmatprep.mubr.bf16.mxu1 %v27166_v41  ;;  %v28809_v33 = vld [vmem:[#allocation64_spill] sm:$0xff] }
 0x94f   : > { %28808 = vst [vmem:[#allocation100_spill] sm:$0xff] %v24859_v47  ;;  %v18781_v47 = vld [vmem:[%s26523_s3 + $0x30] sm:$0xff]  }
 0x950   : > { %17100 = vmatprep.subr.bf16.mxu0 %v18781_v47 }
 0x951   : > { %17101 = vmatpush3.bf16.msra.mxu0 %v18781_v47  ;;  %v28814_v47 = vld [vmem:[#allocation83_spill] sm:$0xff] }
 0x955   : > { %11323 = vmatmul.mubr.bf16.gmra.mrb[52].mxu1 %v27166_v41 }
 0x956   : > { %11330 = vmatprep.mubr.bf16.mxu1 %v27166_v41 }
 0x95d   : > { %11331 = vmatmul.mubr.bf16.gmra.mrb[56].mxu1 %v27166_v41 }
 0x95e   : > { %11338 = vmatprep.mubr.bf16.mxu1 %v27166_v41 }
 0x965   : > { %11339 = vmatmul.mubr.bf16.gmra.mrb[60].mxu1 %v27166_v41 }
 0x966   : > { %11379 = vmatprep.mubr.bf16.mxu1 %v28809_v33  ;;  %v28816_v33 = vld [vmem:[#allocation88_spill] sm:$0xff] }
 0x96d   : > { %16108 = vmatmul.mubr.msk.bf16.vlgmr.msra.gmra.mrb[192].mxu1 %vm19825_vm2, %v28810_v45  ;;  %v18782_v45 = vld [vmem:[%s26523_s3 + $0x38] sm:$0xff]  }
 0x96e   : > { %11387 = vmatprep.mubr.bf16.mxu1 %v28811_v13  ;;  %17102 = vmatprep.subr.bf16.mxu0 %v18782_v45  ;;  %v18786_v13 = vld [vmem:[%s18898_s29 + $0x38] sm:$0xff]  }
 0x96f   : > { %17103 = vmatpush3.bf16.msra.mxu0 %v18782_v45  ;;  %v28819_v45 = vld [vmem:[#allocation162_spill] sm:$0xff] }
 0x975   : > { %16113 = vmatmul.mubr.msk.bf16.gmra.mrb[196].mxu1 %vm19825_vm2, %v28812_v54  ;;  %v18784_v54 = vld [vmem:[%s18898_s29 + $0x28] sm:$0xff]  }
 0x976   : > { %11395 = vmatprep.mubr.bf16.mxu1 %v28813_v17  ;;  %v28818_v17 = vld [vmem:[#allocation15_spill] sm:$0xff] }
 0x97d   : > { %16118 = vmatmul.mubr.msk.bf16.gmra.mrb[200].mxu1 %vm19825_vm2, %v28323_v22  ;;  %v28815_v22 = vld [vmem:[#allocation78_spill] sm:$0xff] }
 0x97e   : > { %11403 = vmatprep.mubr.bf16.mxu1 %v28477_v59  ;;  %v18783_v59 = vld [vmem:[%s18898_s29 + $0x20] sm:$0xff]  }
 0x97f   : > { %17104 = vmatprep.mubr.bf16.mxu0 %v18783_v59  ;;  %v28820_v59 = vld [vmem:[#allocation26_spill] sm:$0xff] }
 0x980   : > { %17105 = vmatmul.mubr.bf16.vlgmr.msra.gmra.mrb[168].mxu0 %v18784_v54  ;;  %v18789_v54 = vld [vmem:[%s18898_s29 + $0x50] sm:$0xff]  }
 0x985   : > { %16123 = vmatmul.mubr.msk.bf16.gmra.mrb[204].mxu1 %vm19825_vm2, %v28479_v34  ;;  %v28817_v34 = vld [vmem:[#allocation86_spill] sm:$0xff] }
 0x986   : > { %11411 = vmatprep.mubr.bf16.mxu1 %v28329_v55  ;;  %v18785_v55 = vld [vmem:[%s18898_s29 + $0x30] sm:$0xff]  }
 0x987   : > { %17108 = vmatprep.mubr.bf16.mxu0 %v18785_v55  ;;  %v18792_v55 = vld [vmem:[%s18898_s29 + $0x68] sm:$0xff]  }
 0x988   : > { %17109 = vmatmul.mubr.bf16.gmra.mrb[172].mxu0 %v18786_v13  ;;  %v28822_v13 = vld [vmem:[#allocation204_spill] sm:$0xff] }
 0x98d   : > { %16128 = vmatmul.mubr.msk.bf16.gmra.mrb[208].mxu1 %vm19825_vm2, %v28814_v47  ;;  %v18787_v47 = vld [vmem:[%s18898_s29 + $0x40] sm:$0xff]  }
 0x98e   : > { %11419 = vmatprep.mubr.bf16.mxu1 %v28815_v22  ;;  %v18788_v22 = vld [vmem:[%s18898_s29 + $0x48] sm:$0xff]   ;;  %17112 = vmatprep.mubr.bf16.mxu0 %v18787_v47 }
 0x98f   : > { %v18796_v47 = vld [vmem:[%s18898_s29 + $0x88] sm:$0xff]  }
 0x990   : > { %17113 = vmatmul.mubr.bf16.gmra.mrb[176].mxu0 %v18788_v22  ;;  %v18797_v22 = vld [vmem:[%s18898_s29 + $0x90] sm:$0xff]  }
 0x991   : > { %17116 = vmatprep.mubr.bf16.mxu0 %v18789_v54  ;;  %v18800_v54 = vld [vmem:[%s18898_s29 + $0xa8] sm:$0xff]  }
 0x995   : > { %16133 = vmatmul.mubr.msk.bf16.gmra.mrb[212].mxu1 %vm19825_vm2, %v28816_v33  ;;  %v18790_v33 = vld [vmem:[%s18898_s29 + $0x58] sm:$0xff]  }
 0x996   : > { %11427 = vmatprep.mubr.bf16.mxu1 %v28817_v34  ;;  %v18791_v34 = vld [vmem:[%s18898_s29 + $0x60] sm:$0xff]  }
 0x998   : > { %17117 = vmatmul.mubr.bf16.gmra.mrb[180].mxu0 %v18790_v33  ;;  %v18812_v33 = vld [vmem:[%s18898_s29 + $0x108] sm:$0xff]  }
 0x999   : > { %17120 = vmatprep.mubr.bf16.mxu0 %v18791_v34  ;;  %v28825_v34 = vld [vmem:[#allocation229_spill] sm:$0xff] }
 0x99d   : > { %16138 = vmatmul.mubr.msk.bf16.gmra.mrb[216].mxu1 %vm19825_vm2, %v28818_v17  ;;  %v18793_v17 = vld [vmem:[%s18898_s29 + $0x70] sm:$0xff]  }
 0x99e   : > { %11435 = vmatprep.mubr.bf16.mxu1 %v28819_v45  ;;  %v18794_v45 = vld [vmem:[%s18898_s29 + $0x78] sm:$0xff]  }
 0x9a0   : > { %17121 = vmatmul.mubr.bf16.gmra.mrb[184].mxu0 %v18792_v55  ;;  %v18814_v55 = vld [vmem:[%s18898_s29 + $0x118] sm:$0xff]  }
 0x9a1   : > { %17124 = vmatprep.mubr.bf16.mxu0 %v18793_v17  ;;  %v28830_v17 = vld [vmem:[#allocation16_spill] sm:$0xff] }
 0x9a5   : > { %16143 = vmatmul.mubr.msk.bf16.gmra.mrb[220].mxu1 %vm19825_vm2, %v28481_v18  ;;  %v28821_v18 = vld [vmem:[#allocation203_spill] sm:$0xff] }
 0x9a6   : > { %11443 = vmatprep.mubr.bf16.mxu1 %v28820_v59  ;;  %v18798_v59 = vld [vmem:[%s18898_s29 + $0x98] sm:$0xff]  }
 0x9a8   : > { %17125 = vmatmul.mubr.bf16.gmra.mrb[188].mxu0 %v18794_v45  ;;  %v28831_v45 = vld [vmem:[#allocation95_spill] sm:$0xff] }
 0x9ad   : > { %16148 = vmatmul.mubr.msk.bf16.gmra.mrb[224].mxu1 %vm19825_vm2, %v28367_v10  ;;  %v18795_v10 = vld [vmem:[%s18898_s29 + $0x80] sm:$0xff]  }
 0x9ae   : > { %11451 = vmatprep.mubr.bf16.mxu1 %v28369_v5  ;;  %v28823_v5 = vld [vmem:[#allocation206_spill] sm:$0xff]  ;;  %17128 = vmatprep.mubr.bf16.mxu0 %v18795_v10  ;;  %v28833_v10 = vld [vmem:[#allocation25_spill] sm:$0xff] }
 0x9b0   : > { %17129 = vmatmul.mubr.bf16.gmra.mrb[192].mxu0 %v18796_v47  ;;  %v28834_v47 = vld [vmem:[#allocation142_spill] sm:$0xff] }
 0x9b1   : > { %17132 = vmatprep.mubr.bf16.mxu0 %v18797_v22  ;;  %v28835_v22 = vld [vmem:[#allocation24_spill] sm:$0xff] }
 0x9b5   : > { %16153 = vmatmul.mubr.msk.bf16.gmra.mrb[228].mxu1 %vm19825_vm2, %v28821_v18  ;;  %v28827_v18 = vld [vmem:[#allocation13_spill] sm:$0xff] }
 0x9b6   : > { %11459 = vmatprep.mubr.bf16.mxu1 %v28822_v13  ;;  %v28829_v13 = vld [vmem:[#allocation18_spill] sm:$0xff] }
 0x9b8   : > { %17133 = vmatmul.mubr.bf16.gmra.mrb[196].mxu0 %v18798_v59  ;;  %v28836_v59 = vld [vmem:[#allocation147_spill] sm:$0xff] }
 0x9bd   : > { %16158 = vmatmul.mubr.msk.bf16.gmra.mrb[232].mxu1 %vm19825_vm2, %v28381_v38  ;;  %v18799_v38 = vld [vmem:[%s18898_s29 + $0xa0] sm:$0xff]  }
 0x9be   : > { %11467 = vmatprep.mubr.bf16.mxu1 %v28823_v5  ;;  %17136 = vmatprep.mubr.bf16.mxu0 %v18799_v38  ;;  %v28832_v5 = vld [vmem:[#allocation236_spill] sm:$0xff]  ;;  %v28837_v38 = vld [vmem:[#allocation154_spill] sm:$0xff] }
 0x9c0   : > { %17137 = vmatmul.mubr.bf16.gmra.mrb[200].mxu0 %v18800_v54  ;;  %v28838_v54 = vld [vmem:[#allocation159_spill] sm:$0xff] }
 0x9c5   : > { %16163 = vmatmul.mubr.msk.bf16.gmra.mrb[236].mxu1 %vm19825_vm2, %v28488_v30  ;;  %v18802_v30 = vld [vmem:[%s18898_s29 + $0xb8] sm:$0xff]  }
 0x9c6   : > { %11475 = vmatprep.mubr.bf16.mxu1 %v28389_v14  ;;  %v18801_v14 = vld [vmem:[%s18898_s29 + $0xb0] sm:$0xff]  }
 0x9c7   : > { %17140 = vmatprep.mubr.bf16.mxu0 %v18801_v14  ;;  %v28839_v14 = vld [vmem:[#allocation268_spill] sm:$0xff] }
 0x9c8   : > { %17141 = vmatmul.mubr.bf16.gmra.mrb[204].mxu0 %v18802_v30 }
 0x9cd   : > { %16168 = vmatmul.mubr.msk.bf16.gmra.mrb[240].mxu1 %vm19825_vm2, %v28394_v50  ;;  %v18804_v50 = vld [vmem:[%s18898_s29 + $0xc8] sm:$0xff]  }
 0x9ce   : > { %11483 = vmatprep.mubr.bf16.mxu1 %v28396_v43  ;;  %v18803_v43 = vld [vmem:[%s18898_s29 + $0xc0] sm:$0xff]  }
 0x9cf   : > { %17144 = vmatprep.mubr.bf16.mxu0 %v18803_v43 }
 0x9d0   : > { %17145 = vmatmul.mubr.bf16.gmra.mrb[208].mxu0 %v18804_v50 }
 0x9d5   : > { %16173 = vmatmul.mubr.msk.bf16.gmra.mrb[244].mxu1 %vm19825_vm2, %v28401_v1  ;;  %v18806_v1 = vld [vmem:[%s18898_s29 + $0xd8] sm:$0xff]  }
 0x9d6   : > { %11491 = vmatprep.mubr.bf16.mxu1 %v28402_v39  ;;  %v18805_v39 = vld [vmem:[%s18898_s29 + $0xd0] sm:$0xff]  }
 0x9d7   : > { %17148 = vmatprep.mubr.bf16.mxu0 %v18805_v39  ;;  %v28840_v39 = vld [vmem:[#allocation311_spill] sm:$0xff] }
 0x9d8   : > { %17149 = vmatmul.mubr.bf16.gmra.mrb[212].mxu0 %v18806_v1 }
 0x9dd   : > { %16178 = vmatmul.mubr.msk.bf16.gmra.mrb[248].mxu1 %vm19825_vm2, %v28407_v58  ;;  %v18807_v58 = vld [vmem:[%s18898_s29 + $0xe0] sm:$0xff]  }
 0x9de   : > { %11499 = vmatprep.mubr.bf16.mxu1 %v28494_v16  ;;  %v18808_v16 = vld [vmem:[%s18898_s29 + $0xe8] sm:$0xff]   ;;  %17152 = vmatprep.mubr.bf16.mxu0 %v18807_v58 }
 0x9e0   : > { %17153 = vmatmul.mubr.bf16.gmra.mrb[216].mxu0 %v18808_v16 }
 0x9e5   : > { %16183 = vmatmul.mubr.msk.bf16.gmra.mrb[252].mxu1 %vm19825_vm2, %v28495_v46  ;;  %v18810_v46 = vld [vmem:[%s18898_s29 + $0xf8] sm:$0xff]  }
 0x9e6   : > { %11507 = vmatprep.mubr.bf16.mxu1 %v28416_v42  ;;  %v18809_v42 = vld [vmem:[%s18898_s29 + $0xf0] sm:$0xff]  }
 0x9e7   : > { %17156 = vmatprep.mubr.bf16.mxu0 %v18809_v42  ;;  %v28842_v42 = vld [vmem:[#allocation265_spill] sm:$0xff] }
 0x9e8   : > { %17157 = vmatmul.mubr.bf16.gmra.mrb[220].mxu0 %v18810_v46 }
 0x9ed   : > { %16188 = vmatmul.mubr.msk.bf16.gmra.mrb[0].mxu1 %vm19825_vm2, %v28422_v52  ;;  %v28824_v52 = vld [vmem:[#allocation92_spill] sm:$0xff] }
 0x9ee   : > { %11515 = vmatprep.mubr.bf16.mxu1 %v28424_v19  ;;  %v18811_v19 = vld [vmem:[%s18898_s29 + $0x100] sm:$0xff]  }
 0x9ef   : > { %17160 = vmatprep.mubr.bf16.mxu0 %v18811_v19 }
 0x9f0   : > { %17161 = vmatmul.mubr.bf16.gmra.mrb[224].mxu0 %v18812_v33 }
 0x9f5   : > { %16193 = vmatmul.mubr.msk.bf16.gmra.mrb[4].mxu1 %vm19825_vm2, %v28430_v37  ;;  %v28826_v37 = vld [vmem:[#allocation87_spill] sm:$0xff] }
 0x9f6   : > { %11523 = vmatprep.mubr.bf16.mxu1 %v27728_v44  ;;  %v18813_v44 = vld [vmem:[%s18898_s29 + $0x110] sm:$0xff]  }
 0x9f7   : > { %17164 = vmatprep.mubr.bf16.mxu0 %v18813_v44 }
 0x9f8   : > { %17165 = vmatmul.mubr.bf16.gmra.mrb[228].mxu0 %v18814_v55  ;;  %v28846_v55 = vld [vmem:[#allocation266_spill] sm:$0xff] }
 0x9fd   : > { %16198 = vmatmul.mubr.msk.bf16.gmra.mrb[8].mxu1 %vm19825_vm2, %v27732_v24  ;;  %v28828_v24 = vld [vmem:[#allocation90_spill] sm:$0xff] }
 0x9fe   : > { %11531 = vmatprep.mubr.bf16.mxu1 %v28824_v52 }
 0xa05   : > { %16203 = vmatmul.mubr.msk.bf16.gmra.mrb[12].mxu1 %vm19825_vm2, %v28825_v34  ;;  %v28844_v34 = vld [vmem:[#allocation314_spill] sm:$0xff] }
 0xa06   : > { %11539 = vmatprep.mubr.bf16.mxu1 %v28826_v37 }
 0xa0d   : > { %16208 = vmatmul.mubr.msk.bf16.gmra.mrb[16].mxu1 %vm19825_vm2, %v28827_v18 }
 0xa0e   : > { %11547 = vmatprep.mubr.bf16.mxu1 %v28828_v24 }
 0xa15   : > { %16213 = vmatmul.mubr.msk.bf16.gmra.mrb[20].mxu1 %vm19825_vm2, %v28829_v13  ;;  %v28848_v13 = vld [vmem:[#allocation316_spill] sm:$0xff] }
 0xa16   : > { %11555 = vmatprep.mubr.bf16.mxu1 %v28830_v17 }
 0xa1d   : > { %16218 = vmatmul.mubr.msk.bf16.gmra.mrb[24].mxu1 %vm19825_vm2, %v28831_v45 }
 0xa1e   : > { %11563 = vmatprep.mubr.bf16.mxu1 %v28832_v5 }
 0xa25   : > { %16223 = vmatmul.mubr.msk.bf16.gmra.mrb[28].mxu1 %vm19825_vm2, %v28833_v10 }
 0xa26   : > { %11571 = vmatprep.mubr.bf16.mxu1 %v28467_v63 }
 0xa2d   : > { %16228 = vmatmul.mubr.msk.bf16.gmra.mrb[32].mxu1 %vm19825_vm2, %v28834_v47 }
 0xa2e   : > { %11579 = vmatprep.mubr.bf16.mxu1 %v28835_v22 }
 0xa35   : > { %16233 = vmatmul.mubr.msk.bf16.gmra.mrb[36].mxu1 %vm19825_vm2, %v28836_v59 }
 0xa36   : > { %11587 = vmatprep.mubr.bf16.mxu1 %v28837_v38 }
 0xa3d   : > { %16238 = vmatmul.mubr.msk.bf16.gmra.mrb[40].mxu1 %vm19825_vm2, %v28838_v54 }
 0xa3e   : > { %11595 = vmatprep.mubr.bf16.mxu1 %v28839_v14  ;;  %v28852_v14 = vld [vmem:[#allocation313_spill] sm:$0xff] }
 0xa40   : > { %v11381_v30 = vpop.f32.mrb[192].mxu1 }
 0xa41   : > { %v11671_v63 = vadd.f32 %v24689_v27, %v11381_v30  ;;  %v11383_v43 = vpop.f32.mrb[193].mxu1 }
 0xa42   : > { %v11384_v50 = vpop.f32.mrb[194].mxu1 }
 0xa43   : > { %v25023_v1 = vadd.f32 %v11671_v63, %v28840_v39  ;;  %v11674_v58 = vadd.f32 %v24693_v32, %v11384_v50  ;;  %v11386_v16 = vpop.f32.mrb[195].mxu1  ;;  %v28854_v39 = vld [vmem:[#allocation315_spill] sm:$0xff] }
 0xa45   : > { %28841 = vst [vmem:[#allocation48_spill] sm:$0xff] %v25023_v1  ;;  %v25027_v46 = vadd.f32 %v11674_v58, %v28842_v42  ;;  %16243 = vmatmul.mubr.msk.bf16.gmra.mrb[44].mxu1 %vm19825_vm2, %v24186_v36 }
 0xa46   : > { %11603 = vmatprep.mubr.bf16.mxu1 %v27166_v41 }
 0xa47   : > { %28843 = vst [vmem:[#allocation290_spill] sm:$0xff] %v25027_v46 }
 0xa48   : > { %v11389_v52 = vpop.f32.mrb[196].mxu1 }
 0xa49   : > { %v11679_v27 = vadd.f32 %v24687_v48, %v11389_v52  ;;  %v11391_v19 = vpop.f32.mrb[197].mxu1 }
 0xa4a   : > { %v11392_v33 = vpop.f32.mrb[198].mxu1 }
 0xa4b   : > { %v25035_v37 = vadd.f32 %v11679_v27, %v28844_v34  ;;  %v11682_v32 = vadd.f32 %v24691_v20, %v11392_v33  ;;  %v11394_v44 = vpop.f32.mrb[199].mxu1  ;;  %v28850_v20 = vld [vmem:[#allocation267_spill] sm:$0xff] }
 0xa4d   : > { %28845 = vst [vmem:[#allocation130_spill] sm:$0xff] %v25035_v37  ;;  %v25039_v18 = vadd.f32 %v11682_v32, %v28846_v55  ;;  %11604 = vmatmul.mubr.bf16.gmra.mrb[48].mxu1 %v27166_v41 }
 0xa4e   : > { %11611 = vmatprep.mubr.bf16.mxu1 %v27166_v41 }
 0xa4f   : > { %28847 = vst [vmem:[#allocation222_spill] sm:$0xff] %v25039_v18 }
 0xa50   : > { %v11397_v56 = vpop.f32.mrb[200].mxu1 }
 0xa51   : > { %v11687_v36 = vadd.f32 %v24701_v21, %v11397_v56  ;;  %v11399_v24 = vpop.f32.mrb[201].mxu1  ;;  %v25054_v21 = vpop.f32.mrb[160].mxu0 }
 0xa52   : > { %v11400_v48 = vpop.f32.mrb[202].mxu1  ;;  %v25056_v54 = vpop.f32.mrb[161].mxu0 }
 0xa53   : > { %v25045_v17 = vadd.f32 %v11687_v36, %v28848_v13  ;;  %v11690_v45 = vadd.f32 %v24705_v62, %v11400_v48  ;;  %v11402_v5 = vpop.f32.mrb[203].mxu1  ;;  %v25062_v43 = vpop.f32.mrb[162].mxu0 }
 0xa54   : > { %v25064_v50 = vpop.f32.mrb[163].mxu0 }
 0xa55   : > { %28849 = vst [vmem:[#allocation126_spill] sm:$0xff] %v25045_v17  ;;  %v25049_v10 = vadd.f32 %v11690_v45, %v28850_v20  ;;  %11612 = vmatmul.mubr.bf16.gmra.mrb[52].mxu1 %v27166_v41  ;;  %v25072_v52 = vpop.f32.mrb[164].mxu0 }
 0xa56   : > { %11619 = vmatprep.mubr.bf16.mxu1 %v27166_v41 }
 0xa57   : > { %28851 = vst [vmem:[#allocation221_spill] sm:$0xff] %v25049_v10 }
 0xa58   : > { %v11405_v47 = vpop.f32.mrb[204].mxu1 }
 0xa59   : > { %v11695_v22 = vadd.f32 %v24699_v0, %v11405_v47  ;;  %v11407_v59 = vpop.f32.mrb[205].mxu1 }
 0xa5a   : > { %v11408_v38 = vpop.f32.mrb[206].mxu1 }
 0xa5b   : > { %v25059_v30 = vadd.f32 %v11695_v22, %v28852_v14  ;;  %v11698_v62 = vadd.f32 %v24703_v15, %v11408_v38  ;;  %v11410_v63 = vpop.f32.mrb[207].mxu1  ;;  %v25074_v15 = vpop.f32.mrb[165].mxu0 }
 0xa5c   : > { %v25080_v32 = vpop.f32.mrb[166].mxu0 }
 0xa5d   : > { %28853 = vst [vmem:[#allocation49_spill] sm:$0xff] %v25059_v30  ;;  %v25067_v58 = vadd.f32 %v11698_v62, %v28854_v39  ;;  %11620 = vmatmul.mubr.bf16.gmra.mrb[56].mxu1 %v27166_v41  ;;  %v25082_v44 = vpop.f32.mrb[167].mxu0 }
 0xa5e   : > { %11627 = vmatprep.mubr.bf16.mxu1 %v27166_v41  ;;  %v25089_v24 = vpop.f32.mrb[168].mxu0 }
 0xa5f   : > { %28855 = vst [vmem:[#allocation244_spill] sm:$0xff] %v25067_v58  ;;  %v25091_v48 = vpop.f32.mrb[169].mxu0 }
 0xa60   : > { %v11413_v0 = vpop.f32.mrb[208].mxu1  ;;  %v25097_v5 = vpop.f32.mrb[170].mxu0 }
 0xa61   : > { %v11703_v16 = vadd.f32 %v24713_v3, %v11413_v0  ;;  %v11415_v42 = vpop.f32.mrb[209].mxu1  ;;  %v28862_v0 = vld [vmem:[#allocation76_spill] sm:$0xff] }
 0xa62   : > { %v11416_v27 = vpop.f32.mrb[210].mxu1 }
 0xa63   : > { %v25077_v19 = vadd.f32 %v11703_v16, %v24189_v61  ;;  %v11706_v33 = vadd.f32 %v24717_v25, %v11416_v27  ;;  %v11418_v34 = vpop.f32.mrb[211].mxu1 }
 0xa65   : > { %28856 = vst [vmem:[#allocation99_spill] sm:$0xff] %v25077_v19  ;;  %v25085_v55 = vadd.f32 %v11706_v33, %v24196_v53  ;;  %11628 = vmatmul.mubr.bf16.gmra.mrb[60].mxu1 %v27166_v41  ;;  %v25099_v53 = vpop.f32.mrb[171].mxu0  ;;  %v28859_v41 = vld [vmem:[#allocation68_spill] sm:$0xff] }
 0xa66   : > { %v25105_v59 = vpop.f32.mrb[172].mxu0 }
 0xa67   : > { %28857 = vst [vmem:[#allocation50_spill] sm:$0xff] %v25085_v55  ;;  %v25107_v14 = vpop.f32.mrb[173].mxu0 }
 0xa68   : > { %v11421_v3 = vpop.f32.mrb[212].mxu1  ;;  %v25113_v63 = vpop.f32.mrb[174].mxu0 }
 0xa69   : > { %v11711_v56 = vadd.f32 %v24711_v57, %v11421_v3  ;;  %v11423_v36 = vpop.f32.mrb[213].mxu1  ;;  %v25115_v39 = vpop.f32.mrb[175].mxu0 }
 0xa6a   : > { %v11424_v61 = vpop.f32.mrb[214].mxu1  ;;  %v25121_v33 = vpop.f32.mrb[176].mxu0 }
 0xa6b   : > { %v25094_v25 = vadd.f32 %v11711_v56, %v24209_v35  ;;  %v11714_v13 = vadd.f32 %v24715_v40, %v11424_v61  ;;  %v11426_v45 = vpop.f32.mrb[215].mxu1  ;;  %v25123_v3 = vpop.f32.mrb[177].mxu0 }
 0xa6c   : > { %v25129_v61 = vpop.f32.mrb[178].mxu0  ;;  %v12188_v45 = vmul.f32 %v25027_v46, %v25027_v46 }
 0xa6d   : > { %28858 = vst [vmem:[#allocation127_spill] sm:$0xff] %v25094_v25  ;;  %v25102_v20 = vadd.f32 %v11714_v13, %v28859_v41  ;;  %v25131_v13 = vpop.f32.mrb[179].mxu0 }
 0xa6f   : > { %28860 = vst [vmem:[#allocation243_spill] sm:$0xff] %v25102_v20 }
 0xa70   : > { %v11429_v57 = vpop.f32.mrb[216].mxu1 }
 0xa71   : > { %v11719_v47 = vadd.f32 %v24725_v4, %v11429_v57  ;;  %v11431_v22 = vpop.f32.mrb[217].mxu1  ;;  %v12187_v57 = vmul.f32 %v25023_v1, %v25023_v1 }
 0xa72   : > { %v11432_v38 = vpop.f32.mrb[218].mxu1 }
 0xa73   : > { %v25110_v35 = vadd.f32 %v11719_v47, %v24229_v51  ;;  %v11722_v40 = vadd.f32 %v24729_v12, %v11432_v38  ;;  %v11434_v62 = vpop.f32.mrb[219].mxu1  ;;  %v28864_v51 = vld [vmem:[#allocation77_spill] sm:$0xff]  ;;  %v12117_v47 = vadd.f32 %v25027_v46, %v25023_v1  ;;  %v12251_v38 = vadd.f32 %v12188_v45, %v12187_v57 }
 0xa75   : > { %28861 = vst [vmem:[#allocation223_spill] sm:$0xff] %v25110_v35  ;;  %v25118_v16 = vadd.f32 %v11722_v40, %v28862_v0  ;;  %v12118_v40 = vadd.f32 %v12117_v47, %v25035_v37  ;;  %v12191_v47 = vmul.f32 %v25045_v17, %v25045_v17 }
 0xa77   : > { %28863 = vst [vmem:[#allocation292_spill] sm:$0xff] %v25118_v16 }
 0xa78   : > { %v11437_v4 = vpop.f32.mrb[220].mxu1 }
 0xa79   : > { %v11727_v42 = vadd.f32 %v24723_v8, %v11437_v4  ;;  %v11439_v27 = vpop.f32.mrb[221].mxu1  ;;  %v28866_v8 = vld [vmem:[#allocation82_spill] sm:$0xff]  ;;  %v25146_v4 = vpop.f32.mrb[180].mxu0 }
 0xa7a   : > { %v11440_v34 = vpop.f32.mrb[222].mxu1  ;;  %v25148_v27 = vpop.f32.mrb[181].mxu0 }
 0xa7b   : > { %v25126_v56 = vadd.f32 %v11727_v42, %v28864_v51  ;;  %v11730_v12 = vadd.f32 %v24727_v49, %v11440_v34  ;;  %v11442_v36 = vpop.f32.mrb[223].mxu1  ;;  %v12189_v49 = vmul.f32 %v25035_v37, %v25035_v37  ;;  %v12190_v51 = vmul.f32 %v25039_v18, %v25039_v18 }
 0xa7d   : > { %28865 = vst [vmem:[#allocation101_spill] sm:$0xff] %v25126_v56  ;;  %v25136_v41 = vadd.f32 %v11730_v12, %v28866_v8  ;;  %v12252_v34 = vadd.f32 %v12251_v38, %v12189_v49  ;;  %v25156_v8 = vpop.f32.mrb[182].mxu0 }
 0xa7e   : > { %v25158_v57 = vpop.f32.mrb[183].mxu0 }
 0xa7f   : > { %28867 = vst [vmem:[#allocation195_spill] sm:$0xff] %v25136_v41  ;;  %v12253_v38 = vadd.f32 %v12252_v34, %v12190_v51  ;;  %v25170_v37 = vpop.f32.mrb[184].mxu0  ;;  %v12193_v34 = vmul.f32 %v25059_v30, %v25059_v30 }
 0xa80   : > { %v11445_v22 = vpop.f32.mrb[224].mxu1 }
 0xa81   : > { %v11735_v62 = vadd.f32 %v24737_v28, %v11445_v22  ;;  %v11447_v0 = vpop.f32.mrb[225].mxu1  ;;  %v12119_v28 = vadd.f32 %v12118_v40, %v25039_v18  ;;  %v28869_v22 = vld [vmem:[#allocation12_spill] sm:$0xff]  ;;  %v25172_v18 = vpop.f32.mrb[185].mxu0 }
 0xa82   : > { %v11448_v42 = vpop.f32.mrb[226].mxu1 }
 0xa83   : > { %v25153_v12 = vadd.f32 %v11735_v62, %v24269_v9  ;;  %v11738_v36 = vadd.f32 %v24741_v2, %v11448_v42  ;;  %v11450_v45 = vpop.f32.mrb[227].mxu1  ;;  %v12120_v0 = vadd.f32 %v12119_v28, %v25045_v17  ;;  %v12254_v62 = vadd.f32 %v12253_v38, %v12191_v47  ;;  %v25181_v47 = vpop.f32.mrb[186].mxu0 }
 0xa84   : > { %v12192_v2 = vmul.f32 %v25049_v10, %v25049_v10 }
 0xa85   : > { %28868 = vst [vmem:[#allocation51_spill] sm:$0xff] %v25153_v12  ;;  %v25164_v49 = vadd.f32 %v11738_v36, %v28869_v22  ;;  %v12121_v46 = vadd.f32 %v12120_v0, %v25049_v10  ;;  %v12194_v10 = vmul.f32 %v25067_v58, %v25067_v58 }
 0xa86   : > { %v12255_v22 = vadd.f32 %v12254_v62, %v12192_v2 }
 0xa87   : > { %28870 = vst [vmem:[#allocation133_spill] sm:$0xff] %v25164_v49  ;;  %v12122_v38 = vadd.f32 %v12121_v46, %v25059_v30 }
 0xa88   : > { %v11453_v9 = vpop.f32.mrb[228].mxu1  ;;  %v12256_v0 = vadd.f32 %v12255_v22, %v12193_v34 }
 0xa89   : > { %v11743_v42 = vadd.f32 %v24735_v7, %v11453_v9  ;;  %v11455_v45 = vpop.f32.mrb[229].mxu1  ;;  %v25183_v7 = vpop.f32.mrb[187].mxu0  ;;  %v28873_v9 = vld [vmem:[#allocation71_spill] sm:$0xff] }
 0xa8a   : > { %v11456_v40 = vpop.f32.mrb[230].mxu1  ;;  %28872 = vst [vmem:[#allocation28_spill] sm:$0xff] %v25183_v7  ;;  %v25195_v1 = vpop.f32.mrb[188].mxu0  ;;  %v12257_v2 = vadd.f32 %v12256_v0, %v12194_v10  ;;  %v12197_v0 = vmul.f32 %v25094_v25, %v25094_v25 }
 0xa8b   : > { %v25178_v51 = vadd.f32 %v11743_v42, %v24289_v29  ;;  %v11746_v36 = vadd.f32 %v24739_v23, %v11456_v40  ;;  %v11458_v28 = vpop.f32.mrb[231].mxu1  ;;  %v12123_v29 = vadd.f32 %v12122_v38, %v25067_v58  ;;  %v12195_v23 = vmul.f32 %v25077_v19, %v25077_v19  ;;  %v28875_v42 = vld [vmem:[#allocation85_spill] sm:$0xff]  ;;  %28876 = vst [vmem:[#allocation246_spill] sm:$0xff] %v25195_v1  ;;  %v25197_v46 = vpop.f32.mrb[189].mxu0 }
 0xa8c   : > { %v25204_v58 = vpop.f32.mrb[190].mxu0 }
 0xa8d   : > { %28871 = vst [vmem:[#allocation245_spill] sm:$0xff] %v25178_v51  ;;  %v25187_v45 = vadd.f32 %v11746_v36, %v28873_v9  ;;  %v12124_v34 = vadd.f32 %v12123_v29, %v25077_v19  ;;  %v28877_v36 = vld [vmem:[#allocation318_spill] sm:$0xff]  ;;  %v28879_v9 = vld [vmem:[#allocation17_spill] sm:$0xff]  ;;  %28880 = vst [vmem:[#allocation53_spill] sm:$0xff] %v25204_v58  ;;  %v25206_v7 = vpop.f32.mrb[191].mxu0 }
 0xa8e   : > { %28881 = vst [vmem:[#allocation128_spill] sm:$0xff] %v25206_v7  ;;  %v25218_v19 = vpop.f32.mrb[192].mxu0 }
 0xa8f   : > { %28874 = vst [vmem:[#allocation52_spill] sm:$0xff] %v25187_v45  ;;  %v12125_v10 = vadd.f32 %v12124_v34, %v25085_v55  ;;  %v28886_v34 = vld [vmem:[#allocation317_spill] sm:$0xff] }
 0xa90   : > { %v11461_v17 = vpop.f32.mrb[232].mxu1 }
 0xa91   : > { %v11751_v40 = vadd.f32 %v28875_v42, %v11461_v17  ;;  %v11463_v28 = vpop.f32.mrb[233].mxu1  ;;  %v12258_v17 = vadd.f32 %v12257_v2, %v12195_v23  ;;  %v12196_v42 = vmul.f32 %v25085_v55, %v25085_v55  ;;  %v25220_v2 = vpop.f32.mrb[193].mxu0  ;;  %v28888_v55 = vld [vmem:[#allocation170_spill] sm:$0xff] }
 0xa92   : > { %v11464_v62 = vpop.f32.mrb[234].mxu1  ;;  %v28882_v28 = vld [vmem:[#allocation320_spill] sm:$0xff]  ;;  %28885 = vst [vmem:[#allocation91_spill] sm:$0xff] %v25220_v2 }
 0xa93   : > { %v25201_v22 = vadd.f32 %v11751_v40, %v28877_v36  ;;  %v11754_v30 = vadd.f32 %v28879_v9, %v11464_v62  ;;  %v11466_v38 = vpop.f32.mrb[235].mxu1  ;;  %v12259_v40 = vadd.f32 %v12258_v17, %v12196_v42  ;;  %v12126_v62 = vadd.f32 %v12125_v10, %v25094_v25  ;;  %v28884_v36 = vld [vmem:[#allocation81_spill] sm:$0xff]  ;;  %v25228_v42 = vpop.f32.mrb[194].mxu0 }
 0xa94   : > { %28889 = vst [vmem:[#allocation134_spill] sm:$0xff] %v25228_v42  ;;  %v25230_v10 = vpop.f32.mrb[195].mxu0 }
 0xa95   : > { %28878 = vst [vmem:[#allocation102_spill] sm:$0xff] %v25201_v22  ;;  %v25211_v1 = vadd.f32 %v11754_v30, %v28882_v28  ;;  %v12260_v7 = vadd.f32 %v12259_v40, %v12197_v0  ;;  %v12198_v30 = vmul.f32 %v25102_v20, %v25102_v20  ;;  %28890 = vst [vmem:[#allocation54_spill] sm:$0xff] %v25230_v10  ;;  %v25242_v10 = vpop.f32.mrb[196].mxu0 }
 0xa96   : > { %28894 = vst [vmem:[#allocation247_spill] sm:$0xff] %v25242_v10 }
 0xa97   : > { %28883 = vst [vmem:[#allocation289_spill] sm:$0xff] %v25211_v1  ;;  %v12261_v40 = vadd.f32 %v12260_v7, %v12198_v30  ;;  %v28896_v7 = vld [vmem:[#allocation322_spill] sm:$0xff] }
 0xa98   : > { %v11469_v29 = vpop.f32.mrb[236].mxu1 }
 0xa99   : > { %v11759_v9 = vadd.f32 %v28884_v36, %v11469_v29  ;;  %v11471_v38 = vpop.f32.mrb[237].mxu1  ;;  %v12127_v29 = vadd.f32 %v12126_v62, %v25102_v20  ;;  %v12199_v36 = vmul.f32 %v25110_v35, %v25110_v35  ;;  %v25244_v20 = vpop.f32.mrb[197].mxu0 }
 0xa9a   : > { %v11472_v23 = vpop.f32.mrb[238].mxu1  ;;  %v28891_v38 = vld [vmem:[#allocation319_spill] sm:$0xff]  ;;  %28895 = vst [vmem:[#allocation56_spill] sm:$0xff] %v25244_v20 }
 0xa9b   : > { %v25225_v28 = vadd.f32 %v11759_v9, %v28886_v34  ;;  %v11762_v58 = vadd.f32 %v28888_v55, %v11472_v23  ;;  %v11474_v17 = vpop.f32.mrb[239].mxu1  ;;  %v12128_v25 = vadd.f32 %v12127_v29, %v25110_v35  ;;  %v12262_v34 = vadd.f32 %v12261_v40, %v12199_v36  ;;  %v28893_v23 = vld [vmem:[#allocation104_spill] sm:$0xff]  ;;  %v25253_v40 = vpop.f32.mrb[198].mxu0 }
 0xa9c   : > { %v12200_v55 = vmul.f32 %v25118_v16, %v25118_v16  ;;  %v28898_v29 = vld [vmem:[#allocation108_spill] sm:$0xff]  ;;  %28899 = vst [vmem:[#allocation105_spill] sm:$0xff] %v25253_v40 }
 0xa9d   : > { %28887 = vst [vmem:[#allocation291_spill] sm:$0xff] %v25225_v28  ;;  %v25236_v0 = vadd.f32 %v11762_v58, %v28891_v38  ;;  %v12129_v2 = vadd.f32 %v12128_v25, %v25118_v16  ;;  %v12201_v58 = vmul.f32 %v25126_v56, %v25126_v56  ;;  %v28901_v35 = vld [vmem:[#allocation324_spill] sm:$0xff]  ;;  %v12202_v16 = vmul.f32 %v25136_v41, %v25136_v41 }
 0xa9f   : > { %28892 = vst [vmem:[#allocation129_spill] sm:$0xff] %v25236_v0 }
 0xaa0   : > { %v11477_v9 = vpop.f32.mrb[240].mxu1 }
 0xaa1   : > { %v11767_v17 = vadd.f32 %v28893_v23, %v11477_v9  ;;  %v11479_v42 = vpop.f32.mrb[241].mxu1  ;;  %v25255_v9 = vpop.f32.mrb[199].mxu0  ;;  %v12130_v23 = vadd.f32 %v12129_v2, %v25126_v56 }
 0xaa2   : > { %v11480_v62 = vpop.f32.mrb[242].mxu1  ;;  %28900 = vst [vmem:[#allocation57_spill] sm:$0xff] %v25255_v9  ;;  %v12263_v42 = vadd.f32 %v12262_v34, %v12200_v55  ;;  %v25267_v9 = vpop.f32.mrb[200].mxu0 }
 0xaa3   : > { %v25250_v30 = vadd.f32 %v11767_v17, %v28896_v7  ;;  %v11770_v36 = vadd.f32 %v28898_v29, %v11480_v62  ;;  %v11482_v38 = vpop.f32.mrb[243].mxu1  ;;  %v12131_v17 = vadd.f32 %v12130_v23, %v25136_v41  ;;  %v12203_v62 = vmul.f32 %v25153_v12, %v25153_v12  ;;  %v28903_v7 = vld [vmem:[#allocation106_spill] sm:$0xff]  ;;  %28904 = vst [vmem:[#allocation131_spill] sm:$0xff] %v25267_v9  ;;  %v25269_v2 = vpop.f32.mrb[201].mxu0 }
 0xaa4   : > { %v12264_v25 = vadd.f32 %v12263_v42, %v12201_v58  ;;  %v28905_v58 = vld [vmem:[#allocation167_spill] sm:$0xff]  ;;  %v25276_v41 = vpop.f32.mrb[202].mxu0 }
 0xaa5   : > { %28897 = vst [vmem:[#allocation132_spill] sm:$0xff] %v25250_v30  ;;  %v25259_v20 = vadd.f32 %v11770_v36, %v28901_v35  ;;  %v12132_v55 = vadd.f32 %v12131_v17, %v25153_v12  ;;  %v28907_v42 = vld [vmem:[#allocation107_spill] sm:$0xff]  ;;  %28908 = vst [vmem:[#allocation230_spill] sm:$0xff] %v25276_v41  ;;  %v25278_v40 = vpop.f32.mrb[203].mxu0 }
 0xaa6   : > { %v12265_v35 = vadd.f32 %v12264_v25, %v12202_v16  ;;  %28909 = vst [vmem:[#allocation296_spill] sm:$0xff] %v25278_v40  ;;  %v12205_v25 = vmul.f32 %v25178_v51, %v25178_v51  ;;  %v25290_v12 = vpop.f32.mrb[204].mxu0 }
 0xaa7   : > { %28902 = vst [vmem:[#allocation226_spill] sm:$0xff] %v25259_v20  ;;  %v12133_v16 = vadd.f32 %v12132_v55, %v25164_v49  ;;  %v28914_v55 = vld [vmem:[#allocation323_spill] sm:$0xff] }
 0xaa8   : > { %v11485_v10 = vpop.f32.mrb[244].mxu1 }
 0xaa9   : > { %v11775_v29 = vadd.f32 %v28903_v7, %v11485_v10  ;;  %v11487_v38 = vpop.f32.mrb[245].mxu1  ;;  %v12266_v10 = vadd.f32 %v12265_v35, %v12203_v62  ;;  %v12204_v7 = vmul.f32 %v25164_v49, %v25164_v49  ;;  %v25292_v35 = vpop.f32.mrb[205].mxu0  ;;  %v28916_v49 = vld [vmem:[#allocation113_spill] sm:$0xff] }
 0xaaa   : > { %v11488_v34 = vpop.f32.mrb[246].mxu1  ;;  %v28910_v38 = vld [vmem:[#allocation321_spill] sm:$0xff]  ;;  %28913 = vst [vmem:[#allocation58_spill] sm:$0xff] %v25292_v35 }
 0xaab   : > { %v25273_v36 = vadd.f32 %v11775_v29, %v28905_v58  ;;  %v11778_v56 = vadd.f32 %v28907_v42, %v11488_v34  ;;  %v11490_v23 = vpop.f32.mrb[247].mxu1  ;;  %v12267_v29 = vadd.f32 %v12266_v10, %v12204_v7  ;;  %v12134_v34 = vadd.f32 %v12133_v16, %v25178_v51  ;;  %v28912_v58 = vld [vmem:[#allocation111_spill] sm:$0xff]  ;;  %v25300_v7 = vpop.f32.mrb[206].mxu0 }
 0xaac   : > { %28917 = vst [vmem:[#allocation293_spill] sm:$0xff] %v25300_v7  ;;  %v25302_v16 = vpop.f32.mrb[207].mxu0 }
 0xaad   : > { %28906 = vst [vmem:[#allocation294_spill] sm:$0xff] %v25273_v36  ;;  %v25283_v9 = vadd.f32 %v11778_v56, %v28910_v38  ;;  %v12268_v40 = vadd.f32 %v12267_v29, %v12205_v25  ;;  %v12206_v56 = vmul.f32 %v25187_v45, %v25187_v45  ;;  %28918 = vst [vmem:[#allocation59_spill] sm:$0xff] %v25302_v16  ;;  %v25314_v16 = vpop.f32.mrb[208].mxu0 }
 0xaae   : > { %28922 = vst [vmem:[#allocation109_spill] sm:$0xff] %v25314_v16 }
 0xaaf   : > { %28911 = vst [vmem:[#allocation19_spill] sm:$0xff] %v25283_v9  ;;  %v12269_v29 = vadd.f32 %v12268_v40, %v12206_v56  ;;  %v28924_v40 = vld [vmem:[#allocation326_spill] sm:$0xff] }
 0xab0   : > { %v11493_v17 = vpop.f32.mrb[248].mxu1 }
 0xab1   : > { %v11783_v42 = vadd.f32 %v28912_v58, %v11493_v17  ;;  %v11495_v23 = vpop.f32.mrb[249].mxu1  ;;  %v12135_v17 = vadd.f32 %v12134_v34, %v25187_v45  ;;  %v12207_v58 = vmul.f32 %v25201_v22, %v25201_v22  ;;  %v25316_v45 = vpop.f32.mrb[209].mxu0 }
 0xab2   : > { %v11496_v62 = vpop.f32.mrb[250].mxu1  ;;  %v28919_v23 = vld [vmem:[#allocation196_spill] sm:$0xff]  ;;  %28923 = vst [vmem:[#allocation60_spill] sm:$0xff] %v25316_v45 }
 0xab3   : > { %v25297_v38 = vadd.f32 %v11783_v42, %v28914_v55  ;;  %v11786_v41 = vadd.f32 %v28916_v49, %v11496_v62  ;;  %v11498_v10 = vpop.f32.mrb[251].mxu1  ;;  %v12136_v51 = vadd.f32 %v12135_v17, %v25201_v22  ;;  %v12270_v55 = vadd.f32 %v12269_v29, %v12207_v58  ;;  %v28921_v62 = vld [vmem:[#allocation207_spill] sm:$0xff]  ;;  %v28926_v17 = vld [vmem:[#allocation73_spill] sm:$0xff]  ;;  %v25325_v29 = vpop.f32.mrb[210].mxu0  ;;  %v28929_v22 = vld [vmem:[#allocation328_spill] sm:$0xff] }
 0xab4   : > { %v12208_v49 = vmul.f32 %v25211_v1, %v25211_v1  ;;  %28927 = vst [vmem:[#allocation189_spill] sm:$0xff] %v25325_v29 }
 0xab5   : > { %28915 = vst [vmem:[#allocation136_spill] sm:$0xff] %v25297_v38  ;;  %v25308_v25 = vadd.f32 %v11786_v41, %v28919_v23  ;;  %v12137_v35 = vadd.f32 %v12136_v51, %v25211_v1  ;;  %v12209_v41 = vmul.f32 %v25225_v28, %v25225_v28  ;;  %v12210_v1 = vmul.f32 %v25236_v0, %v25236_v0 }
 0xab7   : > { %28920 = vst [vmem:[#allocation295_spill] sm:$0xff] %v25308_v25 }
 0xab8   : > { %v11501_v42 = vpop.f32.mrb[252].mxu1 }
 0xab9   : > { %v11791_v10 = vadd.f32 %v28921_v62, %v11501_v42  ;;  %v11503_v7 = vpop.f32.mrb[253].mxu1  ;;  %v25327_v42 = vpop.f32.mrb[211].mxu0  ;;  %v12138_v62 = vadd.f32 %v12137_v35, %v25225_v28 }
 0xaba   : > { %v11504_v34 = vpop.f32.mrb[254].mxu1  ;;  %28928 = vst [vmem:[#allocation10_spill] sm:$0xff] %v25327_v42  ;;  %v12271_v7 = vadd.f32 %v12270_v55, %v12208_v49  ;;  %v28932_v49 = vld [vmem:[#allocation198_spill] sm:$0xff] }
 0xabb   : > { %v25322_v56 = vadd.f32 %v11791_v10, %v28924_v40  ;;  %v11794_v58 = vadd.f32 %v28926_v17, %v11504_v34  ;;  %v11506_v23 = vpop.f32.mrb[255].mxu1  ;;  %v12139_v10 = vadd.f32 %v12138_v62, %v25236_v0  ;;  %v12211_v34 = vmul.f32 %v25250_v30, %v25250_v30  ;;  %v28931_v40 = vld [vmem:[#allocation115_spill] sm:$0xff] }
 0xabc   : > { %v12272_v51 = vadd.f32 %v12271_v7, %v12209_v41  ;;  %v28934_v41 = vld [vmem:[#allocation217_spill] sm:$0xff]  ;;  %v12212_v62 = vmul.f32 %v25259_v20, %v25259_v20  ;;  %v28935_v0 = vld [vmem:[#allocation199_spill] sm:$0xff] }
 0xabd   : > { %28925 = vst [vmem:[#allocation233_spill] sm:$0xff] %v25322_v56  ;;  %v25331_v45 = vadd.f32 %v11794_v58, %v28929_v22  ;;  %v12140_v35 = vadd.f32 %v12139_v10, %v25250_v30 }
 0xabe   : > { %v12273_v55 = vadd.f32 %v12272_v51, %v12210_v1  ;;  %v12213_v1 = vmul.f32 %v25273_v36, %v25273_v36 }
 0xabf   : > { %28930 = vst [vmem:[#allocation93_spill] sm:$0xff] %v25331_v45 }
 0xac0   : > { %v11509_v16 = vpop.f32.mrb[0].mxu1  ;;  %v12274_v28 = vadd.f32 %v12273_v55, %v12211_v34  ;;  %v12214_v55 = vmul.f32 %v25283_v9, %v25283_v9 }
 0xac1   : > { %v11799_v17 = vadd.f32 %v28931_v40, %v11509_v16  ;;  %v11511_v23 = vpop.f32.mrb[1].mxu1  ;;  %v12141_v16 = vadd.f32 %v12140_v35, %v25259_v20 }
 0xac2   : > { %v11512_v42 = vpop.f32.mrb[2].mxu1  ;;  %v12275_v10 = vadd.f32 %v12274_v28, %v12212_v62  ;;  %v12215_v28 = vmul.f32 %v25297_v38, %v25297_v38  ;;  %v28941_v62 = vld [vmem:[#allocation327_spill] sm:$0xff] }
 0xac3   : > { %v25341_v22 = vadd.f32 %v11799_v17, %v28932_v49  ;;  %v11802_v58 = vadd.f32 %v28934_v41, %v11512_v42  ;;  %v11514_v7 = vpop.f32.mrb[3].mxu1  ;;  %v12142_v40 = vadd.f32 %v12141_v16, %v25273_v36  ;;  %v28937_v17 = vld [vmem:[#allocation114_spill] sm:$0xff]  ;;  %v28938_v41 = vld [vmem:[#allocation325_spill] sm:$0xff]  ;;  %v28990_v36 = vld [vmem:[#allocation100_spill] sm:$0xff] }
 0xac4   : > { %v12276_v34 = vadd.f32 %v12275_v10, %v12213_v1 }
 0xac5   : > { %28933 = vst [vmem:[#allocation248_spill] sm:$0xff] %v25341_v22  ;;  %v25347_v29 = vadd.f32 %v11802_v58, %v28935_v0  ;;  %v28940_v58 = vld [vmem:[#allocation216_spill] sm:$0xff]  ;;  %v12143_v20 = vadd.f32 %v12142_v40, %v25283_v9  ;;  %v28944_v9 = vld [vmem:[#allocation205_spill] sm:$0xff] }
 0xac7   : > { %28936 = vst [vmem:[#allocation139_spill] sm:$0xff] %v25347_v29  ;;  %v12144_v1 = vadd.f32 %v12143_v20, %v25297_v38 }
 0xac8   : > { %v11517_v51 = vpop.f32.mrb[4].mxu1 }
 0xac9   : > { %v11807_v23 = vadd.f32 %v28937_v17, %v11517_v51  ;;  %v11519_v42 = vpop.f32.mrb[5].mxu1  ;;  %v12277_v51 = vadd.f32 %v12276_v34, %v12214_v55  ;;  %v12145_v40 = vadd.f32 %v12144_v1, %v25308_v25  ;;  %v28946_v34 = vld [vmem:[#allocation118_spill] sm:$0xff] }
 0xaca   : > { %v11520_v49 = vpop.f32.mrb[6].mxu1  ;;  %v28943_v42 = vld [vmem:[#allocation260_spill] sm:$0xff] }
 0xacb   : > { %v25357_v0 = vadd.f32 %v11807_v23, %v28938_v41  ;;  %v11810_v35 = vadd.f32 %v28940_v58, %v11520_v49  ;;  %v11522_v7 = vpop.f32.mrb[7].mxu1  ;;  %v12278_v17 = vadd.f32 %v12277_v51, %v12215_v28  ;;  %v12216_v23 = vmul.f32 %v25308_v25, %v25308_v25  ;;  %v28947_v51 = vld [vmem:[#allocation208_spill] sm:$0xff] }
 0xacc   : > { %v12217_v7 = vmul.f32 %v25322_v56, %v25322_v56  ;;  %v12146_v28 = vadd.f32 %v12145_v40, %v25322_v56  ;;  %v28950_v40 = vld [vmem:[#allocation210_spill] sm:$0xff] }
 0xacd   : > { %28939 = vst [vmem:[#allocation22_spill] sm:$0xff] %v25357_v0  ;;  %v25364_v16 = vadd.f32 %v11810_v35, %v28941_v62  ;;  %v12279_v62 = vadd.f32 %v12278_v17, %v12216_v23 }
 0xacf   : > { %28942 = vst [vmem:[#allocation190_spill] sm:$0xff] %v25364_v16 }
 0xad0   : > { %v11525_v10 = vpop.f32.mrb[8].mxu1 }
 0xad1   : > { %v11815_v41 = vadd.f32 %v28943_v42, %v11525_v10  ;;  %v11527_v49 = vpop.f32.mrb[9].mxu1  ;;  %v12280_v10 = vadd.f32 %v12279_v62, %v12217_v7  ;;  %v12218_v42 = vmul.f32 %v25331_v45, %v25331_v45  ;;  %v28952_v7 = vld [vmem:[#allocation117_spill] sm:$0xff] }
 0xad2   : > { %v11528_v58 = vpop.f32.mrb[10].mxu1  ;;  %v12147_v49 = vadd.f32 %v12146_v28, %v25331_v45  ;;  %v12220_v28 = vmul.f32 %v25347_v29, %v25347_v29  ;;  %v28953_v45 = vld [vmem:[#allocation209_spill] sm:$0xff] }
 0xad3   : > { %v25374_v35 = vadd.f32 %v11815_v41, %v28944_v9  ;;  %v11818_v55 = vadd.f32 %v28946_v34, %v11528_v58  ;;  %v11530_v20 = vpop.f32.mrb[11].mxu1  ;;  %v12219_v9 = vmul.f32 %v25341_v22, %v25341_v22  ;;  %v28949_v41 = vld [vmem:[#allocation116_spill] sm:$0xff]  ;;  %v12281_v17 = vadd.f32 %v12280_v10, %v12218_v42 }
 0xad4   : > { %v12148_v23 = vadd.f32 %v12147_v49, %v25341_v22  ;;  %v12221_v10 = vmul.f32 %v25357_v0, %v25357_v0 }
 0xad5   : > { %28945 = vst [vmem:[#allocation135_spill] sm:$0xff] %v25374_v35  ;;  %v25379_v38 = vadd.f32 %v11818_v55, %v28947_v51  ;;  %v12282_v51 = vadd.f32 %v12281_v17, %v12219_v9  ;;  %v12222_v17 = vmul.f32 %v25364_v16, %v25364_v16 }
 0xad7   : > { %28948 = vst [vmem:[#allocation141_spill] sm:$0xff] %v25379_v38  ;;  %v12283_v49 = vadd.f32 %v12282_v51, %v12220_v28  ;;  %v12223_v51 = vmul.f32 %v25374_v35, %v25374_v35  ;;  %v28958_v28 = vld [vmem:[#allocation212_spill] sm:$0xff] }
 0xad8   : > { %v11533_v1 = vpop.f32.mrb[12].mxu1 }
 0xad9   : > { %v11823_v25 = vadd.f32 %v28949_v41, %v11533_v1  ;;  %v11535_v58 = vpop.f32.mrb[13].mxu1  ;;  %v12149_v1 = vadd.f32 %v12148_v23, %v25347_v29  ;;  %v28955_v41 = vld [vmem:[#allocation120_spill] sm:$0xff]  ;;  %v12284_v9 = vadd.f32 %v12283_v49, %v12221_v10  ;;  %v28988_v29 = vld [vmem:[#allocation11_spill] sm:$0xff] }
 0xada   : > { %v11536_v34 = vpop.f32.mrb[14].mxu1 }
 0xadb   : > { %v25389_v55 = vadd.f32 %v11823_v25, %v28950_v40  ;;  %v11826_v20 = vadd.f32 %v28952_v7, %v11536_v34  ;;  %v11538_v62 = vpop.f32.mrb[15].mxu1  ;;  %v12150_v25 = vadd.f32 %v12149_v1, %v25357_v0  ;;  %v28956_v7 = vld [vmem:[#allocation211_spill] sm:$0xff] }
 0xadd   : > { %28951 = vst [vmem:[#allocation298_spill] sm:$0xff] %v25389_v55  ;;  %v25395_v56 = vadd.f32 %v11826_v20, %v28953_v45  ;;  %v12151_v62 = vadd.f32 %v12150_v25, %v25364_v16  ;;  %v28961_v16 = vld [vmem:[#allocation213_spill] sm:$0xff] }
 0xadf   : > { %28954 = vst [vmem:[#allocation143_spill] sm:$0xff] %v25395_v56  ;;  %v12152_v10 = vadd.f32 %v12151_v62, %v25374_v35  ;;  %v28964_v35 = vld [vmem:[#allocation214_spill] sm:$0xff] }
 0xae0   : > { %v11541_v42 = vpop.f32.mrb[16].mxu1 }
 0xae1   : > { %v11831_v58 = vadd.f32 %v28955_v41, %v11541_v42  ;;  %v11543_v34 = vpop.f32.mrb[17].mxu1  ;;  %v12285_v42 = vadd.f32 %v12284_v9, %v12222_v17  ;;  %v12153_v25 = vadd.f32 %v12152_v10, %v25379_v38  ;;  %v28963_v9 = vld [vmem:[#allocation125_spill] sm:$0xff]  ;;  %v12226_v10 = vmul.f32 %v25395_v56, %v25395_v56 }
 0xae2   : > { %v11544_v40 = vpop.f32.mrb[18].mxu1  ;;  %v28960_v34 = vld [vmem:[#allocation119_spill] sm:$0xff] }
 0xae3   : > { %v25405_v45 = vadd.f32 %v11831_v58, %v28956_v7  ;;  %v11834_v23 = vadd.f32 %v24822_v11, %v11544_v40  ;;  %v11546_v20 = vpop.f32.mrb[19].mxu1  ;;  %v12286_v41 = vadd.f32 %v12285_v42, %v12223_v51  ;;  %v12224_v58 = vmul.f32 %v25379_v38, %v25379_v38 }
 0xae4   : > { %v12225_v20 = vmul.f32 %v25389_v55, %v25389_v55  ;;  %v12154_v42 = vadd.f32 %v12153_v25, %v25389_v55  ;;  %v28967_v25 = vld [vmem:[#allocation215_spill] sm:$0xff] }
 0xae5   : > { %28957 = vst [vmem:[#allocation269_spill] sm:$0xff] %v25405_v45  ;;  %v25412_v1 = vadd.f32 %v11834_v23, %v28958_v28  ;;  %v25425_v28 = vpop.f32.mrb[212].mxu0  ;;  %v12287_v51 = vadd.f32 %v12286_v41, %v12224_v58 }
 0xae6   : > { %v12155_v38 = vadd.f32 %v12154_v42, %v25395_v56  ;;  %v28970_v56 = vld [vmem:[#allocation218_spill] sm:$0xff] }
 0xae7   : > { %28959 = vst [vmem:[#allocation239_spill] sm:$0xff] %v25412_v1  ;;  %v12228_v42 = vmul.f32 %v25412_v1, %v25412_v1 }
 0xae8   : > { %v11549_v49 = vpop.f32.mrb[20].mxu1  ;;  %v12156_v58 = vadd.f32 %v12155_v38, %v25405_v45 }
 0xae9   : > { %v11839_v7 = vadd.f32 %v28960_v34, %v11549_v49  ;;  %v11551_v11 = vpop.f32.mrb[21].mxu1  ;;  %v12288_v34 = vadd.f32 %v12287_v51, %v12225_v20  ;;  %v28969_v20 = vld [vmem:[#allocation46_spill] sm:$0xff] }
 0xaea   : > { %v11552_v40 = vpop.f32.mrb[22].mxu1 }
 0xaeb   : > { %v25422_v23 = vadd.f32 %v11839_v7, %v28961_v16  ;;  %v11842_v17 = vadd.f32 %v28963_v9, %v11552_v40  ;;  %v11554_v62 = vpop.f32.mrb[23].mxu1  ;;  %v12227_v16 = vmul.f32 %v25405_v45, %v25405_v45  ;;  %v28966_v7 = vld [vmem:[#allocation123_spill] sm:$0xff]  ;;  %v12289_v41 = vadd.f32 %v12288_v34, %v12226_v10 }
 0xaed   : > { %28962 = vst [vmem:[#allocation191_spill] sm:$0xff] %v25422_v23  ;;  %v25429_v49 = vadd.f32 %v11842_v17, %v28964_v35  ;;  %v12290_v55 = vadd.f32 %v12289_v41, %v12227_v16  ;;  %v12229_v34 = vmul.f32 %v25422_v23, %v25422_v23 }
 0xaef   : > { %28965 = vst [vmem:[#allocation7_spill] sm:$0xff] %v25429_v49  ;;  %v12291_v38 = vadd.f32 %v12290_v55, %v12228_v42  ;;  %v12230_v41 = vmul.f32 %v25429_v49, %v25429_v49  ;;  %v28976_v42 = vld [vmem:[#allocation72_spill] sm:$0xff] }
 0xaf0   : > { %v11557_v11 = vpop.f32.mrb[24].mxu1 }
 0xaf1   : > { %v11847_v40 = vadd.f32 %v28966_v7, %v11557_v11  ;;  %v11559_v9 = vpop.f32.mrb[25].mxu1  ;;  %v12157_v11 = vadd.f32 %v12156_v58, %v25412_v1  ;;  %v12292_v16 = vadd.f32 %v12291_v38, %v12229_v34 }
 0xaf2   : > { %v11560_v62 = vpop.f32.mrb[26].mxu1 }
 0xaf3   : > { %v25439_v35 = vadd.f32 %v11847_v40, %v28967_v25  ;;  %v11850_v17 = vadd.f32 %v28969_v20, %v11560_v62  ;;  %v11562_v51 = vpop.f32.mrb[27].mxu1  ;;  %v12158_v7 = vadd.f32 %v12157_v11, %v25422_v23  ;;  %v28972_v40 = vld [vmem:[#allocation122_spill] sm:$0xff]  ;;  %v28973_v20 = vld [vmem:[#allocation219_spill] sm:$0xff] }
 0xaf5   : > { %28968 = vst [vmem:[#allocation27_spill] sm:$0xff] %v25439_v35  ;;  %v25445_v0 = vadd.f32 %v11850_v17, %v28970_v56  ;;  %v28975_v17 = vld [vmem:[#allocation124_spill] sm:$0xff]  ;;  %v12159_v1 = vadd.f32 %v12158_v7, %v25429_v49  ;;  %v12231_v55 = vmul.f32 %v25439_v35, %v25439_v35 }
 0xaf7   : > { %28971 = vst [vmem:[#allocation14_spill] sm:$0xff] %v25445_v0  ;;  %v12160_v34 = vadd.f32 %v12159_v1, %v25439_v35 }
 0xaf8   : > { %v11565_v10 = vpop.f32.mrb[28].mxu1 }
 0xaf9   : > { %v11855_v9 = vadd.f32 %v28972_v40, %v11565_v10  ;;  %v11567_v62 = vpop.f32.mrb[29].mxu1  ;;  %v12293_v10 = vadd.f32 %v12292_v16, %v12230_v41  ;;  %v12161_v7 = vadd.f32 %v12160_v34, %v25445_v0  ;;  %v25475_v41 = vpop.f32.mrb[213].mxu0 }
 0xafa   : > { %v11568_v25 = vpop.f32.mrb[30].mxu1 }
 0xafb   : > { %v25455_v56 = vadd.f32 %v11855_v9, %v28973_v20  ;;  %v11858_v58 = vadd.f32 %v28975_v17, %v11568_v25  ;;  %v11570_v51 = vpop.f32.mrb[31].mxu1  ;;  %v12294_v40 = vadd.f32 %v12293_v10, %v12231_v55  ;;  %v12232_v9 = vmul.f32 %v25445_v0, %v25445_v0  ;;  %v28980_v10 = vld [vmem:[#allocation74_spill] sm:$0xff] }
 0xafc   : > { %v28978_v51 = vld [vmem:[#allocation79_spill] sm:$0xff] }
 0xafd   : > { %28974 = vst [vmem:[#allocation148_spill] sm:$0xff] %v25455_v56  ;;  %v25462_v11 = vadd.f32 %v11858_v58, %v28976_v42  ;;  %v12233_v17 = vmul.f32 %v25455_v56, %v25455_v56  ;;  %v12295_v55 = vadd.f32 %v12294_v40, %v12232_v9  ;;  %v12162_v42 = vadd.f32 %v12161_v7, %v25455_v56 }
 0xaff   : > { %28977 = vst [vmem:[#allocation270_spill] sm:$0xff] %v25462_v11  ;;  %v12234_v34 = vmul.f32 %v25462_v11, %v25462_v11 }
 0xb00   : > { %v11573_v38 = vpop.f32.mrb[32].mxu1 }
 0xb01   : > { %v11863_v62 = vadd.f32 %v24845_v6, %v11573_v38  ;;  %v11575_v25 = vpop.f32.mrb[33].mxu1  ;;  %v12296_v38 = vadd.f32 %v12295_v55, %v12233_v17  ;;  %v28982_v55 = vld [vmem:[#allocation80_spill] sm:$0xff] }
 0xb02   : > { %v11576_v20 = vpop.f32.mrb[34].mxu1  ;;  %v25483_v25 = vpop.f32.mrb[214].mxu0 }
 0xb03   : > { %v25472_v58 = vadd.f32 %v11863_v62, %v28978_v51  ;;  %v11866_v16 = vadd.f32 %v24849_v26, %v11576_v20  ;;  %v11578_v1 = vpop.f32.mrb[35].mxu1  ;;  %v25485_v62 = vpop.f32.mrb[215].mxu0  ;;  %v12163_v26 = vadd.f32 %v12162_v42, %v25462_v11 }
 0xb04   : > { %v25491_v7 = vpop.f32.mrb[216].mxu0 }
 0xb05   : > { %28979 = vst [vmem:[#allocation200_spill] sm:$0xff] %v25472_v58  ;;  %v25479_v6 = vadd.f32 %v11866_v16, %v28980_v10  ;;  %v12235_v20 = vmul.f32 %v25472_v58, %v25472_v58  ;;  %v25493_v17 = vpop.f32.mrb[217].mxu0  ;;  %v12297_v16 = vadd.f32 %v12296_v38, %v12234_v34  ;;  %v12164_v1 = vadd.f32 %v12163_v26, %v25472_v58 }
 0xb06   : > { %v25500_v11 = vpop.f32.mrb[218].mxu0 }
 0xb07   : > { %28981 = vst [vmem:[#allocation300_spill] sm:$0xff] %v25479_v6  ;;  %v25502_v56 = vpop.f32.mrb[219].mxu0  ;;  %v12165_v26 = vadd.f32 %v12164_v1, %v25479_v6 }
 0xb08   : > { %v11581_v0 = vpop.f32.mrb[36].mxu1  ;;  %v25509_v38 = vpop.f32.mrb[220].mxu0 }
 0xb09   : > { %v11871_v40 = vadd.f32 %v24843_v31, %v11581_v0  ;;  %v11583_v9 = vpop.f32.mrb[37].mxu1  ;;  %v12298_v31 = vadd.f32 %v12297_v16, %v12235_v20  ;;  %v12236_v0 = vmul.f32 %v25479_v6, %v25479_v6  ;;  %v25511_v34 = vpop.f32.mrb[221].mxu0 }
 0xb0a   : > { %v11584_v51 = vpop.f32.mrb[38].mxu1  ;;  %v28984_v9 = vld [vmem:[#allocation75_spill] sm:$0xff] }
 0xb0b   : > { %v25497_v10 = vadd.f32 %v11871_v40, %v28982_v55  ;;  %v11874_v35 = vadd.f32 %v24847_v60, %v11584_v51  ;;  %v11586_v42 = vpop.f32.mrb[39].mxu1  ;;  %v25516_v40 = vpop.f32.mrb[222].mxu0  ;;  %v12299_v20 = vadd.f32 %v12298_v31, %v12236_v0 }
 0xb0c   : > { %v25518_v55 = vpop.f32.mrb[223].mxu0  ;;  %v28986_v42 = vld [vmem:[#allocation89_spill] sm:$0xff] }
 0xb0d   : > { %28983 = vst [vmem:[#allocation149_spill] sm:$0xff] %v25497_v10  ;;  %v25507_v49 = vadd.f32 %v11874_v35, %v28984_v9  ;;  %v12237_v60 = vmul.f32 %v25497_v10, %v25497_v10  ;;  %v12166_v16 = vadd.f32 %v12165_v26, %v25497_v10  ;;  %v25522_v58 = vpop.f32.mrb[224].mxu0 }
 0xb0e   : > { %v25524_v45 = vpop.f32.mrb[225].mxu0 }
 0xb0f   : > { %28985 = vst [vmem:[#allocation137_spill] sm:$0xff] %v25507_v49  ;;  %28987 = vst [vmem:[#allocation160_spill] sm:$0xff] %v25524_v45  ;;  %v12300_v1 = vadd.f32 %v12299_v20, %v12237_v60  ;;  %v12238_v6 = vmul.f32 %v25507_v49, %v25507_v49  ;;  %v25532_v0 = vpop.f32.mrb[226].mxu0  ;;  %v29000_v45 = vld [vmem:[#allocation29_spill] sm:$0xff] }
 0xb10   : > { %v11589_v51 = vpop.f32.mrb[40].mxu1  ;;  %28991 = vst [vmem:[#allocation31_spill] sm:$0xff] %v25532_v0  ;;  %v25534_v26 = vpop.f32.mrb[227].mxu0 }
 0xb11   : > { %v11879_v35 = vadd.f32 %v28986_v42, %v11589_v51  ;;  %v11591_v9 = vpop.f32.mrb[41].mxu1  ;;  %28992 = vst [vmem:[#allocation249_spill] sm:$0xff] %v25534_v26  ;;  %v12167_v51 = vadd.f32 %v12166_v16, %v25507_v49  ;;  %v25542_v20 = vpop.f32.mrb[228].mxu0  ;;  %v28999_v49 = vld [vmem:[#allocation5_spill] sm:$0xff] }
 0xb12   : > { %v11592_v23 = vpop.f32.mrb[42].mxu1  ;;  %v28993_v9 = vld [vmem:[#allocation84_spill] sm:$0xff]  ;;  %28995 = vst [vmem:[#allocation4_spill] sm:$0xff] %v25542_v20  ;;  %v25544_v10 = vpop.f32.mrb[229].mxu0 }
 0xb13   : > { %v25529_v22 = vadd.f32 %v11879_v35, %v28988_v29  ;;  %v11882_v30 = vadd.f32 %v28990_v36, %v11592_v23  ;;  %v11594_v31 = vpop.f32.mrb[43].mxu1  ;;  %28996 = vst [vmem:[#allocation158_spill] sm:$0xff] %v25544_v10  ;;  %v12301_v29 = vadd.f32 %v12300_v1, %v12238_v6  ;;  %v25547_v23 = vpop.f32.mrb[230].mxu0  ;;  %v29002_v6 = vld [vmem:[#allocation94_spill] sm:$0xff] }
 0xb14   : > { %28997 = vst [vmem:[#allocation297_spill] sm:$0xff] %v25547_v23  ;;  %v25549_v31 = vpop.f32.mrb[231].mxu0 }
 0xb15   : > { %28989 = vst [vmem:[#allocation153_spill] sm:$0xff] %v25529_v22  ;;  %v12239_v42 = vmul.f32 %v25529_v22, %v25529_v22  ;;  %v25540_v60 = vadd.f32 %v11882_v30, %v28993_v9  ;;  %v12168_v36 = vadd.f32 %v12167_v51, %v25529_v22  ;;  %28998 = vst [vmem:[#allocation271_spill] sm:$0xff] %v25549_v31 }
 0xb17   : > { %28994 = vst [vmem:[#allocation273_spill] sm:$0xff] %v25540_v60  ;;  %v12302_v26 = vadd.f32 %v12301_v29, %v12239_v42  ;;  %v12240_v16 = vmul.f32 %v25540_v60, %v25540_v60  ;;  %v12169_v20 = vadd.f32 %v12168_v36, %v25540_v60  ;;  %v29003_v29 = vld [vmem:[#allocation30_spill] sm:$0xff] }
 0xb18   : > { %v11597_v35 = vpop.f32.mrb[44].mxu1 }
 0xb19   : > { %v11887_v0 = vadd.f32 %v28999_v49, %v11597_v35  ;;  %v11599_v30 = vpop.f32.mrb[45].mxu1  ;;  %v12303_v23 = vadd.f32 %v12302_v26, %v12240_v16  ;;  %v29005_v16 = vld [vmem:[#allocation43_spill] sm:$0xff] }
 0xb1a   : > { %v11600_v9 = vpop.f32.mrb[46].mxu1 }
 0xb1b   : > { %v25556_v10 = vadd.f32 %v11887_v0, %v29000_v45  ;;  %v11890_v1 = vadd.f32 %v29002_v6, %v11600_v9  ;;  %v11602_v51 = vpop.f32.mrb[47].mxu1 }
 0xb1d   : > { %29001 = vst [vmem:[#allocation299_spill] sm:$0xff] %v25556_v10  ;;  %v12170_v22 = vadd.f32 %v12169_v20, %v25556_v10  ;;  %v12241_v42 = vmul.f32 %v25556_v10, %v25556_v10  ;;  %v25563_v31 = vadd.f32 %v11890_v1, %v29003_v29 }
 0xb1f   : > { %29004 = vst [vmem:[#allocation165_spill] sm:$0xff] %v25563_v31  ;;  %v12304_v49 = vadd.f32 %v12303_v23, %v12241_v42  ;;  %v12171_v35 = vadd.f32 %v12170_v22, %v25563_v31  ;;  %v12242_v36 = vmul.f32 %v25563_v31, %v25563_v31  ;;  %v29007_v23 = vld [vmem:[#allocation47_spill] sm:$0xff] }
 0xb20   : > { %v11605_v45 = vpop.f32.mrb[48].mxu1 }
 0xb21   : > { %v12305_v0 = vadd.f32 %v12304_v49, %v12242_v36  ;;  %v11895_v30 = vadd.f32 %v25056_v54, %v11605_v45  ;;  %v11607_v9 = vpop.f32.mrb[49].mxu1 }
 0xb22   : > { %v11608_v26 = vpop.f32.mrb[50].mxu1 }
 0xb23   : > { %v25570_v20 = vadd.f32 %v11895_v30, %v29005_v16  ;;  %v11898_v6 = vadd.f32 %v25064_v50, %v11608_v26  ;;  %v11610_v51 = vpop.f32.mrb[51].mxu1  ;;  %v29009_v26 = vld [vmem:[#allocation61_spill] sm:$0xff] }
 0xb25   : > { %29006 = vst [vmem:[#allocation112_spill] sm:$0xff] %v25570_v20  ;;  %v12172_v1 = vadd.f32 %v12171_v35, %v25570_v20  ;;  %v12243_v22 = vmul.f32 %v25570_v20, %v25570_v20  ;;  %v25577_v42 = vadd.f32 %v11898_v6, %v29007_v23  ;;  %v29211_v20 = vld [vmem:[#allocation7_spill] sm:$0xff] }
 0xb27   : > { %29008 = vst [vmem:[#allocation250_spill] sm:$0xff] %v25577_v42  ;;  %v12306_v29 = vadd.f32 %v12305_v0, %v12243_v22  ;;  %v12173_v49 = vadd.f32 %v12172_v1, %v25577_v42  ;;  %v12244_v54 = vmul.f32 %v25577_v42, %v25577_v42  ;;  %v29011_v1 = vld [vmem:[#allocation62_spill] sm:$0xff]  ;;  %v29209_v42 = vld [vmem:[#allocation191_spill] sm:$0xff] }
 0xb28   : > { %v11613_v36 = vpop.f32.mrb[52].mxu1 }
 0xb29   : > { %v12307_v45 = vadd.f32 %v12306_v29, %v12244_v54  ;;  %v11903_v30 = vadd.f32 %v25054_v21, %v11613_v36  ;;  %v11615_v50 = vpop.f32.mrb[53].mxu1 }
 0xb2a   : > { %v11616_v9 = vpop.f32.mrb[54].mxu1 }
 0xb2b   : > { %v25584_v35 = vadd.f32 %v11903_v30, %v29009_v26  ;;  %v11906_v16 = vadd.f32 %v25062_v43, %v11616_v9  ;;  %v11618_v51 = vpop.f32.mrb[55].mxu1  ;;  %v29013_v9 = vld [vmem:[#allocation9_spill] sm:$0xff] }
 0xb2d   : > { %29010 = vst [vmem:[#allocation272_spill] sm:$0xff] %v25584_v35  ;;  %v12174_v6 = vadd.f32 %v12173_v49, %v25584_v35  ;;  %v12245_v0 = vmul.f32 %v25584_v35, %v25584_v35  ;;  %v25591_v22 = vadd.f32 %v11906_v16, %v29011_v1  ;;  %v29213_v35 = vld [vmem:[#allocation148_spill] sm:$0xff] }
 0xb2f   : > { %29012 = vst [vmem:[#allocation251_spill] sm:$0xff] %v25591_v22  ;;  %v12308_v23 = vadd.f32 %v12307_v45, %v12245_v0  ;;  %v12175_v29 = vadd.f32 %v12174_v6, %v25591_v22  ;;  %v12246_v21 = vmul.f32 %v25591_v22, %v25591_v22  ;;  %v29015_v6 = vld [vmem:[#allocation6_spill] sm:$0xff] }
 0xb30   : > { %v11621_v54 = vpop.f32.mrb[56].mxu1 }
 0xb31   : > { %v12309_v36 = vadd.f32 %v12308_v23, %v12246_v21  ;;  %v11911_v30 = vadd.f32 %v25074_v15, %v11621_v54  ;;  %v11623_v43 = vpop.f32.mrb[57].mxu1  ;;  %v25610_v15 = vld [vmem:[%s26524_s4] ss:$0 sm:$0xff] }
 0xb32   : > { %v11624_v50 = vpop.f32.mrb[58].mxu1  ;;  %29017 = vst [vmem:[#allocation275_spill] sm:$0xff] %v25610_v15  ;;  %v25614_v21 = vadd.f32 %v25089_v24, %v25610_v15  ;;  %v25625_v43 = vadd.f32 %v25097_v5, %v25610_v15  ;;  %v25633_v24 = vadd.f32 %v25105_v59, %v25610_v15  ;;  %v25650_v59 = vadd.f32 %v25610_v15, %v25115_v39  ;;  %v29031_v39 = vld [vmem:[#allocation138_spill] sm:$0xff] }
 0xb33   : > { %v25598_v49 = vadd.f32 %v11911_v30, %v29013_v9  ;;  %v11914_v26 = vadd.f32 %v25082_v44, %v11624_v50  ;;  %v11626_v51 = vpop.f32.mrb[59].mxu1  ;;  %v25618_v44 = vadd.f32 %v25610_v15, %v25091_v48  ;;  %v25637_v48 = vadd.f32 %v25610_v15, %v25107_v14  ;;  %v29025_v9 = vld [vmem:[#allocation8_spill] sm:$0xff] }
 0xb34   : > { %29018 = vst [vmem:[#allocation302_spill] sm:$0xff] %v25614_v21  ;;  %29020 = vst [vmem:[#allocation121_spill] sm:$0xff] %v25625_v43  ;;  %v25654_v14 = vadd.f32 %v25121_v33, %v25610_v15  ;;  %v25672_v33 = vadd.f32 %v25610_v15, %v25131_v13 }
 0xb35   : > { %29014 = vst [vmem:[#allocation224_spill] sm:$0xff] %v25598_v49  ;;  %v12176_v16 = vadd.f32 %v12175_v29, %v25598_v49  ;;  %v12247_v45 = vmul.f32 %v25598_v49, %v25598_v49  ;;  %v25605_v0 = vadd.f32 %v11914_v26, %v29015_v6  ;;  %29019 = vst [vmem:[#allocation225_spill] sm:$0xff] %v25618_v44  ;;  %v29205_v49 = vld [vmem:[#allocation269_spill] sm:$0xff] }
 0xb36   : > { %29022 = vst [vmem:[#allocation23_spill] sm:$0xff] %v25633_v24  ;;  %29023 = vst [vmem:[#allocation277_spill] sm:$0xff] %v25637_v48 }
 0xb37   : > { %29016 = vst [vmem:[#allocation21_spill] sm:$0xff] %v25605_v0  ;;  %v12310_v1 = vadd.f32 %v12309_v36, %v12247_v45  ;;  %v12248_v29 = vmul.f32 %v25605_v0, %v25605_v0  ;;  %v25629_v36 = vadd.f32 %v25610_v15, %v25099_v53  ;;  %v12177_v5 = vadd.f32 %v12176_v16, %v25605_v0 }
 0xb38   : > { %v11629_v23 = vpop.f32.mrb[60].mxu1  ;;  %29027 = vst [vmem:[#allocation227_spill] sm:$0xff] %v25650_v59  ;;  %29028 = vst [vmem:[#allocation145_spill] sm:$0xff] %v25654_v14  ;;  %v25662_v16 = vadd.f32 %v25129_v61, %v25610_v15  ;;  %v25680_v61 = vadd.f32 %v25610_v15, %v25148_v27  ;;  %v25699_v27 = vadd.f32 %v25610_v15, %v25172_v18  ;;  %v29046_v18 = vld [vmem:[#allocation53_spill] sm:$0xff] }
 0xb39   : > { %v11919_v54 = vadd.f32 %v25072_v52, %v11629_v23  ;;  %v11631_v30 = vpop.f32.mrb[61].mxu1  ;;  %29021 = vst [vmem:[#allocation20_spill] sm:$0xff] %v25629_v36  ;;  %v25641_v52 = vadd.f32 %v25113_v63, %v25610_v15  ;;  %v25658_v63 = vadd.f32 %v25610_v15, %v25123_v3  ;;  %v12311_v45 = vadd.f32 %v12310_v1, %v12248_v29 }
 0xb3a   : > { %v11632_v50 = vpop.f32.mrb[62].mxu1  ;;  %29030 = vst [vmem:[#allocation55_spill] sm:$0xff] %v25662_v16  ;;  %29033 = vst [vmem:[#allocation201_spill] sm:$0xff] %v25672_v33  ;;  %v25676_v3 = vadd.f32 %v25146_v4, %v25610_v15  ;;  %v25684_v1 = vadd.f32 %v25156_v8, %v25610_v15  ;;  %v25688_v29 = vadd.f32 %v25610_v15, %v25158_v57  ;;  %v29041_v57 = vld [vmem:[#allocation28_spill] sm:$0xff] }
 0xb3b   : > { %29024 = vst [vmem:[#allocation252_spill] sm:$0xff] %v25641_v52  ;;  %v25645_v26 = vadd.f32 %v11919_v54, %v29025_v9  ;;  %v11922_v53 = vadd.f32 %v25080_v32, %v11632_v50  ;;  %v11634_v51 = vpop.f32.mrb[63].mxu1  ;;  %29029 = vst [vmem:[#allocation274_spill] sm:$0xff] %v25658_v63  ;;  %v25695_v4 = vadd.f32 %v25170_v37, %v25610_v15  ;;  %v29218_v21 = vld [vmem:[#allocation121_spill] sm:$0xff] }
 0xb3c   : > { %29034 = vst [vmem:[#allocation146_spill] sm:$0xff] %v25676_v3  ;;  %29035 = vst [vmem:[#allocation253_spill] sm:$0xff] %v25680_v61  ;;  %v25703_v8 = vadd.f32 %v25181_v47, %v25610_v15  ;;  %v25707_v50 = vadd.f32 %v25610_v15, %v29041_v57  ;;  %v25715_v37 = vadd.f32 %v25610_v15, %v25197_v46  ;;  %v29048_v47 = vld [vmem:[#allocation128_spill] sm:$0xff]  ;;  %v29053_v46 = vld [vmem:[#allocation134_spill] sm:$0xff] }
 0xb3d   : > { %29026 = vst [vmem:[#allocation33_spill] sm:$0xff] %v25645_v26  ;;  %v12178_v32 = vadd.f32 %v12177_v5, %v25645_v26  ;;  %v12249_v6 = vmul.f32 %v25645_v26, %v25645_v26  ;;  %v25668_v23 = vadd.f32 %v11922_v53, %v29031_v39  ;;  %29036 = vst [vmem:[#allocation103_spill] sm:$0xff] %v25684_v1  ;;  %v29043_v5 = vld [vmem:[#allocation246_spill] sm:$0xff]  ;;  %v29051_v39 = vld [vmem:[#allocation91_spill] sm:$0xff] }
 0xb3e   : > { %29037 = vst [vmem:[#allocation304_spill] sm:$0xff] %v25688_v29  ;;  %29038 = vst [vmem:[#allocation63_spill] sm:$0xff] %v25695_v4  ;;  %v25711_v9 = vadd.f32 %v29043_v5, %v25610_v15  ;;  %v25731_v57 = vadd.f32 %v25610_v15, %v29051_v39  ;;  %v25735_v5 = vadd.f32 %v29053_v46, %v25610_v15  ;;  %v29061_v39 = vld [vmem:[#allocation105_spill] sm:$0xff]  ;;  %v29145_v4 = vld [vmem:[#allocation22_spill] sm:$0xff] }
 0xb3f   : > { %29032 = vst [vmem:[#allocation228_spill] sm:$0xff] %v25668_v23  ;;  %v12312_v54 = vadd.f32 %v12311_v45, %v12249_v6  ;;  %v12179_v13 = vadd.f32 %v12178_v32, %v25668_v23  ;;  %v12250_v30 = vmul.f32 %v25668_v23, %v25668_v23  ;;  %29039 = vst [vmem:[#allocation276_spill] sm:$0xff] %v25699_v27  ;;  %v29063_v46 = vld [vmem:[#allocation57_spill] sm:$0xff]  ;;  %v29147_v27 = vld [vmem:[#allocation135_spill] sm:$0xff] }
 0xb40   : > { %29040 = vst [vmem:[#allocation150_spill] sm:$0xff] %v25703_v8  ;;  %29042 = vst [vmem:[#allocation254_spill] sm:$0xff] %v25707_v50  ;;  %v25719_v45 = vadd.f32 %v29046_v18, %v25610_v15  ;;  %v25723_v32 = vadd.f32 %v25610_v15, %v29048_v47  ;;  %v25727_v6 = vadd.f32 %v25218_v19, %v25610_v15  ;;  %v29057_v47 = vld [vmem:[#allocation247_spill] sm:$0xff]  ;;  %v29059_v19 = vld [vmem:[#allocation56_spill] sm:$0xff] }
 0xb41   : > { %29044 = vst [vmem:[#allocation231_spill] sm:$0xff] %v25711_v9  ;;  %29045 = vst [vmem:[#allocation255_spill] sm:$0xff] %v25715_v37  ;;  %v12180_v53 = vrot.slane %v12179_v13, 4  ;;  %v12313_v51 = vadd.f32 %v12312_v54, %v12250_v30  ;;  %v29055_v54 = vld [vmem:[#allocation54_spill] sm:$0xff]  ;;  %v29140_v9 = vld [vmem:[#allocation295_spill] sm:$0xff] }
 0xb42   : > { %29047 = vst [vmem:[#allocation34_spill] sm:$0xff] %v25719_v45  ;;  %29049 = vst [vmem:[#allocation232_spill] sm:$0xff] %v25723_v32  ;;  %v25739_v30 = vadd.f32 %v25610_v15, %v29055_v54  ;;  %v25743_v45 = vadd.f32 %v29057_v47, %v25610_v15  ;;  %v29065_v54 = vld [vmem:[#allocation131_spill] sm:$0xff]  ;;  %v29141_v32 = vld [vmem:[#allocation233_spill] sm:$0xff] }
 0xb43   : > { %29050 = vst [vmem:[#allocation151_spill] sm:$0xff] %v25727_v6  ;;  %29052 = vst [vmem:[#allocation32_spill] sm:$0xff] %v25731_v57  ;;  %v12181_v18 = vadd.f32 %v12180_v53, %v12179_v13  ;;  %v12314_v0 = vrot.slane %v12313_v51, 4  ;;  %v25747_v6 = vadd.f32 %v25610_v15, %v29059_v19  ;;  %v25751_v57 = vadd.f32 %v29061_v39, %v25610_v15  ;;  %v29068_v19 = vld [vmem:[#allocation230_spill] sm:$0xff]  ;;  %v29070_v39 = vld [vmem:[#allocation296_spill] sm:$0xff] }
 0xb44   : > { %29054 = vst [vmem:[#allocation280_spill] sm:$0xff] %v25735_v5  ;;  %29056 = vst [vmem:[#allocation301_spill] sm:$0xff] %v25739_v30  ;;  %v25755_v5 = vadd.f32 %v25610_v15, %v29063_v46  ;;  %v25759_v13 = vadd.f32 %v29065_v54, %v25610_v15  ;;  %v25763_v53 = vadd.f32 %v25610_v15, %v25269_v2  ;;  %v29073_v54 = vld [vmem:[#allocation58_spill] sm:$0xff]  ;;  %v29075_v2 = vld [vmem:[#allocation293_spill] sm:$0xff] }
 0xb45   : > { %29058 = vst [vmem:[#allocation35_spill] sm:$0xff] %v25743_v45  ;;  %29060 = vst [vmem:[#allocation234_spill] sm:$0xff] %v25747_v6  ;;  %v12182_v47 = vrot.slane %v12181_v18, 2  ;;  %v12315_v45 = vadd.f32 %v12314_v0, %v12313_v51  ;;  %v25767_v6 = vadd.f32 %v29068_v19, %v25610_v15  ;;  %v25775_v46 = vadd.f32 %v25290_v12, %v25610_v15  ;;  %v29077_v0 = vld [vmem:[#allocation59_spill] sm:$0xff]  ;;  %v29081_v12 = vld [vmem:[#allocation60_spill] sm:$0xff] }
 0xb46   : > { %29062 = vst [vmem:[#allocation155_spill] sm:$0xff] %v25751_v57  ;;  %29064 = vst [vmem:[#allocation256_spill] sm:$0xff] %v25755_v5  ;;  %v25771_v57 = vadd.f32 %v25610_v15, %v29070_v39  ;;  %v25787_v51 = vadd.f32 %v25610_v15, %v29077_v0  ;;  %v29079_v39 = vld [vmem:[#allocation109_spill] sm:$0xff]  ;;  %v29138_v5 = vld [vmem:[#allocation19_spill] sm:$0xff] }
 0xb47   : > { %29066 = vst [vmem:[#allocation278_spill] sm:$0xff] %v25759_v13  ;;  %29067 = vst [vmem:[#allocation257_spill] sm:$0xff] %v25763_v53  ;;  %v25779_v13 = vadd.f32 %v25610_v15, %v29073_v54  ;;  %v25783_v53 = vadd.f32 %v29075_v2, %v25610_v15  ;;  %v12183_v19 = vadd.f32 %v12182_v47, %v12181_v18  ;;  %v29083_v54 = vld [vmem:[#allocation189_spill] sm:$0xff]  ;;  %v29085_v2 = vld [vmem:[#allocation10_spill] sm:$0xff] }
 0xb48   : > { %29069 = vst [vmem:[#allocation36_spill] sm:$0xff] %v25767_v6  ;;  %29071 = vst [vmem:[#allocation235_spill] sm:$0xff] %v25771_v57  ;;  %v12316_v6 = vrot.slane %v12315_v45, 2  ;;  %v25791_v57 = vadd.f32 %v29079_v39, %v25610_v15  ;;  %v25807_v18 = vadd.f32 %v25425_v28, %v25610_v15  ;;  %v25811_v47 = vadd.f32 %v25610_v15, %v25475_v41  ;;  %v29139_v30 = vld [vmem:[#allocation136_spill] sm:$0xff]  ;;  %v29142_v37 = vld [vmem:[#allocation93_spill] sm:$0xff] }
 0xb49   : > { %29072 = vst [vmem:[#allocation156_spill] sm:$0xff] %v25775_v46  ;;  %29074 = vst [vmem:[#allocation303_spill] sm:$0xff] %v25779_v13  ;;  %v25795_v46 = vadd.f32 %v25610_v15, %v29081_v12  ;;  %v25799_v13 = vadd.f32 %v29083_v54, %v25610_v15  ;;  %v12184_v0 = vrot.slane %v12183_v19, 1  ;;  %v25815_v39 = vadd.f32 %v25483_v25, %v25610_v15  ;;  %v29143_v8 = vld [vmem:[#allocation248_spill] sm:$0xff]  ;;  %v29146_v50 = vld [vmem:[#allocation190_spill] sm:$0xff] }
 0xb4a   : > { %29076 = vst [vmem:[#allocation279_spill] sm:$0xff] %v25783_v53  ;;  %29078 = vst [vmem:[#allocation306_spill] sm:$0xff] %v25787_v51  ;;  %v25803_v53 = vadd.f32 %v25610_v15, %v29085_v2  ;;  %v12317_v51 = vadd.f32 %v12316_v6, %v12315_v45  ;;  %v25819_v12 = vadd.f32 %v25610_v15, %v25485_v62  ;;  %v29148_v1 = vld [vmem:[#allocation141_spill] sm:$0xff]  ;;  %v29149_v3 = vld [vmem:[#allocation298_spill] sm:$0xff] }
 0xb4b   : > { %29080 = vst [vmem:[#allocation37_spill] sm:$0xff] %v25791_v57  ;;  %29082 = vst [vmem:[#allocation237_spill] sm:$0xff] %v25795_v46  ;;  %v25823_v54 = vadd.f32 %v25491_v7, %v25610_v15  ;;  %v25827_v28 = vadd.f32 %v25610_v15, %v25493_v17  ;;  %v12185_v45 = vadd.f32 %v12184_v0, %v12183_v19  ;;  %v29134_v57 = vld [vmem:[#allocation129_spill] sm:$0xff]  ;;  %v29136_v46 = vld [vmem:[#allocation226_spill] sm:$0xff] }
 0xb4c   : > { %29084 = vst [vmem:[#allocation157_spill] sm:$0xff] %v25799_v13  ;;  %29086 = vst [vmem:[#allocation258_spill] sm:$0xff] %v25803_v53  ;;  %v12318_v6 = vrot.slane %v12317_v51, 1  ;;  %v25831_v41 = vadd.f32 %v25500_v11, %v25610_v15  ;;  %v25835_v25 = vadd.f32 %v25610_v15, %v25502_v56  ;;  %v25839_v62 = vadd.f32 %v25509_v38, %v25610_v15  ;;  %v29101_v38 = vld [vmem:[#allocation160_spill] sm:$0xff]  ;;  %v29133_v13 = vld [vmem:[#allocation291_spill] sm:$0xff] }
 0xb4d   : > { %29087 = vst [vmem:[#allocation282_spill] sm:$0xff] %v25807_v18  ;;  %29088 = vst [vmem:[#allocation259_spill] sm:$0xff] %v25811_v47  ;;  %v25843_v7 = vadd.f32 %v25610_v15, %v25511_v34  ;;  %v25847_v17 = vadd.f32 %v25516_v40, %v25610_v15  ;;  %v25851_v11 = vadd.f32 %v25610_v15, %v25518_v55  ;;  %v25853_v19 = vmul.f32 0.001953125, %v12185_v45  ;;  %v29103_v34 = vld [vmem:[#allocation31_spill] sm:$0xff]  ;;  %v29105_v40 = vld [vmem:[#allocation249_spill] sm:$0xff] }
 0xb4e   : > { %29089 = vst [vmem:[#allocation38_spill] sm:$0xff] %v25815_v39  ;;  %29090 = vst [vmem:[#allocation238_spill] sm:$0xff] %v25819_v12  ;;  %v12319_v56 = vadd.f32 %v12318_v6, %v12317_v51  ;;  %v25857_v2 = vadd.f32 %v25522_v58, %v25610_v15  ;;  %v25861_v0 = vadd.f32 %v25610_v15, %v29101_v38  ;;  %v29107_v55 = vld [vmem:[#allocation4_spill] sm:$0xff]  ;;  %v29109_v51 = vld [vmem:[#allocation158_spill] sm:$0xff] }
 0xb4f   : > { %29091 = vst [vmem:[#allocation161_spill] sm:$0xff] %v25823_v54  ;;  %29092 = vst [vmem:[#allocation308_spill] sm:$0xff] %v25827_v28  ;;  %v25873_v45 = vadd.f32 %v29107_v55, %v25610_v15  ;;  %v25877_v58 = vadd.f32 %v25610_v15, %v29109_v51  ;;  %v12321_v38 = vmul.f32 %v25853_v19, %v25853_v19  ;;  %v29114_v55 = vld [vmem:[#allocation222_spill] sm:$0xff]  ;;  %v29122_v51 = vld [vmem:[#allocation243_spill] sm:$0xff] }
 0xb50   : > { %29093 = vst [vmem:[#allocation284_spill] sm:$0xff] %v25831_v41  ;;  %29094 = vst [vmem:[#allocation305_spill] sm:$0xff] %v25835_v25  ;;  %v12320_v6 = vmul.f32 0.001953125, %v12319_v56  ;;  %v29116_v56 = vld [vmem:[#allocation221_spill] sm:$0xff]  ;;  %v29124_v25 = vld [vmem:[#allocation292_spill] sm:$0xff]  ;;  %v29167_v16 = vsub.f32 %v29114_v55, %v25853_v19 }
 0xb51   : > { %29095 = vst [vmem:[#allocation39_spill] sm:$0xff] %v25839_v62  ;;  %29096 = vst [vmem:[#allocation96_spill] sm:$0xff] %v25843_v7  ;;  %v25865_v7 = vadd.f32 %v29103_v34, %v25610_v15  ;;  %v29117_v62 = vld [vmem:[#allocation49_spill] sm:$0xff]  ;;  %v29118_v34 = vld [vmem:[#allocation244_spill] sm:$0xff] }
 0xb52   : > { %29097 = vst [vmem:[#allocation163_spill] sm:$0xff] %v25847_v17  ;;  %29098 = vst [vmem:[#allocation281_spill] sm:$0xff] %v25851_v11  ;;  %v25869_v17 = vadd.f32 %v25610_v15, %v29105_v40  ;;  %v29113_v40 = vld [vmem:[#allocation130_spill] sm:$0xff]  ;;  %v12322_v15 = vsub.f32 %v12320_v6, %v12321_v38  ;;  %v29123_v6 = vld [vmem:[#allocation223_spill] sm:$0xff]  ;;  %v29171_v55 = vsub.f32 %v29118_v34, %v25853_v19 }
 0xb53   : > { %29099 = vst [vmem:[#allocation310_spill] sm:$0xff] %v25853_v19  ;;  %29100 = vst [vmem:[#allocation69_spill] sm:$0xff] %v25857_v2  ;;  %v29115_v11 = vld [vmem:[#allocation126_spill] sm:$0xff]  ;;  %v29119_v2 = vld [vmem:[#allocation99_spill] sm:$0xff]  ;;  %v29166_v24 = vsub.f32 %v29113_v40, %v25853_v19  ;;  %v29170_v40 = vsub.f32 %v29117_v62, %v25853_v19  ;;  %v29175_v34 = vsub.f32 %v29122_v51, %v25853_v19 }
 0xb54   : > { %29102 = vst [vmem:[#allocation240_spill] sm:$0xff] %v25861_v0  ;;  %29104 = vst [vmem:[#allocation164_spill] sm:$0xff] %v25865_v7  ;;  %v29111_v0 = vld [vmem:[#allocation48_spill] sm:$0xff]  ;;  %v29112_v7 = vld [vmem:[#allocation290_spill] sm:$0xff] }
 0xb55   : > { %29106 = vst [vmem:[#allocation307_spill] sm:$0xff] %v25869_v17  ;;  %29108 = vst [vmem:[#allocation110_spill] sm:$0xff] %v25873_v45  ;;  %v29120_v17 = vld [vmem:[#allocation50_spill] sm:$0xff]  ;;  %v29121_v45 = vld [vmem:[#allocation127_spill] sm:$0xff]  ;;  %v29164_v33 = vsub.f32 %v29111_v0, %v25853_v19  ;;  %v29165_v63 = vsub.f32 %v29112_v7, %v25853_v19  ;;  %v29168_v0 = vsub.f32 %v29115_v11, %v25853_v19 }
 0xb56   : > { %29110 = vst [vmem:[#allocation261_spill] sm:$0xff] %v25877_v58  ;;  %v12387_v58 = vadd.f32 1e-05, %v12322_v15  ;;  %v29125_v41 = vld [vmem:[#allocation101_spill] sm:$0xff]  ;;  %v29126_v28 = vld [vmem:[#allocation195_spill] sm:$0xff]  ;;  %v29130_v15 = vld [vmem:[#allocation52_spill] sm:$0xff]  ;;  %v29169_v7 = vsub.f32 %v29116_v56, %v25853_v19  ;;  %v29172_v11 = vsub.f32 %v29119_v2, %v25853_v19  ;;  %v29173_v56 = vsub.f32 %v29120_v17, %v25853_v19 }
 0xb57   : > { %v29127_v54 = vld [vmem:[#allocation51_spill] sm:$0xff]  ;;  %v29128_v12 = vld [vmem:[#allocation133_spill] sm:$0xff]  ;;  %v29131_v47 = vld [vmem:[#allocation102_spill] sm:$0xff]  ;;  %v29174_v62 = vsub.f32 %v29121_v45, %v25853_v19  ;;  %v29176_v2 = vsub.f32 %v29123_v6, %v25853_v19  ;;  %v29177_v17 = vsub.f32 %v29124_v25, %v25853_v19  ;;  %v29178_v45 = vsub.f32 %v29125_v41, %v25853_v19 }
 0xb58   : > { %v29129_v39 = vld [vmem:[#allocation245_spill] sm:$0xff]  ;;  %18817 = vrsqrt.f32 %v12387_v58  ;;  %v29135_v53 = vld [vmem:[#allocation132_spill] sm:$0xff]  ;;  %v29137_v58 = vld [vmem:[#allocation294_spill] sm:$0xff]  ;;  %v29179_v51 = vsub.f32 %v29126_v28, %v25853_v19  ;;  %v29180_v6 = vsub.f32 %v29127_v54, %v25853_v19  ;;  %v29181_v25 = vsub.f32 %v29128_v12, %v25853_v19 }
 0xb59   : > { %v29132_v18 = vld [vmem:[#allocation289_spill] sm:$0xff]  ;;  %v29144_v38 = vld [vmem:[#allocation139_spill] sm:$0xff]  ;;  %v29182_v41 = vsub.f32 %v29129_v39, %v25853_v19  ;;  %v29183_v28 = vsub.f32 %v29130_v15, %v25853_v19  ;;  %v29184_v54 = vsub.f32 %v29131_v47, %v25853_v19  ;;  %v29186_v39 = vsub.f32 %v29133_v13, %v25853_v19 }
 0xb5a   : > { %v29185_v12 = vsub.f32 %v29132_v18, %v25853_v19  ;;  %v29187_v15 = vsub.f32 %v29134_v57, %v25853_v19  ;;  %v29188_v47 = vsub.f32 %v29135_v53, %v25853_v19  ;;  %v29189_v18 = vsub.f32 %v29136_v46, %v25853_v19  ;;  %v29203_v23 = vld [vmem:[#allocation143_spill] sm:$0xff]  ;;  %v29215_v60 = vld [vmem:[#allocation225_spill] sm:$0xff] }
 0xb5b   : > { %v29190_v13 = vsub.f32 %v29137_v58, %v25853_v19  ;;  %v29191_v57 = vsub.f32 %v29138_v5, %v25853_v19  ;;  %v29192_v53 = vsub.f32 %v29139_v30, %v25853_v19  ;;  %v29193_v46 = vsub.f32 %v29140_v9, %v25853_v19  ;;  %v29207_v26 = vld [vmem:[#allocation239_spill] sm:$0xff]  ;;  %v29219_v43 = vld [vmem:[#allocation277_spill] sm:$0xff] }
 0xb5c   : > { %v29194_v58 = vsub.f32 %v29141_v32, %v25853_v19  ;;  %v29195_v5 = vsub.f32 %v29142_v37, %v25853_v19  ;;  %v29196_v30 = vsub.f32 %v29143_v8, %v25853_v19  ;;  %v29197_v9 = vsub.f32 %v29144_v38, %v25853_v19  ;;  %v29220_v48 = vld [vmem:[#allocation227_spill] sm:$0xff] }
 0xb5d   : > { %v29198_v32 = vsub.f32 %v29145_v4, %v25853_v19  ;;  %v29199_v37 = vsub.f32 %v29146_v50, %v25853_v19  ;;  %v29200_v8 = vsub.f32 %v29147_v27, %v25853_v19  ;;  %v29201_v38 = vsub.f32 %v29148_v1, %v25853_v19 }
 0xb5e   : > { %v29202_v4 = vsub.f32 %v29149_v3, %v25853_v19  ;;  %v29204_v50 = vsub.f32 %v29203_v23, %v25853_v19  ;;  %v29206_v27 = vsub.f32 %v29205_v49, %v25853_v19  ;;  %v29208_v1 = vsub.f32 %v29207_v26, %v25853_v19  ;;  %v29216_v26 = vld [vmem:[#allocation20_spill] sm:$0xff] }
 0xb5f   : > { %v29210_v3 = vsub.f32 %v29209_v42, %v25853_v19  ;;  %v29212_v23 = vsub.f32 %v29211_v20, %v25853_v19  ;;  %v29214_v49 = vsub.f32 %v29213_v35, %v25853_v19  ;;  %v29221_v20 = vld [vmem:[#allocation23_spill] sm:$0xff]  ;;  %v29223_v35 = vld [vmem:[#allocation274_spill] sm:$0xff] }
 0xb62   : > { %v25999_v36 = vpop.eup %18817 }
 0xb63   : > { %v12389_v44 = vmul.f32 %v25999_v36, %v29164_v33  ;;  %v12390_v22 = vmul.f32 %v25999_v36, %v29165_v63  ;;  %v12391_v61 = vmul.f32 %v25999_v36, %v29166_v24  ;;  %v12392_v14 = vmul.f32 %v25999_v36, %v29167_v16 }
 0xb64   : > { %v12393_v33 = vmul.f32 %v25999_v36, %v29168_v0  ;;  %v12394_v63 = vmul.f32 %v25999_v36, %v29169_v7  ;;  %v12395_v24 = vmul.f32 %v25999_v36, %v29170_v40  ;;  %v12396_v16 = vmul.f32 %v25999_v36, %v29171_v55 }
 0xb65   : > { %v12397_v0 = vmul.f32 %v25999_v36, %v29172_v11  ;;  %v12398_v7 = vmul.f32 %v25999_v36, %v29173_v56  ;;  %v12399_v40 = vmul.f32 %v25999_v36, %v29174_v62  ;;  %v12400_v55 = vmul.f32 %v25999_v36, %v29175_v34 }
 0xb66   : > { %v12401_v11 = vmul.f32 %v25999_v36, %v29176_v2  ;;  %v12402_v56 = vmul.f32 %v25999_v36, %v29177_v17  ;;  %v12403_v62 = vmul.f32 %v25999_v36, %v29178_v45  ;;  %v12404_v34 = vmul.f32 %v25999_v36, %v29179_v51 }
 0xb67   : > { %v12405_v2 = vmul.f32 %v25999_v36, %v29180_v6  ;;  %v12406_v17 = vmul.f32 %v25999_v36, %v29181_v25  ;;  %v12407_v45 = vmul.f32 %v25999_v36, %v29182_v41  ;;  %v12408_v51 = vmul.f32 %v25999_v36, %v29183_v28 }
 0xb68   : > { %v12409_v6 = vmul.f32 %v25999_v36, %v29184_v54  ;;  %v12410_v25 = vmul.f32 %v25999_v36, %v29185_v12  ;;  %v12411_v41 = vmul.f32 %v25999_v36, %v29186_v39  ;;  %v12412_v28 = vmul.f32 %v25999_v36, %v29187_v15 }
 0xb69   : > { %v12413_v54 = vmul.f32 %v25999_v36, %v29188_v47  ;;  %v12414_v12 = vmul.f32 %v25999_v36, %v29189_v18  ;;  %v12415_v39 = vmul.f32 %v25999_v36, %v29190_v13  ;;  %v12416_v15 = vmul.f32 %v25999_v36, %v29191_v57 }
 0xb6a   : > { %v12417_v47 = vmul.f32 %v25999_v36, %v29192_v53  ;;  %v12418_v18 = vmul.f32 %v25999_v36, %v29193_v46  ;;  %v12419_v13 = vmul.f32 %v25999_v36, %v29194_v58  ;;  %v12420_v57 = vmul.f32 %v25999_v36, %v29195_v5 }
 0xb6b   : > { %v12421_v53 = vmul.f32 %v25999_v36, %v29196_v30  ;;  %v12422_v46 = vmul.f32 %v25999_v36, %v29197_v9  ;;  %v12423_v58 = vmul.f32 %v25999_v36, %v29198_v32  ;;  %v12424_v5 = vmul.f32 %v25999_v36, %v29199_v37 }
 0xb6c   : > { %v12425_v30 = vmul.f32 %v25999_v36, %v29200_v8  ;;  %v12426_v9 = vmul.f32 %v25999_v36, %v29201_v38  ;;  %v12427_v32 = vmul.f32 %v25999_v36, %v29202_v4  ;;  %v12428_v37 = vmul.f32 %v25999_v36, %v29204_v50 }
 0xb6d   : > { %v12429_v8 = vmul.f32 %v25999_v36, %v29206_v27  ;;  %v12430_v38 = vmul.f32 %v25999_v36, %v29208_v1  ;;  %v12431_v4 = vmul.f32 %v25999_v36, %v29210_v3  ;;  %v12432_v50 = vmul.f32 %v25999_v36, %v29212_v23  ;;  %v29217_v1 = vld [vmem:[#allocation302_spill] sm:$0xff]  ;;  %v29222_v23 = vld [vmem:[#allocation252_spill] sm:$0xff] }
 0xb6e   : > { %v12435_v27 = vmul.f32 %v25999_v36, %v29214_v49  ;;  %v13069_v31 = vadd.f32 %v29215_v60, %v12389_v44  ;;  %v13070_v29 = vadd.f32 %v29216_v26, %v12390_v22  ;;  %v13071_v10 = vadd.f32 %v29217_v1, %v12391_v61  ;;  %v29224_v60 = vld [vmem:[#allocation201_spill] sm:$0xff] }
 0xb6f   : > { %v13072_v42 = vadd.f32 %v29218_v21, %v12392_v14  ;;  %v13073_v3 = vadd.f32 %v29219_v43, %v12393_v33  ;;  %v13074_v59 = vadd.f32 %v29220_v48, %v12394_v63  ;;  %v26196_v52 = vadd.f32 %v29221_v20, %v12395_v24  ;;  %v29225_v22 = vld [vmem:[#allocation145_spill] sm:$0xff]  ;;  %v29226_v21 = vld [vmem:[#allocation55_spill] sm:$0xff]  ;;  %v29228_v33 = vld [vmem:[#allocation304_spill] sm:$0xff] }
 0xb70   : > { %v26199_v19 = vadd.f32 %v29222_v23, %v12396_v16  ;;  %v26202_v49 = vadd.f32 %v29223_v35, %v12397_v0  ;;  %v26205_v44 = vadd.f32 %v29224_v60, %v12398_v7  ;;  %v26208_v61 = vadd.f32 %v29225_v22, %v12399_v40  ;;  %v29227_v43 = vld [vmem:[#allocation253_spill] sm:$0xff]  ;;  %v29229_v24 = vld [vmem:[#allocation146_spill] sm:$0xff]  ;;  %v29230_v0 = vld [vmem:[#allocation103_spill] sm:$0xff] }
 0xb71   : > { %v26211_v14 = vadd.f32 %v29226_v21, %v12400_v55  ;;  %v26214_v48 = vadd.f32 %v29227_v43, %v12401_v11  ;;  %v26217_v63 = vadd.f32 %v29228_v33, %v12402_v56  ;;  %v26220_v16 = vadd.f32 %v29229_v24, %v12403_v62  ;;  %v29231_v7 = vld [vmem:[#allocation276_spill] sm:$0xff]  ;;  %v29232_v40 = vld [vmem:[#allocation254_spill] sm:$0xff]  ;;  %v29233_v55 = vld [vmem:[#allocation63_spill] sm:$0xff] }
 0xb72   : > { %v26223_v26 = vadd.f32 %v29230_v0, %v12404_v34  ;;  %v26226_v1 = vadd.f32 %v29231_v7, %v12405_v2  ;;  %v26229_v20 = vadd.f32 %v29232_v40, %v12406_v17  ;;  %v26232_v23 = vadd.f32 %v29233_v55, %v12407_v45  ;;  %v29234_v11 = vld [vmem:[#allocation150_spill] sm:$0xff]  ;;  %v29235_v56 = vld [vmem:[#allocation255_spill] sm:$0xff]  ;;  %v29236_v62 = vld [vmem:[#allocation232_spill] sm:$0xff] }
 0xb73   : > { %v26235_v35 = vadd.f32 %v29234_v11, %v12408_v51  ;;  %v26238_v60 = vadd.f32 %v29235_v56, %v12409_v6  ;;  %v26241_v22 = vadd.f32 %v29236_v62, %v12410_v25  ;;  %v29237_v34 = vld [vmem:[#allocation231_spill] sm:$0xff]  ;;  %v29238_v2 = vld [vmem:[#allocation34_spill] sm:$0xff]  ;;  %v29239_v17 = vld [vmem:[#allocation32_spill] sm:$0xff] }
 0xb74   : > { %v26244_v21 = vadd.f32 %v29237_v34, %v12411_v41  ;;  %v26247_v43 = vadd.f32 %v29238_v2, %v12412_v28  ;;  %v26250_v33 = vadd.f32 %v29239_v17, %v12413_v54  ;;  %v29240_v45 = vld [vmem:[#allocation301_spill] sm:$0xff]  ;;  %v29241_v51 = vld [vmem:[#allocation151_spill] sm:$0xff]  ;;  %v29242_v6 = vld [vmem:[#allocation280_spill] sm:$0xff] }
 0xb75   : > { %v26253_v24 = vadd.f32 %v29240_v45, %v12414_v12  ;;  %v26256_v0 = vadd.f32 %v29241_v51, %v12415_v39  ;;  %v26260_v7 = vadd.f32 %v29242_v6, %v12416_v15  ;;  %v29243_v25 = vld [vmem:[#allocation234_spill] sm:$0xff]  ;;  %v29244_v41 = vld [vmem:[#allocation256_spill] sm:$0xff]  ;;  %v29245_v28 = vld [vmem:[#allocation35_spill] sm:$0xff] }
 0xb76   : > { %v26263_v40 = vadd.f32 %v29243_v25, %v12417_v47  ;;  %v26266_v55 = vadd.f32 %v29244_v41, %v12418_v18  ;;  %v26269_v11 = vadd.f32 %v29245_v28, %v12419_v13  ;;  %v29246_v54 = vld [vmem:[#allocation155_spill] sm:$0xff]  ;;  %v29247_v12 = vld [vmem:[#allocation257_spill] sm:$0xff]  ;;  %v29249_v15 = vld [vmem:[#allocation278_spill] sm:$0xff] }
 0xb77   : > { %v26272_v56 = vadd.f32 %v29246_v54, %v12420_v57  ;;  %v26275_v62 = vadd.f32 %v29247_v12, %v12421_v53  ;;  %v29248_v39 = vld [vmem:[#allocation235_spill] sm:$0xff]  ;;  %v26281_v2 = vadd.f32 %v29249_v15, %v12423_v58  ;;  %v29250_v47 = vld [vmem:[#allocation36_spill] sm:$0xff]  ;;  %v29252_v13 = vld [vmem:[#allocation306_spill] sm:$0xff]  ;;  %v13135_v15 = vmax.f32 %v13071_v10, 0.0 }
 0xb78   : > { %v26278_v34 = vadd.f32 %v29248_v39, %v12422_v46  ;;  %v26284_v17 = vadd.f32 %v29250_v47, %v12424_v5  ;;  %v29251_v18 = vld [vmem:[#allocation303_spill] sm:$0xff]  ;;  %v26290_v51 = vadd.f32 %v29252_v13, %v12426_v9  ;;  %v29253_v57 = vld [vmem:[#allocation156_spill] sm:$0xff]  ;;  %v29255_v58 = vld [vmem:[#allocation237_spill] sm:$0xff]  ;;  %v13133_v39 = vmax.f32 %v13069_v31, 0.0 }
 0xb79   : > { %v26287_v45 = vadd.f32 %v29251_v18, %v12425_v30  ;;  %v26293_v6 = vadd.f32 %v29253_v57, %v12427_v32  ;;  %v29254_v53 = vld [vmem:[#allocation279_spill] sm:$0xff]  ;;  %v26304_v5 = vadd.f32 %v29255_v58, %v12429_v8  ;;  %v29256_v30 = vld [vmem:[#allocation258_spill] sm:$0xff]  ;;  %v29257_v9 = vld [vmem:[#allocation37_spill] sm:$0xff]  ;;  %v13136_v8 = vmax.f32 %v13072_v42, 0.0  ;;  %13199 = vst [vmem:[%s26298_s26 + $0x10] sm:$0xff] %v13135_v15 }
 0xb7a   : > { %v26301_v46 = vadd.f32 %v29254_v53, %v12428_v37  ;;  %v26307_v25 = vadd.f32 %v29256_v30, %v12430_v38  ;;  %v26310_v41 = vadd.f32 %v29257_v9, %v12431_v4  ;;  %v29258_v32 = vld [vmem:[#allocation157_spill] sm:$0xff]  ;;  %v29259_v54 = vld [vmem:[#allocation282_spill] sm:$0xff]  ;;  %v13134_v37 = vmax.f32 %v13070_v29, 0.0  ;;  %13197 = vst [vmem:[%s26298_s26] sm:$0xff] %v13133_v39 }
 0xb7b   : > { %v26313_v28 = vadd.f32 %v29258_v32, %v12432_v50  ;;  %v26316_v12 = vadd.f32 %v29259_v54, %v12435_v27  ;;  %v13137_v47 = vmax.f32 %v13073_v3, 0.0  ;;  %v13138_v38 = vmax.f32 %v13074_v59, 0.0  ;;  %13200 = vst [vmem:[%s26298_s26 + $0x18] sm:$0xff] %v13136_v8  ;;  %v29263_v57 = vld [vmem:[#allocation270_spill] sm:$0xff]  ;;  %v29267_v30 = vld [vmem:[#allocation149_spill] sm:$0xff]  ;;  %v29271_v54 = vld [vmem:[#allocation259_spill] sm:$0xff] }
 0xb7c   : > { %v13139_v18 = vmax.f32 %v26196_v52, 0.0  ;;  %v13140_v4 = vmax.f32 %v26199_v19, 0.0  ;;  %v13141_v50 = vmax.f32 %v26202_v49, 0.0  ;;  %v13142_v27 = vmax.f32 %v26205_v44, 0.0  ;;  %13198 = vst [vmem:[%s26298_s26 + $0x8] sm:$0xff] %v13134_v37  ;;  %v29272_v39 = vld [vmem:[#allocation137_spill] sm:$0xff] }
 0xb7d   : > { %v13143_v10 = vmax.f32 %v26208_v61, 0.0  ;;  %v13144_v31 = vmax.f32 %v26211_v14, 0.0  ;;  %v13145_v59 = vmax.f32 %v26214_v48, 0.0  ;;  %v13146_v52 = vmax.f32 %v26217_v63, 0.0  ;;  %13201 = vst [vmem:[%s26298_s26 + $0x20] sm:$0xff] %v13137_v47  ;;  %13202 = vst [vmem:[%s26298_s26 + $0x28] sm:$0xff] %v13138_v38 }
 0xb7e   : > { %v13147_v29 = vmax.f32 %v26220_v16, 0.0  ;;  %v13148_v19 = vmax.f32 %v26223_v26, 0.0  ;;  %v13149_v42 = vmax.f32 %v26226_v1, 0.0  ;;  %v13150_v3 = vmax.f32 %v26229_v20, 0.0  ;;  %13203 = vst [vmem:[%s26298_s26 + $0x30] sm:$0xff] %v13139_v18  ;;  %13204 = vst [vmem:[%s26298_s26 + $0x38] sm:$0xff] %v13140_v4 }
 0xb7f   : > { %13205 = vst [vmem:[%s26298_s26 + $0x40] sm:$0xff] %v13141_v50  ;;  %13206 = vst [vmem:[%s26298_s26 + $0x48] sm:$0xff] %v13142_v27  ;;  %v13151_v49 = vmax.f32 %v26232_v23, 0.0  ;;  %v13152_v44 = vmax.f32 %v26235_v35, 0.0  ;;  %v13153_v61 = vmax.f32 %v26238_v60, 0.0  ;;  %v13154_v14 = vmax.f32 %v26241_v22, 0.0 }
 0xb80   : > { %13207 = vst [vmem:[%s26298_s26 + $0x50] sm:$0xff] %v13143_v10  ;;  %13208 = vst [vmem:[%s26298_s26 + $0x58] sm:$0xff] %v13144_v31  ;;  %v13155_v48 = vmax.f32 %v26244_v21, 0.0  ;;  %v13156_v63 = vmax.f32 %v26247_v43, 0.0  ;;  %v13157_v16 = vmax.f32 %v26250_v33, 0.0  ;;  %v13158_v26 = vmax.f32 %v26253_v24, 0.0 }
 0xb81   : > { %13209 = vst [vmem:[%s26298_s26 + $0x60] sm:$0xff] %v13145_v59  ;;  %13210 = vst [vmem:[%s26298_s26 + $0x68] sm:$0xff] %v13146_v52  ;;  %v13159_v1 = vmax.f32 %v26256_v0, 0.0  ;;  %v13160_v20 = vmax.f32 %v26260_v7, 0.0  ;;  %v13161_v23 = vmax.f32 %v26263_v40, 0.0  ;;  %v13162_v35 = vmax.f32 %v26266_v55, 0.0 }
 0xb82   : > { %13211 = vst [vmem:[%s26298_s26 + $0x70] sm:$0xff] %v13147_v29  ;;  %13212 = vst [vmem:[%s26298_s26 + $0x78] sm:$0xff] %v13148_v19  ;;  %v13163_v60 = vmax.f32 %v26269_v11, 0.0  ;;  %v13164_v22 = vmax.f32 %v26272_v56, 0.0  ;;  %v13165_v21 = vmax.f32 %v26275_v62, 0.0  ;;  %v13166_v43 = vmax.f32 %v26278_v34, 0.0 }
 0xb83   : > { %13213 = vst [vmem:[%s26298_s26 + $0x80] sm:$0xff] %v13149_v42  ;;  %13214 = vst [vmem:[%s26298_s26 + $0x88] sm:$0xff] %v13150_v3  ;;  %v13167_v33 = vmax.f32 %v26281_v2, 0.0  ;;  %v13168_v24 = vmax.f32 %v26284_v17, 0.0  ;;  %v13169_v0 = vmax.f32 %v26287_v45, 0.0  ;;  %v13170_v7 = vmax.f32 %v26290_v51, 0.0 }
 0xb84   : > { %13215 = vst [vmem:[%s26298_s26 + $0x90] sm:$0xff] %v13151_v49  ;;  %13216 = vst [vmem:[%s26298_s26 + $0x98] sm:$0xff] %v13152_v44  ;;  %v13171_v40 = vmax.f32 %v26293_v6, 0.0  ;;  %v13172_v55 = vmax.f32 %v26301_v46, 0.0  ;;  %v13173_v11 = vmax.f32 %v26304_v5, 0.0  ;;  %v13174_v56 = vmax.f32 %v26307_v25, 0.0 }
 0xb85   : > { %13217 = vst [vmem:[%s26298_s26 + $0xa0] sm:$0xff] %v13153_v61  ;;  %13218 = vst [vmem:[%s26298_s26 + $0xa8] sm:$0xff] %v13154_v14  ;;  %v13175_v62 = vmax.f32 %v26310_v41, 0.0  ;;  %v13176_v34 = vmax.f32 %v26313_v28, 0.0  ;;  %v13179_v2 = vmax.f32 %v26316_v12, 0.0  ;;  %v29260_v17 = vld [vmem:[#allocation27_spill] sm:$0xff] }
 0xb86   : > { %13219 = vst [vmem:[%s26298_s26 + $0xb0] sm:$0xff] %v13155_v48  ;;  %13220 = vst [vmem:[%s26298_s26 + $0xb8] sm:$0xff] %v13156_v63  ;;  %v29261_v45 = vld [vmem:[#allocation310_spill] sm:$0xff]  ;;  %v29269_v41 = vld [vmem:[#allocation200_spill] sm:$0xff] }
 0xb87   : > { %13221 = vst [vmem:[%s26298_s26 + $0xc0] sm:$0xff] %v13157_v16  ;;  %13222 = vst [vmem:[%s26298_s26 + $0xc8] sm:$0xff] %v13158_v26  ;;  %v29262_v13 = vsub.f32 %v29260_v17, %v29261_v45  ;;  %v29264_v6 = vsub.f32 %v29263_v57, %v29261_v45  ;;  %v29265_v46 = vld [vmem:[#allocation14_spill] sm:$0xff]  ;;  %v29268_v25 = vsub.f32 %v29267_v30, %v29261_v45  ;;  %v29274_v8 = vld [vmem:[#allocation300_spill] sm:$0xff] }
 0xb88   : > { %13223 = vst [vmem:[%s26298_s26 + $0xd0] sm:$0xff] %v13159_v1  ;;  %13224 = vst [vmem:[%s26298_s26 + $0xd8] sm:$0xff] %v13160_v20  ;;  %v29266_v58 = vsub.f32 %v29265_v46, %v29261_v45  ;;  %v29270_v32 = vsub.f32 %v29269_v41, %v29261_v45  ;;  %v29273_v37 = vsub.f32 %v29272_v39, %v29261_v45  ;;  %v29276_v18 = vld [vmem:[#allocation299_spill] sm:$0xff]  ;;  %v29278_v27 = vld [vmem:[#allocation38_spill] sm:$0xff] }
 0xb89   : > { %13225 = vst [vmem:[%s26298_s26 + $0xe0] sm:$0xff] %v13161_v23  ;;  %13226 = vst [vmem:[%s26298_s26 + $0xe8] sm:$0xff] %v13162_v35  ;;  %v12433_v51 = vmul.f32 %v25999_v36, %v29262_v13  ;;  %v12436_v53 = vmul.f32 %v25999_v36, %v29264_v6  ;;  %v12439_v9 = vmul.f32 %v25999_v36, %v29268_v25  ;;  %v29279_v31 = vld [vmem:[#allocation238_spill] sm:$0xff]  ;;  %v29280_v52 = vld [vmem:[#allocation161_spill] sm:$0xff] }
 0xb8a   : > { %13227 = vst [vmem:[%s26298_s26 + $0xf0] sm:$0xff] %v13163_v60  ;;  %13228 = vst [vmem:[%s26298_s26 + $0xf8] sm:$0xff] %v13164_v22  ;;  %v12434_v5 = vmul.f32 %v25999_v36, %v29266_v58  ;;  %v12437_v28 = vmul.f32 %v25999_v36, %v29270_v32  ;;  %v12440_v15 = vmul.f32 %v25999_v36, %v29273_v37  ;;  %v29281_v19 = vld [vmem:[#allocation308_spill] sm:$0xff]  ;;  %v29283_v61 = vld [vmem:[#allocation305_spill] sm:$0xff] }
 0xb8b   : > { %13229 = vst [vmem:[%s26298_s26 + $0x100] sm:$0xff] %v13165_v21  ;;  %13230 = vst [vmem:[%s26298_s26 + $0x108] sm:$0xff] %v13166_v43  ;;  %v13113_v12 = vadd.f32 %v29271_v54, %v12433_v51  ;;  %v29275_v47 = vsub.f32 %v29274_v8, %v29261_v45  ;;  %v29277_v4 = vsub.f32 %v29276_v18, %v29261_v45  ;;  %v29282_v49 = vld [vmem:[#allocation284_spill] sm:$0xff]  ;;  %v29284_v48 = vld [vmem:[#allocation39_spill] sm:$0xff] }
 0xb8c   : > { %13231 = vst [vmem:[%s26298_s26 + $0x110] sm:$0xff] %v13167_v33  ;;  %13232 = vst [vmem:[%s26298_s26 + $0x118] sm:$0xff] %v13168_v24  ;;  %v13116_v10 = vadd.f32 %v29278_v27, %v12436_v53  ;;  %v13114_v59 = vadd.f32 %v29279_v31, %v12434_v5  ;;  %v13119_v29 = vadd.f32 %v29280_v52, %v12439_v9  ;;  %v29285_v22 = vld [vmem:[#allocation153_spill] sm:$0xff]  ;;  %v29295_v13 = vld [vmem:[#allocation96_spill] sm:$0xff] }
 0xb8d   : > { %13233 = vst [vmem:[%s26298_s26 + $0x120] sm:$0xff] %v13169_v0  ;;  %13234 = vst [vmem:[%s26298_s26 + $0x128] sm:$0xff] %v13170_v7  ;;  %v12438_v38 = vmul.f32 %v25999_v36, %v29275_v47  ;;  %v12443_v50 = vmul.f32 %v25999_v36, %v29277_v4  ;;  %v13117_v42 = vadd.f32 %v29281_v19, %v12437_v28  ;;  %v13177_v3 = vmax.f32 %v13113_v12, 0.0  ;;  %v29287_v33 = vld [vmem:[#allocation165_spill] sm:$0xff]  ;;  %v29296_v57 = vld [vmem:[#allocation251_spill] sm:$0xff] }
 0xb8e   : > { %13235 = vst [vmem:[%s26298_s26 + $0x130] sm:$0xff] %v13171_v40  ;;  %13236 = vst [vmem:[%s26298_s26 + $0x138] sm:$0xff] %v13172_v55  ;;  %v13120_v44 = vadd.f32 %v29282_v49, %v12440_v15  ;;  %v13180_v16 = vmax.f32 %v13116_v10, 0.0  ;;  %v13178_v26 = vmax.f32 %v13114_v59, 0.0  ;;  %v13183_v1 = vmax.f32 %v13119_v29, 0.0  ;;  %v29289_v7 = vld [vmem:[#allocation273_spill] sm:$0xff] }
 0xb8f   : > { %13237 = vst [vmem:[%s26298_s26 + $0x140] sm:$0xff] %v13173_v11  ;;  %13238 = vst [vmem:[%s26298_s26 + $0x148] sm:$0xff] %v13174_v56  ;;  %v13118_v14 = vadd.f32 %v29283_v61, %v12438_v38  ;;  %v13123_v63 = vadd.f32 %v29284_v48, %v12443_v50  ;;  %v13181_v20 = vmax.f32 %v13117_v42, 0.0  ;;  %v29286_v21 = vsub.f32 %v29285_v22, %v29261_v45  ;;  %v29291_v11 = vld [vmem:[#allocation272_spill] sm:$0xff]  ;;  %v29298_v46 = vld [vmem:[#allocation250_spill] sm:$0xff] }
 0xb90   : > { %13239 = vst [vmem:[%s26298_s26 + $0x150] sm:$0xff] %v13175_v62  ;;  %13240 = vst [vmem:[%s26298_s26 + $0x158] sm:$0xff] %v13176_v34  ;;  %v13184_v23 = vmax.f32 %v13120_v44, 0.0  ;;  %v29288_v24 = vsub.f32 %v29287_v33, %v29261_v45  ;;  %v29290_v40 = vsub.f32 %v29289_v7, %v29261_v45  ;;  %v29292_v56 = vsub.f32 %v29291_v11, %v29261_v45  ;;  %v29293_v34 = vld [vmem:[#allocation112_spill] sm:$0xff]  ;;  %v29300_v30 = vld [vmem:[#allocation33_spill] sm:$0xff] }
 0xb91   : > { %13243 = vst [vmem:[%s26298_s26 + $0x170] sm:$0xff] %v13179_v2  ;;  %13241 = vst [vmem:[%s26298_s26 + $0x160] sm:$0xff] %v13177_v3  ;;  %v13182_v35 = vmax.f32 %v13118_v14, 0.0  ;;  %v13187_v60 = vmax.f32 %v13123_v63, 0.0  ;;  %v12441_v43 = vmul.f32 %v25999_v36, %v29286_v21  ;;  %v29294_v2 = vsub.f32 %v29293_v34, %v29261_v45  ;;  %v29302_v41 = vld [vmem:[#allocation163_spill] sm:$0xff]  ;;  %v29303_v28 = vld [vmem:[#allocation281_spill] sm:$0xff] }
 0xb92   : > { %13244 = vst [vmem:[%s26298_s26 + $0x178] sm:$0xff] %v13180_v16  ;;  %13242 = vst [vmem:[%s26298_s26 + $0x168] sm:$0xff] %v13178_v26  ;;  %v12444_v0 = vmul.f32 %v25999_v36, %v29288_v24  ;;  %v12442_v55 = vmul.f32 %v25999_v36, %v29290_v40  ;;  %v12447_v62 = vmul.f32 %v25999_v36, %v29292_v56  ;;  %v29304_v12 = vld [vmem:[#allocation69_spill] sm:$0xff]  ;;  %v29305_v37 = vld [vmem:[#allocation240_spill] sm:$0xff] }
 0xb93   : > { %13247 = vst [vmem:[%s26298_s26 + $0x190] sm:$0xff] %v13183_v1  ;;  %13245 = vst [vmem:[%s26298_s26 + $0x180] sm:$0xff] %v13181_v20  ;;  %v12445_v17 = vmul.f32 %v25999_v36, %v29294_v2  ;;  %v13121_v51 = vadd.f32 %v29295_v13, %v12441_v43  ;;  %v29297_v6 = vsub.f32 %v29296_v57, %v29261_v45  ;;  %v29306_v47 = vld [vmem:[#allocation164_spill] sm:$0xff]  ;;  %v29307_v18 = vld [vmem:[#allocation307_spill] sm:$0xff] }
 0xb94   : > { %13248 = vst [vmem:[%s26298_s26 + $0x198] sm:$0xff] %v13184_v23  ;;  %13246 = vst [vmem:[%s26298_s26 + $0x188] sm:$0xff] %v13182_v35  ;;  %v29299_v58 = vsub.f32 %v29298_v46, %v29261_v45  ;;  %v29301_v25 = vsub.f32 %v29300_v30, %v29261_v45  ;;  %v13124_v32 = vadd.f32 %v29302_v41, %v12444_v0  ;;  %v29308_v50 = vld [vmem:[#allocation110_spill] sm:$0xff]  ;;  %v29309_v3 = vld [vmem:[#allocation224_spill] sm:$0xff] }
 0xb95   : > { %13251 = vst [vmem:[%s26298_s26 + $0x1b0] sm:$0xff] %v13187_v60  ;;  %v12448_v53 = vmul.f32 %v25999_v36, %v29297_v6  ;;  %v13122_v54 = vadd.f32 %v29303_v28, %v12442_v55  ;;  %v13127_v39 = vadd.f32 %v29304_v12, %v12447_v62  ;;  %v13125_v15 = vadd.f32 %v29305_v37, %v12445_v17  ;;  %v29311_v61 = vld [vmem:[#allocation228_spill] sm:$0xff]  ;;  %v29313_v63 = vld [vmem:[#allocation275_spill] sm:$0xff]  ;;  %v29314_v16 = vld [vmem:[#allocation297_spill] sm:$0xff] }
 0xb96   : > { %v12446_v5 = vmul.f32 %v25999_v36, %v29299_v58  ;;  %v12451_v9 = vmul.f32 %v25999_v36, %v29301_v25  ;;  %v13185_v8 = vmax.f32 %v13121_v51, 0.0  ;;  %v13188_v10 = vmax.f32 %v13124_v32, 0.0  ;;  %v29315_v1 = vld [vmem:[#allocation21_spill] sm:$0xff]  ;;  %v29317_v21 = vld [vmem:[#allocation271_spill] sm:$0xff] }
 0xb97   : > { %v13128_v38 = vadd.f32 %v29306_v47, %v12448_v53  ;;  %v13186_v31 = vmax.f32 %v13122_v54, 0.0  ;;  %v13191_v59 = vmax.f32 %v13127_v39, 0.0  ;;  %v13189_v52 = vmax.f32 %v13125_v15, 0.0  ;;  %v29316_v23 = vld [vmem:[#allocation261_spill] sm:$0xff] }
 0xb98   : > { %v13126_v4 = vadd.f32 %v29307_v18, %v12446_v5  ;;  %v13131_v27 = vadd.f32 %v29308_v50, %v12451_v9  ;;  %13249 = vst [vmem:[%s26298_s26 + $0x1a0] sm:$0xff] %v13185_v8  ;;  %v29310_v49 = vsub.f32 %v29309_v3, %v29261_v45  ;;  %13252 = vst [vmem:[%s26298_s26 + $0x1b8] sm:$0xff] %v13188_v10 }
 0xb99   : > { %v13192_v29 = vmax.f32 %v13128_v38, 0.0  ;;  %13250 = vst [vmem:[%s26298_s26 + $0x1a8] sm:$0xff] %v13186_v31  ;;  %13255 = vst [vmem:[%s26298_s26 + $0x1d0] sm:$0xff] %v13191_v59  ;;  %v29312_v14 = vsub.f32 %v29311_v61, %v29261_v45  ;;  %v13066_v26 = vadd.f32 %v29314_v16, %v29313_v63  ;;  %v12384_v20 = vsub.f32 %v29315_v1, %v29261_v45 }
 0xb9a   : > { %v13190_v19 = vmax.f32 %v13126_v4, 0.0  ;;  %v13195_v42 = vmax.f32 %v13131_v27, 0.0  ;;  %v12449_v44 = vmul.f32 %v25999_v36, %v29310_v49  ;;  %13253 = vst [vmem:[%s26298_s26 + $0x1c0] sm:$0xff] %v13189_v52  ;;  %v13058_v43 = vadd.f32 %v29313_v63, %v29317_v21 }
 0xb9b   : > { %v12452_v48 = vmul.f32 %v25999_v36, %v29312_v14  ;;  %13256 = vst [vmem:[%s26298_s26 + $0x1d8] sm:$0xff] %v13192_v29  ;;  %v12450_v22 = vmul.f32 %v25999_v36, %v12384_v20 }
 0xb9c   : > { %13254 = vst [vmem:[%s26298_s26 + $0x1c8] sm:$0xff] %v13190_v19  ;;  %13259 = vst [vmem:[%s26298_s26 + $0x1f0] sm:$0xff] %v13195_v42  ;;  %v13129_v35 = vadd.f32 %v29316_v23, %v12449_v44 }
 0xb9d   : > { %v13132_v60 = vadd.f32 %v13066_v26, %v12452_v48  ;;  %v13130_v0 = vadd.f32 %v13058_v43, %v12450_v22 }
 0xb9e   : > { %v13193_v33 = vmax.f32 %v13129_v35, 0.0 }
 0xb9f   : > { %v13196_v24 = vmax.f32 %v13132_v60, 0.0  ;;  %v13194_v7 = vmax.f32 %v13130_v0, 0.0 }
 0xba0   : > { %13257 = vst [vmem:[%s26298_s26 + $0x1e0] sm:$0xff] %v13193_v33 }
 0xba1   : > { %13260 = vst [vmem:[%s26298_s26 + $0x1f8] sm:$0xff] %v13196_v24  ;;  %13258 = vst [vmem:[%s26298_s26 + $0x1e8] sm:$0xff] %v13194_v7 }
 0xba2 PF: > { %s15_s18 = sadd.s32 1, %s18841_s18  }
 0xba3   : > { %p12_p4 = scmp.ge.s32.totalorder %s15_s18, 4  }
 0xba5   :  { %14 = sbr.rel (!%p12_p4) target bundleno = 1 (0x1), region = 78 }

</bundles_post_ra>
